<compile_context>
chip_gen: v5e
topology: v5e:2x2
jax: 0.10.0
libtpu: 0.0.40
codegen_flags: <defaults>
</compile_context>

<pallas_src>
import math
import functools

import jax
import jax.numpy as jnp
from jax.experimental import pallas as pl
from jax.experimental.pallas import tpu as pltpu


# ----------------------------------------------------------------------------
# helpers
# ----------------------------------------------------------------------------
def _layer_norm(x, gamma, beta, eps=1e-5):
    mean = jnp.mean(x, axis=-1, keepdims=True)
    var = jnp.mean((x - mean) ** 2, axis=-1, keepdims=True)
    inv = jax.lax.rsqrt(var + eps)
    return (x - mean) * inv * gamma + beta


def raw_positional_encoding(channels, max_len):
    position = jnp.arange(max_len, dtype=jnp.float32)[:, None]
    div_term = jnp.exp(
        jnp.arange(0, channels, 2, dtype=jnp.float32) * (-math.log(10000.0) / channels))
    pe = jnp.zeros((max_len, channels), dtype=jnp.float32)
    pe = pe.at[:, 0::2].set(jnp.sin(position * div_term))
    pe = pe.at[:, 1::2].set(jnp.cos(position * div_term))
    return pe


# ----------------------------------------------------------------------------
# fused Pallas kernel: pos-enc add + L encoder layers + head out_linear
# ----------------------------------------------------------------------------
def _fused_kernel(x_ref, pe_ref,
                  wq_ref, bq_ref, wk_ref, bk_ref, wv_ref, bv_ref,
                  wo_ref, bo_ref, g1_ref, be1_ref,
                  w1_ref, b1_ref, w2_ref, b2_ref, g2_ref, be2_ref,
                  ow_ref, ob_ref, o_ref):
    """One batch item: (S, C) activations resident across all layers."""
    L, H, C, Dh = wq_ref.shape
    S = x_ref.shape[1]
    scale = 1.0 / math.sqrt(Dh)

    # positional encoding folded into the kernel
    x = x_ref[0] + pe_ref[...]                                   # (S, C)

    for l in range(L):
        # ---- multi-head self attention (per-head weights, no lane slicing)
        attn = jnp.zeros((S, C), jnp.float32)
        for h in range(H):
            qh = jnp.dot(x, wq_ref[l, h],
                         preferred_element_type=jnp.float32) + bq_ref[l, h]   # (S, Dh)
            kh = jnp.dot(x, wk_ref[l, h],
                         preferred_element_type=jnp.float32) + bk_ref[l, h]
            vh = jnp.dot(x, wv_ref[l, h],
                         preferred_element_type=jnp.float32) + bv_ref[l, h]
            # scores = (qh * scale) @ kh^T  (contract last dims, no transpose)
            s = jax.lax.dot_general(qh * scale, kh, (((1,), (1,)), ((), ())),
                                    preferred_element_type=jnp.float32)       # (S, S)
            s = s - jnp.max(s, axis=-1, keepdims=True)
            p = jnp.exp(s)
            denom = jnp.sum(p, axis=-1, keepdims=True)                        # (S, 1)
            ctx = jnp.dot(p, vh, preferred_element_type=jnp.float32)          # (S, Dh)
            # deferred softmax normalization on the small (S, Dh) tile
            ctx = ctx * pl.reciprocal(denom, approx=True)
            # accumulate this head's slice of the output projection
            attn = attn + jnp.dot(ctx, wo_ref[l, h],
                                  preferred_element_type=jnp.float32)         # (S, C)
        x = _layer_norm(x + attn + bo_ref[l], g1_ref[l], be1_ref[l])

        # ---- feed-forward (dim_feedforward == channels) --------------------
        h1 = jnp.maximum(
            jnp.dot(x, w1_ref[l], preferred_element_type=jnp.float32) + b1_ref[l], 0.0)
        ff = jnp.dot(h1, w2_ref[l], preferred_element_type=jnp.float32) + b2_ref[l]
        x = _layer_norm(x + ff, g2_ref[l], be2_ref[l])

    # ---- head: out_linear on the first 4 tokens, fused in ------------------
    head = x[0:4, :]                                                          # (4, C)
    o_ref[0] = (jnp.dot(head, ow_ref[...], preferred_element_type=jnp.float32)
                + ob_ref[...])                                                # (4, 128)


_WEIGHT_ORDER = ('pos_enc',
                 'wq', 'bq', 'wk', 'bk', 'wv', 'bv',
                 'wo', 'bo', 'g1', 'be1',
                 'w1', 'b1', 'w2', 'b2', 'g2', 'be2',
                 'out_w', 'out_b')


def fused_forward(x_seq, params):
    """x_seq: (B, S, C) float32 -> (B, 4, out_dim) float32 in one pallas_call."""
    B, S, C = x_seq.shape
    out_dim = params['out_w'].shape[1]

    weights = [params[name] for name in _WEIGHT_ORDER]

    def full_spec(arr):
        nd = arr.ndim
        return pl.BlockSpec(arr.shape, lambda b, _n=nd: (0,) * _n)

    in_specs = ([pl.BlockSpec((1, S, C), lambda b: (b, 0, 0))]
                + [full_spec(w) for w in weights])

    return pl.pallas_call(
        _fused_kernel,
        out_shape=jax.ShapeDtypeStruct((B, 4, out_dim), jnp.float32),
        grid=(B,),
        in_specs=in_specs,
        out_specs=pl.BlockSpec((1, 4, out_dim), lambda b: (b, 0, 0)),
        compiler_params=pltpu.CompilerParams(dimension_semantics=("parallel",)),
    )(x_seq, *weights)


# ----------------------------------------------------------------------------
# parameters (deterministic synthetic init, weights pre-split per layer/head)
# ----------------------------------------------------------------------------
def init_params(key, channels, num_heads, num_layers, seq_len,
                vocab=4192, out_tokens=4, out_dim=64 + 64):
    C = channels
    H = num_heads
    Dh = C // H
    L = num_layers
    scale = 0.02
    keys = jax.random.split(key, 9)

    def rnd(k, shape):
        return scale * jax.random.normal(k, shape, jnp.float32)

    return {
        'embedding': rnd(keys[0], (vocab, C)),
        'out_embedding': rnd(keys[1], (out_tokens, C)),
        'pos_enc': raw_positional_encoding(C, seq_len),            # (S, C)
        # attention weights, per layer / per head
        'wq': rnd(keys[2], (L, H, C, Dh)),
        'wk': rnd(keys[3], (L, H, C, Dh)),
        'wv': rnd(keys[4], (L, H, C, Dh)),
        'bq': jnp.zeros((L, H, 1, Dh), jnp.float32),
        'bk': jnp.zeros((L, H, 1, Dh), jnp.float32),
        'bv': jnp.zeros((L, H, 1, Dh), jnp.float32),
        'wo': rnd(keys[5], (L, H, Dh, C)),
        'bo': jnp.zeros((L, 1, C), jnp.float32),
        # layernorms
        'g1': jnp.ones((L, 1, C), jnp.float32),
        'be1': jnp.zeros((L, 1, C), jnp.float32),
        'g2': jnp.ones((L, 1, C), jnp.float32),
        'be2': jnp.zeros((L, 1, C), jnp.float32),
        # FFN (dim_feedforward == channels per the module constructor)
        'w1': rnd(keys[6], (L, C, C)),
        'b1': jnp.zeros((L, 1, C), jnp.float32),
        'w2': rnd(keys[7], (L, C, C)),
        'b2': jnp.zeros((L, 1, C), jnp.float32),
        # head
        'out_w': rnd(keys[8], (C, out_dim)),
        'out_b': jnp.zeros((1, out_dim), jnp.float32),
    }


# ----------------------------------------------------------------------------
# full forward pass (matches Model.forward semantics, eval mode)
# ----------------------------------------------------------------------------
def model_forward(x_tokens, params):
    b, h, w = x_tokens.shape
    C = params['embedding'].shape[1]

    tokens = x_tokens.reshape(b, h * w)                               # (b, h*w)
    x_emb = jnp.take(params['embedding'], tokens, axis=0)             # (b, h*w, C)
    out_emb = jnp.broadcast_to(params['out_embedding'][None, :, :],
                               (b, 4, C))                             # (b, 4, C)
    x_seq = jnp.concatenate([out_emb, x_emb], axis=1)                 # (b, 4+h*w, C)

    head_out = fused_forward(x_seq, params)                           # (b, 4, 128)
    return head_out.transpose(1, 0, 2)                                # (4, b, 128) as PyTorch


# ----------------------------------------------------------------------------
if __name__ == "__main__":
    # small shapes consistent with the module: channels=32, heads=4, 2 layers,
    # batch=2, spatial 8x8 (so sequence = 4 + 64 = 68)
    channels = 32
    heads = 4
    num_layers = 2
    b, h, w = 2, 8, 8
    seq_len = h * w + 4

    key = jax.random.PRNGKey(0)
    pkey, xkey = jax.random.split(key)
    params = init_params(pkey, channels, heads, num_layers, seq_len)
    x = jax.random.randint(xkey, (b, h, w), 0, 4192, dtype=jnp.int32)

    fwd = jax.jit(model_forward)
    out = fwd(x, params)
    out = jax.block_until_ready(out)
    assert out.shape == (4, b, 128), out.shape
    assert out.dtype == jnp.float32
    assert bool(jnp.all(jnp.isfinite(out)))
    print("KERNEL_OK")
</pallas_src>

<mosaic_0001>
module attributes {stable_mosaic.version = 11 : i64} {
  func.func @_fused_kernel(%arg0: i32, %arg1: memref<1x68x32xf32, #tpu.memory_space<vmem>>, %arg2: memref<68x32xf32, #tpu.memory_space<vmem>>, %arg3: memref<2x4x32x8xf32, #tpu.memory_space<vmem>>, %arg4: memref<2x4x1x8xf32, #tpu.memory_space<vmem>>, %arg5: memref<2x4x32x8xf32, #tpu.memory_space<vmem>>, %arg6: memref<2x4x1x8xf32, #tpu.memory_space<vmem>>, %arg7: memref<2x4x32x8xf32, #tpu.memory_space<vmem>>, %arg8: memref<2x4x1x8xf32, #tpu.memory_space<vmem>>, %arg9: memref<2x4x8x32xf32, #tpu.memory_space<vmem>>, %arg10: memref<2x1x32xf32, #tpu.memory_space<vmem>>, %arg11: memref<2x1x32xf32, #tpu.memory_space<vmem>>, %arg12: memref<2x1x32xf32, #tpu.memory_space<vmem>>, %arg13: memref<2x32x32xf32, #tpu.memory_space<vmem>>, %arg14: memref<2x1x32xf32, #tpu.memory_space<vmem>>, %arg15: memref<2x32x32xf32, #tpu.memory_space<vmem>>, %arg16: memref<2x1x32xf32, #tpu.memory_space<vmem>>, %arg17: memref<2x1x32xf32, #tpu.memory_space<vmem>>, %arg18: memref<2x1x32xf32, #tpu.memory_space<vmem>>, %arg19: memref<32x128xf32, #tpu.memory_space<vmem>>, %arg20: memref<1x128xf32, #tpu.memory_space<vmem>>, %arg21: memref<1x4x128xf32, #tpu.memory_space<vmem>>) attributes {dimension_semantics = [#tpu.dimension_semantics<parallel>], iteration_bounds = array<i64: 2>, scalar_prefetch = 0 : i64, scratch_operands = 0 : i64, tpu.core_type = #tpu.core_type<tc>, window_params = [{transform_indices = @transform_0, window_bounds = array<i64: 1, 68, 32>}, {pipeline_mode = #tpu.pipeline_mode<synchronous>, transform_indices = @transform_1, window_bounds = array<i64: 68, 32>}, {pipeline_mode = #tpu.pipeline_mode<synchronous>, transform_indices = @transform_2, window_bounds = array<i64: 2, 4, 32, 8>}, {pipeline_mode = #tpu.pipeline_mode<synchronous>, transform_indices = @transform_3, window_bounds = array<i64: 2, 4, 1, 8>}, {pipeline_mode = #tpu.pipeline_mode<synchronous>, transform_indices = @transform_4, window_bounds = array<i64: 2, 4, 32, 8>}, {pipeline_mode = #tpu.pipeline_mode<synchronous>, transform_indices = @transform_5, window_bounds = array<i64: 2, 4, 1, 8>}, {pipeline_mode = #tpu.pipeline_mode<synchronous>, transform_indices = @transform_6, window_bounds = array<i64: 2, 4, 32, 8>}, {pipeline_mode = #tpu.pipeline_mode<synchronous>, transform_indices = @transform_7, window_bounds = array<i64: 2, 4, 1, 8>}, {pipeline_mode = #tpu.pipeline_mode<synchronous>, transform_indices = @transform_8, window_bounds = array<i64: 2, 4, 8, 32>}, {pipeline_mode = #tpu.pipeline_mode<synchronous>, transform_indices = @transform_9, window_bounds = array<i64: 2, 1, 32>}, {pipeline_mode = #tpu.pipeline_mode<synchronous>, transform_indices = @transform_10, window_bounds = array<i64: 2, 1, 32>}, {pipeline_mode = #tpu.pipeline_mode<synchronous>, transform_indices = @transform_11, window_bounds = array<i64: 2, 1, 32>}, {pipeline_mode = #tpu.pipeline_mode<synchronous>, transform_indices = @transform_12, window_bounds = array<i64: 2, 32, 32>}, {pipeline_mode = #tpu.pipeline_mode<synchronous>, transform_indices = @transform_13, window_bounds = array<i64: 2, 1, 32>}, {pipeline_mode = #tpu.pipeline_mode<synchronous>, transform_indices = @transform_14, window_bounds = array<i64: 2, 32, 32>}, {pipeline_mode = #tpu.pipeline_mode<synchronous>, transform_indices = @transform_15, window_bounds = array<i64: 2, 1, 32>}, {pipeline_mode = #tpu.pipeline_mode<synchronous>, transform_indices = @transform_16, window_bounds = array<i64: 2, 1, 32>}, {pipeline_mode = #tpu.pipeline_mode<synchronous>, transform_indices = @transform_17, window_bounds = array<i64: 2, 1, 32>}, {pipeline_mode = #tpu.pipeline_mode<synchronous>, transform_indices = @transform_18, window_bounds = array<i64: 32, 128>}, {pipeline_mode = #tpu.pipeline_mode<synchronous>, transform_indices = @transform_19, window_bounds = array<i64: 1, 128>}, {transform_indices = @transform_20, window_bounds = array<i64: 1, 4, 128>}]} {
    %c0 = arith.constant 0 : index
    %c0_0 = arith.constant 0 : index
    %c0_1 = arith.constant 0 : index
    %0 = vector.load %arg1[%c0, %c0_0, %c0_1] : memref<1x68x32xf32, #tpu.memory_space<vmem>>, vector<1x68x32xf32>
    %1 = vector.shape_cast %0 : vector<1x68x32xf32> to vector<68x32xf32>
    %c0_2 = arith.constant 0 : index
    %c0_3 = arith.constant 0 : index
    %2 = vector.load %arg2[%c0_2, %c0_3] : memref<68x32xf32, #tpu.memory_space<vmem>>, vector<68x32xf32>
    %3 = arith.addf %1, %2 : vector<68x32xf32>
    %cst = arith.constant 0.000000e+00 : f32
    %4 = vector.broadcast %cst : f32 to vector<68x32xf32>
    %c0_4 = arith.constant 0 : index
    %c0_5 = arith.constant 0 : index
    %c0_6 = arith.constant 0 : index
    %c0_7 = arith.constant 0 : index
    %5 = vector.load %arg3[%c0_4, %c0_5, %c0_6, %c0_7] : memref<2x4x32x8xf32, #tpu.memory_space<vmem>>, vector<1x1x32x8xf32>
    %6 = vector.shape_cast %5 : vector<1x1x32x8xf32> to vector<32x8xf32>
    %cst_8 = arith.constant dense<0.000000e+00> : vector<68x8xf32>
    %7 = tpu.matmul %3, %6, %cst_8 {dimension_numbers = #tpu.dot_dimension_numbers<[1], [0], [0], [1], [0, 0, 1, 1], [], []>} : vector<68x32xf32>, vector<32x8xf32>, vector<68x8xf32> -> vector<68x8xf32>
    %c0_9 = arith.constant 0 : index
    %c0_10 = arith.constant 0 : index
    %c0_11 = arith.constant 0 : index
    %c0_12 = arith.constant 0 : index
    %8 = vector.load %arg4[%c0_9, %c0_10, %c0_11, %c0_12] : memref<2x4x1x8xf32, #tpu.memory_space<vmem>>, vector<1x1x1x8xf32>
    %9 = vector.shape_cast %8 : vector<1x1x1x8xf32> to vector<1x8xf32>
    %10 = vector.broadcast %9 : vector<1x8xf32> to vector<68x8xf32>
    %11 = arith.addf %7, %10 : vector<68x8xf32>
    %c0_13 = arith.constant 0 : index
    %c0_14 = arith.constant 0 : index
    %c0_15 = arith.constant 0 : index
    %c0_16 = arith.constant 0 : index
    %12 = vector.load %arg5[%c0_13, %c0_14, %c0_15, %c0_16] : memref<2x4x32x8xf32, #tpu.memory_space<vmem>>, vector<1x1x32x8xf32>
    %13 = vector.shape_cast %12 : vector<1x1x32x8xf32> to vector<32x8xf32>
    %cst_17 = arith.constant dense<0.000000e+00> : vector<68x8xf32>
    %14 = tpu.matmul %3, %13, %cst_17 {dimension_numbers = #tpu.dot_dimension_numbers<[1], [0], [0], [1], [0, 0, 1, 1], [], []>} : vector<68x32xf32>, vector<32x8xf32>, vector<68x8xf32> -> vector<68x8xf32>
    %c0_18 = arith.constant 0 : index
    %c0_19 = arith.constant 0 : index
    %c0_20 = arith.constant 0 : index
    %c0_21 = arith.constant 0 : index
    %15 = vector.load %arg6[%c0_18, %c0_19, %c0_20, %c0_21] : memref<2x4x1x8xf32, #tpu.memory_space<vmem>>, vector<1x1x1x8xf32>
    %16 = vector.shape_cast %15 : vector<1x1x1x8xf32> to vector<1x8xf32>
    %17 = vector.broadcast %16 : vector<1x8xf32> to vector<68x8xf32>
    %18 = arith.addf %14, %17 : vector<68x8xf32>
    %c0_22 = arith.constant 0 : index
    %c0_23 = arith.constant 0 : index
    %c0_24 = arith.constant 0 : index
    %c0_25 = arith.constant 0 : index
    %19 = vector.load %arg7[%c0_22, %c0_23, %c0_24, %c0_25] : memref<2x4x32x8xf32, #tpu.memory_space<vmem>>, vector<1x1x32x8xf32>
    %20 = vector.shape_cast %19 : vector<1x1x32x8xf32> to vector<32x8xf32>
    %cst_26 = arith.constant dense<0.000000e+00> : vector<68x8xf32>
    %21 = tpu.matmul %3, %20, %cst_26 {dimension_numbers = #tpu.dot_dimension_numbers<[1], [0], [0], [1], [0, 0, 1, 1], [], []>} : vector<68x32xf32>, vector<32x8xf32>, vector<68x8xf32> -> vector<68x8xf32>
    %c0_27 = arith.constant 0 : index
    %c0_28 = arith.constant 0 : index
    %c0_29 = arith.constant 0 : index
    %c0_30 = arith.constant 0 : index
    %22 = vector.load %arg8[%c0_27, %c0_28, %c0_29, %c0_30] : memref<2x4x1x8xf32, #tpu.memory_space<vmem>>, vector<1x1x1x8xf32>
    %23 = vector.shape_cast %22 : vector<1x1x1x8xf32> to vector<1x8xf32>
    %24 = vector.broadcast %23 : vector<1x8xf32> to vector<68x8xf32>
    %25 = arith.addf %21, %24 : vector<68x8xf32>
    %cst_31 = arith.constant 0.353553385 : f32
    %26 = vector.broadcast %cst_31 : f32 to vector<68x8xf32>
    %27 = arith.mulf %11, %26 : vector<68x8xf32>
    %cst_32 = arith.constant dense<0.000000e+00> : vector<68x68xf32>
    %28 = tpu.matmul %27, %18, %cst_32 {dimension_numbers = #tpu.dot_dimension_numbers<[1], [1], [0], [0], [0, 0, 1, 0], [], []>} : vector<68x8xf32>, vector<68x8xf32>, vector<68x68xf32> -> vector<68x68xf32>
    %cst_33 = arith.constant dense<0xFF800000> : vector<68xf32>
    %29 = vector.multi_reduction <maximumf>, %28, %cst_33 [1] : vector<68x68xf32> to vector<68xf32>
    %30 = vector.shape_cast %29 : vector<68xf32> to vector<68x1xf32>
    %31 = vector.broadcast %30 : vector<68x1xf32> to vector<68x68xf32>
    %32 = arith.subf %28, %31 : vector<68x68xf32>
    %33 = math.exp %32 : vector<68x68xf32>
    %cst_34 = arith.constant dense<0.000000e+00> : vector<68xf32>
    %34 = vector.multi_reduction <add>, %33, %cst_34 [1] : vector<68x68xf32> to vector<68xf32>
    %35 = vector.shape_cast %34 : vector<68xf32> to vector<68x1xf32>
    %cst_35 = arith.constant dense<0.000000e+00> : vector<68x8xf32>
    %36 = tpu.matmul %33, %25, %cst_35 {dimension_numbers = #tpu.dot_dimension_numbers<[1], [0], [0], [1], [0, 0, 1, 1], [], []>} : vector<68x68xf32>, vector<68x8xf32>, vector<68x8xf32> -> vector<68x8xf32>
    %37 = tpu.reciprocal %35 {approx = true} : vector<68x1xf32> -> vector<68x1xf32>
    %38 = vector.broadcast %37 : vector<68x1xf32> to vector<68x8xf32>
    %39 = arith.mulf %36, %38 : vector<68x8xf32>
    %c0_36 = arith.constant 0 : index
    %c0_37 = arith.constant 0 : index
    %c0_38 = arith.constant 0 : index
    %c0_39 = arith.constant 0 : index
    %40 = vector.load %arg9[%c0_36, %c0_37, %c0_38, %c0_39] : memref<2x4x8x32xf32, #tpu.memory_space<vmem>>, vector<1x1x8x32xf32>
    %41 = vector.shape_cast %40 : vector<1x1x8x32xf32> to vector<8x32xf32>
    %cst_40 = arith.constant dense<0.000000e+00> : vector<68x32xf32>
    %42 = tpu.matmul %39, %41, %cst_40 {dimension_numbers = #tpu.dot_dimension_numbers<[1], [0], [0], [1], [0, 0, 1, 1], [], []>} : vector<68x8xf32>, vector<8x32xf32>, vector<68x32xf32> -> vector<68x32xf32>
    %43 = arith.addf %4, %42 : vector<68x32xf32>
    %c0_41 = arith.constant 0 : index
    %c1 = arith.constant 1 : index
    %c0_42 = arith.constant 0 : index
    %c0_43 = arith.constant 0 : index
    %44 = vector.load %arg3[%c0_41, %c1, %c0_42, %c0_43] : memref<2x4x32x8xf32, #tpu.memory_space<vmem>>, vector<1x1x32x8xf32>
    %45 = vector.shape_cast %44 : vector<1x1x32x8xf32> to vector<32x8xf32>
    %cst_44 = arith.constant dense<0.000000e+00> : vector<68x8xf32>
    %46 = tpu.matmul %3, %45, %cst_44 {dimension_numbers = #tpu.dot_dimension_numbers<[1], [0], [0], [1], [0, 0, 1, 1], [], []>} : vector<68x32xf32>, vector<32x8xf32>, vector<68x8xf32> -> vector<68x8xf32>
    %c0_45 = arith.constant 0 : index
    %c1_46 = arith.constant 1 : index
    %c0_47 = arith.constant 0 : index
    %c0_48 = arith.constant 0 : index
    %47 = vector.load %arg4[%c0_45, %c1_46, %c0_47, %c0_48] : memref<2x4x1x8xf32, #tpu.memory_space<vmem>>, vector<1x1x1x8xf32>
    %48 = vector.shape_cast %47 : vector<1x1x1x8xf32> to vector<1x8xf32>
    %49 = vector.broadcast %48 : vector<1x8xf32> to vector<68x8xf32>
    %50 = arith.addf %46, %49 : vector<68x8xf32>
    %c0_49 = arith.constant 0 : index
    %c1_50 = arith.constant 1 : index
    %c0_51 = arith.constant 0 : index
    %c0_52 = arith.constant 0 : index
    %51 = vector.load %arg5[%c0_49, %c1_50, %c0_51, %c0_52] : memref<2x4x32x8xf32, #tpu.memory_space<vmem>>, vector<1x1x32x8xf32>
    %52 = vector.shape_cast %51 : vector<1x1x32x8xf32> to vector<32x8xf32>
    %cst_53 = arith.constant dense<0.000000e+00> : vector<68x8xf32>
    %53 = tpu.matmul %3, %52, %cst_53 {dimension_numbers = #tpu.dot_dimension_numbers<[1], [0], [0], [1], [0, 0, 1, 1], [], []>} : vector<68x32xf32>, vector<32x8xf32>, vector<68x8xf32> -> vector<68x8xf32>
    %c0_54 = arith.constant 0 : index
    %c1_55 = arith.constant 1 : index
    %c0_56 = arith.constant 0 : index
    %c0_57 = arith.constant 0 : index
    %54 = vector.load %arg6[%c0_54, %c1_55, %c0_56, %c0_57] : memref<2x4x1x8xf32, #tpu.memory_space<vmem>>, vector<1x1x1x8xf32>
    %55 = vector.shape_cast %54 : vector<1x1x1x8xf32> to vector<1x8xf32>
    %56 = vector.broadcast %55 : vector<1x8xf32> to vector<68x8xf32>
    %57 = arith.addf %53, %56 : vector<68x8xf32>
    %c0_58 = arith.constant 0 : index
    %c1_59 = arith.constant 1 : index
    %c0_60 = arith.constant 0 : index
    %c0_61 = arith.constant 0 : index
    %58 = vector.load %arg7[%c0_58, %c1_59, %c0_60, %c0_61] : memref<2x4x32x8xf32, #tpu.memory_space<vmem>>, vector<1x1x32x8xf32>
    %59 = vector.shape_cast %58 : vector<1x1x32x8xf32> to vector<32x8xf32>
    %cst_62 = arith.constant dense<0.000000e+00> : vector<68x8xf32>
    %60 = tpu.matmul %3, %59, %cst_62 {dimension_numbers = #tpu.dot_dimension_numbers<[1], [0], [0], [1], [0, 0, 1, 1], [], []>} : vector<68x32xf32>, vector<32x8xf32>, vector<68x8xf32> -> vector<68x8xf32>
    %c0_63 = arith.constant 0 : index
    %c1_64 = arith.constant 1 : index
    %c0_65 = arith.constant 0 : index
    %c0_66 = arith.constant 0 : index
    %61 = vector.load %arg8[%c0_63, %c1_64, %c0_65, %c0_66] : memref<2x4x1x8xf32, #tpu.memory_space<vmem>>, vector<1x1x1x8xf32>
    %62 = vector.shape_cast %61 : vector<1x1x1x8xf32> to vector<1x8xf32>
    %63 = vector.broadcast %62 : vector<1x8xf32> to vector<68x8xf32>
    %64 = arith.addf %60, %63 : vector<68x8xf32>
    %cst_67 = arith.constant 0.353553385 : f32
    %65 = vector.broadcast %cst_67 : f32 to vector<68x8xf32>
    %66 = arith.mulf %50, %65 : vector<68x8xf32>
    %cst_68 = arith.constant dense<0.000000e+00> : vector<68x68xf32>
    %67 = tpu.matmul %66, %57, %cst_68 {dimension_numbers = #tpu.dot_dimension_numbers<[1], [1], [0], [0], [0, 0, 1, 0], [], []>} : vector<68x8xf32>, vector<68x8xf32>, vector<68x68xf32> -> vector<68x68xf32>
    %cst_69 = arith.constant dense<0xFF800000> : vector<68xf32>
    %68 = vector.multi_reduction <maximumf>, %67, %cst_69 [1] : vector<68x68xf32> to vector<68xf32>
    %69 = vector.shape_cast %68 : vector<68xf32> to vector<68x1xf32>
    %70 = vector.broadcast %69 : vector<68x1xf32> to vector<68x68xf32>
    %71 = arith.subf %67, %70 : vector<68x68xf32>
    %72 = math.exp %71 : vector<68x68xf32>
    %cst_70 = arith.constant dense<0.000000e+00> : vector<68xf32>
    %73 = vector.multi_reduction <add>, %72, %cst_70 [1] : vector<68x68xf32> to vector<68xf32>
    %74 = vector.shape_cast %73 : vector<68xf32> to vector<68x1xf32>
    %cst_71 = arith.constant dense<0.000000e+00> : vector<68x8xf32>
    %75 = tpu.matmul %72, %64, %cst_71 {dimension_numbers = #tpu.dot_dimension_numbers<[1], [0], [0], [1], [0, 0, 1, 1], [], []>} : vector<68x68xf32>, vector<68x8xf32>, vector<68x8xf32> -> vector<68x8xf32>
    %76 = tpu.reciprocal %74 {approx = true} : vector<68x1xf32> -> vector<68x1xf32>
    %77 = vector.broadcast %76 : vector<68x1xf32> to vector<68x8xf32>
    %78 = arith.mulf %75, %77 : vector<68x8xf32>
    %c0_72 = arith.constant 0 : index
    %c1_73 = arith.constant 1 : index
    %c0_74 = arith.constant 0 : index
    %c0_75 = arith.constant 0 : index
    %79 = vector.load %arg9[%c0_72, %c1_73, %c0_74, %c0_75] : memref<2x4x8x32xf32, #tpu.memory_space<vmem>>, vector<1x1x8x32xf32>
    %80 = vector.shape_cast %79 : vector<1x1x8x32xf32> to vector<8x32xf32>
    %cst_76 = arith.constant dense<0.000000e+00> : vector<68x32xf32>
    %81 = tpu.matmul %78, %80, %cst_76 {dimension_numbers = #tpu.dot_dimension_numbers<[1], [0], [0], [1], [0, 0, 1, 1], [], []>} : vector<68x8xf32>, vector<8x32xf32>, vector<68x32xf32> -> vector<68x32xf32>
    %82 = arith.addf %43, %81 : vector<68x32xf32>
    %c0_77 = arith.constant 0 : index
    %c2 = arith.constant 2 : index
    %c0_78 = arith.constant 0 : index
    %c0_79 = arith.constant 0 : index
    %83 = vector.load %arg3[%c0_77, %c2, %c0_78, %c0_79] : memref<2x4x32x8xf32, #tpu.memory_space<vmem>>, vector<1x1x32x8xf32>
    %84 = vector.shape_cast %83 : vector<1x1x32x8xf32> to vector<32x8xf32>
    %cst_80 = arith.constant dense<0.000000e+00> : vector<68x8xf32>
    %85 = tpu.matmul %3, %84, %cst_80 {dimension_numbers = #tpu.dot_dimension_numbers<[1], [0], [0], [1], [0, 0, 1, 1], [], []>} : vector<68x32xf32>, vector<32x8xf32>, vector<68x8xf32> -> vector<68x8xf32>
    %c0_81 = arith.constant 0 : index
    %c2_82 = arith.constant 2 : index
    %c0_83 = arith.constant 0 : index
    %c0_84 = arith.constant 0 : index
    %86 = vector.load %arg4[%c0_81, %c2_82, %c0_83, %c0_84] : memref<2x4x1x8xf32, #tpu.memory_space<vmem>>, vector<1x1x1x8xf32>
    %87 = vector.shape_cast %86 : vector<1x1x1x8xf32> to vector<1x8xf32>
    %88 = vector.broadcast %87 : vector<1x8xf32> to vector<68x8xf32>
    %89 = arith.addf %85, %88 : vector<68x8xf32>
    %c0_85 = arith.constant 0 : index
    %c2_86 = arith.constant 2 : index
    %c0_87 = arith.constant 0 : index
    %c0_88 = arith.constant 0 : index
    %90 = vector.load %arg5[%c0_85, %c2_86, %c0_87, %c0_88] : memref<2x4x32x8xf32, #tpu.memory_space<vmem>>, vector<1x1x32x8xf32>
    %91 = vector.shape_cast %90 : vector<1x1x32x8xf32> to vector<32x8xf32>
    %cst_89 = arith.constant dense<0.000000e+00> : vector<68x8xf32>
    %92 = tpu.matmul %3, %91, %cst_89 {dimension_numbers = #tpu.dot_dimension_numbers<[1], [0], [0], [1], [0, 0, 1, 1], [], []>} : vector<68x32xf32>, vector<32x8xf32>, vector<68x8xf32> -> vector<68x8xf32>
    %c0_90 = arith.constant 0 : index
    %c2_91 = arith.constant 2 : index
    %c0_92 = arith.constant 0 : index
    %c0_93 = arith.constant 0 : index
    %93 = vector.load %arg6[%c0_90, %c2_91, %c0_92, %c0_93] : memref<2x4x1x8xf32, #tpu.memory_space<vmem>>, vector<1x1x1x8xf32>
    %94 = vector.shape_cast %93 : vector<1x1x1x8xf32> to vector<1x8xf32>
    %95 = vector.broadcast %94 : vector<1x8xf32> to vector<68x8xf32>
    %96 = arith.addf %92, %95 : vector<68x8xf32>
    %c0_94 = arith.constant 0 : index
    %c2_95 = arith.constant 2 : index
    %c0_96 = arith.constant 0 : index
    %c0_97 = arith.constant 0 : index
    %97 = vector.load %arg7[%c0_94, %c2_95, %c0_96, %c0_97] : memref<2x4x32x8xf32, #tpu.memory_space<vmem>>, vector<1x1x32x8xf32>
    %98 = vector.shape_cast %97 : vector<1x1x32x8xf32> to vector<32x8xf32>
    %cst_98 = arith.constant dense<0.000000e+00> : vector<68x8xf32>
    %99 = tpu.matmul %3, %98, %cst_98 {dimension_numbers = #tpu.dot_dimension_numbers<[1], [0], [0], [1], [0, 0, 1, 1], [], []>} : vector<68x32xf32>, vector<32x8xf32>, vector<68x8xf32> -> vector<68x8xf32>
    %c0_99 = arith.constant 0 : index
    %c2_100 = arith.constant 2 : index
    %c0_101 = arith.constant 0 : index
    %c0_102 = arith.constant 0 : index
    %100 = vector.load %arg8[%c0_99, %c2_100, %c0_101, %c0_102] : memref<2x4x1x8xf32, #tpu.memory_space<vmem>>, vector<1x1x1x8xf32>
    %101 = vector.shape_cast %100 : vector<1x1x1x8xf32> to vector<1x8xf32>
    %102 = vector.broadcast %101 : vector<1x8xf32> to vector<68x8xf32>
    %103 = arith.addf %99, %102 : vector<68x8xf32>
    %cst_103 = arith.constant 0.353553385 : f32
    %104 = vector.broadcast %cst_103 : f32 to vector<68x8xf32>
    %105 = arith.mulf %89, %104 : vector<68x8xf32>
    %cst_104 = arith.constant dense<0.000000e+00> : vector<68x68xf32>
    %106 = tpu.matmul %105, %96, %cst_104 {dimension_numbers = #tpu.dot_dimension_numbers<[1], [1], [0], [0], [0, 0, 1, 0], [], []>} : vector<68x8xf32>, vector<68x8xf32>, vector<68x68xf32> -> vector<68x68xf32>
    %cst_105 = arith.constant dense<0xFF800000> : vector<68xf32>
    %107 = vector.multi_reduction <maximumf>, %106, %cst_105 [1] : vector<68x68xf32> to vector<68xf32>
    %108 = vector.shape_cast %107 : vector<68xf32> to vector<68x1xf32>
    %109 = vector.broadcast %108 : vector<68x1xf32> to vector<68x68xf32>
    %110 = arith.subf %106, %109 : vector<68x68xf32>
    %111 = math.exp %110 : vector<68x68xf32>
    %cst_106 = arith.constant dense<0.000000e+00> : vector<68xf32>
    %112 = vector.multi_reduction <add>, %111, %cst_106 [1] : vector<68x68xf32> to vector<68xf32>
    %113 = vector.shape_cast %112 : vector<68xf32> to vector<68x1xf32>
    %cst_107 = arith.constant dense<0.000000e+00> : vector<68x8xf32>
    %114 = tpu.matmul %111, %103, %cst_107 {dimension_numbers = #tpu.dot_dimension_numbers<[1], [0], [0], [1], [0, 0, 1, 1], [], []>} : vector<68x68xf32>, vector<68x8xf32>, vector<68x8xf32> -> vector<68x8xf32>
    %115 = tpu.reciprocal %113 {approx = true} : vector<68x1xf32> -> vector<68x1xf32>
    %116 = vector.broadcast %115 : vector<68x1xf32> to vector<68x8xf32>
    %117 = arith.mulf %114, %116 : vector<68x8xf32>
    %c0_108 = arith.constant 0 : index
    %c2_109 = arith.constant 2 : index
    %c0_110 = arith.constant 0 : index
    %c0_111 = arith.constant 0 : index
    %118 = vector.load %arg9[%c0_108, %c2_109, %c0_110, %c0_111] : memref<2x4x8x32xf32, #tpu.memory_space<vmem>>, vector<1x1x8x32xf32>
    %119 = vector.shape_cast %118 : vector<1x1x8x32xf32> to vector<8x32xf32>
    %cst_112 = arith.constant dense<0.000000e+00> : vector<68x32xf32>
    %120 = tpu.matmul %117, %119, %cst_112 {dimension_numbers = #tpu.dot_dimension_numbers<[1], [0], [0], [1], [0, 0, 1, 1], [], []>} : vector<68x8xf32>, vector<8x32xf32>, vector<68x32xf32> -> vector<68x32xf32>
    %121 = arith.addf %82, %120 : vector<68x32xf32>
    %c0_113 = arith.constant 0 : index
    %c3 = arith.constant 3 : index
    %c0_114 = arith.constant 0 : index
    %c0_115 = arith.constant 0 : index
    %122 = vector.load %arg3[%c0_113, %c3, %c0_114, %c0_115] : memref<2x4x32x8xf32, #tpu.memory_space<vmem>>, vector<1x1x32x8xf32>
    %123 = vector.shape_cast %122 : vector<1x1x32x8xf32> to vector<32x8xf32>
    %cst_116 = arith.constant dense<0.000000e+00> : vector<68x8xf32>
    %124 = tpu.matmul %3, %123, %cst_116 {dimension_numbers = #tpu.dot_dimension_numbers<[1], [0], [0], [1], [0, 0, 1, 1], [], []>} : vector<68x32xf32>, vector<32x8xf32>, vector<68x8xf32> -> vector<68x8xf32>
    %c0_117 = arith.constant 0 : index
    %c3_118 = arith.constant 3 : index
    %c0_119 = arith.constant 0 : index
    %c0_120 = arith.constant 0 : index
    %125 = vector.load %arg4[%c0_117, %c3_118, %c0_119, %c0_120] : memref<2x4x1x8xf32, #tpu.memory_space<vmem>>, vector<1x1x1x8xf32>
    %126 = vector.shape_cast %125 : vector<1x1x1x8xf32> to vector<1x8xf32>
    %127 = vector.broadcast %126 : vector<1x8xf32> to vector<68x8xf32>
    %128 = arith.addf %124, %127 : vector<68x8xf32>
    %c0_121 = arith.constant 0 : index
    %c3_122 = arith.constant 3 : index
    %c0_123 = arith.constant 0 : index
    %c0_124 = arith.constant 0 : index
    %129 = vector.load %arg5[%c0_121, %c3_122, %c0_123, %c0_124] : memref<2x4x32x8xf32, #tpu.memory_space<vmem>>, vector<1x1x32x8xf32>
    %130 = vector.shape_cast %129 : vector<1x1x32x8xf32> to vector<32x8xf32>
    %cst_125 = arith.constant dense<0.000000e+00> : vector<68x8xf32>
    %131 = tpu.matmul %3, %130, %cst_125 {dimension_numbers = #tpu.dot_dimension_numbers<[1], [0], [0], [1], [0, 0, 1, 1], [], []>} : vector<68x32xf32>, vector<32x8xf32>, vector<68x8xf32> -> vector<68x8xf32>
    %c0_126 = arith.constant 0 : index
    %c3_127 = arith.constant 3 : index
    %c0_128 = arith.constant 0 : index
    %c0_129 = arith.constant 0 : index
    %132 = vector.load %arg6[%c0_126, %c3_127, %c0_128, %c0_129] : memref<2x4x1x8xf32, #tpu.memory_space<vmem>>, vector<1x1x1x8xf32>
    %133 = vector.shape_cast %132 : vector<1x1x1x8xf32> to vector<1x8xf32>
    %134 = vector.broadcast %133 : vector<1x8xf32> to vector<68x8xf32>
    %135 = arith.addf %131, %134 : vector<68x8xf32>
    %c0_130 = arith.constant 0 : index
    %c3_131 = arith.constant 3 : index
    %c0_132 = arith.constant 0 : index
    %c0_133 = arith.constant 0 : index
    %136 = vector.load %arg7[%c0_130, %c3_131, %c0_132, %c0_133] : memref<2x4x32x8xf32, #tpu.memory_space<vmem>>, vector<1x1x32x8xf32>
    %137 = vector.shape_cast %136 : vector<1x1x32x8xf32> to vector<32x8xf32>
    %cst_134 = arith.constant dense<0.000000e+00> : vector<68x8xf32>
    %138 = tpu.matmul %3, %137, %cst_134 {dimension_numbers = #tpu.dot_dimension_numbers<[1], [0], [0], [1], [0, 0, 1, 1], [], []>} : vector<68x32xf32>, vector<32x8xf32>, vector<68x8xf32> -> vector<68x8xf32>
    %c0_135 = arith.constant 0 : index
    %c3_136 = arith.constant 3 : index
    %c0_137 = arith.constant 0 : index
    %c0_138 = arith.constant 0 : index
    %139 = vector.load %arg8[%c0_135, %c3_136, %c0_137, %c0_138] : memref<2x4x1x8xf32, #tpu.memory_space<vmem>>, vector<1x1x1x8xf32>
    %140 = vector.shape_cast %139 : vector<1x1x1x8xf32> to vector<1x8xf32>
    %141 = vector.broadcast %140 : vector<1x8xf32> to vector<68x8xf32>
    %142 = arith.addf %138, %141 : vector<68x8xf32>
    %cst_139 = arith.constant 0.353553385 : f32
    %143 = vector.broadcast %cst_139 : f32 to vector<68x8xf32>
    %144 = arith.mulf %128, %143 : vector<68x8xf32>
    %cst_140 = arith.constant dense<0.000000e+00> : vector<68x68xf32>
    %145 = tpu.matmul %144, %135, %cst_140 {dimension_numbers = #tpu.dot_dimension_numbers<[1], [1], [0], [0], [0, 0, 1, 0], [], []>} : vector<68x8xf32>, vector<68x8xf32>, vector<68x68xf32> -> vector<68x68xf32>
    %cst_141 = arith.constant dense<0xFF800000> : vector<68xf32>
    %146 = vector.multi_reduction <maximumf>, %145, %cst_141 [1] : vector<68x68xf32> to vector<68xf32>
    %147 = vector.shape_cast %146 : vector<68xf32> to vector<68x1xf32>
    %148 = vector.broadcast %147 : vector<68x1xf32> to vector<68x68xf32>
    %149 = arith.subf %145, %148 : vector<68x68xf32>
    %150 = math.exp %149 : vector<68x68xf32>
    %cst_142 = arith.constant dense<0.000000e+00> : vector<68xf32>
    %151 = vector.multi_reduction <add>, %150, %cst_142 [1] : vector<68x68xf32> to vector<68xf32>
    %152 = vector.shape_cast %151 : vector<68xf32> to vector<68x1xf32>
    %cst_143 = arith.constant dense<0.000000e+00> : vector<68x8xf32>
    %153 = tpu.matmul %150, %142, %cst_143 {dimension_numbers = #tpu.dot_dimension_numbers<[1], [0], [0], [1], [0, 0, 1, 1], [], []>} : vector<68x68xf32>, vector<68x8xf32>, vector<68x8xf32> -> vector<68x8xf32>
    %154 = tpu.reciprocal %152 {approx = true} : vector<68x1xf32> -> vector<68x1xf32>
    %155 = vector.broadcast %154 : vector<68x1xf32> to vector<68x8xf32>
    %156 = arith.mulf %153, %155 : vector<68x8xf32>
    %c0_144 = arith.constant 0 : index
    %c3_145 = arith.constant 3 : index
    %c0_146 = arith.constant 0 : index
    %c0_147 = arith.constant 0 : index
    %157 = vector.load %arg9[%c0_144, %c3_145, %c0_146, %c0_147] : memref<2x4x8x32xf32, #tpu.memory_space<vmem>>, vector<1x1x8x32xf32>
    %158 = vector.shape_cast %157 : vector<1x1x8x32xf32> to vector<8x32xf32>
    %cst_148 = arith.constant dense<0.000000e+00> : vector<68x32xf32>
    %159 = tpu.matmul %156, %158, %cst_148 {dimension_numbers = #tpu.dot_dimension_numbers<[1], [0], [0], [1], [0, 0, 1, 1], [], []>} : vector<68x8xf32>, vector<8x32xf32>, vector<68x32xf32> -> vector<68x32xf32>
    %160 = arith.addf %121, %159 : vector<68x32xf32>
    %161 = arith.addf %3, %160 : vector<68x32xf32>
    %c0_149 = arith.constant 0 : index
    %c0_150 = arith.constant 0 : index
    %c0_151 = arith.constant 0 : index
    %162 = vector.load %arg10[%c0_149, %c0_150, %c0_151] : memref<2x1x32xf32, #tpu.memory_space<vmem>>, vector<1x1x32xf32>
    %163 = vector.shape_cast %162 : vector<1x1x32xf32> to vector<1x32xf32>
    %164 = vector.broadcast %163 : vector<1x32xf32> to vector<68x32xf32>
    %165 = arith.addf %161, %164 : vector<68x32xf32>
    %c0_152 = arith.constant 0 : index
    %c0_153 = arith.constant 0 : index
    %c0_154 = arith.constant 0 : index
    %166 = vector.load %arg11[%c0_152, %c0_153, %c0_154] : memref<2x1x32xf32, #tpu.memory_space<vmem>>, vector<1x1x32xf32>
    %167 = vector.shape_cast %166 : vector<1x1x32xf32> to vector<1x32xf32>
    %c0_155 = arith.constant 0 : index
    %c0_156 = arith.constant 0 : index
    %c0_157 = arith.constant 0 : index
    %168 = vector.load %arg12[%c0_155, %c0_156, %c0_157] : memref<2x1x32xf32, #tpu.memory_space<vmem>>, vector<1x1x32xf32>
    %169 = vector.shape_cast %168 : vector<1x1x32xf32> to vector<1x32xf32>
    %cst_158 = arith.constant dense<0.000000e+00> : vector<68xf32>
    %170 = vector.multi_reduction <add>, %165, %cst_158 [1] : vector<68x32xf32> to vector<68xf32>
    %171 = vector.shape_cast %170 : vector<68xf32> to vector<68x1xf32>
    %cst_159 = arith.constant 3.200000e+01 : f32
    %172 = vector.broadcast %cst_159 : f32 to vector<68x1xf32>
    %173 = arith.divf %171, %172 : vector<68x1xf32>
    %174 = vector.broadcast %173 : vector<68x1xf32> to vector<68x32xf32>
    %175 = arith.subf %165, %174 : vector<68x32xf32>
    %176 = arith.mulf %175, %175 : vector<68x32xf32>
    %cst_160 = arith.constant dense<0.000000e+00> : vector<68xf32>
    %177 = vector.multi_reduction <add>, %176, %cst_160 [1] : vector<68x32xf32> to vector<68xf32>
    %178 = vector.shape_cast %177 : vector<68xf32> to vector<68x1xf32>
    %cst_161 = arith.constant 3.200000e+01 : f32
    %179 = vector.broadcast %cst_161 : f32 to vector<68x1xf32>
    %180 = arith.divf %178, %179 : vector<68x1xf32>
    %cst_162 = arith.constant 9.99999974E-6 : f32
    %181 = vector.broadcast %cst_162 : f32 to vector<68x1xf32>
    %182 = arith.addf %180, %181 : vector<68x1xf32>
    %183 = math.rsqrt %182 : vector<68x1xf32>
    %184 = vector.broadcast %173 : vector<68x1xf32> to vector<68x32xf32>
    %185 = arith.subf %165, %184 : vector<68x32xf32>
    %186 = vector.broadcast %183 : vector<68x1xf32> to vector<68x32xf32>
    %187 = arith.mulf %185, %186 : vector<68x32xf32>
    %188 = vector.broadcast %167 : vector<1x32xf32> to vector<68x32xf32>
    %189 = arith.mulf %187, %188 : vector<68x32xf32>
    %190 = vector.broadcast %169 : vector<1x32xf32> to vector<68x32xf32>
    %191 = arith.addf %189, %190 : vector<68x32xf32>
    %c0_163 = arith.constant 0 : index
    %c0_164 = arith.constant 0 : index
    %c0_165 = arith.constant 0 : index
    %192 = vector.load %arg13[%c0_163, %c0_164, %c0_165] : memref<2x32x32xf32, #tpu.memory_space<vmem>>, vector<1x32x32xf32>
    %193 = vector.shape_cast %192 : vector<1x32x32xf32> to vector<32x32xf32>
    %cst_166 = arith.constant dense<0.000000e+00> : vector<68x32xf32>
    %194 = tpu.matmul %191, %193, %cst_166 {dimension_numbers = #tpu.dot_dimension_numbers<[1], [0], [0], [1], [0, 0, 1, 1], [], []>} : vector<68x32xf32>, vector<32x32xf32>, vector<68x32xf32> -> vector<68x32xf32>
    %c0_167 = arith.constant 0 : index
    %c0_168 = arith.constant 0 : index
    %c0_169 = arith.constant 0 : index
    %195 = vector.load %arg14[%c0_167, %c0_168, %c0_169] : memref<2x1x32xf32, #tpu.memory_space<vmem>>, vector<1x1x32xf32>
    %196 = vector.shape_cast %195 : vector<1x1x32xf32> to vector<1x32xf32>
    %197 = vector.broadcast %196 : vector<1x32xf32> to vector<68x32xf32>
    %198 = arith.addf %194, %197 : vector<68x32xf32>
    %cst_170 = arith.constant 0.000000e+00 : f32
    %199 = vector.broadcast %cst_170 : f32 to vector<68x32xf32>
    %200 = arith.maximumf %198, %199 : vector<68x32xf32>
    %c0_171 = arith.constant 0 : index
    %c0_172 = arith.constant 0 : index
    %c0_173 = arith.constant 0 : index
    %201 = vector.load %arg15[%c0_171, %c0_172, %c0_173] : memref<2x32x32xf32, #tpu.memory_space<vmem>>, vector<1x32x32xf32>
    %202 = vector.shape_cast %201 : vector<1x32x32xf32> to vector<32x32xf32>
    %cst_174 = arith.constant dense<0.000000e+00> : vector<68x32xf32>
    %203 = tpu.matmul %200, %202, %cst_174 {dimension_numbers = #tpu.dot_dimension_numbers<[1], [0], [0], [1], [0, 0, 1, 1], [], []>} : vector<68x32xf32>, vector<32x32xf32>, vector<68x32xf32> -> vector<68x32xf32>
    %c0_175 = arith.constant 0 : index
    %c0_176 = arith.constant 0 : index
    %c0_177 = arith.constant 0 : index
    %204 = vector.load %arg16[%c0_175, %c0_176, %c0_177] : memref<2x1x32xf32, #tpu.memory_space<vmem>>, vector<1x1x32xf32>
    %205 = vector.shape_cast %204 : vector<1x1x32xf32> to vector<1x32xf32>
    %206 = vector.broadcast %205 : vector<1x32xf32> to vector<68x32xf32>
    %207 = arith.addf %203, %206 : vector<68x32xf32>
    %208 = arith.addf %191, %207 : vector<68x32xf32>
    %c0_178 = arith.constant 0 : index
    %c0_179 = arith.constant 0 : index
    %c0_180 = arith.constant 0 : index
    %209 = vector.load %arg17[%c0_178, %c0_179, %c0_180] : memref<2x1x32xf32, #tpu.memory_space<vmem>>, vector<1x1x32xf32>
    %210 = vector.shape_cast %209 : vector<1x1x32xf32> to vector<1x32xf32>
    %c0_181 = arith.constant 0 : index
    %c0_182 = arith.constant 0 : index
    %c0_183 = arith.constant 0 : index
    %211 = vector.load %arg18[%c0_181, %c0_182, %c0_183] : memref<2x1x32xf32, #tpu.memory_space<vmem>>, vector<1x1x32xf32>
    %212 = vector.shape_cast %211 : vector<1x1x32xf32> to vector<1x32xf32>
    %cst_184 = arith.constant dense<0.000000e+00> : vector<68xf32>
    %213 = vector.multi_reduction <add>, %208, %cst_184 [1] : vector<68x32xf32> to vector<68xf32>
    %214 = vector.shape_cast %213 : vector<68xf32> to vector<68x1xf32>
    %cst_185 = arith.constant 3.200000e+01 : f32
    %215 = vector.broadcast %cst_185 : f32 to vector<68x1xf32>
    %216 = arith.divf %214, %215 : vector<68x1xf32>
    %217 = vector.broadcast %216 : vector<68x1xf32> to vector<68x32xf32>
    %218 = arith.subf %208, %217 : vector<68x32xf32>
    %219 = arith.mulf %218, %218 : vector<68x32xf32>
    %cst_186 = arith.constant dense<0.000000e+00> : vector<68xf32>
    %220 = vector.multi_reduction <add>, %219, %cst_186 [1] : vector<68x32xf32> to vector<68xf32>
    %221 = vector.shape_cast %220 : vector<68xf32> to vector<68x1xf32>
    %cst_187 = arith.constant 3.200000e+01 : f32
    %222 = vector.broadcast %cst_187 : f32 to vector<68x1xf32>
    %223 = arith.divf %221, %222 : vector<68x1xf32>
    %cst_188 = arith.constant 9.99999974E-6 : f32
    %224 = vector.broadcast %cst_188 : f32 to vector<68x1xf32>
    %225 = arith.addf %223, %224 : vector<68x1xf32>
    %226 = math.rsqrt %225 : vector<68x1xf32>
    %227 = vector.broadcast %216 : vector<68x1xf32> to vector<68x32xf32>
    %228 = arith.subf %208, %227 : vector<68x32xf32>
    %229 = vector.broadcast %226 : vector<68x1xf32> to vector<68x32xf32>
    %230 = arith.mulf %228, %229 : vector<68x32xf32>
    %231 = vector.broadcast %210 : vector<1x32xf32> to vector<68x32xf32>
    %232 = arith.mulf %230, %231 : vector<68x32xf32>
    %233 = vector.broadcast %212 : vector<1x32xf32> to vector<68x32xf32>
    %234 = arith.addf %232, %233 : vector<68x32xf32>
    %cst_189 = arith.constant 0.000000e+00 : f32
    %235 = vector.broadcast %cst_189 : f32 to vector<68x32xf32>
    %c1_190 = arith.constant 1 : index
    %c0_191 = arith.constant 0 : index
    %c0_192 = arith.constant 0 : index
    %c0_193 = arith.constant 0 : index
    %236 = vector.load %arg3[%c1_190, %c0_191, %c0_192, %c0_193] : memref<2x4x32x8xf32, #tpu.memory_space<vmem>>, vector<1x1x32x8xf32>
    %237 = vector.shape_cast %236 : vector<1x1x32x8xf32> to vector<32x8xf32>
    %cst_194 = arith.constant dense<0.000000e+00> : vector<68x8xf32>
    %238 = tpu.matmul %234, %237, %cst_194 {dimension_numbers = #tpu.dot_dimension_numbers<[1], [0], [0], [1], [0, 0, 1, 1], [], []>} : vector<68x32xf32>, vector<32x8xf32>, vector<68x8xf32> -> vector<68x8xf32>
    %c1_195 = arith.constant 1 : index
    %c0_196 = arith.constant 0 : index
    %c0_197 = arith.constant 0 : index
    %c0_198 = arith.constant 0 : index
    %239 = vector.load %arg4[%c1_195, %c0_196, %c0_197, %c0_198] : memref<2x4x1x8xf32, #tpu.memory_space<vmem>>, vector<1x1x1x8xf32>
    %240 = vector.shape_cast %239 : vector<1x1x1x8xf32> to vector<1x8xf32>
    %241 = vector.broadcast %240 : vector<1x8xf32> to vector<68x8xf32>
    %242 = arith.addf %238, %241 : vector<68x8xf32>
    %c1_199 = arith.constant 1 : index
    %c0_200 = arith.constant 0 : index
    %c0_201 = arith.constant 0 : index
    %c0_202 = arith.constant 0 : index
    %243 = vector.load %arg5[%c1_199, %c0_200, %c0_201, %c0_202] : memref<2x4x32x8xf32, #tpu.memory_space<vmem>>, vector<1x1x32x8xf32>
    %244 = vector.shape_cast %243 : vector<1x1x32x8xf32> to vector<32x8xf32>
    %cst_203 = arith.constant dense<0.000000e+00> : vector<68x8xf32>
    %245 = tpu.matmul %234, %244, %cst_203 {dimension_numbers = #tpu.dot_dimension_numbers<[1], [0], [0], [1], [0, 0, 1, 1], [], []>} : vector<68x32xf32>, vector<32x8xf32>, vector<68x8xf32> -> vector<68x8xf32>
    %c1_204 = arith.constant 1 : index
    %c0_205 = arith.constant 0 : index
    %c0_206 = arith.constant 0 : index
    %c0_207 = arith.constant 0 : index
    %246 = vector.load %arg6[%c1_204, %c0_205, %c0_206, %c0_207] : memref<2x4x1x8xf32, #tpu.memory_space<vmem>>, vector<1x1x1x8xf32>
    %247 = vector.shape_cast %246 : vector<1x1x1x8xf32> to vector<1x8xf32>
    %248 = vector.broadcast %247 : vector<1x8xf32> to vector<68x8xf32>
    %249 = arith.addf %245, %248 : vector<68x8xf32>
    %c1_208 = arith.constant 1 : index
    %c0_209 = arith.constant 0 : index
    %c0_210 = arith.constant 0 : index
    %c0_211 = arith.constant 0 : index
    %250 = vector.load %arg7[%c1_208, %c0_209, %c0_210, %c0_211] : memref<2x4x32x8xf32, #tpu.memory_space<vmem>>, vector<1x1x32x8xf32>
    %251 = vector.shape_cast %250 : vector<1x1x32x8xf32> to vector<32x8xf32>
    %cst_212 = arith.constant dense<0.000000e+00> : vector<68x8xf32>
    %252 = tpu.matmul %234, %251, %cst_212 {dimension_numbers = #tpu.dot_dimension_numbers<[1], [0], [0], [1], [0, 0, 1, 1], [], []>} : vector<68x32xf32>, vector<32x8xf32>, vector<68x8xf32> -> vector<68x8xf32>
    %c1_213 = arith.constant 1 : index
    %c0_214 = arith.constant 0 : index
    %c0_215 = arith.constant 0 : index
    %c0_216 = arith.constant 0 : index
    %253 = vector.load %arg8[%c1_213, %c0_214, %c0_215, %c0_216] : memref<2x4x1x8xf32, #tpu.memory_space<vmem>>, vector<1x1x1x8xf32>
    %254 = vector.shape_cast %253 : vector<1x1x1x8xf32> to vector<1x8xf32>
    %255 = vector.broadcast %254 : vector<1x8xf32> to vector<68x8xf32>
    %256 = arith.addf %252, %255 : vector<68x8xf32>
    %cst_217 = arith.constant 0.353553385 : f32
    %257 = vector.broadcast %cst_217 : f32 to vector<68x8xf32>
    %258 = arith.mulf %242, %257 : vector<68x8xf32>
    %cst_218 = arith.constant dense<0.000000e+00> : vector<68x68xf32>
    %259 = tpu.matmul %258, %249, %cst_218 {dimension_numbers = #tpu.dot_dimension_numbers<[1], [1], [0], [0], [0, 0, 1, 0], [], []>} : vector<68x8xf32>, vector<68x8xf32>, vector<68x68xf32> -> vector<68x68xf32>
    %cst_219 = arith.constant dense<0xFF800000> : vector<68xf32>
    %260 = vector.multi_reduction <maximumf>, %259, %cst_219 [1] : vector<68x68xf32> to vector<68xf32>
    %261 = vector.shape_cast %260 : vector<68xf32> to vector<68x1xf32>
    %262 = vector.broadcast %261 : vector<68x1xf32> to vector<68x68xf32>
    %263 = arith.subf %259, %262 : vector<68x68xf32>
    %264 = math.exp %263 : vector<68x68xf32>
    %cst_220 = arith.constant dense<0.000000e+00> : vector<68xf32>
    %265 = vector.multi_reduction <add>, %264, %cst_220 [1] : vector<68x68xf32> to vector<68xf32>
    %266 = vector.shape_cast %265 : vector<68xf32> to vector<68x1xf32>
    %cst_221 = arith.constant dense<0.000000e+00> : vector<68x8xf32>
    %267 = tpu.matmul %264, %256, %cst_221 {dimension_numbers = #tpu.dot_dimension_numbers<[1], [0], [0], [1], [0, 0, 1, 1], [], []>} : vector<68x68xf32>, vector<68x8xf32>, vector<68x8xf32> -> vector<68x8xf32>
    %268 = tpu.reciprocal %266 {approx = true} : vector<68x1xf32> -> vector<68x1xf32>
    %269 = vector.broadcast %268 : vector<68x1xf32> to vector<68x8xf32>
    %270 = arith.mulf %267, %269 : vector<68x8xf32>
    %c1_222 = arith.constant 1 : index
    %c0_223 = arith.constant 0 : index
    %c0_224 = arith.constant 0 : index
    %c0_225 = arith.constant 0 : index
    %271 = vector.load %arg9[%c1_222, %c0_223, %c0_224, %c0_225] : memref<2x4x8x32xf32, #tpu.memory_space<vmem>>, vector<1x1x8x32xf32>
    %272 = vector.shape_cast %271 : vector<1x1x8x32xf32> to vector<8x32xf32>
    %cst_226 = arith.constant dense<0.000000e+00> : vector<68x32xf32>
    %273 = tpu.matmul %270, %272, %cst_226 {dimension_numbers = #tpu.dot_dimension_numbers<[1], [0], [0], [1], [0, 0, 1, 1], [], []>} : vector<68x8xf32>, vector<8x32xf32>, vector<68x32xf32> -> vector<68x32xf32>
    %274 = arith.addf %235, %273 : vector<68x32xf32>
    %c1_227 = arith.constant 1 : index
    %c1_228 = arith.constant 1 : index
    %c0_229 = arith.constant 0 : index
    %c0_230 = arith.constant 0 : index
    %275 = vector.load %arg3[%c1_227, %c1_228, %c0_229, %c0_230] : memref<2x4x32x8xf32, #tpu.memory_space<vmem>>, vector<1x1x32x8xf32>
    %276 = vector.shape_cast %275 : vector<1x1x32x8xf32> to vector<32x8xf32>
    %cst_231 = arith.constant dense<0.000000e+00> : vector<68x8xf32>
    %277 = tpu.matmul %234, %276, %cst_231 {dimension_numbers = #tpu.dot_dimension_numbers<[1], [0], [0], [1], [0, 0, 1, 1], [], []>} : vector<68x32xf32>, vector<32x8xf32>, vector<68x8xf32> -> vector<68x8xf32>
    %c1_232 = arith.constant 1 : index
    %c1_233 = arith.constant 1 : index
    %c0_234 = arith.constant 0 : index
    %c0_235 = arith.constant 0 : index
    %278 = vector.load %arg4[%c1_232, %c1_233, %c0_234, %c0_235] : memref<2x4x1x8xf32, #tpu.memory_space<vmem>>, vector<1x1x1x8xf32>
    %279 = vector.shape_cast %278 : vector<1x1x1x8xf32> to vector<1x8xf32>
    %280 = vector.broadcast %279 : vector<1x8xf32> to vector<68x8xf32>
    %281 = arith.addf %277, %280 : vector<68x8xf32>
    %c1_236 = arith.constant 1 : index
    %c1_237 = arith.constant 1 : index
    %c0_238 = arith.constant 0 : index
    %c0_239 = arith.constant 0 : index
    %282 = vector.load %arg5[%c1_236, %c1_237, %c0_238, %c0_239] : memref<2x4x32x8xf32, #tpu.memory_space<vmem>>, vector<1x1x32x8xf32>
    %283 = vector.shape_cast %282 : vector<1x1x32x8xf32> to vector<32x8xf32>
    %cst_240 = arith.constant dense<0.000000e+00> : vector<68x8xf32>
    %284 = tpu.matmul %234, %283, %cst_240 {dimension_numbers = #tpu.dot_dimension_numbers<[1], [0], [0], [1], [0, 0, 1, 1], [], []>} : vector<68x32xf32>, vector<32x8xf32>, vector<68x8xf32> -> vector<68x8xf32>
    %c1_241 = arith.constant 1 : index
    %c1_242 = arith.constant 1 : index
    %c0_243 = arith.constant 0 : index
    %c0_244 = arith.constant 0 : index
    %285 = vector.load %arg6[%c1_241, %c1_242, %c0_243, %c0_244] : memref<2x4x1x8xf32, #tpu.memory_space<vmem>>, vector<1x1x1x8xf32>
    %286 = vector.shape_cast %285 : vector<1x1x1x8xf32> to vector<1x8xf32>
    %287 = vector.broadcast %286 : vector<1x8xf32> to vector<68x8xf32>
    %288 = arith.addf %284, %287 : vector<68x8xf32>
    %c1_245 = arith.constant 1 : index
    %c1_246 = arith.constant 1 : index
    %c0_247 = arith.constant 0 : index
    %c0_248 = arith.constant 0 : index
    %289 = vector.load %arg7[%c1_245, %c1_246, %c0_247, %c0_248] : memref<2x4x32x8xf32, #tpu.memory_space<vmem>>, vector<1x1x32x8xf32>
    %290 = vector.shape_cast %289 : vector<1x1x32x8xf32> to vector<32x8xf32>
    %cst_249 = arith.constant dense<0.000000e+00> : vector<68x8xf32>
    %291 = tpu.matmul %234, %290, %cst_249 {dimension_numbers = #tpu.dot_dimension_numbers<[1], [0], [0], [1], [0, 0, 1, 1], [], []>} : vector<68x32xf32>, vector<32x8xf32>, vector<68x8xf32> -> vector<68x8xf32>
    %c1_250 = arith.constant 1 : index
    %c1_251 = arith.constant 1 : index
    %c0_252 = arith.constant 0 : index
    %c0_253 = arith.constant 0 : index
    %292 = vector.load %arg8[%c1_250, %c1_251, %c0_252, %c0_253] : memref<2x4x1x8xf32, #tpu.memory_space<vmem>>, vector<1x1x1x8xf32>
    %293 = vector.shape_cast %292 : vector<1x1x1x8xf32> to vector<1x8xf32>
    %294 = vector.broadcast %293 : vector<1x8xf32> to vector<68x8xf32>
    %295 = arith.addf %291, %294 : vector<68x8xf32>
    %cst_254 = arith.constant 0.353553385 : f32
    %296 = vector.broadcast %cst_254 : f32 to vector<68x8xf32>
    %297 = arith.mulf %281, %296 : vector<68x8xf32>
    %cst_255 = arith.constant dense<0.000000e+00> : vector<68x68xf32>
    %298 = tpu.matmul %297, %288, %cst_255 {dimension_numbers = #tpu.dot_dimension_numbers<[1], [1], [0], [0], [0, 0, 1, 0], [], []>} : vector<68x8xf32>, vector<68x8xf32>, vector<68x68xf32> -> vector<68x68xf32>
    %cst_256 = arith.constant dense<0xFF800000> : vector<68xf32>
    %299 = vector.multi_reduction <maximumf>, %298, %cst_256 [1] : vector<68x68xf32> to vector<68xf32>
    %300 = vector.shape_cast %299 : vector<68xf32> to vector<68x1xf32>
    %301 = vector.broadcast %300 : vector<68x1xf32> to vector<68x68xf32>
    %302 = arith.subf %298, %301 : vector<68x68xf32>
    %303 = math.exp %302 : vector<68x68xf32>
    %cst_257 = arith.constant dense<0.000000e+00> : vector<68xf32>
    %304 = vector.multi_reduction <add>, %303, %cst_257 [1] : vector<68x68xf32> to vector<68xf32>
    %305 = vector.shape_cast %304 : vector<68xf32> to vector<68x1xf32>
    %cst_258 = arith.constant dense<0.000000e+00> : vector<68x8xf32>
    %306 = tpu.matmul %303, %295, %cst_258 {dimension_numbers = #tpu.dot_dimension_numbers<[1], [0], [0], [1], [0, 0, 1, 1], [], []>} : vector<68x68xf32>, vector<68x8xf32>, vector<68x8xf32> -> vector<68x8xf32>
    %307 = tpu.reciprocal %305 {approx = true} : vector<68x1xf32> -> vector<68x1xf32>
    %308 = vector.broadcast %307 : vector<68x1xf32> to vector<68x8xf32>
    %309 = arith.mulf %306, %308 : vector<68x8xf32>
    %c1_259 = arith.constant 1 : index
    %c1_260 = arith.constant 1 : index
    %c0_261 = arith.constant 0 : index
    %c0_262 = arith.constant 0 : index
    %310 = vector.load %arg9[%c1_259, %c1_260, %c0_261, %c0_262] : memref<2x4x8x32xf32, #tpu.memory_space<vmem>>, vector<1x1x8x32xf32>
    %311 = vector.shape_cast %310 : vector<1x1x8x32xf32> to vector<8x32xf32>
    %cst_263 = arith.constant dense<0.000000e+00> : vector<68x32xf32>
    %312 = tpu.matmul %309, %311, %cst_263 {dimension_numbers = #tpu.dot_dimension_numbers<[1], [0], [0], [1], [0, 0, 1, 1], [], []>} : vector<68x8xf32>, vector<8x32xf32>, vector<68x32xf32> -> vector<68x32xf32>
    %313 = arith.addf %274, %312 : vector<68x32xf32>
    %c1_264 = arith.constant 1 : index
    %c2_265 = arith.constant 2 : index
    %c0_266 = arith.constant 0 : index
    %c0_267 = arith.constant 0 : index
    %314 = vector.load %arg3[%c1_264, %c2_265, %c0_266, %c0_267] : memref<2x4x32x8xf32, #tpu.memory_space<vmem>>, vector<1x1x32x8xf32>
    %315 = vector.shape_cast %314 : vector<1x1x32x8xf32> to vector<32x8xf32>
    %cst_268 = arith.constant dense<0.000000e+00> : vector<68x8xf32>
    %316 = tpu.matmul %234, %315, %cst_268 {dimension_numbers = #tpu.dot_dimension_numbers<[1], [0], [0], [1], [0, 0, 1, 1], [], []>} : vector<68x32xf32>, vector<32x8xf32>, vector<68x8xf32> -> vector<68x8xf32>
    %c1_269 = arith.constant 1 : index
    %c2_270 = arith.constant 2 : index
    %c0_271 = arith.constant 0 : index
    %c0_272 = arith.constant 0 : index
    %317 = vector.load %arg4[%c1_269, %c2_270, %c0_271, %c0_272] : memref<2x4x1x8xf32, #tpu.memory_space<vmem>>, vector<1x1x1x8xf32>
    %318 = vector.shape_cast %317 : vector<1x1x1x8xf32> to vector<1x8xf32>
    %319 = vector.broadcast %318 : vector<1x8xf32> to vector<68x8xf32>
    %320 = arith.addf %316, %319 : vector<68x8xf32>
    %c1_273 = arith.constant 1 : index
    %c2_274 = arith.constant 2 : index
    %c0_275 = arith.constant 0 : index
    %c0_276 = arith.constant 0 : index
    %321 = vector.load %arg5[%c1_273, %c2_274, %c0_275, %c0_276] : memref<2x4x32x8xf32, #tpu.memory_space<vmem>>, vector<1x1x32x8xf32>
    %322 = vector.shape_cast %321 : vector<1x1x32x8xf32> to vector<32x8xf32>
    %cst_277 = arith.constant dense<0.000000e+00> : vector<68x8xf32>
    %323 = tpu.matmul %234, %322, %cst_277 {dimension_numbers = #tpu.dot_dimension_numbers<[1], [0], [0], [1], [0, 0, 1, 1], [], []>} : vector<68x32xf32>, vector<32x8xf32>, vector<68x8xf32> -> vector<68x8xf32>
    %c1_278 = arith.constant 1 : index
    %c2_279 = arith.constant 2 : index
    %c0_280 = arith.constant 0 : index
    %c0_281 = arith.constant 0 : index
    %324 = vector.load %arg6[%c1_278, %c2_279, %c0_280, %c0_281] : memref<2x4x1x8xf32, #tpu.memory_space<vmem>>, vector<1x1x1x8xf32>
    %325 = vector.shape_cast %324 : vector<1x1x1x8xf32> to vector<1x8xf32>
    %326 = vector.broadcast %325 : vector<1x8xf32> to vector<68x8xf32>
    %327 = arith.addf %323, %326 : vector<68x8xf32>
    %c1_282 = arith.constant 1 : index
    %c2_283 = arith.constant 2 : index
    %c0_284 = arith.constant 0 : index
    %c0_285 = arith.constant 0 : index
    %328 = vector.load %arg7[%c1_282, %c2_283, %c0_284, %c0_285] : memref<2x4x32x8xf32, #tpu.memory_space<vmem>>, vector<1x1x32x8xf32>
    %329 = vector.shape_cast %328 : vector<1x1x32x8xf32> to vector<32x8xf32>
    %cst_286 = arith.constant dense<0.000000e+00> : vector<68x8xf32>
    %330 = tpu.matmul %234, %329, %cst_286 {dimension_numbers = #tpu.dot_dimension_numbers<[1], [0], [0], [1], [0, 0, 1, 1], [], []>} : vector<68x32xf32>, vector<32x8xf32>, vector<68x8xf32> -> vector<68x8xf32>
    %c1_287 = arith.constant 1 : index
    %c2_288 = arith.constant 2 : index
    %c0_289 = arith.constant 0 : index
    %c0_290 = arith.constant 0 : index
    %331 = vector.load %arg8[%c1_287, %c2_288, %c0_289, %c0_290] : memref<2x4x1x8xf32, #tpu.memory_space<vmem>>, vector<1x1x1x8xf32>
    %332 = vector.shape_cast %331 : vector<1x1x1x8xf32> to vector<1x8xf32>
    %333 = vector.broadcast %332 : vector<1x8xf32> to vector<68x8xf32>
    %334 = arith.addf %330, %333 : vector<68x8xf32>
    %cst_291 = arith.constant 0.353553385 : f32
    %335 = vector.broadcast %cst_291 : f32 to vector<68x8xf32>
    %336 = arith.mulf %320, %335 : vector<68x8xf32>
    %cst_292 = arith.constant dense<0.000000e+00> : vector<68x68xf32>
    %337 = tpu.matmul %336, %327, %cst_292 {dimension_numbers = #tpu.dot_dimension_numbers<[1], [1], [0], [0], [0, 0, 1, 0], [], []>} : vector<68x8xf32>, vector<68x8xf32>, vector<68x68xf32> -> vector<68x68xf32>
    %cst_293 = arith.constant dense<0xFF800000> : vector<68xf32>
    %338 = vector.multi_reduction <maximumf>, %337, %cst_293 [1] : vector<68x68xf32> to vector<68xf32>
    %339 = vector.shape_cast %338 : vector<68xf32> to vector<68x1xf32>
    %340 = vector.broadcast %339 : vector<68x1xf32> to vector<68x68xf32>
    %341 = arith.subf %337, %340 : vector<68x68xf32>
    %342 = math.exp %341 : vector<68x68xf32>
    %cst_294 = arith.constant dense<0.000000e+00> : vector<68xf32>
    %343 = vector.multi_reduction <add>, %342, %cst_294 [1] : vector<68x68xf32> to vector<68xf32>
    %344 = vector.shape_cast %343 : vector<68xf32> to vector<68x1xf32>
    %cst_295 = arith.constant dense<0.000000e+00> : vector<68x8xf32>
    %345 = tpu.matmul %342, %334, %cst_295 {dimension_numbers = #tpu.dot_dimension_numbers<[1], [0], [0], [1], [0, 0, 1, 1], [], []>} : vector<68x68xf32>, vector<68x8xf32>, vector<68x8xf32> -> vector<68x8xf32>
    %346 = tpu.reciprocal %344 {approx = true} : vector<68x1xf32> -> vector<68x1xf32>
    %347 = vector.broadcast %346 : vector<68x1xf32> to vector<68x8xf32>
    %348 = arith.mulf %345, %347 : vector<68x8xf32>
    %c1_296 = arith.constant 1 : index
    %c2_297 = arith.constant 2 : index
    %c0_298 = arith.constant 0 : index
    %c0_299 = arith.constant 0 : index
    %349 = vector.load %arg9[%c1_296, %c2_297, %c0_298, %c0_299] : memref<2x4x8x32xf32, #tpu.memory_space<vmem>>, vector<1x1x8x32xf32>
    %350 = vector.shape_cast %349 : vector<1x1x8x32xf32> to vector<8x32xf32>
    %cst_300 = arith.constant dense<0.000000e+00> : vector<68x32xf32>
    %351 = tpu.matmul %348, %350, %cst_300 {dimension_numbers = #tpu.dot_dimension_numbers<[1], [0], [0], [1], [0, 0, 1, 1], [], []>} : vector<68x8xf32>, vector<8x32xf32>, vector<68x32xf32> -> vector<68x32xf32>
    %352 = arith.addf %313, %351 : vector<68x32xf32>
    %c1_301 = arith.constant 1 : index
    %c3_302 = arith.constant 3 : index
    %c0_303 = arith.constant 0 : index
    %c0_304 = arith.constant 0 : index
    %353 = vector.load %arg3[%c1_301, %c3_302, %c0_303, %c0_304] : memref<2x4x32x8xf32, #tpu.memory_space<vmem>>, vector<1x1x32x8xf32>
    %354 = vector.shape_cast %353 : vector<1x1x32x8xf32> to vector<32x8xf32>
    %cst_305 = arith.constant dense<0.000000e+00> : vector<68x8xf32>
    %355 = tpu.matmul %234, %354, %cst_305 {dimension_numbers = #tpu.dot_dimension_numbers<[1], [0], [0], [1], [0, 0, 1, 1], [], []>} : vector<68x32xf32>, vector<32x8xf32>, vector<68x8xf32> -> vector<68x8xf32>
    %c1_306 = arith.constant 1 : index
    %c3_307 = arith.constant 3 : index
    %c0_308 = arith.constant 0 : index
    %c0_309 = arith.constant 0 : index
    %356 = vector.load %arg4[%c1_306, %c3_307, %c0_308, %c0_309] : memref<2x4x1x8xf32, #tpu.memory_space<vmem>>, vector<1x1x1x8xf32>
    %357 = vector.shape_cast %356 : vector<1x1x1x8xf32> to vector<1x8xf32>
    %358 = vector.broadcast %357 : vector<1x8xf32> to vector<68x8xf32>
    %359 = arith.addf %355, %358 : vector<68x8xf32>
    %c1_310 = arith.constant 1 : index
    %c3_311 = arith.constant 3 : index
    %c0_312 = arith.constant 0 : index
    %c0_313 = arith.constant 0 : index
    %360 = vector.load %arg5[%c1_310, %c3_311, %c0_312, %c0_313] : memref<2x4x32x8xf32, #tpu.memory_space<vmem>>, vector<1x1x32x8xf32>
    %361 = vector.shape_cast %360 : vector<1x1x32x8xf32> to vector<32x8xf32>
    %cst_314 = arith.constant dense<0.000000e+00> : vector<68x8xf32>
    %362 = tpu.matmul %234, %361, %cst_314 {dimension_numbers = #tpu.dot_dimension_numbers<[1], [0], [0], [1], [0, 0, 1, 1], [], []>} : vector<68x32xf32>, vector<32x8xf32>, vector<68x8xf32> -> vector<68x8xf32>
    %c1_315 = arith.constant 1 : index
    %c3_316 = arith.constant 3 : index
    %c0_317 = arith.constant 0 : index
    %c0_318 = arith.constant 0 : index
    %363 = vector.load %arg6[%c1_315, %c3_316, %c0_317, %c0_318] : memref<2x4x1x8xf32, #tpu.memory_space<vmem>>, vector<1x1x1x8xf32>
    %364 = vector.shape_cast %363 : vector<1x1x1x8xf32> to vector<1x8xf32>
    %365 = vector.broadcast %364 : vector<1x8xf32> to vector<68x8xf32>
    %366 = arith.addf %362, %365 : vector<68x8xf32>
    %c1_319 = arith.constant 1 : index
    %c3_320 = arith.constant 3 : index
    %c0_321 = arith.constant 0 : index
    %c0_322 = arith.constant 0 : index
    %367 = vector.load %arg7[%c1_319, %c3_320, %c0_321, %c0_322] : memref<2x4x32x8xf32, #tpu.memory_space<vmem>>, vector<1x1x32x8xf32>
    %368 = vector.shape_cast %367 : vector<1x1x32x8xf32> to vector<32x8xf32>
    %cst_323 = arith.constant dense<0.000000e+00> : vector<68x8xf32>
    %369 = tpu.matmul %234, %368, %cst_323 {dimension_numbers = #tpu.dot_dimension_numbers<[1], [0], [0], [1], [0, 0, 1, 1], [], []>} : vector<68x32xf32>, vector<32x8xf32>, vector<68x8xf32> -> vector<68x8xf32>
    %c1_324 = arith.constant 1 : index
    %c3_325 = arith.constant 3 : index
    %c0_326 = arith.constant 0 : index
    %c0_327 = arith.constant 0 : index
    %370 = vector.load %arg8[%c1_324, %c3_325, %c0_326, %c0_327] : memref<2x4x1x8xf32, #tpu.memory_space<vmem>>, vector<1x1x1x8xf32>
    %371 = vector.shape_cast %370 : vector<1x1x1x8xf32> to vector<1x8xf32>
    %372 = vector.broadcast %371 : vector<1x8xf32> to vector<68x8xf32>
    %373 = arith.addf %369, %372 : vector<68x8xf32>
    %cst_328 = arith.constant 0.353553385 : f32
    %374 = vector.broadcast %cst_328 : f32 to vector<68x8xf32>
    %375 = arith.mulf %359, %374 : vector<68x8xf32>
    %cst_329 = arith.constant dense<0.000000e+00> : vector<68x68xf32>
    %376 = tpu.matmul %375, %366, %cst_329 {dimension_numbers = #tpu.dot_dimension_numbers<[1], [1], [0], [0], [0, 0, 1, 0], [], []>} : vector<68x8xf32>, vector<68x8xf32>, vector<68x68xf32> -> vector<68x68xf32>
    %cst_330 = arith.constant dense<0xFF800000> : vector<68xf32>
    %377 = vector.multi_reduction <maximumf>, %376, %cst_330 [1] : vector<68x68xf32> to vector<68xf32>
    %378 = vector.shape_cast %377 : vector<68xf32> to vector<68x1xf32>
    %379 = vector.broadcast %378 : vector<68x1xf32> to vector<68x68xf32>
    %380 = arith.subf %376, %379 : vector<68x68xf32>
    %381 = math.exp %380 : vector<68x68xf32>
    %cst_331 = arith.constant dense<0.000000e+00> : vector<68xf32>
    %382 = vector.multi_reduction <add>, %381, %cst_331 [1] : vector<68x68xf32> to vector<68xf32>
    %383 = vector.shape_cast %382 : vector<68xf32> to vector<68x1xf32>
    %cst_332 = arith.constant dense<0.000000e+00> : vector<68x8xf32>
    %384 = tpu.matmul %381, %373, %cst_332 {dimension_numbers = #tpu.dot_dimension_numbers<[1], [0], [0], [1], [0, 0, 1, 1], [], []>} : vector<68x68xf32>, vector<68x8xf32>, vector<68x8xf32> -> vector<68x8xf32>
    %385 = tpu.reciprocal %383 {approx = true} : vector<68x1xf32> -> vector<68x1xf32>
    %386 = vector.broadcast %385 : vector<68x1xf32> to vector<68x8xf32>
    %387 = arith.mulf %384, %386 : vector<68x8xf32>
    %c1_333 = arith.constant 1 : index
    %c3_334 = arith.constant 3 : index
    %c0_335 = arith.constant 0 : index
    %c0_336 = arith.constant 0 : index
    %388 = vector.load %arg9[%c1_333, %c3_334, %c0_335, %c0_336] : memref<2x4x8x32xf32, #tpu.memory_space<vmem>>, vector<1x1x8x32xf32>
    %389 = vector.shape_cast %388 : vector<1x1x8x32xf32> to vector<8x32xf32>
    %cst_337 = arith.constant dense<0.000000e+00> : vector<68x32xf32>
    %390 = tpu.matmul %387, %389, %cst_337 {dimension_numbers = #tpu.dot_dimension_numbers<[1], [0], [0], [1], [0, 0, 1, 1], [], []>} : vector<68x8xf32>, vector<8x32xf32>, vector<68x32xf32> -> vector<68x32xf32>
    %391 = arith.addf %352, %390 : vector<68x32xf32>
    %392 = arith.addf %234, %391 : vector<68x32xf32>
    %c1_338 = arith.constant 1 : index
    %c0_339 = arith.constant 0 : index
    %c0_340 = arith.constant 0 : index
    %393 = vector.load %arg10[%c1_338, %c0_339, %c0_340] : memref<2x1x32xf32, #tpu.memory_space<vmem>>, vector<1x1x32xf32>
    %394 = vector.shape_cast %393 : vector<1x1x32xf32> to vector<1x32xf32>
    %395 = vector.broadcast %394 : vector<1x32xf32> to vector<68x32xf32>
    %396 = arith.addf %392, %395 : vector<68x32xf32>
    %c1_341 = arith.constant 1 : index
    %c0_342 = arith.constant 0 : index
    %c0_343 = arith.constant 0 : index
    %397 = vector.load %arg11[%c1_341, %c0_342, %c0_343] : memref<2x1x32xf32, #tpu.memory_space<vmem>>, vector<1x1x32xf32>
    %398 = vector.shape_cast %397 : vector<1x1x32xf32> to vector<1x32xf32>
    %c1_344 = arith.constant 1 : index
    %c0_345 = arith.constant 0 : index
    %c0_346 = arith.constant 0 : index
    %399 = vector.load %arg12[%c1_344, %c0_345, %c0_346] : memref<2x1x32xf32, #tpu.memory_space<vmem>>, vector<1x1x32xf32>
    %400 = vector.shape_cast %399 : vector<1x1x32xf32> to vector<1x32xf32>
    %cst_347 = arith.constant dense<0.000000e+00> : vector<68xf32>
    %401 = vector.multi_reduction <add>, %396, %cst_347 [1] : vector<68x32xf32> to vector<68xf32>
    %402 = vector.shape_cast %401 : vector<68xf32> to vector<68x1xf32>
    %cst_348 = arith.constant 3.200000e+01 : f32
    %403 = vector.broadcast %cst_348 : f32 to vector<68x1xf32>
    %404 = arith.divf %402, %403 : vector<68x1xf32>
    %405 = vector.broadcast %404 : vector<68x1xf32> to vector<68x32xf32>
    %406 = arith.subf %396, %405 : vector<68x32xf32>
    %407 = arith.mulf %406, %406 : vector<68x32xf32>
    %cst_349 = arith.constant dense<0.000000e+00> : vector<68xf32>
    %408 = vector.multi_reduction <add>, %407, %cst_349 [1] : vector<68x32xf32> to vector<68xf32>
    %409 = vector.shape_cast %408 : vector<68xf32> to vector<68x1xf32>
    %cst_350 = arith.constant 3.200000e+01 : f32
    %410 = vector.broadcast %cst_350 : f32 to vector<68x1xf32>
    %411 = arith.divf %409, %410 : vector<68x1xf32>
    %cst_351 = arith.constant 9.99999974E-6 : f32
    %412 = vector.broadcast %cst_351 : f32 to vector<68x1xf32>
    %413 = arith.addf %411, %412 : vector<68x1xf32>
    %414 = math.rsqrt %413 : vector<68x1xf32>
    %415 = vector.broadcast %404 : vector<68x1xf32> to vector<68x32xf32>
    %416 = arith.subf %396, %415 : vector<68x32xf32>
    %417 = vector.broadcast %414 : vector<68x1xf32> to vector<68x32xf32>
    %418 = arith.mulf %416, %417 : vector<68x32xf32>
    %419 = vector.broadcast %398 : vector<1x32xf32> to vector<68x32xf32>
    %420 = arith.mulf %418, %419 : vector<68x32xf32>
    %421 = vector.broadcast %400 : vector<1x32xf32> to vector<68x32xf32>
    %422 = arith.addf %420, %421 : vector<68x32xf32>
    %c1_352 = arith.constant 1 : index
    %c0_353 = arith.constant 0 : index
    %c0_354 = arith.constant 0 : index
    %423 = vector.load %arg13[%c1_352, %c0_353, %c0_354] : memref<2x32x32xf32, #tpu.memory_space<vmem>>, vector<1x32x32xf32>
    %424 = vector.shape_cast %423 : vector<1x32x32xf32> to vector<32x32xf32>
    %cst_355 = arith.constant dense<0.000000e+00> : vector<68x32xf32>
    %425 = tpu.matmul %422, %424, %cst_355 {dimension_numbers = #tpu.dot_dimension_numbers<[1], [0], [0], [1], [0, 0, 1, 1], [], []>} : vector<68x32xf32>, vector<32x32xf32>, vector<68x32xf32> -> vector<68x32xf32>
    %c1_356 = arith.constant 1 : index
    %c0_357 = arith.constant 0 : index
    %c0_358 = arith.constant 0 : index
    %426 = vector.load %arg14[%c1_356, %c0_357, %c0_358] : memref<2x1x32xf32, #tpu.memory_space<vmem>>, vector<1x1x32xf32>
    %427 = vector.shape_cast %426 : vector<1x1x32xf32> to vector<1x32xf32>
    %428 = vector.broadcast %427 : vector<1x32xf32> to vector<68x32xf32>
    %429 = arith.addf %425, %428 : vector<68x32xf32>
    %cst_359 = arith.constant 0.000000e+00 : f32
    %430 = vector.broadcast %cst_359 : f32 to vector<68x32xf32>
    %431 = arith.maximumf %429, %430 : vector<68x32xf32>
    %c1_360 = arith.constant 1 : index
    %c0_361 = arith.constant 0 : index
    %c0_362 = arith.constant 0 : index
    %432 = vector.load %arg15[%c1_360, %c0_361, %c0_362] : memref<2x32x32xf32, #tpu.memory_space<vmem>>, vector<1x32x32xf32>
    %433 = vector.shape_cast %432 : vector<1x32x32xf32> to vector<32x32xf32>
    %cst_363 = arith.constant dense<0.000000e+00> : vector<68x32xf32>
    %434 = tpu.matmul %431, %433, %cst_363 {dimension_numbers = #tpu.dot_dimension_numbers<[1], [0], [0], [1], [0, 0, 1, 1], [], []>} : vector<68x32xf32>, vector<32x32xf32>, vector<68x32xf32> -> vector<68x32xf32>
    %c1_364 = arith.constant 1 : index
    %c0_365 = arith.constant 0 : index
    %c0_366 = arith.constant 0 : index
    %435 = vector.load %arg16[%c1_364, %c0_365, %c0_366] : memref<2x1x32xf32, #tpu.memory_space<vmem>>, vector<1x1x32xf32>
    %436 = vector.shape_cast %435 : vector<1x1x32xf32> to vector<1x32xf32>
    %437 = vector.broadcast %436 : vector<1x32xf32> to vector<68x32xf32>
    %438 = arith.addf %434, %437 : vector<68x32xf32>
    %439 = arith.addf %422, %438 : vector<68x32xf32>
    %c1_367 = arith.constant 1 : index
    %c0_368 = arith.constant 0 : index
    %c0_369 = arith.constant 0 : index
    %440 = vector.load %arg17[%c1_367, %c0_368, %c0_369] : memref<2x1x32xf32, #tpu.memory_space<vmem>>, vector<1x1x32xf32>
    %441 = vector.shape_cast %440 : vector<1x1x32xf32> to vector<1x32xf32>
    %c1_370 = arith.constant 1 : index
    %c0_371 = arith.constant 0 : index
    %c0_372 = arith.constant 0 : index
    %442 = vector.load %arg18[%c1_370, %c0_371, %c0_372] : memref<2x1x32xf32, #tpu.memory_space<vmem>>, vector<1x1x32xf32>
    %443 = vector.shape_cast %442 : vector<1x1x32xf32> to vector<1x32xf32>
    %cst_373 = arith.constant dense<0.000000e+00> : vector<68xf32>
    %444 = vector.multi_reduction <add>, %439, %cst_373 [1] : vector<68x32xf32> to vector<68xf32>
    %445 = vector.shape_cast %444 : vector<68xf32> to vector<68x1xf32>
    %cst_374 = arith.constant 3.200000e+01 : f32
    %446 = vector.broadcast %cst_374 : f32 to vector<68x1xf32>
    %447 = arith.divf %445, %446 : vector<68x1xf32>
    %448 = vector.broadcast %447 : vector<68x1xf32> to vector<68x32xf32>
    %449 = arith.subf %439, %448 : vector<68x32xf32>
    %450 = arith.mulf %449, %449 : vector<68x32xf32>
    %cst_375 = arith.constant dense<0.000000e+00> : vector<68xf32>
    %451 = vector.multi_reduction <add>, %450, %cst_375 [1] : vector<68x32xf32> to vector<68xf32>
    %452 = vector.shape_cast %451 : vector<68xf32> to vector<68x1xf32>
    %cst_376 = arith.constant 3.200000e+01 : f32
    %453 = vector.broadcast %cst_376 : f32 to vector<68x1xf32>
    %454 = arith.divf %452, %453 : vector<68x1xf32>
    %cst_377 = arith.constant 9.99999974E-6 : f32
    %455 = vector.broadcast %cst_377 : f32 to vector<68x1xf32>
    %456 = arith.addf %454, %455 : vector<68x1xf32>
    %457 = math.rsqrt %456 : vector<68x1xf32>
    %458 = vector.broadcast %447 : vector<68x1xf32> to vector<68x32xf32>
    %459 = arith.subf %439, %458 : vector<68x32xf32>
    %460 = vector.broadcast %457 : vector<68x1xf32> to vector<68x32xf32>
    %461 = arith.mulf %459, %460 : vector<68x32xf32>
    %462 = vector.broadcast %441 : vector<1x32xf32> to vector<68x32xf32>
    %463 = arith.mulf %461, %462 : vector<68x32xf32>
    %464 = vector.broadcast %443 : vector<1x32xf32> to vector<68x32xf32>
    %465 = arith.addf %463, %464 : vector<68x32xf32>
    %466 = vector.extract_strided_slice %465 {offsets = [0, 0], sizes = [4, 32], strides = [1, 1]} : vector<68x32xf32> to vector<4x32xf32>
    %c0_378 = arith.constant 0 : index
    %c0_379 = arith.constant 0 : index
    %467 = vector.load %arg19[%c0_378, %c0_379] : memref<32x128xf32, #tpu.memory_space<vmem>>, vector<32x128xf32>
    %cst_380 = arith.constant dense<0.000000e+00> : vector<4x128xf32>
    %468 = tpu.matmul %466, %467, %cst_380 {dimension_numbers = #tpu.dot_dimension_numbers<[1], [0], [0], [1], [0, 0, 1, 1], [], []>} : vector<4x32xf32>, vector<32x128xf32>, vector<4x128xf32> -> vector<4x128xf32>
    %c0_381 = arith.constant 0 : index
    %c0_382 = arith.constant 0 : index
    %469 = vector.load %arg20[%c0_381, %c0_382] : memref<1x128xf32, #tpu.memory_space<vmem>>, vector<1x128xf32>
    %470 = vector.broadcast %469 : vector<1x128xf32> to vector<4x128xf32>
    %471 = arith.addf %468, %470 : vector<4x128xf32>
    %c0_383 = arith.constant 0 : index
    %c0_384 = arith.constant 0 : index
    %c0_385 = arith.constant 0 : index
    %472 = vector.load %arg21[%c0_383, %c0_384, %c0_385] : memref<1x4x128xf32, #tpu.memory_space<vmem>>, vector<1x4x128xf32>
    %473 = vector.shape_cast %472 : vector<1x4x128xf32> to vector<4x128xf32>
    %474 = vector.shape_cast %471 : vector<4x128xf32> to vector<1x4x128xf32>
    tpu.vector_store %arg21[%c0_383, %c0_384, %c0_385], %474 {strides = array<i32>} : memref<1x4x128xf32, #tpu.memory_space<vmem>>, vector<1x4x128xf32>,
    return
  }
  func.func @transform_0(%arg0: i32) -> (i32, i32, i32) {
    %c0_i32 = arith.constant 0 : i32
    %c0_i32_0 = arith.constant 0 : i32
    %c0_i32_1 = arith.constant 0 : i32
    return %arg0, %c0_i32, %c0_i32_0 : i32, i32, i32
  }
  func.func @transform_1(%arg0: i32) -> (i32, i32) {
    %c0_i32 = arith.constant 0 : i32
    %c0_i32_0 = arith.constant 0 : i32
    %c0_i32_1 = arith.constant 0 : i32
    return %c0_i32, %c0_i32_0 : i32, i32
  }
  func.func @transform_2(%arg0: i32) -> (i32, i32, i32, i32) {
    %c0_i32 = arith.constant 0 : i32
    %c0_i32_0 = arith.constant 0 : i32
    %c0_i32_1 = arith.constant 0 : i32
    %c0_i32_2 = arith.constant 0 : i32
    %c0_i32_3 = arith.constant 0 : i32
    return %c0_i32, %c0_i32_0, %c0_i32_1, %c0_i32_2 : i32, i32, i32, i32
  }
  func.func @transform_3(%arg0: i32) -> (i32, i32, i32, i32) {
    %c0_i32 = arith.constant 0 : i32
    %c0_i32_0 = arith.constant 0 : i32
    %c0_i32_1 = arith.constant 0 : i32
    %c0_i32_2 = arith.constant 0 : i32
    %c0_i32_3 = arith.constant 0 : i32
    return %c0_i32, %c0_i32_0, %c0_i32_1, %c0_i32_2 : i32, i32, i32, i32
  }
  func.func @transform_4(%arg0: i32) -> (i32, i32, i32, i32) {
    %c0_i32 = arith.constant 0 : i32
    %c0_i32_0 = arith.constant 0 : i32
    %c0_i32_1 = arith.constant 0 : i32
    %c0_i32_2 = arith.constant 0 : i32
    %c0_i32_3 = arith.constant 0 : i32
    return %c0_i32, %c0_i32_0, %c0_i32_1, %c0_i32_2 : i32, i32, i32, i32
  }
  func.func @transform_5(%arg0: i32) -> (i32, i32, i32, i32) {
    %c0_i32 = arith.constant 0 : i32
    %c0_i32_0 = arith.constant 0 : i32
    %c0_i32_1 = arith.constant 0 : i32
    %c0_i32_2 = arith.constant 0 : i32
    %c0_i32_3 = arith.constant 0 : i32
    return %c0_i32, %c0_i32_0, %c0_i32_1, %c0_i32_2 : i32, i32, i32, i32
  }
  func.func @transform_6(%arg0: i32) -> (i32, i32, i32, i32) {
    %c0_i32 = arith.constant 0 : i32
    %c0_i32_0 = arith.constant 0 : i32
    %c0_i32_1 = arith.constant 0 : i32
    %c0_i32_2 = arith.constant 0 : i32
    %c0_i32_3 = arith.constant 0 : i32
    return %c0_i32, %c0_i32_0, %c0_i32_1, %c0_i32_2 : i32, i32, i32, i32
  }
  func.func @transform_7(%arg0: i32) -> (i32, i32, i32, i32) {
    %c0_i32 = arith.constant 0 : i32
    %c0_i32_0 = arith.constant 0 : i32
    %c0_i32_1 = arith.constant 0 : i32
    %c0_i32_2 = arith.constant 0 : i32
    %c0_i32_3 = arith.constant 0 : i32
    return %c0_i32, %c0_i32_0, %c0_i32_1, %c0_i32_2 : i32, i32, i32, i32
  }
  func.func @transform_8(%arg0: i32) -> (i32, i32, i32, i32) {
    %c0_i32 = arith.constant 0 : i32
    %c0_i32_0 = arith.constant 0 : i32
    %c0_i32_1 = arith.constant 0 : i32
    %c0_i32_2 = arith.constant 0 : i32
    %c0_i32_3 = arith.constant 0 : i32
    return %c0_i32, %c0_i32_0, %c0_i32_1, %c0_i32_2 : i32, i32, i32, i32
  }
  func.func @transform_9(%arg0: i32) -> (i32, i32, i32) {
    %c0_i32 = arith.constant 0 : i32
    %c0_i32_0 = arith.constant 0 : i32
    %c0_i32_1 = arith.constant 0 : i32
    %c0_i32_2 = arith.constant 0 : i32
    return %c0_i32, %c0_i32_0, %c0_i32_1 : i32, i32, i32
  }
  func.func @transform_10(%arg0: i32) -> (i32, i32, i32) {
    %c0_i32 = arith.constant 0 : i32
    %c0_i32_0 = arith.constant 0 : i32
    %c0_i32_1 = arith.constant 0 : i32
    %c0_i32_2 = arith.constant 0 : i32
    return %c0_i32, %c0_i32_0, %c0_i32_1 : i32, i32, i32
  }
  func.func @transform_11(%arg0: i32) -> (i32, i32, i32) {
    %c0_i32 = arith.constant 0 : i32
    %c0_i32_0 = arith.constant 0 : i32
    %c0_i32_1 = arith.constant 0 : i32
    %c0_i32_2 = arith.constant 0 : i32
    return %c0_i32, %c0_i32_0, %c0_i32_1 : i32, i32, i32
  }
  func.func @transform_12(%arg0: i32) -> (i32, i32, i32) {
    %c0_i32 = arith.constant 0 : i32
    %c0_i32_0 = arith.constant 0 : i32
    %c0_i32_1 = arith.constant 0 : i32
    %c0_i32_2 = arith.constant 0 : i32
    return %c0_i32, %c0_i32_0, %c0_i32_1 : i32, i32, i32
  }
  func.func @transform_13(%arg0: i32) -> (i32, i32, i32) {
    %c0_i32 = arith.constant 0 : i32
    %c0_i32_0 = arith.constant 0 : i32
    %c0_i32_1 = arith.constant 0 : i32
    %c0_i32_2 = arith.constant 0 : i32
    return %c0_i32, %c0_i32_0, %c0_i32_1 : i32, i32, i32
  }
  func.func @transform_14(%arg0: i32) -> (i32, i32, i32) {
    %c0_i32 = arith.constant 0 : i32
    %c0_i32_0 = arith.constant 0 : i32
    %c0_i32_1 = arith.constant 0 : i32
    %c0_i32_2 = arith.constant 0 : i32
    return %c0_i32, %c0_i32_0, %c0_i32_1 : i32, i32, i32
  }
  func.func @transform_15(%arg0: i32) -> (i32, i32, i32) {
    %c0_i32 = arith.constant 0 : i32
    %c0_i32_0 = arith.constant 0 : i32
    %c0_i32_1 = arith.constant 0 : i32
    %c0_i32_2 = arith.constant 0 : i32
    return %c0_i32, %c0_i32_0, %c0_i32_1 : i32, i32, i32
  }
  func.func @transform_16(%arg0: i32) -> (i32, i32, i32) {
    %c0_i32 = arith.constant 0 : i32
    %c0_i32_0 = arith.constant 0 : i32
    %c0_i32_1 = arith.constant 0 : i32
    %c0_i32_2 = arith.constant 0 : i32
    return %c0_i32, %c0_i32_0, %c0_i32_1 : i32, i32, i32
  }
  func.func @transform_17(%arg0: i32) -> (i32, i32, i32) {
    %c0_i32 = arith.constant 0 : i32
    %c0_i32_0 = arith.constant 0 : i32
    %c0_i32_1 = arith.constant 0 : i32
    %c0_i32_2 = arith.constant 0 : i32
    return %c0_i32, %c0_i32_0, %c0_i32_1 : i32, i32, i32
  }
  func.func @transform_18(%arg0: i32) -> (i32, i32) {
    %c0_i32 = arith.constant 0 : i32
    %c0_i32_0 = arith.constant 0 : i32
    %c0_i32_1 = arith.constant 0 : i32
    return %c0_i32, %c0_i32_0 : i32, i32
  }
  func.func @transform_19(%arg0: i32) -> (i32, i32) {
    %c0_i32 = arith.constant 0 : i32
    %c0_i32_0 = arith.constant 0 : i32
    %c0_i32_1 = arith.constant 0 : i32
    return %c0_i32, %c0_i32_0 : i32, i32
  }
  func.func @transform_20(%arg0: i32) -> (i32, i32, i32) {
    %c0_i32 = arith.constant 0 : i32
    %c0_i32_0 = arith.constant 0 : i32
    %c0_i32_1 = arith.constant 0 : i32
    return %arg0, %c0_i32, %c0_i32_0 : i32, i32, i32
  }
}

</mosaic_0001>

<bundles_post_ra>
// kernel: model_forward.1
= control target key start
LH: loop header
LB: loop body
LE: loop exit
PB: predicated region body
PF: predicated region fallthrough
CT: control target
= control target key end

     0   :  { %s9755_s0 = inlined_call_operand.vmem [shape: f32[2,68,32], index: 0, kind: input, shape index: {}]   ;;  %s9756_s1 = inlined_call_operand.vmem [shape: f32[68,32], index: 1, kind: input, shape index: {}]   ;;  %s9757_s2 = inlined_call_operand.vmem [shape: f32[2,4,32,8], index: 2, kind: input, shape index: {}]   ;;  %s9758_s3 = inlined_call_operand.vmem [shape: f32[2,4,1,8], index: 3, kind: input, shape index: {}]   ;;  %s9759_s4 = inlined_call_operand.vmem [shape: f32[2,4,32,8], index: 4, kind: input, shape index: {}]   ;;  %s9760_s5 = inlined_call_operand.vmem [shape: f32[2,4,1,8], index: 5, kind: input, shape index: {}]   ;;  %s9761_s6 = inlined_call_operand.vmem [shape: f32[2,4,32,8], index: 6, kind: input, shape index: {}]   ;;  %s9762_s7 = inlined_call_operand.vmem [shape: f32[2,4,1,8], index: 7, kind: input, shape index: {}]   ;;  %s9763_s8 = inlined_call_operand.vmem [shape: f32[2,4,8,32], index: 8, kind: input, shape index: {}]   ;;  %s9764_s9 = inlined_call_operand.vmem [shape: f32[2,1,32], index: 9, kind: input, shape index: {}]   ;;  %s9765_s10 = inlined_call_operand.vmem [shape: f32[2,1,32], index: 10, kind: input, shape index: {}]   ;;  %s9766_s11 = inlined_call_operand.vmem [shape: f32[2,1,32], index: 11, kind: input, shape index: {}]   ;;  %s9767_s12 = inlined_call_operand.vmem [shape: f32[2,32,32], index: 12, kind: input, shape index: {}]   ;;  %s9768_s13 = inlined_call_operand.vmem [shape: f32[2,1,32], index: 13, kind: input, shape index: {}]   ;;  %s9769_s14 = inlined_call_operand.vmem [shape: f32[2,32,32], index: 14, kind: input, shape index: {}]   ;;  %s9770_s15 = inlined_call_operand.vmem [shape: f32[2,1,32], index: 15, kind: input, shape index: {}]   ;;  %s9771_s16 = inlined_call_operand.vmem [shape: f32[2,1,32], index: 16, kind: input, shape index: {}]   ;;  %s9772_s17 = inlined_call_operand.vmem [shape: f32[2,1,32], index: 17, kind: input, shape index: {}]   ;;  %s9773_s18 = inlined_call_operand.vmem [shape: f32[32,128], index: 18, kind: input, shape index: {}]   ;;  %s9774_s19 = inlined_call_operand.vmem [shape: f32[1,128], index: 19, kind: input, shape index: {}]   ;;  %s9775_s20 = inlined_call_operand.vmem [shape: f32[2,4,128], index: 20, kind: output, shape index: {}]  }
   0x1   :  { %9781 = sst [smem:[#allocation3_spill]] %s9755_s0 }
   0x2   :  { %9782 = sst [smem:[#allocation4_spill]] %s9756_s1  ;;  %s7261_s1 = smov 0  }
   0x3   :  { %9783 = sst [smem:[#allocation5_spill]] %s9757_s2 }
   0x4   :  { %9784 = sst [smem:[#allocation6_spill]] %s9758_s3 }
   0x5   :  { %9785 = sst [smem:[#allocation7_spill]] %s9759_s4 }
   0x6 LB: > { %9786 = sst [smem:[#allocation2_spill]] %s7153_s1  ;;  %s6049_s22 = sadd.s32 4294967295, %s7153_s1   ;;  %s7153_s1 = sphi %s7261_s1, %s30_s1  }
   0x7   : > { %p6053_p0 = scmp.ge.s32.totalorder %s7153_s1, 1  ;;  %p562_p1 = scmp.lt.s32.totalorder %s7153_s1, 3 }
   0x9   : > { %p563_p2 = pnand %p6053_p0, %p562_p1 }
   0xa   : > { %s9787_s2 = sld [smem:[#allocation7_spill]] (!%p563_p2)  ;;  %p619_p3 = scmp.lt.s32.totalorder (!%p563_p2), %s6049_s22, 1 }
   0xb   : > { %566 = sbr.rel (%p563_p2) target bundleno = 6028 (0x178c), region = 100  ;;  %s9788_s21 = sld [smem:[#allocation4_spill]] (!%p563_p2) }
   0xc   : > { %s9789_s25 = sld [smem:[#allocation3_spill]] (!%p563_p2) }
   0xd   : > { %s9791_s1 = sld [smem:[#allocation6_spill]] (!%p563_p2) }
  0x10   : > { %v738_v0 = vld [vmem:[%s9787_s2 + $0x18] sm:$0xff]  ;;  %v737_v1 = vld [vmem:[%s9787_s2 + $0x10] sm:$0xff]  ;;  %v736_v2 = vld [vmem:[%s9787_s2 + $0x8] sm:$0xff]  ;;  %s9795_s22 = smov (!%p619_p3, %s6049_s22), 1  ;;  %vm663_vm0 = vcmask 261120   ;;  %vm848_vm1 = vcmask 64512  }
  0x11   : > { %755 = vmatpush.msra.mxu1 %v738_v0  ;;  %v735_v3 = vld [vmem:[%s9787_s2] sm:$0xff]  ;;  %s6752_s29 = smul.u32 72, %s9795_s22  ;;  %v638_v8 = vld [vmem:[%s9788_s21 + $0x8] sm:$0xff]  ;;  %v639_v11 = vld [vmem:[%s9788_s21 + $0x10] sm:$0xff]  ;;  %vm1057_vm2 = vcmask 1043456   ;;  %vm947_vm3 = vcmask 556032  }
  0x12   : > { %v637_v4 = vld [vmem:[%s9788_s21] sm:$0xff]  ;;  %v640_v14 = vld [vmem:[%s9788_s21 + $0x18] sm:$0xff]  ;;  %v789_v20 = vld [vmem:[%s9761_s6 + $0x10] sm:$0xff]  ;;  %vm972_vm4 = vcmask 551936   ;;  %vm2806_vm6 = vcmask 257024   ;;  %s6055_s28 = sshll.u32 %s9795_s22, 2 }
  0x13   : > { %756 = vmatpush.msra.mxu1 %v737_v1  ;;  %s7290_s3 = scalar_lea.vmem %s9789_s25, %s6752_s29  ;;  %v641_v17 = vld [vmem:[%s9788_s21 + $0x20] sm:$0xff]  ;;  %v790_v19 = vld [vmem:[%s9761_s6 + $0x18] sm:$0xff]  ;;  %s9790_s29 = sld [smem:[#allocation5_spill]]  ;;  %v642_v23 = vld [vmem:[%s9788_s21 + $0x28] sm:$0xff] }
  0x14   : > { %v628_v5 = vld [vmem:[%s7290_s3] sm:$0xff]  ;;  %v629_v7 = vld [vmem:[%s7290_s3 + $0x8] sm:$0xff]  ;;  %v630_v10 = vld [vmem:[%s7290_s3 + $0x10] sm:$0xff]  ;;  %807 = vmatpush.msra.mxu2 %v790_v19  ;;  %s9792_s0 = smov %s9791_s1  ;;  %s627_s24 = scalar_lea.vmem %s9775_s20, %s6055_s28 }
  0x15   : > { %757 = vmatpush.msra.mxu1 %v736_v2  ;;  %v7293_v6 = vadd.f32 %v637_v4, %v628_v5  ;;  %v7301_v9 = vadd.f32 %v638_v8, %v629_v7  ;;  %v7309_v12 = vadd.f32 %v639_v11, %v630_v10  ;;  %v631_v13 = vld [vmem:[%s7290_s3 + $0x18] sm:$0xff]  ;;  %v632_v16 = vld [vmem:[%s7290_s3 + $0x20] sm:$0xff]  ;;  %v633_v22 = vld [vmem:[%s7290_s3 + $0x28] sm:$0xff] }
  0x16   : > { %v7317_v15 = vadd.f32 %v640_v14, %v631_v13  ;;  %v7325_v18 = vadd.f32 %v641_v17, %v632_v16  ;;  %v788_v25 = vld [vmem:[%s9761_s6 + $0x8] sm:$0xff]  ;;  %808 = vmatpush.msra.mxu2 %v789_v20  ;;  %v7351_v27 = vadd.f32 %v642_v23, %v633_v22  ;;  %v787_v28 = vld [vmem:[%s9761_s6] sm:$0xff]  ;;  %v634_v30 = vld [vmem:[%s7290_s3 + $0x30] sm:$0xff] }
  0x17   : > { %758 = vmatpush.msra.mxu1 %v735_v3  ;;  %v643_v31 = vld [vmem:[%s9788_s21 + $0x30] sm:$0xff]  ;;  %v635_v33 = vld [vmem:[%s7290_s3 + $0x38] sm:$0xff]  ;;  %v636_v36 = vld [vmem:[%s7290_s3 + $0x40] sm:$0xf] }
  0x18   : > { %6065 = vmatmul.msk.f32.vlgmr.msra.gmra.mxu1 %vm663_vm0, %v7293_v6  ;;  %809 = vmatpush.msra.mxu2 %v788_v25  ;;  %v7369_v32 = vadd.f32 %v643_v31, %v634_v30  ;;  %v644_v34 = vld [vmem:[%s9788_s21 + $0x38] sm:$0xff]  ;;  %v645_v37 = vld [vmem:[%s9788_s21 + $0x40] sm:$0xf]  ;;  %v6127_v17 = vld [vmem:[%s9787_s2 + $0x30] sm:$0xff] }
  0x19   : > { %v658_v21 = vld [vmem:[%s9790_s29 + $0x18] sm:$0xff]  ;;  %v657_v24 = vld [vmem:[%s9790_s29 + $0x10] sm:$0xff]  ;;  %v656_v26 = vld [vmem:[%s9790_s29 + $0x8] sm:$0xff]  ;;  %v7381_v35 = vadd.f32 %v644_v34, %v635_v33  ;;  %v7393_v38 = vadd.f32 %v645_v37, %v636_v36 }
  0x1a   : > { %703 = vmatpush.msra.mxu0 %v658_v21  ;;  %v655_v29 = vld [vmem:[%s9790_s29] sm:$0xff]  ;;  %810 = vmatpush.msra.mxu2 %v787_v28  ;;  %v6128_v10 = vld [vmem:[%s9787_s2 + $0x38] sm:$0xff]  ;;  %v6126_v20 = vld [vmem:[%s9787_s2 + $0x28] sm:$0xff] }
  0x1b   : > { %6074 = vmatmul.msk.f32.vlgmr.msra.gmra.mxu2 %vm663_vm0, %v7293_v6  ;;  %v6762_v50 = vld [vmem:[%s9760_s5] ss:$0 sm:$0xff] }
  0x1c   : > { %704 = vmatpush.msra.mxu0 %v657_v24  ;;  %v7457_v2 = vld [vmem:[%s9791_s1] ss:$0 sm:$0xff] }
  0x1d   : > { %v6125_v22 = vld [vmem:[%s9787_s2 + $0x20] sm:$0xff] }
  0x1e   : > { %705 = vmatpush.msra.mxu0 %v656_v26  ;;  %v6764_v28 = vld [vmem:[%s9762_s7] ss:$0 sm:$0xff] }
  0x20   : > { %6066 = vmatmul.msk.f32.gmra.mxu1 %vm663_vm0, %v7301_v9  ;;  %706 = vmatpush.msra.mxu0 %v655_v29 }
  0x21   : > { %6056 = vmatmul.msk.f32.vlgmr.msra.gmra.mxu0 %vm663_vm0, %v7293_v6 }
  0x23   : > { %6075 = vmatmul.msk.f32.gmra.mxu2 %vm663_vm0, %v7301_v9 }
  0x28   : > { %6067 = vmatmul.msk.f32.gmra.mxu1 %vm663_vm0, %v7309_v12 }
  0x29   : > { %6057 = vmatmul.msk.f32.gmra.mxu0 %vm663_vm0, %v7301_v9 }
  0x2b   : > { %6076 = vmatmul.msk.f32.gmra.mxu2 %vm663_vm0, %v7309_v12 }
  0x30   : > { %6068 = vmatmul.msk.f32.gmra.mxu1 %vm663_vm0, %v7317_v15 }
  0x31   : > { %6058 = vmatmul.msk.f32.gmra.mxu0 %vm663_vm0, %v7309_v12 }
  0x33   : > { %6077 = vmatmul.msk.f32.gmra.mxu2 %vm663_vm0, %v7317_v15 }
  0x38   : > { %6069 = vmatmul.msk.f32.gmra.mxu1 %vm663_vm0, %v7325_v18 }
  0x39   : > { %6059 = vmatmul.msk.f32.gmra.mxu0 %vm663_vm0, %v7317_v15 }
  0x3b   : > { %6078 = vmatmul.msk.f32.gmra.mxu2 %vm663_vm0, %v7325_v18 }
  0x40   : > { %6070 = vmatmul.msk.f32.gmra.mxu1 %vm663_vm0, %v7351_v27 }
  0x41   : > { %6060 = vmatmul.msk.f32.gmra.mxu0 %vm663_vm0, %v7325_v18 }
  0x43   : > { %6079 = vmatmul.msk.f32.gmra.mxu2 %vm663_vm0, %v7351_v27 }
  0x48   : > { %6071 = vmatmul.msk.f32.gmra.mxu1 %vm663_vm0, %v7369_v32 }
  0x49   : > { %6061 = vmatmul.msk.f32.gmra.mxu0 %vm663_vm0, %v7351_v27 }
  0x4b   : > { %6080 = vmatmul.msk.f32.gmra.mxu2 %vm663_vm0, %v7369_v32 }
  0x50   : > { %6072 = vmatmul.msk.f32.gmra.mxu1 %vm663_vm0, %v7381_v35 }
  0x51   : > { %6062 = vmatmul.msk.f32.gmra.mxu0 %vm663_vm0, %v7369_v32 }
  0x53   : > { %6081 = vmatmul.msk.f32.gmra.mxu2 %vm663_vm0, %v7381_v35 }
  0x58   : > { %6073 = vmatmul.msk.f32.gmra.mxu1 %vm663_vm0, %v7393_v38 }
  0x59   : > { %6063 = vmatmul.msk.f32.gmra.mxu0 %vm663_vm0, %v7381_v35 }
  0x5b   : > { %6082 = vmatmul.msk.f32.gmra.mxu2 %vm663_vm0, %v7393_v38 }
  0x61   : > { %6064 = vmatmul.msk.f32.gmra.mxu0 %vm663_vm0, %v7393_v38 }
  0x95   : > { %v760_v39 = vpop.f32.mrf.mxu1 }
  0x96   : > { %v761_v8 = vadd.f32 %v6762_v50, %v760_v39 }
  0x9d   : > { %v763_v40 = vpop.f32.mrf.mxu1 }
  0x9e   : > { %v7421_v46 = vpop.f32.mrf.mxu2  ;;  %v708_v49 = vpop.f32.mrf.mxu0  ;;  %v764_v3 = vadd.f32 %v6762_v50, %v763_v40 }
  0x9f   : > { %v709_v7 = vadd.f32 %v7457_v2, %v708_v49 }
  0xa1   : > { %v839_v16 = vmul.f32 0.35355338, %v709_v7 }
  0xa5   : > { %v766_v41 = vpop.f32.mrf.mxu1 }
  0xa6   : > { %v7423_v48 = vpop.f32.mrf.mxu2  ;;  %v711_v55 = vpop.f32.mrf.mxu0  ;;  %v767_v63 = vadd.f32 %v6762_v50, %v766_v41 }
  0xa7   : > { %v712_v4 = vadd.f32 %v7457_v2, %v711_v55 }
  0xa9   : > { %v840_v13 = vmul.f32 0.35355338, %v712_v4  ;;  %v6114_v4 = vld [vmem:[%s9790_s29 + $0x38] sm:$0xff] }
  0xad   : > { %v769_v42 = vpop.f32.mrf.mxu1 }
  0xae   : > { %v7428_v53 = vpop.f32.mrf.mxu2  ;;  %v714_v59 = vpop.f32.mrf.mxu0  ;;  %v770_v62 = vadd.f32 %v6762_v50, %v769_v42 }
  0xaf   : > { %v715_v5 = vadd.f32 %v7457_v2, %v714_v59 }
  0xb1   : > { %v841_v14 = vmul.f32 0.35355338, %v715_v5  ;;  %v6113_v5 = vld [vmem:[%s9790_s29 + $0x30] sm:$0xff] }
  0xb5   : > { %v772_v43 = vpop.f32.mrf.mxu1 }
  0xb6   : > { %v7436_v57 = vpop.f32.mrf.mxu2  ;;  %v773_v60 = vadd.f32 %v6762_v50, %v772_v43  ;;  %v717_v1 = vpop.f32.mrf.mxu0 }
  0xb7   : > { %v718_v21 = vadd.f32 %v7457_v2, %v717_v1  ;;  %v822_v42 = vadd.f32 %v6764_v28, %v7436_v57 }
  0xb9   : > { %v842_v24 = vmul.f32 0.35355338, %v718_v21 }
  0xbd   : > { %v775_v44 = vpop.f32.mrf.mxu1 }
  0xbe   : > { %v776_v58 = vadd.f32 %v6762_v50, %v775_v44  ;;  %v7444_v61 = vpop.f32.mrf.mxu2  ;;  %v720_v19 = vpop.f32.mrf.mxu0  ;;  %v819_v44 = vadd.f32 %v6764_v28, %v7428_v53 }
  0xbf   : > { %v721_v26 = vadd.f32 %v7457_v2, %v720_v19  ;;  %v825_v41 = vadd.f32 %v6764_v28, %v7444_v61 }
  0xc1   : > { %v843_v30 = vmul.f32 0.35355338, %v721_v26 }
  0xc5   : > { %v778_v45 = vpop.f32.mrf.mxu1 }
  0xc6   : > { %v779_v56 = vadd.f32 %v6762_v50, %v778_v45  ;;  %v827_v0 = vpop.f32.mrf.mxu2  ;;  %v723_v25 = vpop.f32.mrf.mxu0  ;;  %v816_v45 = vadd.f32 %v6764_v28, %v7423_v48 }
  0xc7   : > { %v724_v33 = vadd.f32 %v7457_v2, %v723_v25  ;;  %v828_v39 = vadd.f32 %v6764_v28, %v827_v0  ;;  %v6765_v25 = vld [vmem:[%s9760_s5 + $0x1] ss:$0 sm:$0xff] }
  0xc9   : > { %v844_v40 = vmul.f32 0.35355338, %v724_v33 }
  0xcd   : > { %v781_v47 = vpop.f32.mrf.mxu1 }
  0xce   : > { %v782_v54 = vadd.f32 %v6762_v50, %v781_v47  ;;  %v830_v11 = vpop.f32.mrf.mxu2  ;;  %v726_v37 = vpop.f32.mrf.mxu0 }
  0xcf   : > { %v831_v36 = vadd.f32 %v6764_v28, %v830_v11  ;;  %v727_v43 = vadd.f32 %v7457_v2, %v726_v37 }
  0xd1   : > { %v845_v49 = vmul.f32 0.35355338, %v727_v43  ;;  %v6139_v43 = vld [vmem:[%s9761_s6 + $0x20] sm:$0xff] }
  0xd5   : > { %v784_v51 = vpop.f32.mrf.mxu1 }
  0xd6   : > { %v785_v52 = vadd.f32 %v6762_v50, %v784_v51  ;;  %v833_v23 = vpop.f32.mrf.mxu2  ;;  %v729_v47 = vpop.f32.mrf.mxu0  ;;  %v813_v50 = vadd.f32 %v6764_v28, %v7421_v46 }
  0xd7   : > { %v834_v34 = vadd.f32 %v6764_v28, %v833_v23  ;;  %v730_v51 = vadd.f32 %v7457_v2, %v729_v47 }
  0xd8   : > { %6083 = vmatpush.xpose.msk.msrb.mxu1 %vm848_vm1, %v785_v52  ;;  %6734 = vmatpush.xpose.msk.msrb.mxu2 %vm848_vm1, %v785_v52 }
  0xd9   : > { %6735 = vmatpush.xpose.msk.msra.mxu3 %vm848_vm1, %v785_v52  ;;  %v846_v52 = vmul.f32 0.35355338, %v730_v51 }
  0xdc   : > { %6084 = vmatpush.xpose.msk.msrb.mxu1 %vm848_vm1, %v782_v54  ;;  %6736 = vmatpush.xpose.msk.msrb.mxu2 %vm848_vm1, %v782_v54 }
  0xdd   : > { %6737 = vmatpush.xpose.msk.msra.mxu3 %vm848_vm1, %v782_v54 }
  0xde   : > { %v836_v29 = vpop.f32.mrf.mxu2  ;;  %v732_v54 = vpop.f32.mrf.mxu0 }
  0xdf   : > { %v837_v31 = vadd.f32 %v6764_v28, %v836_v29  ;;  %v733_v48 = vadd.f32 %v7457_v2, %v732_v54 }
  0xe0   : > { %6085 = vmatpush.xpose.msk.msrb.mxu1 %vm848_vm1, %v779_v56  ;;  %6738 = vmatpush.xpose.msk.msrb.mxu2 %vm848_vm1, %v779_v56 }
  0xe1   : > { %6739 = vmatpush.xpose.msk.msra.mxu3 %vm848_vm1, %v779_v56  ;;  %6101 = vmatpush.msk.msrb.mxu0 %vm1057_vm2, %v837_v31  ;;  %v847_v53 = vmul.f32 0.35355338, %v733_v48 }
  0xe3   : > { %1069 = vmatpush.msrb.mxu0 %v834_v34 }
  0xe4   : > { %6086 = vmatpush.xpose.msk.msrb.mxu1 %vm848_vm1, %v776_v58  ;;  %6740 = vmatpush.xpose.msk.msrb.mxu2 %vm848_vm1, %v776_v58 }
  0xe5   : > { %6741 = vmatpush.xpose.msk.msra.mxu3 %vm848_vm1, %v776_v58  ;;  %1070 = vmatpush.msrb.mxu0 %v831_v36 }
  0xe7   : > { %1071 = vmatpush.msrb.mxu0 %v828_v39  ;;  %v6142_v39 = vld [vmem:[%s9761_s6 + $0x38] sm:$0xff] }
  0xe8   : > { %6087 = vmatpush.xpose.msk.msrb.mxu1 %vm848_vm1, %v773_v60  ;;  %6742 = vmatpush.xpose.msk.msrb.mxu2 %vm848_vm1, %v773_v60 }
  0xe9   : > { %6743 = vmatpush.xpose.msk.msra.mxu3 %vm848_vm1, %v773_v60  ;;  %1072 = vmatpush.msrb.mxu0 %v825_v41  ;;  %v6140_v41 = vld [vmem:[%s9761_s6 + $0x28] sm:$0xff] }
  0xeb   : > { %1073 = vmatpush.msrb.mxu0 %v822_v42 }
  0xec   : > { %6088 = vmatpush.xpose.msk.msrb.mxu1 %vm848_vm1, %v770_v62  ;;  %6744 = vmatpush.xpose.msk.msrb.mxu2 %vm848_vm1, %v770_v62 }
  0xed   : > { %6745 = vmatpush.xpose.msk.msra.mxu3 %vm848_vm1, %v770_v62  ;;  %1074 = vmatpush.msrb.mxu0 %v819_v44 }
  0xef   : > { %1075 = vmatpush.msrb.mxu0 %v816_v45 }
  0xf0   : > { %6089 = vmatpush.xpose.msk.msrb.mxu1 %vm848_vm1, %v767_v63  ;;  %6746 = vmatpush.xpose.msk.msrb.mxu2 %vm848_vm1, %v767_v63 }
  0xf1   : > { %6747 = vmatpush.xpose.msk.msra.mxu3 %vm848_vm1, %v767_v63  ;;  %1076 = vmatpush.msrb.mxu0 %v813_v50 }
  0xf4   : > { %6090 = vmatpush.xpose.msk.msrb.mxu1 %vm848_vm1, %v764_v3  ;;  %6748 = vmatpush.xpose.msk.msrb.mxu2 %vm848_vm1, %v764_v3 }
  0xf5   : > { %6749 = vmatpush.xpose.msk.msra.mxu3 %vm848_vm1, %v764_v3 }
  0xf8   : > { %6091 = vmatpush.xpose.msk.msrb.mxu1 %vm848_vm1, %v761_v8  ;;  %6750 = vmatpush.xpose.msk.msrb.mxu2 %vm848_vm1, %v761_v8 }
  0xf9   : > { %6751 = vmatpush.xpose.msk.msra.mxu3 %vm848_vm1, %v761_v8  ;;  %v6112_v8 = vld [vmem:[%s9790_s29 + $0x28] sm:$0xff] }
  0xfb   : > { %6092 = vmatmul.msk.f32.vlgmr.msrb.gmra.mxu1 %vm848_vm1, %v839_v16  ;;  %6093 = vmatmul.msk.f32.vlgmr.msrb.gmra.mxu2 %vm848_vm1, %v840_v13 }
  0xfc   : > { %1200 = vmatpush.msra.mxu2 %v6128_v10  ;;  %6094 = vmatmul.msk.f32.vlgmr.msra.gmra.mxu3 %vm848_vm1, %v841_v14  ;;  %v6111_v10 = vld [vmem:[%s9790_s29 + $0x20] sm:$0xff] }
  0xfd   : > { %1146 = vmatpush.msra.mxu1 %v6114_v4  ;;  %1254 = vmatpush.msrb.mxu3 %v6142_v39 }
  0xfe   : > { %1201 = vmatpush.msra.mxu2 %v6127_v17 }
  0xff   : > { %1147 = vmatpush.msra.mxu1 %v6113_v5 }
 0x100   : > { %1202 = vmatpush.msra.mxu2 %v6126_v20 }
 0x101   : > { %1148 = vmatpush.msra.mxu1 %v6112_v8 }
 0x102   : > { %1203 = vmatpush.msra.mxu2 %v6125_v22 }
 0x103   : > { %6130 = vmatmul.msk.f32.vlgmr.msra.gmra.mxu2 %vm663_vm0, %v7293_v6  ;;  %1149 = vmatpush.msra.mxu1 %v6111_v10 }
 0x104   : > { %6095 = vmatmul.msk.f32.gmra.mxu3 %vm848_vm1, %v842_v24  ;;  %6116 = vmatmul.msk.f32.vlgmr.msra.gmra.mxu1 %vm663_vm0, %v7293_v6 }
 0x10b   : > { %6131 = vmatmul.msk.f32.gmra.mxu2 %vm663_vm0, %v7301_v9 }
 0x10c   : > { %6096 = vmatmul.msk.f32.gmra.mxu3 %vm848_vm1, %v843_v30  ;;  %6117 = vmatmul.msk.f32.gmra.mxu1 %vm663_vm0, %v7301_v9 }
 0x113   : > { %6132 = vmatmul.msk.f32.gmra.mxu2 %vm663_vm0, %v7309_v12 }
 0x114   : > { %6097 = vmatmul.msk.f32.gmra.mxu3 %vm848_vm1, %v844_v40  ;;  %6118 = vmatmul.msk.f32.gmra.mxu1 %vm663_vm0, %v7309_v12  ;;  %v6141_v40 = vld [vmem:[%s9761_s6 + $0x30] sm:$0xff] }
 0x115   : > { %1255 = vmatpush.msrb.mxu3 %v6141_v40 }
 0x117   : > { %1256 = vmatpush.msrb.mxu3 %v6140_v41 }
 0x119   : > { %1257 = vmatpush.msrb.mxu3 %v6139_v43 }
 0x11b   : > { %6133 = vmatmul.msk.f32.gmra.mxu2 %vm663_vm0, %v7317_v15 }
 0x11c   : > { %6098 = vmatmul.msk.f32.gmra.mxu3 %vm848_vm1, %v845_v49  ;;  %6119 = vmatmul.msk.f32.gmra.mxu1 %vm663_vm0, %v7317_v15 }
 0x123   : > { %6134 = vmatmul.msk.f32.gmra.mxu2 %vm663_vm0, %v7325_v18 }
 0x124   : > { %6099 = vmatmul.msk.f32.gmra.mxu3 %vm848_vm1, %v846_v52  ;;  %6120 = vmatmul.msk.f32.gmra.mxu1 %vm663_vm0, %v7325_v18 }
 0x12b   : > { %6135 = vmatmul.msk.f32.gmra.mxu2 %vm663_vm0, %v7351_v27 }
 0x12c   : > { %6100 = vmatmul.msk.f32.gmra.mxu3 %vm848_vm1, %v847_v53  ;;  %6121 = vmatmul.msk.f32.gmra.mxu1 %vm663_vm0, %v7351_v27 }
 0x133   : > { %6136 = vmatmul.msk.f32.gmra.mxu2 %vm663_vm0, %v7369_v32 }
 0x134   : > { %6122 = vmatmul.msk.f32.gmra.mxu1 %vm663_vm0, %v7369_v32  ;;  %6144 = vmatmul.msk.f32.vlgmr.msrb.gmra.mxu3 %vm663_vm0, %v7293_v6 }
 0x13b   : > { %6137 = vmatmul.msk.f32.gmra.mxu2 %vm663_vm0, %v7381_v35 }
 0x13c   : > { %6123 = vmatmul.msk.f32.gmra.mxu1 %vm663_vm0, %v7381_v35  ;;  %6145 = vmatmul.msk.f32.gmra.mxu3 %vm663_vm0, %v7301_v9 }
 0x143   : > { %6138 = vmatmul.msk.f32.gmra.mxu2 %vm663_vm0, %v7393_v38 }
 0x144   : > { %6124 = vmatmul.msk.f32.gmra.mxu1 %vm663_vm0, %v7393_v38  ;;  %6146 = vmatmul.msk.f32.gmra.mxu3 %vm663_vm0, %v7309_v12 }
 0x14c   : > { %6147 = vmatmul.msk.f32.gmra.mxu3 %vm663_vm0, %v7317_v15 }
 0x154   : > { %6148 = vmatmul.msk.f32.gmra.mxu3 %vm663_vm0, %v7325_v18 }
 0x15c   : > { %6149 = vmatmul.msk.f32.gmra.mxu3 %vm663_vm0, %v7351_v27 }
 0x164   : > { %6150 = vmatmul.msk.f32.gmra.mxu3 %vm663_vm0, %v7369_v32 }
 0x16c   : > { %6151 = vmatmul.msk.f32.gmra.mxu3 %vm663_vm0, %v7381_v35 }
 0x174   : > { %6152 = vmatmul.msk.f32.gmra.mxu3 %vm663_vm0, %v7393_v38 }
 0x178   : > { %v7523_v46 = vpop.f32.mrf.mxu1 }
 0x179   : > { %v948_v55 = vsel %vm947_vm3, %v7523_v46, -inf }
 0x17a   : > { %949 = vmax.xlane.f32.xlu0 %v948_v55 }
 0x17e   : > { %v7527_v56 = vpop.f32.mrf.mxu2 }
 0x17f   : > { %v7529_v57 = vpop.f32.mrf.mxu3  ;;  %v951_v58 = vsel %vm947_vm3, %v7527_v56, -inf }
 0x180   : > { %v954_v59 = vsel %vm947_vm3, %v7529_v57, -inf }
 0x181   : > { %955 = vmax.xlane.f32.xlu1 %v954_v59 }
 0x182   : > { %952 = vmax.xlane.f32.xlu0 %v951_v58 }
 0x186   : > { %v7535_v60 = vpop.f32.mrf.mxu2 }
 0x187   : > { %v7537_v61 = vpop.f32.mrf.mxu3  ;;  %v1206_v42 = vadd.f32 %v6765_v25, %v7535_v60 }
 0x188   : > { %v957_v62 = vsel %vm947_vm3, %v7537_v61, -inf }
 0x189   : > { %958 = vmax.xlane.f32.xlu1 %v957_v62 }
 0x18e   : > { %v1208_v63 = vpop.f32.mrf.mxu2 }
 0x18f   : > { %v7541_v0 = vpop.f32.mrf.mxu3  ;;  %v1209_v37 = vadd.f32 %v6765_v25, %v1208_v63 }
 0x190   : > { %v960_v1 = vsel %vm947_vm3, %v7541_v0, -inf }
 0x191   : > { %961 = vmax.xlane.f32.xlu2 %v960_v1 }
 0x196   : > { %v1211_v2 = vpop.f32.mrf.mxu2 }
 0x197   : > { %v7545_v3 = vpop.f32.mrf.mxu3  ;;  %v1212_v36 = vadd.f32 %v6765_v25, %v1211_v2 }
 0x198   : > { %v963_v7 = vsel %vm947_vm3, %v7545_v3, -inf }
 0x199   : > { %964 = vmax.xlane.f32.xlu2 %v963_v7 }
 0x19e   : > { %v1214_v11 = vpop.f32.mrf.mxu2 }
 0x19f   : > { %v7561_v13 = vpop.f32.mrf.mxu3  ;;  %v1215_v34 = vadd.f32 %v6765_v25, %v1214_v11  ;;  %v1151_v11 = vpop.f32.mrf.mxu1 }
 0x1a0   : > { %v966_v14 = vsel %vm947_vm3, %v7561_v13, -inf }
 0x1a1   : > { %967 = vmax.xlane.f32.xlu0 %v966_v14 }
 0x1a6   : > { %v1217_v16 = vpop.f32.mrf.mxu2 }
 0x1a7   : > { %v7567_v17 = vpop.f32.mrf.mxu3  ;;  %v1218_v33 = vadd.f32 %v6765_v25, %v1217_v16 }
 0x1a8   : > { %v969_v19 = vsel %vm947_vm3, %v7567_v17, -inf }
 0x1a9   : > { %970 = vmax.xlane.f32.xlu1 %v969_v19 }
 0x1ae   : > { %v1220_v20 = vpop.f32.mrf.mxu2 }
 0x1af   : > { %v7573_v21 = vpop.f32.mrf.mxu3  ;;  %v1221_v31 = vadd.f32 %v6765_v25, %v1220_v20 }
 0x1b0   : > { %v973_v22 = vsel %vm972_vm4, %v7573_v21, -inf }
 0x1b1   : > { %974 = vmax.xlane.f32.xlu2 %v973_v22  ;;  %v1154_v22 = vpop.f32.mrf.mxu1 }
 0x1b6   : > { %v1223_v23 = vpop.f32.mrf.mxu2 }
 0x1b7   : > { %v1224_v30 = vadd.f32 %v6765_v25, %v1223_v23  ;;  %v6766_v23 = vld [vmem:[%s9792_s0 + $0x1] ss:$0 sm:$0xff] }
 0x1be   : > { %v1226_v24 = vpop.f32.mrf.mxu2 }
 0x1bf   : > { %v1227_v29 = vadd.f32 %v6765_v25, %v1226_v24 }
 0x1c6   : > { %v1229_v26 = vpop.f32.mrf.mxu2 }
 0x1c7   : > { %v1230_v28 = vadd.f32 %v6765_v25, %v1229_v26  ;;  %v1157_v25 = vpop.f32.mrf.mxu1 }
 0x1c9   : > { %6153 = vmatpush.xpose.msk.msra.mxu0 %vm848_vm1, %v1230_v28  ;;  %v1155_v28 = vadd.f32 %v6766_v23, %v1154_v22 }
 0x1cd   : > { %6154 = vmatpush.xpose.msk.msra.mxu0 %vm848_vm1, %v1227_v29 }
 0x1cf   : > { %v1160_v29 = vpop.f32.mrf.mxu1 }
 0x1d1   : > { %6155 = vmatpush.xpose.msk.msra.mxu0 %vm848_vm1, %v1224_v30  ;;  %v1287_v30 = vmul.f32 0.35355338, %v1155_v28 }
 0x1d5   : > { %6156 = vmatpush.xpose.msk.msra.mxu0 %vm848_vm1, %v1221_v31  ;;  %v1158_v31 = vadd.f32 %v6766_v23, %v1157_v25 }
 0x1d9   : > { %6157 = vmatpush.xpose.msk.msra.mxu0 %vm848_vm1, %v1218_v33  ;;  %v1288_v33 = vmul.f32 0.35355338, %v1158_v31 }
 0x1dd   : > { %6158 = vmatpush.xpose.msk.msra.mxu0 %vm848_vm1, %v1215_v34  ;;  %v1163_v34 = vpop.f32.mrf.mxu1 }
 0x1de   : > { %v1164_v40 = vadd.f32 %v6766_v23, %v1163_v34 }
 0x1e0   : > { %v1290_v41 = vmul.f32 0.35355338, %v1164_v40 }
 0x1e1   : > { %6159 = vmatpush.xpose.msk.msra.mxu0 %vm848_vm1, %v1212_v36  ;;  %v1161_v36 = vadd.f32 %v6766_v23, %v1160_v29 }
 0x1e5   : > { %6160 = vmatpush.xpose.msk.msra.mxu0 %vm848_vm1, %v1209_v37  ;;  %v1289_v37 = vmul.f32 0.35355338, %v1161_v36  ;;  %v1166_v39 = vpop.f32.mrf.mxu1 }
 0x1e9   : > { %6161 = vmatpush.xpose.msk.msra.mxu0 %vm848_vm1, %v1206_v42  ;;  %v1167_v42 = vadd.f32 %v6766_v23, %v1166_v39 }
 0x1ed   : > { %v950_v44 = vpop.xlane.xlu0 %949  ;;  %v1169_v43 = vpop.f32.mrf.mxu1 }
 0x1ee   : > { %v976_v45 = vsub.f32 %v7523_v46, %v950_v44  ;;  %v1291_v44 = vmul.f32 0.35355338, %v1167_v42 }
 0x1f0   : > { %v985_v47 = vmul.f32 1.442695, %v976_v45  ;;  %v1170_v45 = vadd.f32 %v6766_v23, %v1169_v43 }
 0x1f2   : > { %6801 = vpow2.f32 %v985_v47 }
 0x1f4   : > { %v956_v49 = vpop.xlane.xlu1 %955 }
 0x1f5   : > { %v953_v50 = vpop.xlane.xlu0 %952  ;;  %v978_v48 = vsub.f32 %v7529_v57, %v956_v49  ;;  %v1172_v47 = vpop.f32.mrf.mxu1  ;;  %v1292_v49 = vmul.f32 0.35355338, %v1170_v45 }
 0x1f6   : > { %v977_v51 = vsub.f32 %v7527_v56, %v953_v50  ;;  %v1259_v50 = vpop.f32.mrf.mxu3 }
 0x1f7   : > { %v989_v53 = vmul.f32 1.442695, %v978_v48 }
 0x1f8   : > { %v7622_v52 = vpop.eup %6801  ;;  %v987_v54 = vmul.f32 1.442695, %v977_v51  ;;  %v1173_v51 = vadd.f32 %v6766_v23, %v1172_v47 }
 0x1f9   : > { %6102 = vmatmul.msk.f32.vlgmr.msrb.gmra.mxu0 %vm947_vm3, %v7622_v52 }
 0x1fa   : > { %6803 = vpow2.f32 %v987_v54  ;;  %v1293_v54 = vmul.f32 0.35355338, %v1173_v51 }
 0x1fb   : > { %6805 = vpow2.f32 %v989_v53 }
 0x1fc   : > { %v959_v46 = vpop.xlane.xlu1 %958 }
 0x1fd   : > { %v979_v56 = vsub.f32 %v7537_v61, %v959_v46  ;;  %v1175_v48 = vpop.f32.mrf.mxu1 }
 0x1fe   : > { %v1262_v46 = vpop.f32.mrf.mxu3 }
 0x1ff   : > { %v991_v59 = vmul.f32 1.442695, %v979_v56  ;;  %v1176_v56 = vadd.f32 %v6766_v23, %v1175_v48 }
 0x200   : > { %v7629_v55 = vpop.eup %6803 }
 0x201   : > { %6103 = vmatmul.msk.f32.gmra.mxu0 %vm947_vm3, %v7629_v55  ;;  %v7636_v57 = vpop.eup %6805  ;;  %6807 = vpow2.f32 %v991_v59 }
 0x204   : > { %v962_v58 = vpop.xlane.xlu2 %961 }
 0x205   : > { %v980_v60 = vsub.f32 %v7541_v0, %v962_v58  ;;  %v1294_v58 = vmul.f32 0.35355338, %v1176_v56 }
 0x207   : > { %v993_v62 = vmul.f32 1.442695, %v980_v60  ;;  %v7643_v1 = vpop.eup %6807  ;;  %v1265_v60 = vpop.f32.mrf.mxu3 }
 0x209   : > { %6104 = vmatmul.msk.f32.gmra.mxu0 %vm947_vm3, %v7636_v57  ;;  %6809 = vpow2.f32 %v993_v62 }
 0x20c   : > { %v965_v63 = vpop.xlane.xlu2 %964 }
 0x20d   : > { %v981_v61 = vsub.f32 %v7545_v3, %v965_v63 }
 0x20f   : > { %v995_v2 = vmul.f32 1.442695, %v981_v61  ;;  %v7650_v5 = vpop.eup %6809  ;;  %v1268_v63 = vpop.f32.mrf.mxu3 }
 0x211   : > { %6105 = vmatmul.msk.f32.gmra.mxu0 %vm947_vm3, %v7643_v1  ;;  %6811 = vpow2.f32 %v995_v2 }
 0x214   : > { %v968_v4 = vpop.xlane.xlu0 %967 }
 0x215   : > { %v982_v0 = vsub.f32 %v7561_v13, %v968_v4 }
 0x217   : > { %v997_v7 = vmul.f32 1.442695, %v982_v0  ;;  %v7657_v10 = vpop.eup %6811  ;;  %v1271_v2 = vpop.f32.mrf.mxu3 }
 0x219   : > { %6106 = vmatmul.msk.f32.gmra.mxu0 %vm947_vm3, %v7650_v5  ;;  %6813 = vpow2.f32 %v997_v7 }
 0x21c   : > { %v971_v8 = vpop.xlane.xlu1 %970 }
 0x21d   : > { %v983_v3 = vsub.f32 %v7567_v17, %v971_v8 }
 0x21f   : > { %v999_v14 = vmul.f32 1.442695, %v983_v3  ;;  %v7664_v13 = vpop.eup %6813  ;;  %v1274_v0 = vpop.f32.mrf.mxu3 }
 0x221   : > { %6107 = vmatmul.msk.f32.gmra.mxu0 %vm947_vm3, %v7657_v10  ;;  %6815 = vpow2.f32 %v999_v14  ;;  %v6767_v14 = vld [vmem:[%s9762_s7 + $0x1] ss:$0 sm:$0xff] }
 0x222   : > { %v1272_v25 = vadd.f32 %v6767_v14, %v1271_v2  ;;  %v1269_v28 = vadd.f32 %v6767_v14, %v1268_v63  ;;  %v1266_v29 = vadd.f32 %v6767_v14, %v1265_v60  ;;  %v1260_v31 = vadd.f32 %v6767_v14, %v1259_v50 }
 0x224   : > { %v975_v16 = vpop.xlane.xlu2 %974 }
 0x225   : > { %v984_v19 = vsub.f32 %v7573_v21, %v975_v16  ;;  %v1152_v21 = vadd.f32 %v6766_v23, %v1151_v11 }
 0x227   : > { %v1001_v20 = vmul.f32 1.442695, %v984_v19  ;;  %v7671_v17 = vpop.eup %6815  ;;  %v1286_v26 = vmul.f32 0.35355338, %v1152_v21  ;;  %v1277_v8 = vpop.f32.mrf.mxu3  ;;  %v1275_v21 = vadd.f32 %v6767_v14, %v1274_v0 }
 0x228   : > { %v1278_v23 = vadd.f32 %v6767_v14, %v1277_v8 }
 0x229   : > { %6108 = vmatmul.msk.f32.gmra.mxu0 %vm947_vm3, %v7664_v13  ;;  %6817 = vpow2.f32 %v1001_v20 }
 0x22f   : > { %v7678_v24 = vpop.eup %6817  ;;  %v1280_v11 = vpop.f32.mrf.mxu3 }
 0x230   : > { %v1281_v20 = vadd.f32 %v6767_v14, %v1280_v11 }
 0x231   : > { %6109 = vmatmul.msk.f32.gmra.mxu0 %vm947_vm3, %v7671_v17 }
 0x237   : > { %v1283_v19 = vpop.f32.mrf.mxu3 }
 0x238   : > { %v1284_v22 = vadd.f32 %v6767_v14, %v1283_v19 }
 0x239   : > { %6110 = vmatmul.msk.f32.gmra.mxu0 %vm947_vm3, %v7678_v24 }
 0x23a   : > { %6171 = vmatpush.msk.msrb.mxu1 %vm1057_vm2, %v1284_v22 }
 0x23c   : > { %1512 = vmatpush.msrb.mxu1 %v1281_v20 }
 0x23e   : > { %1513 = vmatpush.msrb.mxu1 %v1278_v23 }
 0x240   : > { %1514 = vmatpush.msrb.mxu1 %v1275_v21  ;;  %v6217_v21 = vld [vmem:[%s9787_s2 + $0x58] sm:$0xff] }
 0x241   : > { %6162 = vmatmul.msk.f32.vlgmr.msra.gmra.mxu0 %vm848_vm1, %v1286_v26 }
 0x242   : > { %1515 = vmatpush.msrb.mxu1 %v1272_v25 }
 0x244   : > { %1516 = vmatpush.msrb.mxu1 %v1269_v28 }
 0x246   : > { %1517 = vmatpush.msrb.mxu1 %v1266_v29 }
 0x249   : > { %6163 = vmatmul.msk.f32.gmra.mxu0 %vm848_vm1, %v1287_v30  ;;  %v1263_v30 = vadd.f32 %v6767_v14, %v1262_v46 }
 0x24b   : > { %1518 = vmatpush.msrb.mxu1 %v1263_v30 }
 0x24d   : > { %1519 = vmatpush.msrb.mxu1 %v1260_v31  ;;  %v1003_v31 = vsel %vm947_vm3, %v7622_v52, 0.0 }
 0x24f   : > { %1786 = vmatpush.msra.mxu1 %v6217_v21 }
 0x251   : > { %6164 = vmatmul.msk.f32.gmra.mxu0 %vm848_vm1, %v1288_v33 }
 0x259   : > { %6165 = vmatmul.msk.f32.gmra.mxu0 %vm848_vm1, %v1289_v37 }
 0x261   : > { %6166 = vmatmul.msk.f32.gmra.mxu0 %vm848_vm1, %v1290_v41 }
 0x269   : > { %6167 = vmatmul.msk.f32.gmra.mxu0 %vm848_vm1, %v1291_v44 }
 0x271   : > { %6168 = vmatmul.msk.f32.gmra.mxu0 %vm848_vm1, %v1292_v49 }
 0x276   : > { %v7689_v53 = vpop.f32.mrf.mxu0 }
 0x279   : > { %6169 = vmatmul.msk.f32.gmra.mxu0 %vm848_vm1, %v1293_v54 }
 0x27e   : > { %v7692_v59 = vpop.f32.mrf.mxu0 }
 0x281   : > { %6170 = vmatmul.msk.f32.gmra.mxu0 %vm848_vm1, %v1294_v58 }
 0x286   : > { %v7695_v62 = vpop.f32.mrf.mxu0 }
 0x28e   : > { %v7697_v61 = vpop.f32.mrf.mxu0 }
 0x296   : > { %v7699_v4 = vpop.f32.mrf.mxu0 }
 0x29e   : > { %v7701_v7 = vpop.f32.mrf.mxu0 }
 0x2a6   : > { %v7703_v3 = vpop.f32.mrf.mxu0 }
 0x2ae   : > { %v7708_v16 = vpop.f32.mrf.mxu0 }
 0x2b6   : > { %v7711_v26 = vpop.f32.mrf.mxu0 }
 0x2be   : > { %v1366_v33 = vpop.f32.mrf.mxu0 }
 0x2bf   : > { %v1393_v34 = vsel %vm947_vm3, %v1366_v33, -inf }
 0x2c0   : > { %1394 = vmax.xlane.f32.xlu0 %v1393_v34 }
 0x2c6   : > { %v1369_v36 = vpop.f32.mrf.mxu0 }
 0x2c7   : > { %v1396_v37 = vsel %vm947_vm3, %v1369_v36, -inf }
 0x2c8   : > { %1397 = vmax.xlane.f32.xlu1 %v1396_v37 }
 0x2ce   : > { %v1372_v39 = vpop.f32.mrf.mxu0 }
 0x2cf   : > { %v1399_v40 = vsel %vm947_vm3, %v1372_v39, -inf }
 0x2d0   : > { %1400 = vmax.xlane.f32.xlu2 %v1399_v40 }
 0x2d6   : > { %v1375_v41 = vpop.f32.mrf.mxu0 }
 0x2d7   : > { %v1402_v42 = vsel %vm947_vm3, %v1375_v41, -inf }
 0x2d8   : > { %1403 = vmax.xlane.f32.xlu0 %v1402_v42 }
 0x2de   : > { %v1378_v43 = vpop.f32.mrf.mxu0 }
 0x2df   : > { %v1405_v44 = vsel %vm947_vm3, %v1378_v43, -inf }
 0x2e0   : > { %1406 = vmax.xlane.f32.xlu1 %v1405_v44 }
 0x2e6   : > { %v1381_v45 = vpop.f32.mrf.mxu0 }
 0x2e7   : > { %v1408_v47 = vsel %vm947_vm3, %v1381_v45, -inf }
 0x2e8   : > { %1409 = vmax.xlane.f32.xlu2 %v1408_v47 }
 0x2ee   : > { %v7719_v49 = vpop.f32.mrf.mxu0 }
 0x2ef   : > { %v1411_v50 = vsel %vm947_vm3, %v7719_v49, -inf }
 0x2f0   : > { %1412 = vmax.xlane.f32.xlu0 %v1411_v50 }
 0x2f6   : > { %v7723_v51 = vpop.f32.mrf.mxu0 }
 0x2f7   : > { %v1414_v54 = vsel %vm947_vm3, %v7723_v51, -inf }
 0x2f8   : > { %1415 = vmax.xlane.f32.xlu1 %v1414_v54  ;;  %v6215_v54 = vld [vmem:[%s9787_s2 + $0x48] sm:$0xff] }
 0x2fe   : > { %v7727_v48 = vpop.f32.mrf.mxu0 }
 0x2ff   : > { %v1417_v46 = vsel %vm972_vm4, %v7727_v48, -inf }
 0x300   : > { %1418 = vmax.xlane.f32.xlu2 %v1417_v46 }
 0x333   : > { %v1395_v56 = vpop.xlane.xlu0 %1394 }
 0x334   : > { %v1420_v58 = vsub.f32 %v1366_v33, %v1395_v56 }
 0x336   : > { %v1429_v60 = vmul.f32 1.442695, %v1420_v58 }
 0x338   : > { %6819 = vpow2.f32 %v1429_v60 }
 0x33b   : > { %v1398_v63 = vpop.xlane.xlu1 %1397 }
 0x33c   : > { %v1421_v2 = vsub.f32 %v1369_v36, %v1398_v63  ;;  %v1009_v63 = vsel %vm947_vm3, %v7636_v57, 0.0 }
 0x33e   : > { %v6820_v0 = vpop.eup %6819  ;;  %v1431_v8 = vmul.f32 1.442695, %v1421_v2 }
 0x33f   : > { %6172 = vmatmul.msk.f32.vlgmr.msrb.gmra.mxu1 %vm947_vm3, %v6820_v0  ;;  %v1447_v11 = vsel %vm947_vm3, %v6820_v0, 0.0 }
 0x340   : > { %6821 = vpow2.f32 %v1431_v8  ;;  %1448 = vadd.xlane.f32.xlu0 %v1447_v11 }
 0x343   : > { %v1401_v14 = vpop.xlane.xlu2 %1400 }
 0x344   : > { %v1422_v19 = vsub.f32 %v1372_v39, %v1401_v14  ;;  %v1012_v14 = vsel %vm947_vm3, %v7643_v1, 0.0  ;;  %v1018_v1 = vsel %vm947_vm3, %v7657_v10, 0.0  ;;  %v6181_v10 = vld [vmem:[%s9763_s8 + $0x8] sm:$0xff] }
 0x345   : > { %1610 = vmatpush.msrb.mxu2 %v6181_v10 }
 0x346   : > { %v6822_v20 = vpop.eup %6821  ;;  %v1433_v22 = vmul.f32 1.442695, %v1422_v19 }
 0x347   : > { %6173 = vmatmul.msk.f32.gmra.mxu1 %vm947_vm3, %v6822_v20  ;;  %v1450_v23 = vsel %vm947_vm3, %v6822_v20, 0.0 }
 0x348   : > { %6823 = vpow2.f32 %v1433_v22  ;;  %1451 = vadd.xlane.f32.xlu1 %v1450_v23 }
 0x34b   : > { %v1404_v25 = vpop.xlane.xlu0 %1403 }
 0x34c   : > { %v1423_v28 = vsub.f32 %v1375_v41, %v1404_v25  ;;  %v6216_v41 = vld [vmem:[%s9787_s2 + $0x50] sm:$0xff]  ;;  %v1021_v25 = vsel %vm947_vm3, %v7664_v13, 0.0  ;;  %v6203_v13 = vld [vmem:[%s9790_s29 + $0x58] sm:$0xff] }
 0x34d   : > { %1787 = vmatpush.msra.mxu1 %v6216_v41  ;;  %1732 = vmatpush.msrb.mxu0 %v6203_v13 }
 0x34e   : > { %v6824_v29 = vpop.eup %6823  ;;  %v1435_v30 = vmul.f32 1.442695, %v1423_v28  ;;  %v1024_v28 = vsel %vm947_vm3, %v7671_v17, 0.0  ;;  %v1123_v17 = vld [vmem:[%s9763_s8] sm:$0xff] }
 0x34f   : > { %6174 = vmatmul.msk.f32.gmra.mxu1 %vm947_vm3, %v6824_v29  ;;  %v1453_v33 = vsel %vm947_vm3, %v6824_v29, 0.0  ;;  %1681 = vmatpush.msra.mxu3 %v1123_v17  ;;  %v6202_v29 = vld [vmem:[%s9790_s29 + $0x50] sm:$0xff] }
 0x350   : > { %6825 = vpow2.f32 %v1435_v30  ;;  %1004 = vadd.xlane.f32.xlu1 %v1003_v31  ;;  %1454 = vadd.xlane.f32.xlu2 %v1453_v33 }
 0x351   : > { %1788 = vmatpush.msra.mxu1 %v6215_v54  ;;  %1733 = vmatpush.msrb.mxu0 %v6202_v29 }
 0x353   : > { %v1407_v34 = vpop.xlane.xlu1 %1406 }
 0x354   : > { %v1424_v36 = vsub.f32 %v1378_v43, %v1407_v34  ;;  %v1006_v43 = vsel %vm947_vm3, %v7629_v55, 0.0 }
 0x356   : > { %v6826_v37 = vpop.eup %6825  ;;  %v1437_v39 = vmul.f32 1.442695, %v1424_v36 }
 0x357   : > { %6175 = vmatmul.msk.f32.gmra.mxu1 %vm947_vm3, %v6826_v37  ;;  %v1456_v40 = vsel %vm947_vm3, %v6826_v37, 0.0 }
 0x358   : > { %6827 = vpow2.f32 %v1437_v39  ;;  %1457 = vadd.xlane.f32.xlu0 %v1456_v40 }
 0x35b   : > { %v1410_v52 = vpop.xlane.xlu2 %1409 }
 0x35c   : > { %v1425_v42 = vsub.f32 %v1381_v45, %v1410_v52  ;;  %v6214_v45 = vld [vmem:[%s9787_s2 + $0x40] sm:$0xff]  ;;  %v6201_v52 = vld [vmem:[%s9790_s29 + $0x48] sm:$0xff] }
 0x35d   : > { %1789 = vmatpush.msra.mxu1 %v6214_v45  ;;  %1734 = vmatpush.msrb.mxu0 %v6201_v52 }
 0x35e   : > { %v6828_v44 = vpop.eup %6827  ;;  %v1439_v47 = vmul.f32 1.442695, %v1425_v42  ;;  %v6200_v42 = vld [vmem:[%s9790_s29 + $0x40] sm:$0xff] }
 0x35f   : > { %6176 = vmatmul.msk.f32.gmra.mxu1 %vm947_vm3, %v6828_v44  ;;  %v1459_v50 = vsel %vm947_vm3, %v6828_v44, 0.0  ;;  %1735 = vmatpush.msrb.mxu0 %v6200_v42 }
 0x360   : > { %6829 = vpow2.f32 %v1439_v47  ;;  %1007 = vadd.xlane.f32.xlu0 %v1006_v43  ;;  %1460 = vadd.xlane.f32.xlu2 %v1459_v50 }
 0x361   : > { %6205 = vmatmul.msk.f32.vlgmr.msrb.gmra.mxu0 %vm663_vm0, %v7293_v6 }
 0x363   : > { %v1413_v46 = vpop.xlane.xlu0 %1412 }
 0x364   : > { %v1426_v56 = vsub.f32 %v7719_v49, %v1413_v46 }
 0x366   : > { %v6830_v58 = vpop.eup %6829  ;;  %v1441_v55 = vmul.f32 1.442695, %v1426_v56 }
 0x367   : > { %6177 = vmatmul.msk.f32.gmra.mxu1 %vm947_vm3, %v6830_v58  ;;  %v1462_v60 = vsel %vm947_vm3, %v6830_v58, 0.0 }
 0x368   : > { %6831 = vpow2.f32 %v1441_v55  ;;  %1463 = vadd.xlane.f32.xlu1 %v1462_v60  ;;  %1010 = vadd.xlane.f32.xlu2 %v1009_v63 }
 0x369   : > { %6206 = vmatmul.msk.f32.gmra.mxu0 %vm663_vm0, %v7301_v9 }
 0x36b   : > { %v1416_v2 = vpop.xlane.xlu1 %1415 }
 0x36c   : > { %v1427_v0 = vsub.f32 %v7723_v51, %v1416_v2  ;;  %v1015_v51 = vsel %vm947_vm3, %v7650_v5, 0.0  ;;  %v1027_v5 = vsel %vm972_vm4, %v7678_v24, 0.0 }
 0x36e   : > { %v6832_v8 = vpop.eup %6831  ;;  %v1443_v11 = vmul.f32 1.442695, %v1427_v0 }
 0x36f   : > { %6178 = vmatmul.msk.f32.gmra.mxu1 %vm947_vm3, %v6832_v8  ;;  %v1465_v49 = vsel %vm947_vm3, %v6832_v8, 0.0 }
 0x370   : > { %6833 = vpow2.f32 %v1443_v11  ;;  %1466 = vadd.xlane.f32.xlu0 %v1465_v49  ;;  %1013 = vadd.xlane.f32.xlu1 %v1012_v14 }
 0x371   : > { %6207 = vmatmul.msk.f32.gmra.mxu0 %vm663_vm0, %v7309_v12 }
 0x373   : > { %v1419_v19 = vpop.xlane.xlu2 %1418 }
 0x374   : > { %v1428_v57 = vsub.f32 %v7727_v48, %v1419_v19 }
 0x376   : > { %v6834_v20 = vpop.eup %6833  ;;  %v1445_v22 = vmul.f32 1.442695, %v1428_v57 }
 0x377   : > { %6179 = vmatmul.msk.f32.gmra.mxu1 %vm947_vm3, %v6834_v20  ;;  %v1468_v23 = vsel %vm947_vm3, %v6834_v20, 0.0 }
 0x378   : > { %6835 = vpow2.f32 %v1445_v22  ;;  %1016 = vadd.xlane.f32.xlu0 %v1015_v51  ;;  %1469 = vadd.xlane.f32.xlu2 %v1468_v23 }
 0x379   : > { %6208 = vmatmul.msk.f32.gmra.mxu0 %vm663_vm0, %v7317_v15 }
 0x37e   : > { %v6836_v21 = vpop.eup %6835 }
 0x37f   : > { %6180 = vmatmul.msk.f32.gmra.mxu1 %vm947_vm3, %v6836_v21  ;;  %v1471_v48 = vsel %vm972_vm4, %v6836_v21, 0.0 }
 0x380   : > { %1019 = vadd.xlane.f32.xlu2 %v1018_v1  ;;  %1472 = vadd.xlane.f32.xlu1 %v1471_v48 }
 0x381   : > { %1022 = vadd.xlane.f32.xlu0 %v1021_v25  ;;  %6209 = vmatmul.msk.f32.gmra.mxu0 %vm663_vm0, %v7325_v18 }
 0x387   : > { %6219 = vmatmul.msk.f32.vlgmr.msra.gmra.mxu1 %vm663_vm0, %v7293_v6 }
 0x388   : > { %1028 = vadd.xlane.f32.xlu2 %v1027_v5  ;;  %1025 = vadd.xlane.f32.xlu1 %v1024_v28 }
 0x389   : > { %6210 = vmatmul.msk.f32.gmra.mxu0 %vm663_vm0, %v7351_v27 }
 0x38f   : > { %6220 = vmatmul.msk.f32.gmra.mxu1 %vm663_vm0, %v7301_v9 }
 0x391   : > { %6211 = vmatmul.msk.f32.gmra.mxu0 %vm663_vm0, %v7369_v32 }
 0x397   : > { %6221 = vmatmul.msk.f32.gmra.mxu1 %vm663_vm0, %v7309_v12 }
 0x399   : > { %6212 = vmatmul.msk.f32.gmra.mxu0 %vm663_vm0, %v7381_v35 }
 0x39f   : > { %6222 = vmatmul.msk.f32.gmra.mxu1 %vm663_vm0, %v7317_v15 }
 0x3a1   : > { %6213 = vmatmul.msk.f32.gmra.mxu0 %vm663_vm0, %v7393_v38 }
 0x3a7   : > { %6223 = vmatmul.msk.f32.gmra.mxu1 %vm663_vm0, %v7325_v18 }
 0x3af   : > { %6224 = vmatmul.msk.f32.gmra.mxu1 %vm663_vm0, %v7351_v27 }
 0x3b3   : > { %v1449_v24 = vpop.xlane.xlu0 %1448 }
 0x3b4   : > { %6837 = vrcp.f32 %v1449_v24 }
 0x3b7   : > { %6225 = vmatmul.msk.f32.gmra.mxu1 %vm663_vm0, %v7369_v32 }
 0x3ba   : > { %v6838_v31 = vpop.eup %6837 }
 0x3bb   : > { %v1452_v30 = vpop.xlane.xlu1 %1451 }
 0x3bc   : > { %v1521_v33 = vpop.f32.mrf.mxu1  ;;  %6839 = vrcp.f32 %v1452_v30 }
 0x3bd   : > { %v1557_v34 = vmul.f32 %v6838_v31, %v1521_v33 }
 0x3bf   : > { %6182 = vmatmul.msk.f32.vlgmr.msrb.gmra.mxu2 %vm848_vm1, %v1557_v34  ;;  %6226 = vmatmul.msk.f32.gmra.mxu1 %vm663_vm0, %v7381_v35 }
 0x3c2   : > { %v6840_v39 = vpop.eup %6839 }
 0x3c3   : > { %v1005_v36 = vpop.xlane.xlu1 %1004  ;;  %v1455_v37 = vpop.xlane.xlu2 %1454 }
 0x3c4   : > { %6841 = vrcp.f32 %v1005_v36  ;;  %v1524_v40 = vpop.f32.mrf.mxu1 }
 0x3c5   : > { %v1558_v41 = vmul.f32 %v6840_v39, %v1524_v40  ;;  %6843 = vrcp.f32 %v1455_v37 }
 0x3c7   : > { %6183 = vmatmul.msk.f32.gmra.mxu2 %vm848_vm1, %v1558_v41  ;;  %6227 = vmatmul.msk.f32.gmra.mxu1 %vm663_vm0, %v7393_v38 }
 0x3ca   : > { %v6842_v44 = vpop.eup %6841 }
 0x3cb   : > { %v1114_v47 = vmul.f32 %v6842_v44, %v7689_v53  ;;  %v1458_v43 = vpop.xlane.xlu0 %1457  ;;  %v6844_v50 = vpop.eup %6843 }
 0x3cc   : > { %v1527_v54 = vpop.f32.mrf.mxu1  ;;  %6845 = vrcp.f32 %v1458_v43  ;;  %v6230_v43 = vld [vmem:[%s9761_s6 + $0x50] sm:$0xff] }
 0x3cd   : > { %v1559_v45 = vmul.f32 %v6844_v50, %v1527_v54  ;;  %6191 = vmatmul.msk.f32.vlgmr.msra.gmra.mxu3 %vm848_vm1, %v1114_v47  ;;  %v6231_v47 = vld [vmem:[%s9761_s6 + $0x58] sm:$0xff] }
 0x3ce   : > { %1840 = vmatpush.msra.mxu2 %v6231_v47 }
 0x3cf   : > { %6184 = vmatmul.msk.f32.gmra.mxu2 %vm848_vm1, %v1559_v45  ;;  %v6228_v45 = vld [vmem:[%s9761_s6 + $0x40] sm:$0xff] }
 0x3d0   : > { %1841 = vmatpush.msra.mxu2 %v6230_v43 }
 0x3d2   : > { %v6846_v58 = vpop.eup %6845 }
 0x3d3   : > { %v1008_v46 = vpop.xlane.xlu0 %1007  ;;  %v1461_v56 = vpop.xlane.xlu2 %1460 }
 0x3d4   : > { %6847 = vrcp.f32 %v1008_v46  ;;  %v1530_v55 = vpop.f32.mrf.mxu1 }
 0x3d5   : > { %v1560_v60 = vmul.f32 %v6846_v58, %v1530_v55  ;;  %6849 = vrcp.f32 %v1461_v56 }
 0x3d7   : > { %6185 = vmatmul.msk.f32.gmra.mxu2 %vm848_vm1, %v1560_v60 }
 0x3da   : > { %v6848_v53 = vpop.eup %6847 }
 0x3db   : > { %v1464_v63 = vpop.xlane.xlu1 %1463  ;;  %v1011_v2 = vpop.xlane.xlu2 %1010  ;;  %v1115_v0 = vmul.f32 %v6848_v53, %v7692_v59  ;;  %v6768_v53 = vld [vmem:[%s9760_s5 + $0x2] ss:$0 sm:$0xff] }
 0x3dc   : > { %v6850_v8 = vpop.eup %6849  ;;  %v1533_v11 = vpop.f32.mrf.mxu1  ;;  %6851 = vrcp.f32 %v1011_v2 }
 0x3dd   : > { %v1561_v49 = vmul.f32 %v6850_v8, %v1533_v11  ;;  %6192 = vmatmul.msk.f32.gmra.mxu3 %vm848_vm1, %v1115_v0  ;;  %6853 = vrcp.f32 %v1464_v63 }
 0x3df   : > { %6186 = vmatmul.msk.f32.gmra.mxu2 %vm848_vm1, %v1561_v49  ;;  %v1737_v49 = vpop.f32.mrf.mxu0 }
 0x3e2   : > { %v6852_v14 = vpop.eup %6851 }
 0x3e3   : > { %v1467_v19 = vpop.xlane.xlu0 %1466  ;;  %v1014_v57 = vpop.xlane.xlu1 %1013  ;;  %v1116_v51 = vmul.f32 %v6852_v14, %v7695_v62 }
 0x3e4   : > { %v6854_v20 = vpop.eup %6853  ;;  %v1536_v22 = vpop.f32.mrf.mxu1  ;;  %6855 = vrcp.f32 %v1014_v57 }
 0x3e5   : > { %v1562_v59 = vmul.f32 %v6854_v20, %v1536_v22  ;;  %6857 = vrcp.f32 %v1467_v19  ;;  %6193 = vmatmul.msk.f32.gmra.mxu3 %vm848_vm1, %v1116_v51 }
 0x3e7   : > { %6187 = vmatmul.msk.f32.gmra.mxu2 %vm848_vm1, %v1562_v59  ;;  %v1740_v22 = vpop.f32.mrf.mxu0  ;;  %v6769_v59 = vld [vmem:[%s9792_s0 + $0x2] ss:$0 sm:$0xff] }
 0x3ea   : > { %v6856_v23 = vpop.eup %6855 }
 0x3eb   : > { %v1017_v21 = vpop.xlane.xlu0 %1016  ;;  %v1470_v1 = vpop.xlane.xlu2 %1469  ;;  %v1117_v5 = vmul.f32 %v6856_v23, %v7697_v61 }
 0x3ec   : > { %v6858_v48 = vpop.eup %6857  ;;  %6859 = vrcp.f32 %v1017_v21  ;;  %v1539_v25 = vpop.f32.mrf.mxu1 }
 0x3ed   : > { %v1563_v28 = vmul.f32 %v6858_v48, %v1539_v25  ;;  %6861 = vrcp.f32 %v1470_v1  ;;  %6194 = vmatmul.msk.f32.gmra.mxu3 %vm848_vm1, %v1117_v5  ;;  %v1738_v1 = vadd.f32 %v6769_v59, %v1737_v49 }
 0x3ef   : > { %6188 = vmatmul.msk.f32.gmra.mxu2 %vm848_vm1, %v1563_v28  ;;  %v1743_v48 = vpop.f32.mrf.mxu0  ;;  %v1872_v5 = vmul.f32 0.35355338, %v1738_v1 }
 0x3f2   : > { %v6860_v62 = vpop.eup %6859 }
 0x3f3   : > { %v1473_v10 = vpop.xlane.xlu1 %1472  ;;  %v1020_v13 = vpop.xlane.xlu2 %1019  ;;  %v1118_v17 = vmul.f32 %v6860_v62, %v7699_v4  ;;  %v1741_v62 = vadd.f32 %v6769_v59, %v1740_v22 }
 0x3f4   : > { %v6862_v24 = vpop.eup %6861  ;;  %v1542_v29 = vpop.f32.mrf.mxu1  ;;  %6863 = vrcp.f32 %v1020_v13 }
 0x3f5   : > { %v1564_v30 = vmul.f32 %v6862_v24, %v1542_v29  ;;  %6865 = vrcp.f32 %v1473_v10  ;;  %6195 = vmatmul.msk.f32.gmra.mxu3 %vm848_vm1, %v1118_v17  ;;  %v1023_v61 = vpop.xlane.xlu0 %1022  ;;  %v1873_v13 = vmul.f32 0.35355338, %v1741_v62  ;;  %v1744_v17 = vadd.f32 %v6769_v59, %v1743_v48 }
 0x3f6   : > { %6867 = vrcp.f32 %v1023_v61 }
 0x3f7   : > { %6189 = vmatmul.msk.f32.gmra.mxu2 %vm848_vm1, %v1564_v30  ;;  %v1746_v10 = vpop.f32.mrf.mxu0  ;;  %v1874_v29 = vmul.f32 0.35355338, %v1744_v17 }
 0x3f8   : > { %v1747_v61 = vadd.f32 %v6769_v59, %v1746_v10 }
 0x3fa   : > { %v6864_v31 = vpop.eup %6863 }
 0x3fb   : > { %v6866_v33 = vpop.eup %6865  ;;  %v1119_v36 = vmul.f32 %v6864_v31, %v7701_v7  ;;  %v1026_v37 = vpop.xlane.xlu1 %1025 }
 0x3fc   : > { %v1545_v34 = vpop.f32.mrf.mxu1  ;;  %v6868_v39 = vpop.eup %6867  ;;  %6869 = vrcp.f32 %v1026_v37 }
 0x3fd   : > { %v1565_v4 = vmul.f32 %v6866_v33, %v1545_v34  ;;  %6196 = vmatmul.msk.f32.gmra.mxu3 %vm848_vm1, %v1119_v36  ;;  %v1120_v41 = vmul.f32 %v6868_v39, %v7703_v3  ;;  %v1029_v52 = vpop.xlane.xlu2 %1028  ;;  %v6229_v3 = vld [vmem:[%s9761_s6 + $0x48] sm:$0xff]  ;;  %v1875_v33 = vmul.f32 0.35355338, %v1747_v61 }
 0x3fe   : > { %6871 = vrcp.f32 %v1029_v52  ;;  %1842 = vmatpush.msra.mxu2 %v6229_v3 }
 0x3ff   : > { %6190 = vmatmul.msk.f32.gmra.mxu2 %vm848_vm1, %v1565_v4  ;;  %v1749_v30 = vpop.f32.mrf.mxu0 }
 0x400   : > { %1843 = vmatpush.msra.mxu2 %v6228_v45  ;;  %v1750_v36 = vadd.f32 %v6769_v59, %v1749_v30 }
 0x402   : > { %v6870_v42 = vpop.eup %6869  ;;  %v1876_v4 = vmul.f32 0.35355338, %v1750_v36 }
 0x403   : > { %v1121_v44 = vmul.f32 %v6870_v42, %v7708_v16 }
 0x404   : > { %v7855_v40 = vpop.f32.mrf.mxu1  ;;  %v6872_v50 = vpop.eup %6871 }
 0x405   : > { %6197 = vmatmul.msk.f32.gmra.mxu3 %vm848_vm1, %v1120_v41  ;;  %v1122_v16 = vmul.f32 %v6872_v50, %v7711_v26  ;;  %v1792_v25 = vadd.f32 %v6768_v53, %v7855_v40 }
 0x407   : > { %6233 = vmatmul.msk.f32.vlgmr.msra.gmra.mxu2 %vm663_vm0, %v7293_v6  ;;  %v1752_v34 = vpop.f32.mrf.mxu0 }
 0x408   : > { %v1753_v39 = vadd.f32 %v6769_v59, %v1752_v34 }
 0x40a   : > { %v1877_v41 = vmul.f32 0.35355338, %v1753_v39 }
 0x40c   : > { %v1794_v7 = vpop.f32.mrf.mxu1 }
 0x40d   : > { %6198 = vmatmul.msk.f32.gmra.mxu3 %vm848_vm1, %v1121_v44  ;;  %v1795_v21 = vadd.f32 %v6768_v53, %v1794_v7 }
 0x40f   : > { %6234 = vmatmul.msk.f32.gmra.mxu2 %vm663_vm0, %v7301_v9  ;;  %v1755_v40 = vpop.f32.mrf.mxu0 }
 0x410   : > { %v1756_v42 = vadd.f32 %v6769_v59, %v1755_v40 }
 0x412   : > { %v1878_v44 = vmul.f32 0.35355338, %v1756_v42 }
 0x414   : > { %v1797_v54 = vpop.f32.mrf.mxu1 }
 0x415   : > { %6199 = vmatmul.msk.f32.gmra.mxu3 %vm848_vm1, %v1122_v16  ;;  %v1798_v51 = vadd.f32 %v6768_v53, %v1797_v54 }
 0x417   : > { %6235 = vmatmul.msk.f32.gmra.mxu2 %vm663_vm0, %v7309_v12  ;;  %v1758_v7 = vpop.f32.mrf.mxu0 }
 0x418   : > { %v1759_v43 = vadd.f32 %v6769_v59, %v1758_v7 }
 0x41a   : > { %v1879_v50 = vmul.f32 0.35355338, %v1759_v43 }
 0x41c   : > { %v1800_v46 = vpop.f32.mrf.mxu1 }
 0x41d   : > { %v1801_v20 = vadd.f32 %v6768_v53, %v1800_v46 }
 0x41f   : > { %6236 = vmatmul.msk.f32.gmra.mxu2 %vm663_vm0, %v7317_v15  ;;  %v1761_v16 = vpop.f32.mrf.mxu0 }
 0x420   : > { %v1762_v45 = vadd.f32 %v6769_v59, %v1761_v16 }
 0x424   : > { %v1803_v56 = vpop.f32.mrf.mxu1 }
 0x425   : > { %v1804_v19 = vadd.f32 %v6768_v53, %v1803_v56  ;;  %v6297_v56 = vld [vmem:[%s9787_s2 + $0x78] sm:$0xff] }
 0x427   : > { %6237 = vmatmul.msk.f32.gmra.mxu2 %vm663_vm0, %v7325_v18 }
 0x42c   : > { %v1806_v58 = vpop.f32.mrf.mxu1 }
 0x42d   : > { %v1807_v14 = vadd.f32 %v6768_v53, %v1806_v58  ;;  %v1880_v58 = vmul.f32 0.35355338, %v1762_v45 }
 0x42f   : > { %6238 = vmatmul.msk.f32.gmra.mxu2 %vm663_vm0, %v7351_v27 }
 0x434   : > { %v1809_v26 = vpop.f32.mrf.mxu1 }
 0x435   : > { %v1810_v11 = vadd.f32 %v6768_v53, %v1809_v26 }
 0x437   : > { %6239 = vmatmul.msk.f32.gmra.mxu2 %vm663_vm0, %v7369_v32 }
 0x43c   : > { %v1812_v55 = vpop.f32.mrf.mxu1 }
 0x43d   : > { %v1813_v0 = vadd.f32 %v6768_v53, %v1812_v55 }
 0x43f   : > { %6240 = vmatmul.msk.f32.gmra.mxu2 %vm663_vm0, %v7381_v35 }
 0x442   : > { %v7889_v60 = vpop.f32.mrf.mxu2 }
 0x444   : > { %v1815_v63 = vpop.f32.mrf.mxu1 }
 0x445   : > { %v1816_v2 = vadd.f32 %v6768_v53, %v1815_v63  ;;  %v6296_v53 = vld [vmem:[%s9787_s2 + $0x70] sm:$0xff]  ;;  %v6295_v63 = vld [vmem:[%s9787_s2 + $0x68] sm:$0xff] }
 0x447   : > { %6242 = vmatpush.xpose.msk.msrb.mxu3 %vm848_vm1, %v1816_v2  ;;  %6241 = vmatmul.msk.f32.gmra.mxu2 %vm663_vm0, %v7393_v38  ;;  %v6294_v2 = vld [vmem:[%s9787_s2 + $0x60] sm:$0xff] }
 0x44a   : > { %v7898_v8 = vpop.f32.mrf.mxu2 }
 0x44b   : > { %6243 = vmatpush.xpose.msk.msrb.mxu3 %vm848_vm1, %v1813_v0 }
 0x44f   : > { %6244 = vmatpush.xpose.msk.msrb.mxu3 %vm848_vm1, %v1810_v11 }
 0x450   : > { %v7935_v47 = vpop.f32.mrf.mxu3 }
 0x452   : > { %v7904_v57 = vpop.f32.mrf.mxu2 }
 0x453   : > { %6245 = vmatpush.xpose.msk.msrb.mxu3 %vm848_vm1, %v1807_v14 }
 0x457   : > { %6246 = vmatpush.xpose.msk.msrb.mxu3 %vm848_vm1, %v1804_v19 }
 0x45a   : > { %v7914_v23 = vpop.f32.mrf.mxu2 }
 0x45b   : > { %6247 = vmatpush.xpose.msk.msrb.mxu3 %vm848_vm1, %v1801_v20 }
 0x45f   : > { %6248 = vmatpush.xpose.msk.msrb.mxu3 %vm848_vm1, %v1798_v51 }
 0x460   : > { %v7938_v54 = vpop.f32.mrf.mxu3 }
 0x462   : > { %v7919_v28 = vpop.f32.mrf.mxu2 }
 0x463   : > { %6249 = vmatpush.xpose.msk.msrb.mxu3 %vm848_vm1, %v1795_v21  ;;  %v6770_v21 = vld [vmem:[%s9762_s7 + $0x2] ss:$0 sm:$0xff] }
 0x467   : > { %6250 = vmatpush.xpose.msk.msrb.mxu3 %vm848_vm1, %v1792_v25 }
 0x468   : > { %v7944_v26 = vpop.f32.mrf.mxu3 }
 0x46a   : > { %6251 = vmatmul.msk.f32.vlgmr.msrb.gmra.mxu3 %vm848_vm1, %v1872_v5  ;;  %v7923_v24 = vpop.f32.mrf.mxu2 }
 0x46b   : > { %2310 = vmatpush.msra.mxu3 %v6297_v56 }
 0x46d   : > { %2311 = vmatpush.msra.mxu3 %v6296_v53 }
 0x46f   : > { %2312 = vmatpush.msra.mxu3 %v6295_v63 }
 0x470   : > { %v7958_v11 = vpop.f32.mrf.mxu3 }
 0x471   : > { %2313 = vmatpush.msra.mxu3 %v6294_v2 }
 0x472   : > { %6252 = vmatmul.msk.f32.gmra.mxu3 %vm848_vm1, %v1873_v13  ;;  %v7926_v31 = vpop.f32.mrf.mxu2 }
 0x478   : > { %v7962_v14 = vpop.f32.mrf.mxu3 }
 0x47a   : > { %6253 = vmatmul.msk.f32.gmra.mxu3 %vm848_vm1, %v1874_v29  ;;  %v7929_v37 = vpop.f32.mrf.mxu2 }
 0x480   : > { %v7966_v20 = vpop.f32.mrf.mxu3 }
 0x482   : > { %6254 = vmatmul.msk.f32.gmra.mxu3 %vm848_vm1, %v1875_v33  ;;  %v7932_v52 = vpop.f32.mrf.mxu2 }
 0x488   : > { %v7970_v51 = vpop.f32.mrf.mxu3 }
 0x48a   : > { %6255 = vmatmul.msk.f32.gmra.mxu3 %vm848_vm1, %v1876_v4  ;;  %v1845_v3 = vpop.f32.mrf.mxu2 }
 0x48b   : > { %v1846_v33 = vadd.f32 %v6770_v21, %v1845_v3 }
 0x490   : > { %v7979_v48 = vpop.f32.mrf.mxu3 }
 0x492   : > { %6256 = vmatmul.msk.f32.gmra.mxu3 %vm848_vm1, %v1877_v41  ;;  %v1848_v46 = vpop.f32.mrf.mxu2 }
 0x493   : > { %v1849_v61 = vadd.f32 %v6770_v21, %v1848_v46 }
 0x498   : > { %v7984_v29 = vpop.f32.mrf.mxu3 }
 0x49a   : > { %6257 = vmatmul.msk.f32.gmra.mxu3 %vm848_vm1, %v1878_v44  ;;  %v1851_v55 = vpop.f32.mrf.mxu2 }
 0x49b   : > { %v1852_v30 = vadd.f32 %v6770_v21, %v1851_v55 }
 0x4a2   : > { %6258 = vmatmul.msk.f32.gmra.mxu3 %vm848_vm1, %v1879_v50  ;;  %v1854_v0 = vpop.f32.mrf.mxu2 }
 0x4a3   : > { %v1855_v17 = vadd.f32 %v6770_v21, %v1854_v0 }
 0x4aa   : > { %6259 = vmatmul.msk.f32.gmra.mxu3 %vm848_vm1, %v1880_v58  ;;  %v1857_v49 = vpop.f32.mrf.mxu2 }
 0x4ab   : > { %v1858_v13 = vadd.f32 %v6770_v21, %v1857_v49 }
 0x4b2   : > { %6299 = vmatmul.msk.f32.vlgmr.msra.gmra.mxu3 %vm663_vm0, %v7293_v6  ;;  %v1860_v19 = vpop.f32.mrf.mxu2 }
 0x4b3   : > { %v1861_v10 = vadd.f32 %v6770_v21, %v1860_v19 }
 0x4ba   : > { %6300 = vmatmul.msk.f32.gmra.mxu3 %vm663_vm0, %v7301_v9  ;;  %v1863_v22 = vpop.f32.mrf.mxu2 }
 0x4bb   : > { %v1864_v62 = vadd.f32 %v6770_v21, %v1863_v22 }
 0x4c2   : > { %6301 = vmatmul.msk.f32.gmra.mxu3 %vm663_vm0, %v7309_v12  ;;  %v1866_v59 = vpop.f32.mrf.mxu2 }
 0x4c3   : > { %v1867_v25 = vadd.f32 %v6770_v21, %v1866_v59 }
 0x4ca   : > { %6302 = vmatmul.msk.f32.gmra.mxu3 %vm663_vm0, %v7317_v15  ;;  %v1869_v1 = vpop.f32.mrf.mxu2 }
 0x4cb   : > { %v1870_v5 = vadd.f32 %v6770_v21, %v1869_v1 }
 0x4cd   : > { %6260 = vmatpush.msk.msra.mxu0 %vm1057_vm2, %v1870_v5 }
 0x4cf   : > { %2098 = vmatpush.msra.mxu0 %v1867_v25 }
 0x4d1   : > { %2099 = vmatpush.msra.mxu0 %v1864_v62  ;;  %v6283_v62 = vld [vmem:[%s9790_s29 + $0x78] sm:$0xff] }
 0x4d2   : > { %6303 = vmatmul.msk.f32.gmra.mxu3 %vm663_vm0, %v7325_v18  ;;  %2256 = vmatpush.msrb.mxu2 %v6283_v62 }
 0x4d3   : > { %2100 = vmatpush.msra.mxu0 %v1861_v10 }
 0x4d5   : > { %2101 = vmatpush.msra.mxu0 %v1858_v13 }
 0x4d7   : > { %2102 = vmatpush.msra.mxu0 %v1855_v17 }
 0x4d9   : > { %2103 = vmatpush.msra.mxu0 %v1852_v30 }
 0x4da   : > { %6304 = vmatmul.msk.f32.gmra.mxu3 %vm663_vm0, %v7351_v27 }
 0x4db   : > { %2104 = vmatpush.msra.mxu0 %v1849_v61 }
 0x4dd   : > { %2105 = vmatpush.msra.mxu0 %v1846_v33 }
 0x4e2   : > { %6305 = vmatmul.msk.f32.gmra.mxu3 %vm663_vm0, %v7369_v32 }
 0x4ea   : > { %6306 = vmatmul.msk.f32.gmra.mxu3 %vm663_vm0, %v7381_v35 }
 0x4ed   : > { %v1952_v34 = vpop.f32.mrf.mxu3 }
 0x4ee   : > { %v1979_v36 = vsel %vm947_vm3, %v1952_v34, -inf }
 0x4ef   : > { %1980 = vmax.xlane.f32.xlu0 %v1979_v36 }
 0x4f2   : > { %6307 = vmatmul.msk.f32.gmra.mxu3 %vm663_vm0, %v7393_v38 }
 0x4f5   : > { %v1955_v4 = vpop.f32.mrf.mxu3 }
 0x4f6   : > { %v1982_v39 = vsel %vm947_vm3, %v1955_v4, -inf }
 0x4f7   : > { %1983 = vmax.xlane.f32.xlu1 %v1982_v39 }
 0x4fd   : > { %v1958_v40 = vpop.f32.mrf.mxu3 }
 0x4fe   : > { %v1985_v41 = vsel %vm947_vm3, %v1958_v40, -inf }
 0x4ff   : > { %1986 = vmax.xlane.f32.xlu2 %v1985_v41 }
 0x505   : > { %v1961_v42 = vpop.f32.mrf.mxu3 }
 0x506   : > { %v1988_v7 = vsel %vm947_vm3, %v1961_v42, -inf }
 0x507   : > { %1989 = vmax.xlane.f32.xlu0 %v1988_v7 }
 0x50d   : > { %v1964_v44 = vpop.f32.mrf.mxu3 }
 0x50e   : > { %v1991_v43 = vsel %vm947_vm3, %v1964_v44, -inf }
 0x50f   : > { %1992 = vmax.xlane.f32.xlu1 %v1991_v43 }
 0x515   : > { %v7995_v3 = vpop.f32.mrf.mxu3 }
 0x516   : > { %v1994_v50 = vsel %vm947_vm3, %v7995_v3, -inf }
 0x517   : > { %1995 = vmax.xlane.f32.xlu2 %v1994_v50 }
 0x51d   : > { %v7999_v16 = vpop.f32.mrf.mxu3 }
 0x51e   : > { %v1997_v45 = vsel %vm947_vm3, %v7999_v16, -inf }
 0x51f   : > { %1998 = vmax.xlane.f32.xlu0 %v1997_v45 }
 0x525   : > { %v8003_v46 = vpop.f32.mrf.mxu3 }
 0x526   : > { %v2000_v56 = vsel %vm947_vm3, %v8003_v46, -inf }
 0x527   : > { %2001 = vmax.xlane.f32.xlu1 %v2000_v56 }
 0x52d   : > { %v8007_v58 = vpop.f32.mrf.mxu3 }
 0x52e   : > { %v2003_v55 = vsel %vm972_vm4, %v8007_v58, -inf }
 0x52f   : > { %2004 = vmax.xlane.f32.xlu2 %v2003_v55 }
 0x535   : > { %v8011_v53 = vpop.f32.mrf.mxu3 }
 0x53d   : > { %v8013_v63 = vpop.f32.mrf.mxu3 }
 0x545   : > { %v8015_v2 = vpop.f32.mrf.mxu3 }
 0x54d   : > { %v8017_v22 = vpop.f32.mrf.mxu3 }
 0x555   : > { %v8024_v10 = vpop.f32.mrf.mxu3 }
 0x562   : > { %v1981_v0 = vpop.xlane.xlu0 %1980 }
 0x563   : > { %v2006_v49 = vsub.f32 %v1952_v34, %v1981_v0  ;;  %v2330_v34 = vpop.f32.mrf.mxu3 }
 0x565   : > { %v2015_v19 = vmul.f32 1.442695, %v2006_v49  ;;  %v6281_v49 = vld [vmem:[%s9790_s29 + $0x68] sm:$0xff] }
 0x567   : > { %6873 = vpow2.f32 %v2015_v19  ;;  %v6280_v19 = vld [vmem:[%s9790_s29 + $0x60] sm:$0xff] }
 0x56a   : > { %v1984_v59 = vpop.xlane.xlu1 %1983 }
 0x56b   : > { %v2007_v21 = vsub.f32 %v1955_v4, %v1984_v59  ;;  %v2333_v43 = vpop.f32.mrf.mxu3 }
 0x56d   : > { %v6874_v1 = vpop.eup %6873  ;;  %v2017_v25 = vmul.f32 1.442695, %v2007_v21  ;;  %v6771_v21 = vld [vmem:[%s9760_s5 + $0x3] ss:$0 sm:$0xff] }
 0x56e   : > { %6261 = vmatmul.msk.f32.vlgmr.msra.gmra.mxu0 %vm947_vm3, %v6874_v1  ;;  %v2033_v5 = vsel %vm947_vm3, %v6874_v1, 0.0 }
 0x56f   : > { %6875 = vpow2.f32 %v2017_v25  ;;  %2034 = vadd.xlane.f32.xlu0 %v2033_v5 }
 0x572   : > { %v1987_v13 = vpop.xlane.xlu2 %1986 }
 0x573   : > { %v2008_v17 = vsub.f32 %v1958_v40, %v1987_v13  ;;  %v6282_v40 = vld [vmem:[%s9790_s29 + $0x70] sm:$0xff]  ;;  %v2336_v0 = vpop.f32.mrf.mxu3 }
 0x574   : > { %2257 = vmatpush.msrb.mxu2 %v6282_v40 }
 0x575   : > { %v6876_v30 = vpop.eup %6875  ;;  %v2019_v61 = vmul.f32 1.442695, %v2008_v17 }
 0x576   : > { %6262 = vmatmul.msk.f32.gmra.mxu0 %vm947_vm3, %v6876_v30  ;;  %v2036_v33 = vsel %vm947_vm3, %v6876_v30, 0.0  ;;  %2258 = vmatpush.msrb.mxu2 %v6281_v49  ;;  %v2337_v30 = vadd.f32 %v6771_v21, %v2336_v0  ;;  %v2316_v49 = vadd.f32 %v6771_v21, %v8011_v53  ;;  %v6311_v53 = vld [vmem:[%s9761_s6 + $0x78] sm:$0xff] }
 0x577   : > { %6877 = vpow2.f32 %v2019_v61  ;;  %2037 = vadd.xlane.f32.xlu1 %v2036_v33  ;;  %2364 = vmatpush.msrb.mxu0 %v6311_v53 }
 0x578   : > { %2259 = vmatpush.msrb.mxu2 %v6280_v19  ;;  %v6309_v19 = vld [vmem:[%s9761_s6 + $0x68] sm:$0xff] }
 0x579   : > { %6285 = vmatmul.msk.f32.vlgmr.msrb.gmra.mxu2 %vm663_vm0, %v7293_v6 }
 0x57a   : > { %v1990_v36 = vpop.xlane.xlu0 %1989 }
 0x57b   : > { %v2009_v4 = vsub.f32 %v1961_v42, %v1990_v36  ;;  %v2339_v62 = vpop.f32.mrf.mxu3 }
 0x57c   : > { %v2340_v13 = vadd.f32 %v6771_v21, %v2339_v62 }
 0x57d   : > { %v6878_v39 = vpop.eup %6877  ;;  %v2021_v41 = vmul.f32 1.442695, %v2009_v4 }
 0x57e   : > { %6263 = vmatmul.msk.f32.gmra.mxu0 %vm947_vm3, %v6878_v39  ;;  %v2039_v7 = vsel %vm947_vm3, %v6878_v39, 0.0  ;;  %v2334_v39 = vadd.f32 %v6771_v21, %v2333_v43 }
 0x57f   : > { %6879 = vpow2.f32 %v2021_v41  ;;  %2040 = vadd.xlane.f32.xlu2 %v2039_v7  ;;  %v2331_v41 = vadd.f32 %v6771_v21, %v2330_v34  ;;  %v2325_v34 = vadd.f32 %v6771_v21, %v8017_v22  ;;  %v2319_v22 = vadd.f32 %v6771_v21, %v8013_v63  ;;  %v6310_v63 = vld [vmem:[%s9761_s6 + $0x70] sm:$0xff] }
 0x580   : > { %2365 = vmatpush.msrb.mxu0 %v6310_v63 }
 0x581   : > { %6286 = vmatmul.msk.f32.gmra.mxu2 %vm663_vm0, %v7301_v9 }
 0x582   : > { %v1993_v50 = vpop.xlane.xlu1 %1992  ;;  %2366 = vmatpush.msrb.mxu0 %v6309_v19  ;;  %v6772_v19 = vld [vmem:[%s9792_s0 + $0x3] ss:$0 sm:$0xff] }
 0x583   : > { %v2010_v45 = vsub.f32 %v1964_v44, %v1993_v50 }
 0x585   : > { %v6880_v56 = vpop.eup %6879  ;;  %v2023_v55 = vmul.f32 1.442695, %v2010_v45  ;;  %v2328_v45 = vadd.f32 %v6771_v21, %v8024_v10 }
 0x586   : > { %6264 = vmatmul.msk.f32.gmra.mxu0 %vm947_vm3, %v6880_v56  ;;  %v2042_v42 = vsel %vm947_vm3, %v6880_v56, 0.0 }
 0x587   : > { %6881 = vpow2.f32 %v2023_v55  ;;  %2043 = vadd.xlane.f32.xlu0 %v2042_v42  ;;  %v2322_v42 = vadd.f32 %v6771_v21, %v8015_v2 }
 0x589   : > { %6287 = vmatmul.msk.f32.gmra.mxu2 %vm663_vm0, %v7309_v12 }
 0x58a   : > { %v1996_v59 = vpop.xlane.xlu2 %1995 }
 0x58b   : > { %v2011_v44 = vsub.f32 %v7995_v3, %v1996_v59  ;;  %v6270_v3 = vld [vmem:[%s9763_s8 + $0x10] sm:$0xff]  ;;  %v6308_v59 = vld [vmem:[%s9761_s6 + $0x60] sm:$0xff] }
 0x58c   : > { %2196 = vmatpush.msrb.mxu1 %v6270_v3  ;;  %2367 = vmatpush.msrb.mxu0 %v6308_v59 }
 0x58d   : > { %v6882_v1 = vpop.eup %6881  ;;  %v2025_v25 = vmul.f32 1.442695, %v2011_v44 }
 0x58e   : > { %6265 = vmatmul.msk.f32.gmra.mxu0 %vm947_vm3, %v6882_v1  ;;  %v2045_v5 = vsel %vm947_vm3, %v6882_v1, 0.0  ;;  %6322 = vmatpush.xpose.msk.msra.mxu1 %vm848_vm1, %v2340_v13 }
 0x58f   : > { %6883 = vpow2.f32 %v2025_v25  ;;  %2046 = vadd.xlane.f32.xlu1 %v2045_v5 }
 0x591   : > { %6288 = vmatmul.msk.f32.gmra.mxu2 %vm663_vm0, %v7317_v15 }
 0x592   : > { %v1999_v17 = vpop.xlane.xlu0 %1998  ;;  %6323 = vmatpush.xpose.msk.msra.mxu1 %vm848_vm1, %v2337_v30 }
 0x593   : > { %v2012_v61 = vsub.f32 %v7999_v16, %v1999_v17 }
 0x595   : > { %v6884_v33 = vpop.eup %6883  ;;  %v2027_v36 = vmul.f32 1.442695, %v2012_v61 }
 0x596   : > { %6266 = vmatmul.msk.f32.gmra.mxu0 %vm947_vm3, %v6884_v33  ;;  %v2048_v4 = vsel %vm947_vm3, %v6884_v33, 0.0  ;;  %6324 = vmatpush.xpose.msk.msra.mxu1 %vm848_vm1, %v2334_v39 }
 0x597   : > { %6885 = vpow2.f32 %v2027_v36  ;;  %2049 = vadd.xlane.f32.xlu2 %v2048_v4 }
 0x599   : > { %6289 = vmatmul.msk.f32.gmra.mxu2 %vm663_vm0, %v7325_v18 }
 0x59a   : > { %v2002_v7 = vpop.xlane.xlu1 %2001  ;;  %6325 = vmatpush.xpose.msk.msra.mxu1 %vm848_vm1, %v2331_v41 }
 0x59b   : > { %v2013_v16 = vsub.f32 %v8003_v46, %v2002_v7 }
 0x59d   : > { %v6886_v40 = vpop.eup %6885  ;;  %v2029_v50 = vmul.f32 1.442695, %v2013_v16 }
 0x59e   : > { %6267 = vmatmul.msk.f32.gmra.mxu0 %vm947_vm3, %v6886_v40  ;;  %v2051_v43 = vsel %vm947_vm3, %v6886_v40, 0.0  ;;  %6326 = vmatpush.xpose.msk.msra.mxu1 %vm848_vm1, %v2328_v45 }
 0x59f   : > { %6887 = vpow2.f32 %v2029_v50  ;;  %2052 = vadd.xlane.f32.xlu0 %v2051_v43 }
 0x5a1   : > { %6290 = vmatmul.msk.f32.gmra.mxu2 %vm663_vm0, %v7351_v27 }
 0x5a2   : > { %v2005_v56 = vpop.xlane.xlu2 %2004  ;;  %6327 = vmatpush.xpose.msk.msra.mxu1 %vm848_vm1, %v2325_v34 }
 0x5a3   : > { %v2014_v46 = vsub.f32 %v8007_v58, %v2005_v56 }
 0x5a5   : > { %v6888_v55 = vpop.eup %6887  ;;  %v2031_v10 = vmul.f32 1.442695, %v2014_v46 }
 0x5a6   : > { %6268 = vmatmul.msk.f32.gmra.mxu0 %vm947_vm3, %v6888_v55  ;;  %v2054_v0 = vsel %vm947_vm3, %v6888_v55, 0.0  ;;  %6328 = vmatpush.xpose.msk.msra.mxu1 %vm848_vm1, %v2322_v42 }
 0x5a7   : > { %6889 = vpow2.f32 %v2031_v10  ;;  %2055 = vadd.xlane.f32.xlu1 %v2054_v0 }
 0x5a9   : > { %6291 = vmatmul.msk.f32.gmra.mxu2 %vm663_vm0, %v7369_v32 }
 0x5aa   : > { %6329 = vmatpush.xpose.msk.msra.mxu1 %vm848_vm1, %v2319_v22 }
 0x5ad   : > { %v6890_v58 = vpop.eup %6889 }
 0x5ae   : > { %6269 = vmatmul.msk.f32.gmra.mxu0 %vm947_vm3, %v6890_v58  ;;  %v2057_v2 = vsel %vm972_vm4, %v6890_v58, 0.0  ;;  %6330 = vmatpush.xpose.msk.msra.mxu1 %vm848_vm1, %v2316_v49 }
 0x5af   : > { %2058 = vadd.xlane.f32.xlu2 %v2057_v2 }
 0x5b1   : > { %6292 = vmatmul.msk.f32.gmra.mxu2 %vm663_vm0, %v7381_v35 }
 0x5b6   : > { %6313 = vmatmul.msk.f32.vlgmr.msrb.gmra.mxu0 %vm663_vm0, %v7293_v6 }
 0x5b9   : > { %6293 = vmatmul.msk.f32.gmra.mxu2 %vm663_vm0, %v7393_v38 }
 0x5be   : > { %6314 = vmatmul.msk.f32.gmra.mxu0 %vm663_vm0, %v7301_v9 }
 0x5c6   : > { %6315 = vmatmul.msk.f32.gmra.mxu0 %vm663_vm0, %v7309_v12 }
 0x5ce   : > { %6316 = vmatmul.msk.f32.gmra.mxu0 %vm663_vm0, %v7317_v15 }
 0x5d6   : > { %6317 = vmatmul.msk.f32.gmra.mxu0 %vm663_vm0, %v7325_v18 }
 0x5de   : > { %6318 = vmatmul.msk.f32.gmra.mxu0 %vm663_vm0, %v7351_v27 }
 0x5e2   : > { %v2035_v44 = vpop.xlane.xlu0 %2034 }
 0x5e3   : > { %6891 = vrcp.f32 %v2035_v44 }
 0x5e6   : > { %6319 = vmatmul.msk.f32.gmra.mxu0 %vm663_vm0, %v7369_v32 }
 0x5e9   : > { %v6892_v1 = vpop.eup %6891 }
 0x5ea   : > { %v2038_v21 = vpop.xlane.xlu1 %2037 }
 0x5eb   : > { %v2107_v25 = vpop.f32.mrf.mxu0  ;;  %6893 = vrcp.f32 %v2038_v21 }
 0x5ec   : > { %v2143_v5 = vmul.f32 %v6892_v1, %v2107_v25 }
 0x5ee   : > { %6271 = vmatmul.msk.f32.vlgmr.msrb.gmra.mxu1 %vm848_vm1, %v2143_v5  ;;  %6320 = vmatmul.msk.f32.gmra.mxu0 %vm663_vm0, %v7381_v35 }
 0x5f1   : > { %v6894_v3 = vpop.eup %6893 }
 0x5f2   : > { %v2041_v62 = vpop.xlane.xlu2 %2040 }
 0x5f3   : > { %v2110_v13 = vpop.f32.mrf.mxu0  ;;  %6895 = vrcp.f32 %v2041_v62 }
 0x5f4   : > { %v2144_v17 = vmul.f32 %v6894_v3, %v2110_v13 }
 0x5f6   : > { %6272 = vmatmul.msk.f32.gmra.mxu1 %vm848_vm1, %v2144_v17  ;;  %6321 = vmatmul.msk.f32.gmra.mxu0 %vm663_vm0, %v7393_v38 }
 0x5f9   : > { %v6896_v61 = vpop.eup %6895 }
 0x5fa   : > { %v2044_v30 = vpop.xlane.xlu0 %2043 }
 0x5fb   : > { %v2113_v33 = vpop.f32.mrf.mxu0  ;;  %6897 = vrcp.f32 %v2044_v30 }
 0x5fc   : > { %v2145_v36 = vmul.f32 %v6896_v61, %v2113_v33  ;;  %v2261_v0 = vpop.f32.mrf.mxu2 }
 0x5fd   : > { %v2262_v1 = vadd.f32 %v6772_v19, %v2261_v0 }
 0x5fe   : > { %6273 = vmatmul.msk.f32.gmra.mxu1 %vm848_vm1, %v2145_v36 }
 0x5ff   : > { %v2396_v5 = vmul.f32 0.35355338, %v2262_v1 }
 0x601   : > { %v6898_v39 = vpop.eup %6897 }
 0x602   : > { %v2047_v4 = vpop.xlane.xlu1 %2046 }
 0x603   : > { %v2116_v41 = vpop.f32.mrf.mxu0  ;;  %6899 = vrcp.f32 %v2047_v4 }
 0x604   : > { %v2146_v7 = vmul.f32 %v6898_v39, %v2116_v41  ;;  %v2264_v63 = vpop.f32.mrf.mxu2 }
 0x605   : > { %v2265_v62 = vadd.f32 %v6772_v19, %v2264_v63 }
 0x606   : > { %6274 = vmatmul.msk.f32.gmra.mxu1 %vm848_vm1, %v2146_v7 }
 0x607   : > { %v2397_v13 = vmul.f32 0.35355338, %v2265_v62  ;;  %v6773_v62 = vld [vmem:[%s9762_s7 + $0x3] ss:$0 sm:$0xff] }
 0x609   : > { %v6900_v40 = vpop.eup %6899 }
 0x60a   : > { %v2050_v16 = vpop.xlane.xlu2 %2049 }
 0x60b   : > { %v2119_v50 = vpop.f32.mrf.mxu0  ;;  %6901 = vrcp.f32 %v2050_v16 }
 0x60c   : > { %v2147_v45 = vmul.f32 %v6900_v40, %v2119_v50  ;;  %v2267_v25 = vpop.f32.mrf.mxu2 }
 0x60d   : > { %v2268_v17 = vadd.f32 %v6772_v19, %v2267_v25 }
 0x60e   : > { %6275 = vmatmul.msk.f32.gmra.mxu1 %vm848_vm1, %v2147_v45 }
 0x60f   : > { %v2398_v30 = vmul.f32 0.35355338, %v2268_v17 }
 0x611   : > { %v6902_v34 = vpop.eup %6901 }
 0x612   : > { %v2053_v43 = vpop.xlane.xlu0 %2052 }
 0x613   : > { %v2122_v56 = vpop.f32.mrf.mxu0  ;;  %6903 = vrcp.f32 %v2053_v43 }
 0x614   : > { %v2148_v46 = vmul.f32 %v6902_v34, %v2122_v56  ;;  %v2270_v3 = vpop.f32.mrf.mxu2 }
 0x615   : > { %v2271_v33 = vadd.f32 %v6772_v19, %v2270_v3 }
 0x616   : > { %6276 = vmatmul.msk.f32.gmra.mxu1 %vm848_vm1, %v2148_v46 }
 0x617   : > { %v2399_v36 = vmul.f32 0.35355338, %v2271_v33 }
 0x619   : > { %v6904_v10 = vpop.eup %6903 }
 0x61a   : > { %v2056_v55 = vpop.xlane.xlu1 %2055 }
 0x61b   : > { %v2125_v42 = vpop.f32.mrf.mxu0  ;;  %6905 = vrcp.f32 %v2056_v55 }
 0x61c   : > { %v2149_v22 = vmul.f32 %v6904_v10, %v2125_v42  ;;  %v2273_v61 = vpop.f32.mrf.mxu2 }
 0x61d   : > { %v2274_v39 = vadd.f32 %v6772_v19, %v2273_v61 }
 0x61e   : > { %6277 = vmatmul.msk.f32.gmra.mxu1 %vm848_vm1, %v2149_v22 }
 0x61f   : > { %v2400_v41 = vmul.f32 0.35355338, %v2274_v39 }
 0x621   : > { %v6906_v49 = vpop.eup %6905 }
 0x622   : > { %v2059_v58 = vpop.xlane.xlu2 %2058 }
 0x623   : > { %v2128_v2 = vpop.f32.mrf.mxu0  ;;  %6907 = vrcp.f32 %v2059_v58 }
 0x624   : > { %v2150_v53 = vmul.f32 %v6906_v49, %v2128_v2  ;;  %v2276_v4 = vpop.f32.mrf.mxu2 }
 0x625   : > { %v2277_v7 = vadd.f32 %v6772_v19, %v2276_v4 }
 0x626   : > { %6278 = vmatmul.msk.f32.gmra.mxu1 %vm848_vm1, %v2150_v53 }
 0x627   : > { %v2401_v40 = vmul.f32 0.35355338, %v2277_v7 }
 0x629   : > { %v6908_v59 = vpop.eup %6907 }
 0x62b   : > { %v2131_v44 = vpop.f32.mrf.mxu0 }
 0x62c   : > { %v2151_v21 = vmul.f32 %v6908_v59, %v2131_v44  ;;  %v2279_v16 = vpop.f32.mrf.mxu2 }
 0x62d   : > { %v2280_v50 = vadd.f32 %v6772_v19, %v2279_v16 }
 0x62e   : > { %6279 = vmatmul.msk.f32.gmra.mxu1 %vm848_vm1, %v2151_v21 }
 0x62f   : > { %v2402_v34 = vmul.f32 0.35355338, %v2280_v50 }
 0x633   : > { %v2369_v45 = vpop.f32.mrf.mxu0 }
 0x634   : > { %v2282_v43 = vpop.f32.mrf.mxu2  ;;  %v2370_v16 = vadd.f32 %v6773_v62, %v2369_v45 }
 0x635   : > { %v2283_v56 = vadd.f32 %v6772_v19, %v2282_v43 }
 0x636   : > { %6331 = vmatmul.msk.f32.vlgmr.msra.gmra.mxu1 %vm848_vm1, %v2396_v5 }
 0x637   : > { %v2403_v55 = vmul.f32 0.35355338, %v2283_v56 }
 0x63b   : > { %v2372_v46 = vpop.f32.mrf.mxu0 }
 0x63c   : > { %v2285_v42 = vpop.f32.mrf.mxu2  ;;  %v2373_v7 = vadd.f32 %v6773_v62, %v2372_v46 }
 0x63d   : > { %v2286_v0 = vadd.f32 %v6772_v19, %v2285_v42 }
 0x63e   : > { %6332 = vmatmul.msk.f32.gmra.mxu1 %vm848_vm1, %v2397_v13 }
 0x63f   : > { %v2404_v58 = vmul.f32 0.35355338, %v2286_v0 }
 0x643   : > { %v2375_v22 = vpop.f32.mrf.mxu0 }
 0x644   : > { %v2376_v39 = vadd.f32 %v6773_v62, %v2375_v22 }
 0x646   : > { %6333 = vmatmul.msk.f32.gmra.mxu1 %vm848_vm1, %v2398_v30 }
 0x64b   : > { %v2378_v2 = vpop.f32.mrf.mxu0 }
 0x64c   : > { %v2379_v4 = vadd.f32 %v6773_v62, %v2378_v2 }
 0x64e   : > { %6334 = vmatmul.msk.f32.gmra.mxu1 %vm848_vm1, %v2399_v36 }
 0x653   : > { %v2381_v63 = vpop.f32.mrf.mxu0 }
 0x654   : > { %v2382_v36 = vadd.f32 %v6773_v62, %v2381_v63 }
 0x656   : > { %6335 = vmatmul.msk.f32.gmra.mxu1 %vm848_vm1, %v2400_v41 }
 0x65b   : > { %v2384_v44 = vpop.f32.mrf.mxu0 }
 0x65c   : > { %v2385_v33 = vadd.f32 %v6773_v62, %v2384_v44 }
 0x65e   : > { %6336 = vmatmul.msk.f32.gmra.mxu1 %vm848_vm1, %v2401_v40 }
 0x663   : > { %v2387_v1 = vpop.f32.mrf.mxu0 }
 0x664   : > { %v2388_v30 = vadd.f32 %v6773_v62, %v2387_v1 }
 0x666   : > { %6337 = vmatmul.msk.f32.gmra.mxu1 %vm848_vm1, %v2402_v34 }
 0x66b   : > { %v8142_v10 = vpop.f32.mrf.mxu1  ;;  %v2390_v5 = vpop.f32.mrf.mxu0 }
 0x66c   : > { %v2391_v13 = vadd.f32 %v6773_v62, %v2390_v5 }
 0x66e   : > { %6338 = vmatmul.msk.f32.gmra.mxu1 %vm848_vm1, %v2403_v55 }
 0x673   : > { %v8145_v49 = vpop.f32.mrf.mxu1  ;;  %v2393_v3 = vpop.f32.mrf.mxu0 }
 0x674   : > { %v2394_v17 = vadd.f32 %v6773_v62, %v2393_v3 }
 0x676   : > { %6339 = vmatmul.msk.f32.gmra.mxu1 %vm848_vm1, %v2404_v58  ;;  %6340 = vmatpush.msk.msra.mxu2 %vm1057_vm2, %v2394_v17 }
 0x678   : > { %2622 = vmatpush.msra.mxu2 %v2391_v13 }
 0x67a   : > { %2623 = vmatpush.msra.mxu2 %v2388_v30 }
 0x67b   : > { %v8148_v53 = vpop.f32.mrf.mxu1 }
 0x67c   : > { %2624 = vmatpush.msra.mxu2 %v2385_v33 }
 0x67e   : > { %2625 = vmatpush.msra.mxu2 %v2382_v36 }
 0x680   : > { %2626 = vmatpush.msra.mxu2 %v2379_v4 }
 0x682   : > { %2627 = vmatpush.msra.mxu2 %v2376_v39 }
 0x683   : > { %v8150_v59 = vpop.f32.mrf.mxu1 }
 0x684   : > { %2628 = vmatpush.msra.mxu2 %v2373_v7 }
 0x686   : > { %2629 = vmatpush.msra.mxu2 %v2370_v16 }
 0x68b   : > { %v8152_v21 = vpop.f32.mrf.mxu1 }
 0x693   : > { %v8154_v25 = vpop.f32.mrf.mxu1 }
 0x69b   : > { %v8156_v19 = vpop.f32.mrf.mxu1 }
 0x6a3   : > { %v8162_v61 = vpop.f32.mrf.mxu1 }
 0x6ab   : > { %v8164_v41 = vpop.f32.mrf.mxu1 }
 0x6b3   : > { %v2476_v40 = vpop.f32.mrf.mxu1 }
 0x6b4   : > { %v2503_v50 = vsel %vm947_vm3, %v2476_v40, -inf }
 0x6b5   : > { %2504 = vmax.xlane.f32.xlu0 %v2503_v50 }
 0x6bb   : > { %v2479_v43 = vpop.f32.mrf.mxu1 }
 0x6bc   : > { %v2506_v34 = vsel %vm947_vm3, %v2479_v43, -inf }
 0x6bd   : > { %2507 = vmax.xlane.f32.xlu1 %v2506_v34 }
 0x6c3   : > { %v2482_v56 = vpop.f32.mrf.mxu1 }
 0x6c4   : > { %v2509_v55 = vsel %vm947_vm3, %v2482_v56, -inf }
 0x6c5   : > { %2510 = vmax.xlane.f32.xlu2 %v2509_v55 }
 0x6cb   : > { %v2485_v42 = vpop.f32.mrf.mxu1 }
 0x6cc   : > { %v2512_v46 = vsel %vm947_vm3, %v2485_v42, -inf }
 0x6cd   : > { %2513 = vmax.xlane.f32.xlu0 %v2512_v46 }
 0x6d3   : > { %v2488_v45 = vpop.f32.mrf.mxu1 }
 0x6d4   : > { %v2515_v0 = vsel %vm947_vm3, %v2488_v45, -inf }
 0x6d5   : > { %2516 = vmax.xlane.f32.xlu1 %v2515_v0 }
 0x6db   : > { %v2491_v22 = vpop.f32.mrf.mxu1 }
 0x6dc   : > { %v2518_v58 = vsel %vm947_vm3, %v2491_v22, -inf }
 0x6dd   : > { %2519 = vmax.xlane.f32.xlu2 %v2518_v58 }
 0x6e3   : > { %v2494_v2 = vpop.f32.mrf.mxu1 }
 0x6e4   : > { %v2521_v63 = vsel %vm947_vm3, %v2494_v2, -inf }
 0x6e5   : > { %2522 = vmax.xlane.f32.xlu0 %v2521_v63 }
 0x6eb   : > { %v8173_v44 = vpop.f32.mrf.mxu1 }
 0x6ec   : > { %v2524_v1 = vsel %vm947_vm3, %v8173_v44, -inf }
 0x6ed   : > { %2525 = vmax.xlane.f32.xlu1 %v2524_v1 }
 0x6f3   : > { %v8177_v5 = vpop.f32.mrf.mxu1 }
 0x6f4   : > { %v2527_v62 = vsel %vm972_vm4, %v8177_v5, -inf }
 0x6f5   : > { %2528 = vmax.xlane.f32.xlu2 %v2527_v62 }
 0x728   : > { %v2505_v3 = vpop.xlane.xlu0 %2504 }
 0x729   : > { %v2530_v13 = vsub.f32 %v2476_v40, %v2505_v3 }
 0x72b   : > { %v2539_v17 = vmul.f32 1.442695, %v2530_v13 }
 0x72d   : > { %6909 = vpow2.f32 %v2539_v17 }
 0x730   : > { %v2508_v30 = vpop.xlane.xlu1 %2507 }
 0x731   : > { %v2531_v33 = vsub.f32 %v2479_v43, %v2508_v30 }
 0x733   : > { %v6910_v36 = vpop.eup %6909  ;;  %v2541_v4 = vmul.f32 1.442695, %v2531_v33 }
 0x734   : > { %6341 = vmatmul.msk.f32.vlgmr.msra.gmra.mxu2 %vm947_vm3, %v6910_v36  ;;  %v2557_v39 = vsel %vm947_vm3, %v6910_v36, 0.0 }
 0x735   : > { %6911 = vpow2.f32 %v2541_v4  ;;  %2558 = vadd.xlane.f32.xlu0 %v2557_v39 }
 0x738   : > { %v2511_v7 = vpop.xlane.xlu2 %2510 }
 0x739   : > { %v2532_v16 = vsub.f32 %v2482_v56, %v2511_v7 }
 0x73b   : > { %v6912_v50 = vpop.eup %6911  ;;  %v2543_v34 = vmul.f32 1.442695, %v2532_v16 }
 0x73c   : > { %6342 = vmatmul.msk.f32.gmra.mxu2 %vm947_vm3, %v6912_v50  ;;  %v2560_v40 = vsel %vm947_vm3, %v6912_v50, 0.0 }
 0x73d   : > { %6913 = vpow2.f32 %v2543_v34  ;;  %2561 = vadd.xlane.f32.xlu1 %v2560_v40 }
 0x740   : > { %v2514_v55 = vpop.xlane.xlu0 %2513 }
 0x741   : > { %v2533_v43 = vsub.f32 %v2485_v42, %v2514_v55 }
 0x743   : > { %v6914_v46 = vpop.eup %6913  ;;  %v2545_v0 = vmul.f32 1.442695, %v2533_v43 }
 0x744   : > { %6343 = vmatmul.msk.f32.gmra.mxu2 %vm947_vm3, %v6914_v46  ;;  %v2563_v58 = vsel %vm947_vm3, %v6914_v46, 0.0 }
 0x745   : > { %6915 = vpow2.f32 %v2545_v0  ;;  %2564 = vadd.xlane.f32.xlu2 %v2563_v58 }
 0x748   : > { %v2517_v63 = vpop.xlane.xlu1 %2516 }
 0x749   : > { %v2534_v56 = vsub.f32 %v2488_v45, %v2517_v63  ;;  %v6350_v45 = vld [vmem:[%s9763_s8 + $0x18] sm:$0xff] }
 0x74a   : > { %2720 = vmatpush.msrb.mxu3 %v6350_v45 }
 0x74b   : > { %v6916_v1 = vpop.eup %6915  ;;  %v2547_v62 = vmul.f32 1.442695, %v2534_v56 }
 0x74c   : > { %6344 = vmatmul.msk.f32.gmra.mxu2 %vm947_vm3, %v6916_v1  ;;  %v2566_v3 = vsel %vm947_vm3, %v6916_v1, 0.0 }
 0x74d   : > { %6917 = vpow2.f32 %v2547_v62  ;;  %2567 = vadd.xlane.f32.xlu0 %v2566_v3 }
 0x750   : > { %v2520_v13 = vpop.xlane.xlu2 %2519 }
 0x751   : > { %v2535_v42 = vsub.f32 %v2491_v22, %v2520_v13 }
 0x753   : > { %v6918_v17 = vpop.eup %6917  ;;  %v2549_v30 = vmul.f32 1.442695, %v2535_v42 }
 0x754   : > { %6345 = vmatmul.msk.f32.gmra.mxu2 %vm947_vm3, %v6918_v17  ;;  %v2569_v33 = vsel %vm947_vm3, %v6918_v17, 0.0 }
 0x755   : > { %6919 = vpow2.f32 %v2549_v30  ;;  %2570 = vadd.xlane.f32.xlu1 %v2569_v33 }
 0x758   : > { %v2523_v36 = vpop.xlane.xlu0 %2522 }
 0x759   : > { %v2536_v4 = vsub.f32 %v2494_v2, %v2523_v36 }
 0x75b   : > { %v6920_v39 = vpop.eup %6919  ;;  %v2551_v7 = vmul.f32 1.442695, %v2536_v4 }
 0x75c   : > { %6346 = vmatmul.msk.f32.gmra.mxu2 %vm947_vm3, %v6920_v39  ;;  %v2572_v22 = vsel %vm947_vm3, %v6920_v39, 0.0 }
 0x75d   : > { %6921 = vpow2.f32 %v2551_v7  ;;  %2573 = vadd.xlane.f32.xlu2 %v2572_v22 }
 0x760   : > { %v2526_v16 = vpop.xlane.xlu1 %2525 }
 0x761   : > { %v2537_v50 = vsub.f32 %v8173_v44, %v2526_v16 }
 0x763   : > { %v6922_v34 = vpop.eup %6921  ;;  %v2553_v40 = vmul.f32 1.442695, %v2537_v50 }
 0x764   : > { %6347 = vmatmul.msk.f32.gmra.mxu2 %vm947_vm3, %v6922_v34  ;;  %v2575_v55 = vsel %vm947_vm3, %v6922_v34, 0.0 }
 0x765   : > { %6923 = vpow2.f32 %v2553_v40  ;;  %2576 = vadd.xlane.f32.xlu0 %v2575_v55 }
 0x768   : > { %v2529_v2 = vpop.xlane.xlu2 %2528 }
 0x769   : > { %v2538_v43 = vsub.f32 %v8177_v5, %v2529_v2 }
 0x76b   : > { %v6924_v46 = vpop.eup %6923  ;;  %v2555_v0 = vmul.f32 1.442695, %v2538_v43 }
 0x76c   : > { %6348 = vmatmul.msk.f32.gmra.mxu2 %vm947_vm3, %v6924_v46  ;;  %v2578_v58 = vsel %vm947_vm3, %v6924_v46, 0.0 }
 0x76d   : > { %6925 = vpow2.f32 %v2555_v0  ;;  %2579 = vadd.xlane.f32.xlu1 %v2578_v58 }
 0x773   : > { %v6926_v44 = vpop.eup %6925 }
 0x774   : > { %6349 = vmatmul.msk.f32.gmra.mxu2 %vm947_vm3, %v6926_v44  ;;  %v2581_v63 = vsel %vm972_vm4, %v6926_v44, 0.0 }
 0x775   : > { %2582 = vadd.xlane.f32.xlu2 %v2581_v63 }
 0x7a8   : > { %v2559_v56 = vpop.xlane.xlu0 %2558 }
 0x7a9   : > { %6927 = vrcp.f32 %v2559_v56 }
 0x7af   : > { %v6928_v62 = vpop.eup %6927 }
 0x7b0   : > { %v2562_v1 = vpop.xlane.xlu1 %2561 }
 0x7b1   : > { %6929 = vrcp.f32 %v2562_v1 }
 0x7b7   : > { %v2631_v3 = vpop.f32.mrf.mxu2  ;;  %v6930_v42 = vpop.eup %6929 }
 0x7b8   : > { %v2667_v5 = vmul.f32 %v6928_v62, %v2631_v3  ;;  %v2565_v13 = vpop.xlane.xlu2 %2564 }
 0x7b9   : > { %6931 = vrcp.f32 %v2565_v13 }
 0x7ba   : > { %6351 = vmatmul.msk.f32.vlgmr.msrb.gmra.mxu3 %vm848_vm1, %v2667_v5 }
 0x7bf   : > { %v2634_v17 = vpop.f32.mrf.mxu2  ;;  %v6932_v45 = vpop.eup %6931 }
 0x7c0   : > { %v2668_v30 = vmul.f32 %v6930_v42, %v2634_v17  ;;  %v2568_v33 = vpop.xlane.xlu0 %2567 }
 0x7c1   : > { %6933 = vrcp.f32 %v2568_v33 }
 0x7c2   : > { %6352 = vmatmul.msk.f32.gmra.mxu3 %vm848_vm1, %v2668_v30  ;;  %v1684_v30 = vadd.f32 %v7935_v47, %v7889_v60 }
 0x7c4   : > { %v2225_v33 = vadd.f32 %v8142_v10, %v1684_v30 }
 0x7c7   : > { %v2637_v36 = vpop.f32.mrf.mxu2  ;;  %v6934_v7 = vpop.eup %6933 }
 0x7c8   : > { %v2669_v4 = vmul.f32 %v6932_v45, %v2637_v36  ;;  %v2571_v39 = vpop.xlane.xlu1 %2570 }
 0x7c9   : > { %6935 = vrcp.f32 %v2571_v39 }
 0x7ca   : > { %6353 = vmatmul.msk.f32.gmra.mxu3 %vm848_vm1, %v2669_v4  ;;  %v8219_v4 = vld [vmem:[%s9764_s9] ss:$0 sm:$0xff] }
 0x7cf   : > { %v2640_v22 = vpop.f32.mrf.mxu2  ;;  %v6936_v34 = vpop.eup %6935 }
 0x7d0   : > { %v2670_v16 = vmul.f32 %v6934_v7, %v2640_v22  ;;  %v2574_v50 = vpop.xlane.xlu2 %2573  ;;  %v1687_v7 = vadd.f32 %v7938_v54, %v7898_v8 }
 0x7d1   : > { %6937 = vrcp.f32 %v2574_v50 }
 0x7d2   : > { %6354 = vmatmul.msk.f32.gmra.mxu3 %vm848_vm1, %v2670_v16  ;;  %v2226_v16 = vadd.f32 %v8145_v49, %v1687_v7 }
 0x7d7   : > { %v2643_v40 = vpop.f32.mrf.mxu2  ;;  %v6938_v43 = vpop.eup %6937 }
 0x7d8   : > { %v2671_v55 = vmul.f32 %v6936_v34, %v2643_v40  ;;  %v2577_v2 = vpop.xlane.xlu0 %2576  ;;  %v1690_v34 = vadd.f32 %v7944_v26, %v7904_v57 }
 0x7d9   : > { %6939 = vrcp.f32 %v2577_v2  ;;  %v1693_v2 = vadd.f32 %v7958_v11, %v7914_v23 }
 0x7da   : > { %6355 = vmatmul.msk.f32.gmra.mxu3 %vm848_vm1, %v2671_v55  ;;  %v2227_v8 = vadd.f32 %v8148_v53, %v1690_v34 }
 0x7db   : > { %v2228_v57 = vadd.f32 %v8150_v59, %v1693_v2 }
 0x7df   : > { %v2646_v46 = vpop.f32.mrf.mxu2  ;;  %v6940_v44 = vpop.eup %6939 }
 0x7e0   : > { %v2672_v0 = vmul.f32 %v6938_v43, %v2646_v46  ;;  %v2580_v58 = vpop.xlane.xlu1 %2579 }
 0x7e1   : > { %6941 = vrcp.f32 %v2580_v58 }
 0x7e2   : > { %6356 = vmatmul.msk.f32.gmra.mxu3 %vm848_vm1, %v2672_v0  ;;  %v1696_v0 = vadd.f32 %v7962_v14, %v7919_v28 }
 0x7e4   : > { %v2229_v23 = vadd.f32 %v8152_v21, %v1696_v0 }
 0x7e7   : > { %v2649_v63 = vpop.f32.mrf.mxu2  ;;  %v6942_v62 = vpop.eup %6941 }
 0x7e8   : > { %v2673_v56 = vmul.f32 %v6940_v44, %v2649_v63  ;;  %v2583_v1 = vpop.xlane.xlu2 %2582  ;;  %v1699_v63 = vadd.f32 %v7966_v20, %v7923_v24 }
 0x7e9   : > { %6943 = vrcp.f32 %v2583_v1 }
 0x7ea   : > { %6357 = vmatmul.msk.f32.gmra.mxu3 %vm848_vm1, %v2673_v56  ;;  %v2230_v28 = vadd.f32 %v8154_v25, %v1699_v63 }
 0x7ef   : > { %v2652_v3 = vpop.f32.mrf.mxu2  ;;  %v6944_v13 = vpop.eup %6943 }
 0x7f0   : > { %v2674_v5 = vmul.f32 %v6942_v62, %v2652_v3  ;;  %v1702_v62 = vadd.f32 %v7970_v51, %v7926_v31  ;;  %v7155_v31 = vmov 32.0  }
 0x7f1   : > { %6945 = vrcp.f32 %v7155_v31 }
 0x7f2   : > { %6358 = vmatmul.msk.f32.gmra.mxu3 %vm848_vm1, %v2674_v5  ;;  %v2231_v24 = vadd.f32 %v8156_v19, %v1702_v62 }
 0x7f7   : > { %v2655_v42 = vpop.f32.mrf.mxu2  ;;  %v6946_v51 = vpop.eup %6945 }
 0x7f8   : > { %v2675_v17 = vmul.f32 %v6944_v13, %v2655_v42  ;;  %v2811_v42 = vmul.f32 32.0, %v6946_v51  ;;  %vm2815_vm5 = vweird.f32 %v6946_v51 }
 0x7fa   : > { %6359 = vmatmul.msk.f32.gmra.mxu3 %vm848_vm1, %v2675_v17  ;;  %v2812_v19 = vsub.f32 1.0, %v2811_v42 }
 0x7fc   : > { %v2813_v17 = vmul.f32 %v6946_v51, %v2812_v19 }
 0x7fe   : > { %v2814_v30 = vadd.f32 %v6946_v51, %v2813_v17 }
 0x83d   : > { %v2722_v45 = vpop.f32.mrf.mxu3 }
 0x83e   : > { %v2749_v36 = vadd.f32 %v2722_v45, %v2225_v33  ;;  %v8281_v45 = vsel %vm2815_vm5, %v6946_v51, %v2814_v30 }
 0x840   : > { %v2758_v39 = vadd.f32 %v2749_v36, %v7293_v6 }
 0x842   : > { %v8225_v22 = vadd.f32 %v8219_v4, %v2758_v39 }
 0x844   : > { %v2782_v60 = vsel %vm663_vm0, %v8225_v22, 0.0 }
 0x845   : > { %2783 = vadd.xlane.f32.xlu0 %v2782_v60  ;;  %v2725_v47 = vpop.f32.mrf.mxu3 }
 0x846   : > { %v2750_v10 = vadd.f32 %v2725_v47, %v2226_v16 }
 0x848   : > { %v2759_v50 = vadd.f32 %v2750_v10, %v7301_v9  ;;  %v1708_v10 = vadd.f32 %v7984_v29, %v7932_v52 }
 0x84a   : > { %v8234_v6 = vadd.f32 %v8219_v4, %v2759_v50 }
 0x84c   : > { %v2785_v54 = vsel %vm663_vm0, %v8234_v6, 0.0 }
 0x84d   : > { %2786 = vadd.xlane.f32.xlu1 %v2785_v54  ;;  %v2728_v49 = vpop.f32.mrf.mxu3 }
 0x84e   : > { %v2751_v40 = vadd.f32 %v2728_v49, %v2227_v8 }
 0x850   : > { %v2760_v55 = vadd.f32 %v2751_v40, %v7309_v12 }
 0x852   : > { %v8243_v9 = vadd.f32 %v8219_v4, %v2760_v55 }
 0x854   : > { %v2788_v26 = vsel %vm663_vm0, %v8243_v9, 0.0 }
 0x855   : > { %2789 = vadd.xlane.f32.xlu2 %v2788_v26  ;;  %v2731_v53 = vpop.f32.mrf.mxu3 }
 0x856   : > { %v2752_v43 = vadd.f32 %v2731_v53, %v2228_v57 }
 0x858   : > { %v2761_v46 = vadd.f32 %v2752_v43, %v7317_v15 }
 0x85a   : > { %v8252_v12 = vadd.f32 %v8219_v4, %v2761_v46 }
 0x85c   : > { %v2791_v11 = vsel %vm663_vm0, %v8252_v12, 0.0 }
 0x85d   : > { %2792 = vadd.xlane.f32.xlu0 %v2791_v11  ;;  %v2734_v59 = vpop.f32.mrf.mxu3 }
 0x85e   : > { %v2753_v58 = vadd.f32 %v2734_v59, %v2229_v23 }
 0x860   : > { %v2762_v44 = vadd.f32 %v2753_v58, %v7325_v18 }
 0x862   : > { %v8261_v15 = vadd.f32 %v8219_v4, %v2762_v44 }
 0x864   : > { %v2794_v14 = vsel %vm663_vm0, %v8261_v15, 0.0 }
 0x865   : > { %2795 = vadd.xlane.f32.xlu1 %v2794_v14  ;;  %v2737_v21 = vpop.f32.mrf.mxu3 }
 0x866   : > { %v2754_v56 = vadd.f32 %v2737_v21, %v2230_v28 }
 0x868   : > { %v2763_v1 = vadd.f32 %v2754_v56, %v7351_v27 }
 0x86a   : > { %v8270_v18 = vadd.f32 %v8219_v4, %v2763_v1 }
 0x86c   : > { %v2797_v20 = vsel %vm663_vm0, %v8270_v18, 0.0 }
 0x86d   : > { %2798 = vadd.xlane.f32.xlu2 %v2797_v20  ;;  %v2740_v25 = vpop.f32.mrf.mxu3  ;;  %v3013_v20 = vld [vmem:[%s9767_s12 + $0x8] sm:$0xff] }
 0x86e   : > { %v2755_v3 = vadd.f32 %v2740_v25, %v2231_v24  ;;  %v3012_v25 = vld [vmem:[%s9767_s12] sm:$0xff] }
 0x870   : > { %v2764_v5 = vadd.f32 %v2755_v3, %v7369_v32  ;;  %v1705_v32 = vadd.f32 %v7979_v48, %v7929_v37 }
 0x872   : > { %v8277_v13 = vadd.f32 %v8219_v4, %v2764_v5  ;;  %v2232_v39 = vadd.f32 %v8162_v61, %v1705_v32  ;;  %v2233_v61 = vadd.f32 %v8164_v41, %v1708_v10 }
 0x874   : > { %v2800_v27 = vsel %vm663_vm0, %v8277_v13, 0.0 }
 0x875   : > { %2801 = vadd.xlane.f32.xlu1 %v2800_v27  ;;  %v2743_v33 = vpop.f32.mrf.mxu3 }
 0x876   : > { %v2756_v16 = vadd.f32 %v2743_v33, %v2232_v39 }
 0x878   : > { %v2765_v50 = vadd.f32 %v2756_v16, %v7381_v35 }
 0x87a   : > { %v2778_v49 = vadd.f32 %v8219_v4, %v2765_v50 }
 0x87c   : > { %v2803_v40 = vsel %vm663_vm0, %v2778_v49, 0.0 }
 0x87d   : > { %v2746_v37 = vpop.f32.mrf.mxu3 }
 0x87e   : > { %v2757_v54 = vadd.f32 %v2746_v37, %v2233_v61 }
 0x880   : > { %v2766_v35 = vadd.f32 %v2757_v54, %v7393_v38 }
 0x8b8   : > { %v2784_v36 = vpop.xlane.xlu0 %2783 }
 0x8b9   : > { %v2817_v7 = vmul.f32 %v8281_v45, %v2784_v36 }
 0x8bb   : > { %v8288_v60 = vsub.f32 %v8225_v22, %v2817_v7 }
 0x8bd   : > { %v2835_v47 = vmul.f32 %v8288_v60, %v8288_v60 }
 0x8bf   : > { %v2844_v34 = vsel %vm663_vm0, %v2835_v47, 0.0 }
 0x8c0   : > { %v2787_v48 = vpop.xlane.xlu1 %2786  ;;  %2845 = vadd.xlane.f32.xlu0 %v2844_v34 }
 0x8c1   : > { %v2818_v8 = vmul.f32 %v8281_v45, %v2787_v48 }
 0x8c3   : > { %v8299_v22 = vsub.f32 %v8234_v6, %v2818_v8  ;;  %v8312_v6 = vadd.f32 %v8219_v4, %v2766_v35 }
 0x8c5   : > { %v2836_v52 = vmul.f32 %v8299_v22, %v8299_v22  ;;  %v2807_v38 = vsel %vm2806_vm6, %v8312_v6, 0.0 }
 0x8c7   : > { %v2847_v29 = vsel %vm663_vm0, %v2836_v52, 0.0 }
 0x8c8   : > { %2848 = vadd.xlane.f32.xlu2 %v2847_v29  ;;  %v2790_v55 = vpop.xlane.xlu2 %2789  ;;  %2804 = vadd.xlane.f32.xlu0 %v2803_v40  ;;  %v8382_v40 = vld [vmem:[%s9766_s11] ss:$0 sm:$0xff] }
 0x8c9   : > { %v2819_v41 = vmul.f32 %v8281_v45, %v2790_v55 }
 0x8cb   : > { %v8309_v2 = vsub.f32 %v8243_v9, %v2819_v41  ;;  %v3015_v9 = vld [vmem:[%s9767_s12 + $0x18] sm:$0xff] }
 0x8cc   : > { %3059 = vmatpush.msra.mxu0 %v3015_v9 }
 0x8cd   : > { %v2837_v57 = vmul.f32 %v8309_v2, %v8309_v2 }
 0x8cf   : > { %v2850_v26 = vsel %vm663_vm0, %v2837_v57, 0.0 }
 0x8d0   : > { %v2793_v53 = vpop.xlane.xlu0 %2792  ;;  %2808 = vadd.xlane.f32.xlu2 %v2807_v38  ;;  %2851 = vadd.xlane.f32.xlu1 %v2850_v26 }
 0x8d1   : > { %v2820_v43 = vmul.f32 %v8281_v45, %v2793_v53 }
 0x8d3   : > { %v8324_v4 = vsub.f32 %v8252_v12, %v2820_v43 }
 0x8d5   : > { %v2838_v46 = vmul.f32 %v8324_v4, %v8324_v4 }
 0x8d7   : > { %v2853_v0 = vsel %vm663_vm0, %v2838_v46, 0.0 }
 0x8d8   : > { %v2796_v23 = vpop.xlane.xlu1 %2795  ;;  %2854 = vadd.xlane.f32.xlu0 %v2853_v0 }
 0x8d9   : > { %v2821_v11 = vmul.f32 %v8281_v45, %v2796_v23 }
 0x8db   : > { %v8331_v59 = vsub.f32 %v8261_v15, %v2821_v11 }
 0x8dd   : > { %v2839_v58 = vmul.f32 %v8331_v59, %v8331_v59 }
 0x8df   : > { %v2856_v44 = vsel %vm663_vm0, %v2839_v58, 0.0 }
 0x8e0   : > { %v2799_v63 = vpop.xlane.xlu2 %2798  ;;  %2857 = vadd.xlane.f32.xlu1 %v2856_v44 }
 0x8e1   : > { %v2822_v12 = vmul.f32 %v8281_v45, %v2799_v63 }
 0x8e3   : > { %v8338_v28 = vsub.f32 %v8270_v18, %v2822_v12  ;;  %v3014_v18 = vld [vmem:[%s9767_s12 + $0x10] sm:$0xff] }
 0x8e4   : > { %3060 = vmatpush.msra.mxu0 %v3014_v18 }
 0x8e5   : > { %v2840_v14 = vmul.f32 %v8338_v28, %v8338_v28 }
 0x8e6   : > { %3061 = vmatpush.msra.mxu0 %v3013_v20 }
 0x8e7   : > { %v2859_v21 = vsel %vm663_vm0, %v2840_v14, 0.0 }
 0x8e8   : > { %2860 = vadd.xlane.f32.xlu2 %v2859_v21  ;;  %v2802_v15 = vpop.xlane.xlu1 %2801  ;;  %3062 = vmatpush.msra.mxu0 %v3012_v25 }
 0x8e9   : > { %v2823_v56 = vmul.f32 %v8281_v45, %v2802_v15 }
 0x8eb   : > { %v8345_v1 = vsub.f32 %v8277_v13, %v2823_v56 }
 0x8ed   : > { %v2841_v62 = vmul.f32 %v8345_v1, %v8345_v1 }
 0x8ef   : > { %v2862_v24 = vsel %vm663_vm0, %v2841_v62, 0.0 }
 0x8f0   : > { %2863 = vadd.xlane.f32.xlu0 %v2862_v24 }
 0x933   : > { %v2846_v3 = vpop.xlane.xlu0 %2845 }
 0x934   : > { %v2871_v5 = vmul.f32 %v2846_v3, %v8281_v45 }
 0x936   : > { %v2880_v13 = vadd.f32 1e-05, %v2871_v5 }
 0x938   : > { %6947 = vrsqrt.f32 %v2880_v13  ;;  %vm2895_vm8 = vweird.f32 %v2880_v13 }
 0x93b   : > { %v2849_v27 = vpop.xlane.xlu2 %2848  ;;  %v2805_v31 = vpop.xlane.xlu0 %2804 }
 0x93c   : > { %v2872_v51 = vmul.f32 %v2849_v27, %v8281_v45  ;;  %v2824_v42 = vmul.f32 %v8281_v45, %v2805_v31 }
 0x93e   : > { %v6948_v19 = vpop.eup %6947  ;;  %v2881_v17 = vadd.f32 1e-05, %v2872_v51  ;;  %v8362_v30 = vsub.f32 %v2778_v49, %v2824_v42  ;;  %v8375_v49 = vld [vmem:[%s9765_s10] ss:$0 sm:$0xff] }
 0x93f   : > { %v2890_v33 = vmul.f32 %v6948_v19, %v2880_v13  ;;  %vm2896_vm7 = vweird.f32 %v6948_v19 }
 0x940   : > { %6949 = vrsqrt.f32 %v2881_v17  ;;  %v2842_v32 = vmul.f32 %v8362_v30, %v8362_v30  ;;  %vm2897_vm9 = vmor %vm2895_vm8, %vm2896_vm7  ;;  %vm2905_vm11 = vweird.f32 %v2881_v17 }
 0x941   : > { %v2891_v36 = vmul.f32 %v6948_v19, %v2890_v33 }
 0x942   : > { %v2865_v39 = vsel %vm663_vm0, %v2842_v32, 0.0 }
 0x943   : > { %v2892_v7 = vmul.f32 0.5, %v2891_v36  ;;  %v2809_v16 = vpop.xlane.xlu2 %2808  ;;  %2866 = vadd.xlane.f32.xlu1 %v2865_v39  ;;  %v2852_v47 = vpop.xlane.xlu1 %2851 }
 0x944   : > { %v2825_v10 = vmul.f32 %v8281_v45, %v2809_v16  ;;  %v2873_v50 = vmul.f32 %v2852_v47, %v8281_v45 }
 0x945   : > { %v2893_v34 = vsub.f32 1.5, %v2892_v7 }
 0x946   : > { %v6950_v37 = vpop.eup %6949  ;;  %v8370_v48 = vsub.f32 %v8312_v6, %v2825_v10  ;;  %v2882_v61 = vadd.f32 1e-05, %v2873_v50 }
 0x947   : > { %v2894_v8 = vmul.f32 %v6948_v19, %v2893_v34  ;;  %v2900_v54 = vmul.f32 %v6950_v37, %v2881_v17  ;;  %vm2906_vm10 = vweird.f32 %v6950_v37 }
 0x948   : > { %6951 = vrsqrt.f32 %v2882_v61  ;;  %v2843_v52 = vmul.f32 %v8370_v48, %v8370_v48  ;;  %vm2907_vm12 = vmor %vm2905_vm11, %vm2906_vm10  ;;  %vm2915_vm14 = vweird.f32 %v2882_v61 }
 0x949   : > { %v2898_v35 = vsel %vm2897_vm9, %v6948_v19, %v2894_v8  ;;  %v2901_v29 = vmul.f32 %v6950_v37, %v2900_v54 }
 0x94a   : > { %v2979_v55 = vmul.f32 %v2898_v35, %v8288_v60  ;;  %v2868_v41 = vsel %vm2806_vm6, %v2843_v52, 0.0 }
 0x94b   : > { %v2902_v6 = vmul.f32 0.5, %v2901_v29  ;;  %2869 = vadd.xlane.f32.xlu2 %v2868_v41  ;;  %v2855_v57 = vpop.xlane.xlu0 %2854 }
 0x94c   : > { %v2991_v38 = vmul.f32 %v8375_v49, %v2979_v55  ;;  %v2874_v26 = vmul.f32 %v2855_v57, %v8281_v45 }
 0x94d   : > { %v2903_v53 = vsub.f32 1.5, %v2902_v6 }
 0x94e   : > { %v6952_v9 = vpop.eup %6951  ;;  %v8389_v43 = vadd.f32 %v8382_v40, %v2991_v38  ;;  %v2883_v46 = vadd.f32 1e-05, %v2874_v26 }
 0x94f   : > { %v2904_v0 = vmul.f32 %v6950_v37, %v2903_v53  ;;  %v2910_v23 = vmul.f32 %v6952_v9, %v2882_v61  ;;  %vm2916_vm13 = vweird.f32 %v6952_v9 }
 0x950   : > { %6953 = vrsqrt.f32 %v2883_v46  ;;  %6360 = vmatmul.msk.f32.vlgmr.msra.gmra.mxu0 %vm663_vm0, %v8389_v43  ;;  %vm2917_vm15 = vmor %vm2915_vm14, %vm2916_vm13  ;;  %vm2925_vm7 = vweird.f32 %v2883_v46 }
 0x951   : > { %v2908_v60 = vsel %vm2907_vm12, %v6950_v37, %v2904_v0  ;;  %v2911_v11 = vmul.f32 %v6952_v9, %v2910_v23 }
 0x952   : > { %v2980_v58 = vmul.f32 %v2908_v60, %v8299_v22 }
 0x953   : > { %v2912_v44 = vmul.f32 0.5, %v2911_v11  ;;  %v2858_v63 = vpop.xlane.xlu1 %2857 }
 0x954   : > { %v2875_v12 = vmul.f32 %v2858_v63, %v8281_v45  ;;  %v2992_v14 = vmul.f32 %v8375_v49, %v2980_v58 }
 0x955   : > { %v2913_v21 = vsub.f32 1.5, %v2912_v44 }
 0x956   : > { %v6954_v15 = vpop.eup %6953  ;;  %v2884_v56 = vadd.f32 1e-05, %v2875_v12  ;;  %v8397_v62 = vadd.f32 %v8382_v40, %v2992_v14  ;;  %v3102_v12 = vld [vmem:[%s9769_s14 + $0x10] sm:$0xff]  ;;  %v3101_v14 = vld [vmem:[%s9769_s14 + $0x8] sm:$0xff] }
 0x957   : > { %v2914_v24 = vmul.f32 %v6952_v9, %v2913_v21  ;;  %v2920_v18 = vmul.f32 %v6954_v15, %v2883_v46  ;;  %vm2926_vm5 = vweird.f32 %v6954_v15 }
 0x958   : > { %6955 = vrsqrt.f32 %v2884_v56  ;;  %6361 = vmatmul.msk.f32.gmra.mxu0 %vm663_vm0, %v8397_v62  ;;  %vm2927_vm8 = vmor %vm2925_vm7, %vm2926_vm5  ;;  %vm2935_vm10 = vweird.f32 %v2884_v56 }
 0x959   : > { %v2918_v22 = vsel %vm2917_vm15, %v6952_v9, %v2914_v24  ;;  %v2921_v20 = vmul.f32 %v6954_v15, %v2920_v18 }
 0x95a   : > { %v2981_v25 = vmul.f32 %v2918_v22, %v8309_v2  ;;  %v3103_v2 = vld [vmem:[%s9769_s14 + $0x18] sm:$0xff] }
 0x95b   : > { %v2922_v3 = vmul.f32 0.5, %v2921_v20  ;;  %v2861_v5 = vpop.xlane.xlu2 %2860  ;;  %3147 = vmatpush.msrb.mxu1 %v3103_v2 }
 0x95c   : > { %v2876_v13 = vmul.f32 %v2861_v5, %v8281_v45  ;;  %v2993_v27 = vmul.f32 %v8375_v49, %v2981_v25 }
 0x95d   : > { %v2923_v31 = vsub.f32 1.5, %v2922_v3  ;;  %3148 = vmatpush.msrb.mxu1 %v3102_v12 }
 0x95e   : > { %v6956_v51 = vpop.eup %6955  ;;  %v2885_v42 = vadd.f32 1e-05, %v2876_v13  ;;  %v8405_v19 = vadd.f32 %v8382_v40, %v2993_v27 }
 0x95f   : > { %v2924_v17 = vmul.f32 %v6954_v15, %v2923_v31  ;;  %v2930_v33 = vmul.f32 %v6956_v51, %v2884_v56  ;;  %vm2936_vm9 = vweird.f32 %v6956_v51  ;;  %3149 = vmatpush.msrb.mxu1 %v3101_v14 }
 0x960   : > { %6957 = vrsqrt.f32 %v2885_v42  ;;  %6362 = vmatmul.msk.f32.gmra.mxu0 %vm663_vm0, %v8405_v19  ;;  %vm2937_vm11 = vmor %vm2935_vm10, %vm2936_vm9  ;;  %vm2945_vm13 = vweird.f32 %v2885_v42 }
 0x961   : > { %v2928_v32 = vsel %vm2927_vm8, %v6954_v15, %v2924_v17  ;;  %v2931_v36 = vmul.f32 %v6956_v51, %v2930_v33 }
 0x962   : > { %v2982_v39 = vmul.f32 %v2928_v32, %v8324_v4 }
 0x963   : > { %v2932_v7 = vmul.f32 0.5, %v2931_v36  ;;  %v2864_v16 = vpop.xlane.xlu0 %2863 }
 0x964   : > { %v2877_v47 = vmul.f32 %v2864_v16, %v8281_v45  ;;  %v2994_v10 = vmul.f32 %v8375_v49, %v2982_v39 }
 0x965   : > { %v2933_v50 = vsub.f32 1.5, %v2932_v7 }
 0x966   : > { %v6958_v34 = vpop.eup %6957  ;;  %v2886_v37 = vadd.f32 1e-05, %v2877_v47  ;;  %v8416_v61 = vadd.f32 %v8382_v40, %v2994_v10 }
 0x967   : > { %v2934_v8 = vmul.f32 %v6956_v51, %v2933_v50  ;;  %v2940_v54 = vmul.f32 %v6958_v34, %v2885_v42  ;;  %vm2946_vm12 = vweird.f32 %v6958_v34  ;;  %v6777_v42 = vld [vmem:[%s9768_s13] ss:$0 sm:$0xff] }
 0x968   : > { %6959 = vrsqrt.f32 %v2886_v37  ;;  %6363 = vmatmul.msk.f32.gmra.mxu0 %vm663_vm0, %v8416_v61  ;;  %vm2947_vm14 = vmor %vm2945_vm13, %vm2946_vm12  ;;  %vm2955_vm5 = vweird.f32 %v2886_v37 }
 0x969   : > { %v2938_v4 = vsel %vm2937_vm11, %v6956_v51, %v2934_v8  ;;  %v2941_v52 = vmul.f32 %v6958_v34, %v2940_v54 }
 0x96a   : > { %v2983_v35 = vmul.f32 %v2938_v4, %v8331_v59 }
 0x96b   : > { %v2942_v29 = vmul.f32 0.5, %v2941_v52 }
 0x96c   : > { %v2995_v55 = vmul.f32 %v8375_v49, %v2983_v35 }
 0x96d   : > { %v2943_v41 = vsub.f32 1.5, %v2942_v29 }
 0x96e   : > { %v6960_v6 = vpop.eup %6959  ;;  %v8423_v57 = vadd.f32 %v8382_v40, %v2995_v55 }
 0x96f   : > { %v2944_v38 = vmul.f32 %v6958_v34, %v2943_v41  ;;  %v2950_v26 = vmul.f32 %v6960_v6, %v2886_v37  ;;  %vm2956_vm15 = vweird.f32 %v6960_v6 }
 0x970   : > { %6364 = vmatmul.msk.f32.gmra.mxu0 %vm663_vm0, %v8423_v57  ;;  %vm2957_vm7 = vmor %vm2955_vm5, %vm2956_vm15 }
 0x971   : > { %v2948_v53 = vsel %vm2947_vm14, %v6958_v34, %v2944_v38  ;;  %v2951_v9 = vmul.f32 %v6960_v6, %v2950_v26 }
 0x972   : > { %v2984_v59 = vmul.f32 %v2948_v53, %v8338_v28 }
 0x973   : > { %v2952_v46 = vmul.f32 0.5, %v2951_v9 }
 0x974   : > { %v2996_v0 = vmul.f32 %v8375_v49, %v2984_v59 }
 0x975   : > { %v2953_v23 = vsub.f32 1.5, %v2952_v46 }
 0x976   : > { %v8430_v60 = vadd.f32 %v8382_v40, %v2996_v0 }
 0x977   : > { %v2954_v11 = vmul.f32 %v6960_v6, %v2953_v23  ;;  %v8479_v23 = vld [vmem:[%s9770_s15] ss:$0 sm:$0xff] }
 0x978   : > { %6365 = vmatmul.msk.f32.gmra.mxu0 %vm663_vm0, %v8430_v60 }
 0x979   : > { %v2958_v58 = vsel %vm2957_vm7, %v6960_v6, %v2954_v11 }
 0x97a   : > { %v2985_v44 = vmul.f32 %v2958_v58, %v8345_v1  ;;  %v3100_v1 = vld [vmem:[%s9769_s14] sm:$0xff] }
 0x97b   : > { %3150 = vmatpush.msrb.mxu1 %v3100_v1 }
 0x97c   : > { %v2997_v63 = vmul.f32 %v8375_v49, %v2985_v44 }
 0x97e   : > { %v8437_v28 = vadd.f32 %v8382_v40, %v2997_v63 }
 0x980   : > { %6366 = vmatmul.msk.f32.gmra.mxu0 %vm663_vm0, %v8437_v28 }
 0x9b6   : > { %v2867_v21 = vpop.xlane.xlu1 %2866 }
 0x9b7   : > { %v2878_v15 = vmul.f32 %v2867_v21, %v8281_v45 }
 0x9b9   : > { %v2887_v56 = vadd.f32 1e-05, %v2878_v15 }
 0x9bb   : > { %6961 = vrsqrt.f32 %v2887_v56  ;;  %vm2965_vm9 = vweird.f32 %v2887_v56 }
 0x9be   : > { %v2870_v24 = vpop.xlane.xlu2 %2869 }
 0x9bf   : > { %v2879_v18 = vmul.f32 %v2870_v24, %v8281_v45 }
 0x9c1   : > { %v6962_v22 = vpop.eup %6961  ;;  %v2888_v20 = vadd.f32 1e-05, %v2879_v18 }
 0x9c2   : > { %v2960_v25 = vmul.f32 %v6962_v22, %v2887_v56  ;;  %vm2966_vm8 = vweird.f32 %v6962_v22 }
 0x9c3   : > { %6963 = vrsqrt.f32 %v2888_v20  ;;  %vm2967_vm10 = vmor %vm2965_vm9, %vm2966_vm8  ;;  %vm2975_vm12 = vweird.f32 %v2888_v20 }
 0x9c4   : > { %v2961_v3 = vmul.f32 %v6962_v22, %v2960_v25 }
 0x9c6   : > { %v2962_v5 = vmul.f32 0.5, %v2961_v3 }
 0x9c8   : > { %v2963_v13 = vsub.f32 1.5, %v2962_v5 }
 0x9c9   : > { %v6964_v27 = vpop.eup %6963 }
 0x9ca   : > { %v2964_v31 = vmul.f32 %v6962_v22, %v2963_v13  ;;  %v2970_v51 = vmul.f32 %v6964_v27, %v2888_v20  ;;  %vm2976_vm11 = vweird.f32 %v6964_v27 }
 0x9cb   : > { %vm2977_vm13 = vmor %vm2975_vm12, %vm2976_vm11 }
 0x9cc   : > { %v2968_v17 = vsel %vm2967_vm10, %v6962_v22, %v2964_v31  ;;  %v2971_v33 = vmul.f32 %v6964_v27, %v2970_v51 }
 0x9cd   : > { %v2986_v2 = vmul.f32 %v2968_v17, %v8362_v30  ;;  %v3064_v32 = vpop.f32.mrf.mxu0 }
 0x9ce   : > { %v2972_v36 = vmul.f32 0.5, %v2971_v33  ;;  %v3065_v39 = vadd.f32 %v6777_v42, %v3064_v32 }
 0x9cf   : > { %v2998_v7 = vmul.f32 %v8375_v49, %v2986_v2 }
 0x9d0   : > { %v2973_v16 = vsub.f32 1.5, %v2972_v36  ;;  %v3091_v47 = vmax.f32 %v3065_v39, 0.0 }
 0x9d1   : > { %v8458_v10 = vadd.f32 %v8382_v40, %v2998_v7 }
 0x9d2   : > { %v2974_v50 = vmul.f32 %v6964_v27, %v2973_v16  ;;  %6369 = vmatmul.msk.f32.vlgmr.msrb.gmra.mxu1 %vm663_vm0, %v3091_v47 }
 0x9d3   : > { %6367 = vmatmul.msk.f32.gmra.mxu0 %vm663_vm0, %v8458_v10 }
 0x9d4   : > { %v2978_v30 = vsel %vm2977_vm13, %v6964_v27, %v2974_v50 }
 0x9d5   : > { %v2987_v34 = vmul.f32 %v2978_v30, %v8370_v48  ;;  %v3067_v37 = vpop.f32.mrf.mxu0 }
 0x9d6   : > { %v3068_v8 = vadd.f32 %v6777_v42, %v3067_v37 }
 0x9d7   : > { %v2999_v54 = vmul.f32 %v8375_v49, %v2987_v34 }
 0x9d8   : > { %v3092_v4 = vmax.f32 %v3068_v8, 0.0 }
 0x9d9   : > { %v8466_v52 = vadd.f32 %v8382_v40, %v2999_v54 }
 0x9da   : > { %6370 = vmatmul.msk.f32.gmra.mxu1 %vm663_vm0, %v3092_v4 }
 0x9db   : > { %6368 = vmatmul.msk.f32.gmra.mxu0 %vm663_vm0, %v8466_v52 }
 0x9dd   : > { %v3070_v35 = vpop.f32.mrf.mxu0 }
 0x9de   : > { %v3071_v29 = vadd.f32 %v6777_v42, %v3070_v35 }
 0x9e0   : > { %v3093_v55 = vmax.f32 %v3071_v29, 0.0 }
 0x9e2   : > { %6371 = vmatmul.msk.f32.gmra.mxu1 %vm663_vm0, %v3093_v55 }
 0x9e5   : > { %v3073_v41 = vpop.f32.mrf.mxu0 }
 0x9e6   : > { %v3074_v48 = vadd.f32 %v6777_v42, %v3073_v41 }
 0x9e8   : > { %v3094_v6 = vmax.f32 %v3074_v48, 0.0 }
 0x9ea   : > { %6372 = vmatmul.msk.f32.gmra.mxu1 %vm663_vm0, %v3094_v6 }
 0x9ed   : > { %v3076_v49 = vpop.f32.mrf.mxu0 }
 0x9ee   : > { %v3077_v38 = vadd.f32 %v6777_v42, %v3076_v49 }
 0x9f0   : > { %v3095_v26 = vmax.f32 %v3077_v38, 0.0 }
 0x9f2   : > { %6373 = vmatmul.msk.f32.gmra.mxu1 %vm663_vm0, %v3095_v26 }
 0x9f5   : > { %v3079_v40 = vpop.f32.mrf.mxu0 }
 0x9f6   : > { %v3080_v53 = vadd.f32 %v6777_v42, %v3079_v40 }
 0x9f8   : > { %v3096_v9 = vmax.f32 %v3080_v53, 0.0 }
 0x9fa   : > { %6374 = vmatmul.msk.f32.gmra.mxu1 %vm663_vm0, %v3096_v9 }
 0x9fd   : > { %v3082_v59 = vpop.f32.mrf.mxu0 }
 0x9fe   : > { %v3083_v46 = vadd.f32 %v6777_v42, %v3082_v59 }
 0xa00   : > { %v3097_v0 = vmax.f32 %v3083_v46, 0.0 }
 0xa02   : > { %6375 = vmatmul.msk.f32.gmra.mxu1 %vm663_vm0, %v3097_v0 }
 0xa4f   : > { %v3152_v11 = vpop.f32.mrf.mxu1 }
 0xa50   : > { %v3153_v58 = vadd.f32 %v8479_v23, %v3152_v11  ;;  %v3085_v44 = vpop.f32.mrf.mxu0 }
 0xa51   : > { %v3086_v63 = vadd.f32 %v6777_v42, %v3085_v44 }
 0xa52   : > { %v3179_v12 = vadd.f32 %v3153_v58, %v8389_v43 }
 0xa53   : > { %v3098_v14 = vmax.f32 %v3086_v63, 0.0 }
 0xa54   : > { %v3190_v1 = vsel %vm663_vm0, %v3179_v12, 0.0 }
 0xa55   : > { %3191 = vadd.xlane.f32.xlu0 %v3190_v1  ;;  %6376 = vmatmul.msk.f32.gmra.mxu1 %vm663_vm0, %v3098_v14 }
 0xa57   : > { %v3155_v21 = vpop.f32.mrf.mxu1 }
 0xa58   : > { %v3156_v15 = vadd.f32 %v8479_v23, %v3155_v21  ;;  %v3088_v56 = vpop.f32.mrf.mxu0 }
 0xa59   : > { %v3089_v24 = vadd.f32 %v6777_v42, %v3088_v56 }
 0xa5a   : > { %v3180_v18 = vadd.f32 %v3156_v15, %v8397_v62 }
 0xa5b   : > { %v3099_v22 = vmax.f32 %v3089_v24, 0.0 }
 0xa5c   : > { %v3193_v20 = vsel %vm663_vm0, %v3180_v18, 0.0 }
 0xa5d   : > { %3194 = vadd.xlane.f32.xlu1 %v3193_v20  ;;  %6377 = vmatmul.msk.f32.gmra.mxu1 %vm663_vm0, %v3099_v22 }
 0xa5f   : > { %v3158_v43 = vpop.f32.mrf.mxu1 }
 0xa60   : > { %v3159_v25 = vadd.f32 %v8479_v23, %v3158_v43  ;;  %v6381_v43 = vld [vmem:[%s9790_s29 + $0x98] sm:$0xff] }
 0xa61   : > { %3461 = vmatpush.msrb.mxu2 %v6381_v43 }
 0xa62   : > { %v3181_v3 = vadd.f32 %v3159_v25, %v8405_v19  ;;  %v6395_v25 = vld [vmem:[%s9787_s2 + $0x98] sm:$0xff] }
 0xa63   : > { %3515 = vmatpush.msra.mxu3 %v6395_v25 }
 0xa64   : > { %v3196_v5 = vsel %vm663_vm0, %v3181_v3, 0.0 }
 0xa65   : > { %3197 = vadd.xlane.f32.xlu2 %v3196_v5  ;;  %v6380_v5 = vld [vmem:[%s9790_s29 + $0x90] sm:$0xff] }
 0xa66   : > { %3462 = vmatpush.msrb.mxu2 %v6380_v5 }
 0xa67   : > { %v3161_v13 = vpop.f32.mrf.mxu1 }
 0xa68   : > { %v3162_v27 = vadd.f32 %v8479_v23, %v3161_v13  ;;  %v6394_v13 = vld [vmem:[%s9787_s2 + $0x90] sm:$0xff] }
 0xa69   : > { %3516 = vmatpush.msra.mxu3 %v6394_v13 }
 0xa6a   : > { %v3182_v31 = vadd.f32 %v3162_v27, %v8416_v61  ;;  %v6408_v27 = vld [vmem:[%s9761_s6 + $0x90] sm:$0xff] }
 0xa6c   : > { %v3199_v62 = vsel %vm663_vm0, %v3182_v31, 0.0 }
 0xa6d   : > { %3200 = vadd.xlane.f32.xlu0 %v3199_v62  ;;  %v6393_v62 = vld [vmem:[%s9787_s2 + $0x88] sm:$0xff] }
 0xa6e   : > { %3517 = vmatpush.msra.mxu3 %v6393_v62 }
 0xa6f   : > { %v3164_v51 = vpop.f32.mrf.mxu1 }
 0xa70   : > { %v3165_v42 = vadd.f32 %v8479_v23, %v3164_v51  ;;  %v6407_v51 = vld [vmem:[%s9761_s6 + $0x88] sm:$0xff] }
 0xa72   : > { %v3183_v17 = vadd.f32 %v3165_v42, %v8423_v57  ;;  %v6378_v42 = vld [vmem:[%s9790_s29 + $0x80] sm:$0xff] }
 0xa74   : > { %v3202_v33 = vsel %vm663_vm0, %v3183_v17, 0.0 }
 0xa75   : > { %3203 = vadd.xlane.f32.xlu1 %v3202_v33  ;;  %v6406_v33 = vld [vmem:[%s9761_s6 + $0x80] sm:$0xff] }
 0xa77   : > { %v3167_v19 = vpop.f32.mrf.mxu1 }
 0xa78   : > { %v3168_v2 = vadd.f32 %v8479_v23, %v3167_v19 }
 0xa7a   : > { %v3184_v32 = vadd.f32 %v3168_v2, %v8430_v60 }
 0xa7c   : > { %v3205_v36 = vsel %vm663_vm0, %v3184_v32, 0.0 }
 0xa7d   : > { %3206 = vadd.xlane.f32.xlu2 %v3205_v36 }
 0xa7f   : > { %v3170_v61 = vpop.f32.mrf.mxu1 }
 0xa80   : > { %v3171_v39 = vadd.f32 %v8479_v23, %v3170_v61 }
 0xa82   : > { %v3185_v7 = vadd.f32 %v3171_v39, %v8437_v28 }
 0xa84   : > { %v3208_v16 = vsel %vm663_vm0, %v3185_v7, 0.0 }
 0xa85   : > { %3209 = vadd.xlane.f32.xlu1 %v3208_v16 }
 0xac8   : > { %v3192_v57 = vpop.xlane.xlu0 %3191 }
 0xac9   : > { %v3217_v47 = vmul.f32 %v3192_v57, %v8281_v45 }
 0xacb   : > { %v8505_v50 = vsub.f32 %v3179_v12, %v3217_v47 }
 0xacd   : > { %v3235_v30 = vmul.f32 %v8505_v50, %v8505_v50 }
 0xacf   : > { %v3244_v60 = vsel %vm663_vm0, %v3235_v30, 0.0 }
 0xad0   : > { %3245 = vadd.xlane.f32.xlu0 %v3244_v60  ;;  %v3195_v34 = vpop.xlane.xlu1 %3194 }
 0xad1   : > { %v3218_v37 = vmul.f32 %v3195_v34, %v8281_v45 }
 0xad2   : > { %v3173_v8 = vpop.f32.mrf.mxu1 }
 0xad3   : > { %v8511_v54 = vsub.f32 %v3180_v18, %v3218_v37  ;;  %v3174_v28 = vadd.f32 %v8479_v23, %v3173_v8 }
 0xad5   : > { %v8515_v4 = vadd.f32 %v3174_v28, %v8458_v10  ;;  %v3236_v35 = vmul.f32 %v8511_v54, %v8511_v54 }
 0xad7   : > { %v3211_v29 = vsel %vm663_vm0, %v8515_v4, 0.0  ;;  %v3247_v55 = vsel %vm663_vm0, %v3236_v35, 0.0 }
 0xad8   : > { %v3198_v41 = vpop.xlane.xlu2 %3197  ;;  %3212 = vadd.xlane.f32.xlu0 %v3211_v29  ;;  %3248 = vadd.xlane.f32.xlu2 %v3247_v55 }
 0xad9   : > { %v3219_v48 = vmul.f32 %v3198_v41, %v8281_v45 }
 0xada   : > { %v3176_v6 = vpop.f32.mrf.mxu1 }
 0xadb   : > { %v8523_v49 = vsub.f32 %v3181_v3, %v3219_v48  ;;  %v3177_v38 = vadd.f32 %v8479_v23, %v3176_v6  ;;  %v6409_v3 = vld [vmem:[%s9761_s6 + $0x98] sm:$0xff] }
 0xadc   : > { %3569 = vmatpush.msrb.mxu0 %v6409_v3 }
 0xadd   : > { %v3237_v10 = vmul.f32 %v8523_v49, %v8523_v49  ;;  %v8529_v26 = vadd.f32 %v3177_v38, %v8466_v52 }
 0xade   : > { %3570 = vmatpush.msrb.mxu0 %v6408_v27 }
 0xadf   : > { %v3250_v40 = vsel %vm663_vm0, %v3237_v10, 0.0  ;;  %v3214_v53 = vsel %vm2806_vm6, %v8529_v26, 0.0 }
 0xae0   : > { %v3201_v9 = vpop.xlane.xlu0 %3200  ;;  %3251 = vadd.xlane.f32.xlu1 %v3250_v40  ;;  %3215 = vadd.xlane.f32.xlu2 %v3214_v53  ;;  %v8611_v40 = vld [vmem:[%s9771_s16] ss:$0 sm:$0xff] }
 0xae1   : > { %v3220_v59 = vmul.f32 %v3201_v9, %v8281_v45  ;;  %3571 = vmatpush.msrb.mxu0 %v6407_v51 }
 0xae3   : > { %v8535_v46 = vsub.f32 %v3182_v31, %v3220_v59  ;;  %v6379_v31 = vld [vmem:[%s9790_s29 + $0x88] sm:$0xff]  ;;  %3572 = vmatpush.msrb.mxu0 %v6406_v33 }
 0xae4   : > { %3463 = vmatpush.msrb.mxu2 %v6379_v31 }
 0xae5   : > { %v3238_v0 = vmul.f32 %v8535_v46, %v8535_v46 }
 0xae6   : > { %3464 = vmatpush.msrb.mxu2 %v6378_v42 }
 0xae7   : > { %v3253_v23 = vsel %vm663_vm0, %v3238_v0, 0.0 }
 0xae8   : > { %3254 = vadd.xlane.f32.xlu0 %v3253_v23  ;;  %v3204_v52 = vpop.xlane.xlu1 %3203 }
 0xae9   : > { %v3221_v11 = vmul.f32 %v3204_v52, %v8281_v45 }
 0xaeb   : > { %v8541_v58 = vsub.f32 %v3183_v17, %v3221_v11  ;;  %v6392_v17 = vld [vmem:[%s9787_s2 + $0x80] sm:$0xff] }
 0xaec   : > { %3518 = vmatpush.msra.mxu3 %v6392_v17 }
 0xaed   : > { %v3239_v44 = vmul.f32 %v8541_v58, %v8541_v58 }
 0xaef   : > { %v3256_v63 = vsel %vm663_vm0, %v3239_v44, 0.0 }
 0xaf0   : > { %v3207_v12 = vpop.xlane.xlu2 %3206  ;;  %3257 = vadd.xlane.f32.xlu1 %v3256_v63 }
 0xaf1   : > { %v3222_v14 = vmul.f32 %v3207_v12, %v8281_v45 }
 0xaf3   : > { %v8547_v1 = vsub.f32 %v3184_v32, %v3222_v14 }
 0xaf5   : > { %v3240_v21 = vmul.f32 %v8547_v1, %v8547_v1 }
 0xaf7   : > { %v3259_v15 = vsel %vm663_vm0, %v3240_v21, 0.0 }
 0xaf8   : > { %3260 = vadd.xlane.f32.xlu2 %v3259_v15  ;;  %v3210_v56 = vpop.xlane.xlu1 %3209 }
 0xaf9   : > { %v3223_v24 = vmul.f32 %v3210_v56, %v8281_v45 }
 0xafb   : > { %v8553_v18 = vsub.f32 %v3185_v7, %v3223_v24 }
 0xafd   : > { %v3241_v22 = vmul.f32 %v8553_v18, %v8553_v18 }
 0xaff   : > { %v3262_v20 = vsel %vm663_vm0, %v3241_v22, 0.0 }
 0xb00   : > { %3263 = vadd.xlane.f32.xlu0 %v3262_v20 }
 0xb43   : > { %v3246_v19 = vpop.xlane.xlu0 %3245 }
 0xb44   : > { %v3271_v2 = vmul.f32 %v3246_v19, %v8281_v45 }
 0xb46   : > { %v3280_v32 = vadd.f32 1e-05, %v3271_v2 }
 0xb48   : > { %6965 = vrsqrt.f32 %v3280_v32  ;;  %vm3295_vm15 = vweird.f32 %v3280_v32 }
 0xb4b   : > { %v3213_v36 = vpop.xlane.xlu0 %3212  ;;  %v3249_v61 = vpop.xlane.xlu2 %3248 }
 0xb4c   : > { %v3224_v39 = vmul.f32 %v3213_v36, %v8281_v45  ;;  %v3272_v7 = vmul.f32 %v3249_v61, %v8281_v45 }
 0xb4e   : > { %v6966_v16 = vpop.eup %6965  ;;  %v8598_v57 = vsub.f32 %v8515_v4, %v3224_v39  ;;  %v3281_v47 = vadd.f32 1e-05, %v3272_v7 }
 0xb4f   : > { %v3290_v30 = vmul.f32 %v6966_v16, %v3280_v32  ;;  %vm3296_vm14 = vweird.f32 %v6966_v16 }
 0xb50   : > { %6967 = vrsqrt.f32 %v3281_v47  ;;  %v3242_v60 = vmul.f32 %v8598_v57, %v8598_v57  ;;  %vm3297_vm5 = vmor %vm3295_vm15, %vm3296_vm14  ;;  %vm3305_vm8 = vweird.f32 %v3281_v47 }
 0xb51   : > { %v3291_v34 = vmul.f32 %v6966_v16, %v3290_v30 }
 0xb52   : > { %v3265_v37 = vsel %vm663_vm0, %v3242_v60, 0.0 }
 0xb53   : > { %v3292_v8 = vmul.f32 0.5, %v3291_v34  ;;  %v3216_v28 = vpop.xlane.xlu2 %3215  ;;  %3266 = vadd.xlane.f32.xlu1 %v3265_v37  ;;  %v3252_v35 = vpop.xlane.xlu1 %3251 }
 0xb54   : > { %v3225_v29 = vmul.f32 %v3216_v28, %v8281_v45  ;;  %v3273_v55 = vmul.f32 %v3252_v35, %v8281_v45 }
 0xb55   : > { %v3293_v41 = vsub.f32 1.5, %v3292_v8 }
 0xb56   : > { %v6968_v4 = vpop.eup %6967  ;;  %v8606_v48 = vsub.f32 %v8529_v26, %v3225_v29  ;;  %v3282_v6 = vadd.f32 1e-05, %v3273_v55  ;;  %v8618_v26 = vld [vmem:[%s9772_s17] ss:$0 sm:$0xff] }
 0xb57   : > { %v3294_v38 = vmul.f32 %v6966_v16, %v3293_v41  ;;  %v3300_v10 = vmul.f32 %v6968_v4, %v3281_v47  ;;  %vm3306_vm7 = vweird.f32 %v6968_v4 }
 0xb58   : > { %6969 = vrsqrt.f32 %v3282_v6  ;;  %v3243_v53 = vmul.f32 %v8606_v48, %v8606_v48  ;;  %vm3307_vm9 = vmor %vm3305_vm8, %vm3306_vm7  ;;  %vm3315_vm11 = vweird.f32 %v3282_v6 }
 0xb59   : > { %v3298_v9 = vsel %vm3297_vm5, %v6966_v16, %v3294_v38  ;;  %v3301_v59 = vmul.f32 %v6968_v4, %v3300_v10 }
 0xb5a   : > { %v3379_v0 = vmul.f32 %v3298_v9, %v8505_v50  ;;  %v3268_v23 = vsel %vm2806_vm6, %v3243_v53, 0.0 }
 0xb5b   : > { %v3302_v52 = vmul.f32 0.5, %v3301_v59  ;;  %v3255_v11 = vpop.xlane.xlu0 %3254  ;;  %3269 = vadd.xlane.f32.xlu2 %v3268_v23 }
 0xb5c   : > { %v3391_v44 = vmul.f32 %v8611_v40, %v3379_v0  ;;  %v3274_v63 = vmul.f32 %v3255_v11, %v8281_v45 }
 0xb5d   : > { %v3303_v12 = vsub.f32 1.5, %v3302_v52 }
 0xb5e   : > { %v6970_v14 = vpop.eup %6969  ;;  %v8625_v21 = vadd.f32 %v8618_v26, %v3391_v44  ;;  %v3283_v15 = vadd.f32 1e-05, %v3274_v63 }
 0xb5f   : > { %v3304_v56 = vmul.f32 %v6968_v4, %v3303_v12  ;;  %v3310_v24 = vmul.f32 %v6970_v14, %v3282_v6  ;;  %vm3316_vm10 = vweird.f32 %v6970_v14 }
 0xb60   : > { %6971 = vrsqrt.f32 %v3283_v15  ;;  %6383 = vmatmul.msk.f32.vlgmr.msrb.gmra.mxu2 %vm663_vm0, %v8625_v21  ;;  %6397 = vmatmul.msk.f32.vlgmr.msra.gmra.mxu3 %vm663_vm0, %v8625_v21  ;;  %vm3317_vm12 = vmor %vm3315_vm11, %vm3316_vm10  ;;  %vm3325_vm14 = vweird.f32 %v3283_v15 }
 0xb61   : > { %v3308_v50 = vsel %vm3307_vm9, %v6968_v4, %v3304_v56  ;;  %v3311_v22 = vmul.f32 %v6970_v14, %v3310_v24  ;;  %6411 = vmatmul.msk.f32.vlgmr.msrb.gmra.mxu0 %vm663_vm0, %v8625_v21 }
 0xb62   : > { %v3380_v20 = vmul.f32 %v3308_v50, %v8511_v54 }
 0xb63   : > { %v3312_v43 = vmul.f32 0.5, %v3311_v22  ;;  %v3258_v25 = vpop.xlane.xlu1 %3257 }
 0xb64   : > { %v3392_v3 = vmul.f32 %v8611_v40, %v3380_v20  ;;  %v3275_v5 = vmul.f32 %v3258_v25, %v8281_v45 }
 0xb65   : > { %v3313_v13 = vsub.f32 1.5, %v3312_v43 }
 0xb66   : > { %v6972_v27 = vpop.eup %6971  ;;  %v8637_v31 = vadd.f32 %v8618_v26, %v3392_v3  ;;  %v3284_v62 = vadd.f32 1e-05, %v3275_v5 }
 0xb67   : > { %v3314_v51 = vmul.f32 %v6970_v14, %v3313_v13  ;;  %v3320_v42 = vmul.f32 %v6972_v27, %v3283_v15  ;;  %vm3326_vm13 = vweird.f32 %v6972_v27  ;;  %v6466_v13 = vld [vmem:[%s9787_s2 + $0xb8] sm:$0xff] }
 0xb68   : > { %6973 = vrsqrt.f32 %v3284_v62  ;;  %6384 = vmatmul.msk.f32.gmra.mxu2 %vm663_vm0, %v8637_v31  ;;  %6398 = vmatmul.msk.f32.gmra.mxu3 %vm663_vm0, %v8637_v31  ;;  %vm3327_vm15 = vmor %vm3325_vm14, %vm3326_vm13  ;;  %vm3335_vm7 = vweird.f32 %v3284_v62 }
 0xb69   : > { %v3318_v54 = vsel %vm3317_vm12, %v6970_v14, %v3314_v51  ;;  %v3321_v17 = vmul.f32 %v6972_v27, %v3320_v42  ;;  %6412 = vmatmul.msk.f32.gmra.mxu0 %vm663_vm0, %v8637_v31  ;;  %v6451_v51 = vld [vmem:[%s9790_s29 + $0xb0] sm:$0xff] }
 0xb6a   : > { %v3381_v33 = vmul.f32 %v3318_v54, %v8523_v49  ;;  %3959 = vmatpush.msra.mxu0 %v6466_v13  ;;  %v6465_v42 = vld [vmem:[%s9787_s2 + $0xb0] sm:$0xff]  ;;  %v6450_v54 = vld [vmem:[%s9790_s29 + $0xa8] sm:$0xff] }
 0xb6b   : > { %v3322_v19 = vmul.f32 0.5, %v3321_v17  ;;  %v3261_v2 = vpop.xlane.xlu2 %3260  ;;  %v6464_v17 = vld [vmem:[%s9787_s2 + $0xa8] sm:$0xff] }
 0xb6c   : > { %v3393_v32 = vmul.f32 %v8611_v40, %v3381_v33  ;;  %v3276_v36 = vmul.f32 %v3261_v2, %v8281_v45  ;;  %3960 = vmatpush.msra.mxu0 %v6465_v42  ;;  %v6449_v2 = vld [vmem:[%s9790_s29 + $0xa0] sm:$0xff] }
 0xb6d   : > { %v3323_v61 = vsub.f32 1.5, %v3322_v19 }
 0xb6e   : > { %v6974_v39 = vpop.eup %6973  ;;  %v8649_v7 = vadd.f32 %v8618_v26, %v3393_v32  ;;  %v3285_v16 = vadd.f32 1e-05, %v3276_v36  ;;  %v6463_v32 = vld [vmem:[%s9787_s2 + $0xa0] sm:$0xff]  ;;  %3961 = vmatpush.msra.mxu0 %v6464_v17 }
 0xb6f   : > { %v3324_v47 = vmul.f32 %v6972_v27, %v3323_v61  ;;  %v3330_v30 = vmul.f32 %v6974_v39, %v3284_v62  ;;  %vm3336_vm5 = vweird.f32 %v6974_v39 }
 0xb70   : > { %6975 = vrsqrt.f32 %v3285_v16  ;;  %6385 = vmatmul.msk.f32.gmra.mxu2 %vm663_vm0, %v8649_v7  ;;  %6399 = vmatmul.msk.f32.gmra.mxu3 %vm663_vm0, %v8649_v7  ;;  %vm3337_vm8 = vmor %vm3335_vm7, %vm3336_vm5  ;;  %vm3345_vm10 = vweird.f32 %v3285_v16 }
 0xb71   : > { %v3328_v49 = vsel %vm3327_vm15, %v6972_v27, %v3324_v47  ;;  %v3331_v60 = vmul.f32 %v6974_v39, %v3330_v30  ;;  %6413 = vmatmul.msk.f32.gmra.mxu0 %vm663_vm0, %v8649_v7 }
 0xb72   : > { %v3382_v34 = vmul.f32 %v3328_v49, %v8535_v46  ;;  %3962 = vmatpush.msra.mxu0 %v6463_v32 }
 0xb73   : > { %v3332_v37 = vmul.f32 0.5, %v3331_v60  ;;  %v3264_v8 = vpop.xlane.xlu0 %3263 }
 0xb74   : > { %v3394_v28 = vmul.f32 %v8611_v40, %v3382_v34  ;;  %v3277_v35 = vmul.f32 %v3264_v8, %v8281_v45 }
 0xb75   : > { %v3333_v29 = vsub.f32 1.5, %v3332_v37 }
 0xb76   : > { %v6976_v55 = vpop.eup %6975  ;;  %v8661_v41 = vadd.f32 %v8618_v26, %v3394_v28  ;;  %v3286_v4 = vadd.f32 1e-05, %v3277_v35 }
 0xb77   : > { %v3334_v6 = vmul.f32 %v6974_v39, %v3333_v29  ;;  %v3340_v38 = vmul.f32 %v6976_v55, %v3285_v16  ;;  %vm3346_vm9 = vweird.f32 %v6976_v55 }
 0xb78   : > { %6977 = vrsqrt.f32 %v3286_v4  ;;  %6386 = vmatmul.msk.f32.gmra.mxu2 %vm663_vm0, %v8661_v41  ;;  %6400 = vmatmul.msk.f32.gmra.mxu3 %vm663_vm0, %v8661_v41  ;;  %vm3347_vm11 = vmor %vm3345_vm10, %vm3346_vm9  ;;  %vm3355_vm13 = vweird.f32 %v3286_v4 }
 0xb79   : > { %v3338_v46 = vsel %vm3337_vm8, %v6974_v39, %v3334_v6  ;;  %v3341_v10 = vmul.f32 %v6976_v55, %v3340_v38  ;;  %6414 = vmatmul.msk.f32.gmra.mxu0 %vm663_vm0, %v8661_v41 }
 0xb7a   : > { %v3383_v53 = vmul.f32 %v3338_v46, %v8541_v58 }
 0xb7b   : > { %v3342_v9 = vmul.f32 0.5, %v3341_v10 }
 0xb7c   : > { %v3395_v59 = vmul.f32 %v8611_v40, %v3383_v53 }
 0xb7d   : > { %v3343_v0 = vsub.f32 1.5, %v3342_v9 }
 0xb7e   : > { %v6978_v23 = vpop.eup %6977  ;;  %v8672_v52 = vadd.f32 %v8618_v26, %v3395_v59 }
 0xb7f   : > { %v3344_v11 = vmul.f32 %v6976_v55, %v3343_v0  ;;  %v3350_v44 = vmul.f32 %v6978_v23, %v3286_v4  ;;  %vm3356_vm12 = vweird.f32 %v6978_v23 }
 0xb80   : > { %6387 = vmatmul.msk.f32.gmra.mxu2 %vm663_vm0, %v8672_v52  ;;  %6401 = vmatmul.msk.f32.gmra.mxu3 %vm663_vm0, %v8672_v52  ;;  %vm3357_vm14 = vmor %vm3355_vm13, %vm3356_vm12 }
 0xb81   : > { %v3348_v58 = vsel %vm3347_vm11, %v6976_v55, %v3344_v11  ;;  %v3351_v63 = vmul.f32 %v6978_v23, %v3350_v44  ;;  %6415 = vmatmul.msk.f32.gmra.mxu0 %vm663_vm0, %v8672_v52 }
 0xb82   : > { %v3384_v12 = vmul.f32 %v3348_v58, %v8547_v1 }
 0xb83   : > { %v3352_v14 = vmul.f32 0.5, %v3351_v63 }
 0xb84   : > { %v3396_v15 = vmul.f32 %v8611_v40, %v3384_v12 }
 0xb85   : > { %v3353_v56 = vsub.f32 1.5, %v3352_v14 }
 0xb86   : > { %v8683_v24 = vadd.f32 %v8618_v26, %v3396_v15  ;;  %v6781_v15 = vld [vmem:[%s9762_s7 + $0x4] ss:$0 sm:$0xff] }
 0xb87   : > { %v3354_v50 = vmul.f32 %v6978_v23, %v3353_v56 }
 0xb88   : > { %6388 = vmatmul.msk.f32.gmra.mxu2 %vm663_vm0, %v8683_v24  ;;  %6402 = vmatmul.msk.f32.gmra.mxu3 %vm663_vm0, %v8683_v24 }
 0xb89   : > { %v3358_v22 = vsel %vm3357_vm14, %v6978_v23, %v3354_v50  ;;  %6416 = vmatmul.msk.f32.gmra.mxu0 %vm663_vm0, %v8683_v24 }
 0xb8a   : > { %v3385_v1 = vmul.f32 %v3358_v22, %v8553_v18  ;;  %v6452_v18 = vld [vmem:[%s9790_s29 + $0xb8] sm:$0xff] }
 0xb8b   : > { %3905 = vmatpush.msrb.mxu3 %v6452_v18 }
 0xb8c   : > { %v3397_v20 = vmul.f32 %v8611_v40, %v3385_v1  ;;  %v6783_v1 = vld [vmem:[%s9760_s5 + $0x4] ss:$0 sm:$0xff] }
 0xb8d   : > { %3906 = vmatpush.msrb.mxu3 %v6451_v51 }
 0xb8e   : > { %v8694_v43 = vadd.f32 %v8618_v26, %v3397_v20 }
 0xb8f   : > { %3907 = vmatpush.msrb.mxu3 %v6450_v54 }
 0xb90   : > { %6389 = vmatmul.msk.f32.gmra.mxu2 %vm663_vm0, %v8694_v43  ;;  %6403 = vmatmul.msk.f32.gmra.mxu3 %vm663_vm0, %v8694_v43 }
 0xb91   : > { %6417 = vmatmul.msk.f32.gmra.mxu0 %vm663_vm0, %v8694_v43  ;;  %3908 = vmatpush.msrb.mxu3 %v6449_v2 }
 0xbc6   : > { %v3267_v25 = vpop.xlane.xlu1 %3266 }
 0xbc7   : > { %v3278_v3 = vmul.f32 %v3267_v25, %v8281_v45 }
 0xbc9   : > { %v3287_v5 = vadd.f32 1e-05, %v3278_v3 }
 0xbcb   : > { %6979 = vrsqrt.f32 %v3287_v5  ;;  %vm3365_vm5 = vweird.f32 %v3287_v5 }
 0xbce   : > { %v3270_v27 = vpop.xlane.xlu2 %3269 }
 0xbcf   : > { %v3279_v62 = vmul.f32 %v3270_v27, %v8281_v45 }
 0xbd1   : > { %v6980_v33 = vpop.eup %6979  ;;  %v3288_v19 = vadd.f32 1e-05, %v3279_v62 }
 0xbd2   : > { %v3360_v36 = vmul.f32 %v6980_v33, %v3287_v5  ;;  %vm3366_vm15 = vweird.f32 %v6980_v33 }
 0xbd3   : > { %6981 = vrsqrt.f32 %v3288_v19  ;;  %vm3367_vm7 = vmor %vm3365_vm5, %vm3366_vm15  ;;  %vm3375_vm9 = vweird.f32 %v3288_v19 }
 0xbd4   : > { %v3361_v61 = vmul.f32 %v6980_v33, %v3360_v36 }
 0xbd6   : > { %v3362_v39 = vmul.f32 0.5, %v3361_v61 }
 0xbd8   : > { %v3363_v16 = vsub.f32 1.5, %v3362_v39 }
 0xbd9   : > { %v6982_v47 = vpop.eup %6981 }
 0xbda   : > { %v3364_v30 = vmul.f32 %v6980_v33, %v3363_v16  ;;  %v3370_v49 = vmul.f32 %v6982_v47, %v3288_v19  ;;  %vm3376_vm8 = vweird.f32 %v6982_v47 }
 0xbdb   : > { %vm3377_vm10 = vmor %vm3375_vm9, %vm3376_vm8 }
 0xbdc   : > { %v3368_v60 = vsel %vm3367_vm7, %v6980_v33, %v3364_v30  ;;  %v3371_v34 = vmul.f32 %v6982_v47, %v3370_v49  ;;  %v8811_v30 = vld [vmem:[%s9792_s0 + $0x4] ss:$0 sm:$0xff] }
 0xbdd   : > { %v3386_v37 = vmul.f32 %v3368_v60, %v8598_v57 }
 0xbde   : > { %v3372_v8 = vmul.f32 0.5, %v3371_v34 }
 0xbdf   : > { %v3398_v28 = vmul.f32 %v8611_v40, %v3386_v37 }
 0xbe0   : > { %v3373_v35 = vsub.f32 1.5, %v3372_v8 }
 0xbe1   : > { %v8731_v29 = vadd.f32 %v8618_v26, %v3398_v28 }
 0xbe2   : > { %v3374_v55 = vmul.f32 %v6982_v47, %v3373_v35 }
 0xbe3   : > { %6390 = vmatmul.msk.f32.gmra.mxu2 %vm663_vm0, %v8731_v29  ;;  %6404 = vmatmul.msk.f32.gmra.mxu3 %vm663_vm0, %v8731_v29  ;;  %v3466_v2 = vpop.f32.mrf.mxu2 }
 0xbe4   : > { %v3378_v4 = vsel %vm3377_vm10, %v6982_v47, %v3374_v55  ;;  %6418 = vmatmul.msk.f32.gmra.mxu0 %vm663_vm0, %v8731_v29  ;;  %v3467_v60 = vadd.f32 %v8811_v30, %v3466_v2 }
 0xbe5   : > { %v3387_v57 = vmul.f32 %v3378_v4, %v8606_v48  ;;  %v3574_v48 = vpop.f32.mrf.mxu0 }
 0xbe6   : > { %v3575_v33 = vadd.f32 %v6781_v15, %v3574_v48  ;;  %v3601_v28 = vmul.f32 0.35355338, %v3467_v60 }
 0xbe7   : > { %v3399_v6 = vmul.f32 %v8611_v40, %v3387_v57  ;;  %v8774_v40 = vpop.f32.mrf.mxu3 }
 0xbe8   : > { %v3521_v34 = vadd.f32 %v6783_v1, %v8774_v40 }
 0xbe9   : > { %v8742_v38 = vadd.f32 %v8618_v26, %v3399_v6 }
 0xbeb   : > { %6391 = vmatmul.msk.f32.gmra.mxu2 %vm663_vm0, %v8742_v38  ;;  %6405 = vmatmul.msk.f32.gmra.mxu3 %vm663_vm0, %v8742_v38  ;;  %v3469_v39 = vpop.f32.mrf.mxu2 }
 0xbec   : > { %6419 = vmatmul.msk.f32.gmra.mxu0 %vm663_vm0, %v8742_v38  ;;  %v3470_v35 = vadd.f32 %v8811_v30, %v3469_v39 }
 0xbed   : > { %v3577_v26 = vpop.f32.mrf.mxu0 }
 0xbee   : > { %v3578_v54 = vadd.f32 %v6781_v15, %v3577_v26  ;;  %v3602_v4 = vmul.f32 0.35355338, %v3470_v35 }
 0xbef   : > { %v3523_v46 = vpop.f32.mrf.mxu3 }
 0xbf0   : > { %v3524_v49 = vadd.f32 %v6783_v1, %v3523_v46 }
 0xbf3   : > { %6454 = vmatmul.msk.f32.vlgmr.msrb.gmra.mxu3 %vm663_vm0, %v8625_v21  ;;  %v3472_v37 = vpop.f32.mrf.mxu2 }
 0xbf4   : > { %6468 = vmatmul.msk.f32.vlgmr.msra.gmra.mxu0 %vm663_vm0, %v8625_v21  ;;  %v3473_v6 = vadd.f32 %v8811_v30, %v3472_v37 }
 0xbf5   : > { %v3580_v10 = vpop.f32.mrf.mxu0 }
 0xbf6   : > { %v3581_v51 = vadd.f32 %v6781_v15, %v3580_v10  ;;  %v3603_v26 = vmul.f32 0.35355338, %v3473_v6 }
 0xbf7   : > { %v3526_v53 = vpop.f32.mrf.mxu3 }
 0xbf8   : > { %v3527_v16 = vadd.f32 %v6783_v1, %v3526_v53 }
 0xbfb   : > { %6455 = vmatmul.msk.f32.gmra.mxu3 %vm663_vm0, %v8637_v31  ;;  %v3475_v57 = vpop.f32.mrf.mxu2 }
 0xbfc   : > { %6469 = vmatmul.msk.f32.gmra.mxu0 %vm663_vm0, %v8637_v31  ;;  %v3476_v46 = vadd.f32 %v8811_v30, %v3475_v57 }
 0xbfd   : > { %v3583_v9 = vpop.f32.mrf.mxu0 }
 0xbfe   : > { %v3584_v62 = vadd.f32 %v6781_v15, %v3583_v9  ;;  %v3604_v53 = vmul.f32 0.35355338, %v3476_v46 }
 0xbff   : > { %v3529_v59 = vpop.f32.mrf.mxu3 }
 0xc00   : > { %v3530_v61 = vadd.f32 %v6783_v1, %v3529_v59 }
 0xc03   : > { %6456 = vmatmul.msk.f32.gmra.mxu3 %vm663_vm0, %v8649_v7  ;;  %v3478_v40 = vpop.f32.mrf.mxu2 }
 0xc04   : > { %6470 = vmatmul.msk.f32.gmra.mxu0 %vm663_vm0, %v8649_v7  ;;  %v3479_v9 = vadd.f32 %v8811_v30, %v3478_v40 }
 0xc05   : > { %v3586_v0 = vpop.f32.mrf.mxu0 }
 0xc06   : > { %v3587_v13 = vadd.f32 %v6781_v15, %v3586_v0  ;;  %v6784_v0 = vld [vmem:[%s9760_s5 + $0x5] ss:$0 sm:$0xff] }
 0xc07   : > { %v3532_v23 = vpop.f32.mrf.mxu3 }
 0xc08   : > { %v3533_v32 = vadd.f32 %v6783_v1, %v3532_v23 }
 0xc0b   : > { %6457 = vmatmul.msk.f32.gmra.mxu3 %vm663_vm0, %v8661_v41  ;;  %v3481_v59 = vpop.f32.mrf.mxu2 }
 0xc0c   : > { %6471 = vmatmul.msk.f32.gmra.mxu0 %vm663_vm0, %v8661_v41 }
 0xc0d   : > { %v3589_v11 = vpop.f32.mrf.mxu0 }
 0xc0e   : > { %v3590_v5 = vadd.f32 %v6781_v15, %v3589_v11  ;;  %v3605_v11 = vmul.f32 0.35355338, %v3479_v9 }
 0xc0f   : > { %v3535_v44 = vpop.f32.mrf.mxu3 }
 0xc10   : > { %v3536_v19 = vadd.f32 %v6783_v1, %v3535_v44 }
 0xc13   : > { %6458 = vmatmul.msk.f32.gmra.mxu3 %vm663_vm0, %v8672_v52 }
 0xc14   : > { %6472 = vmatmul.msk.f32.gmra.mxu0 %vm663_vm0, %v8672_v52 }
 0xc15   : > { %v3592_v58 = vpop.f32.mrf.mxu0 }
 0xc16   : > { %v3593_v20 = vadd.f32 %v6781_v15, %v3592_v58  ;;  %v6480_v58 = vld [vmem:[%s9761_s6 + $0xb8] sm:$0xff] }
 0xc17   : > { %v3538_v63 = vpop.f32.mrf.mxu3 }
 0xc18   : > { %v3539_v42 = vadd.f32 %v6783_v1, %v3538_v63  ;;  %v6479_v63 = vld [vmem:[%s9761_s6 + $0xb0] sm:$0xff] }
 0xc1b   : > { %6459 = vmatmul.msk.f32.gmra.mxu3 %vm663_vm0, %v8683_v24 }
 0xc1c   : > { %6473 = vmatmul.msk.f32.gmra.mxu0 %vm663_vm0, %v8683_v24 }
 0xc23   : > { %6460 = vmatmul.msk.f32.gmra.mxu3 %vm663_vm0, %v8694_v43 }
 0xc24   : > { %6474 = vmatmul.msk.f32.gmra.mxu0 %vm663_vm0, %v8694_v43 }
 0xc2b   : > { %6461 = vmatmul.msk.f32.gmra.mxu3 %vm663_vm0, %v8731_v29 }
 0xc2c   : > { %6475 = vmatmul.msk.f32.gmra.mxu0 %vm663_vm0, %v8731_v29 }
 0xc33   : > { %6462 = vmatmul.msk.f32.gmra.mxu3 %vm663_vm0, %v8742_v38 }
 0xc34   : > { %6476 = vmatmul.msk.f32.gmra.mxu0 %vm663_vm0, %v8742_v38 }
 0xc61   : > { %v3595_v12 = vpop.f32.mrf.mxu0 }
 0xc62   : > { %v3596_v22 = vadd.f32 %v6781_v15, %v3595_v12  ;;  %v3482_v12 = vadd.f32 %v8811_v30, %v3481_v59 }
 0xc66   : > { %v3541_v14 = vpop.f32.mrf.mxu3 }
 0xc67   : > { %v3542_v27 = vadd.f32 %v6783_v1, %v3541_v14 }
 0xc69   : > { %v3598_v56 = vpop.f32.mrf.mxu0 }
 0xc6a   : > { %v3599_v50 = vadd.f32 %v6781_v15, %v3598_v56  ;;  %v6478_v15 = vld [vmem:[%s9761_s6 + $0xa8] sm:$0xff]  ;;  %v6477_v56 = vld [vmem:[%s9761_s6 + $0xa0] sm:$0xff] }
 0xc6c   : > { %6438 = vmatpush.msk.msra.mxu2 %vm1057_vm2, %v3599_v50  ;;  %v3484_v50 = vpop.f32.mrf.mxu2 }
 0xc6e   : > { %3827 = vmatpush.msra.mxu2 %v3596_v22  ;;  %v3544_v25 = vpop.f32.mrf.mxu3  ;;  %v3606_v22 = vmul.f32 0.35355338, %v3482_v12 }
 0xc6f   : > { %v3545_v3 = vadd.f32 %v6783_v1, %v3544_v25 }
 0xc70   : > { %3828 = vmatpush.msra.mxu2 %v3593_v20  ;;  %v3485_v20 = vadd.f32 %v8811_v30, %v3484_v50 }
 0xc71   : > { %v8795_v18 = vpop.f32.mrf.mxu0  ;;  %6420 = vmatpush.xpose.msk.msra.mxu1 %vm848_vm1, %v3545_v3 }
 0xc72   : > { %3829 = vmatpush.msra.mxu2 %v3590_v5  ;;  %v3607_v5 = vmul.f32 0.35355338, %v3485_v20 }
 0xc74   : > { %3830 = vmatpush.msra.mxu2 %v3587_v13  ;;  %v3487_v3 = vpop.f32.mrf.mxu2 }
 0xc75   : > { %6421 = vmatpush.xpose.msk.msra.mxu1 %vm848_vm1, %v3542_v27  ;;  %v3488_v27 = vadd.f32 %v8811_v30, %v3487_v3 }
 0xc76   : > { %3831 = vmatpush.msra.mxu2 %v3584_v62 }
 0xc78   : > { %3832 = vmatpush.msra.mxu2 %v3581_v51  ;;  %v3608_v51 = vmul.f32 0.35355338, %v3488_v27 }
 0xc79   : > { %v8799_v17 = vpop.f32.mrf.mxu0  ;;  %6422 = vmatpush.xpose.msk.msra.mxu1 %vm848_vm1, %v3539_v42 }
 0xc7a   : > { %3833 = vmatpush.msra.mxu2 %v3578_v54 }
 0xc7c   : > { %3834 = vmatpush.msra.mxu2 %v3575_v33  ;;  %v3490_v54 = vpop.f32.mrf.mxu2 }
 0xc7d   : > { %6423 = vmatpush.xpose.msk.msra.mxu1 %vm848_vm1, %v3536_v19  ;;  %v3491_v33 = vadd.f32 %v8811_v30, %v3490_v54  ;;  %v3968_v19 = vadd.f32 %v6784_v0, %v8799_v17 }
 0xc7f   : > { %v3609_v2 = vmul.f32 0.35355338, %v3491_v33 }
 0xc81   : > { %v8803_v36 = vpop.f32.mrf.mxu0  ;;  %6424 = vmatpush.xpose.msk.msra.mxu1 %vm848_vm1, %v3533_v32  ;;  %v3965_v32 = vadd.f32 %v6784_v0, %v8795_v18 }
 0xc82   : > { %v3971_v42 = vadd.f32 %v6784_v0, %v8803_v36 }
 0xc85   : > { %6425 = vmatpush.xpose.msk.msra.mxu1 %vm848_vm1, %v3530_v61 }
 0xc89   : > { %v3973_v47 = vpop.f32.mrf.mxu0  ;;  %6426 = vmatpush.xpose.msk.msra.mxu1 %vm848_vm1, %v3527_v16 }
 0xc8a   : > { %v3974_v62 = vadd.f32 %v6784_v0, %v3973_v47 }
 0xc8d   : > { %6427 = vmatpush.xpose.msk.msra.mxu1 %vm848_vm1, %v3524_v49 }
 0xc91   : > { %v3976_v8 = vpop.f32.mrf.mxu0  ;;  %6428 = vmatpush.xpose.msk.msra.mxu1 %vm848_vm1, %v3521_v34 }
 0xc92   : > { %v3977_v13 = vadd.f32 %v6784_v0, %v3976_v8 }
 0xc94   : > { %6429 = vmatmul.msk.f32.vlgmr.msra.gmra.mxu1 %vm848_vm1, %v3601_v28 }
 0xc95   : > { %4013 = vmatpush.msrb.mxu1 %v6480_v58 }
 0xc97   : > { %4014 = vmatpush.msrb.mxu1 %v6479_v63 }
 0xc99   : > { %v3979_v55 = vpop.f32.mrf.mxu0  ;;  %4015 = vmatpush.msrb.mxu1 %v6478_v15  ;;  %v6786_v15 = vld [vmem:[%s9762_s7 + $0x5] ss:$0 sm:$0xff] }
 0xc9a   : > { %v3980_v25 = vadd.f32 %v6784_v0, %v3979_v55 }
 0xc9b   : > { %4016 = vmatpush.msrb.mxu1 %v6477_v56 }
 0xc9c   : > { %6430 = vmatmul.msk.f32.gmra.mxu1 %vm848_vm1, %v3602_v4 }
 0xca1   : > { %v3982_v48 = vpop.f32.mrf.mxu0 }
 0xca2   : > { %v3983_v1 = vadd.f32 %v6784_v0, %v3982_v48 }
 0xca4   : > { %6431 = vmatmul.msk.f32.gmra.mxu1 %vm848_vm1, %v3603_v26 }
 0xca9   : > { %v3985_v10 = vpop.f32.mrf.mxu0 }
 0xcaa   : > { %v3986_v14 = vadd.f32 %v6784_v0, %v3985_v10 }
 0xcac   : > { %6432 = vmatmul.msk.f32.gmra.mxu1 %vm848_vm1, %v3604_v53 }
 0xcb1   : > { %v3988_v23 = vpop.f32.mrf.mxu0 }
 0xcb2   : > { %v3989_v44 = vadd.f32 %v6784_v0, %v3988_v23 }
 0xcb4   : > { %6491 = vmatpush.xpose.msk.msrb.mxu2 %vm848_vm1, %v3989_v44  ;;  %6433 = vmatmul.msk.f32.gmra.mxu1 %vm848_vm1, %v3605_v11 }
 0xcb8   : > { %6492 = vmatpush.xpose.msk.msrb.mxu2 %vm848_vm1, %v3986_v14 }
 0xcbc   : > { %6493 = vmatpush.xpose.msk.msrb.mxu2 %vm848_vm1, %v3983_v1  ;;  %6434 = vmatmul.msk.f32.gmra.mxu1 %vm848_vm1, %v3606_v22 }
 0xcc0   : > { %6494 = vmatpush.xpose.msk.msrb.mxu2 %vm848_vm1, %v3980_v25 }
 0xcc4   : > { %6495 = vmatpush.xpose.msk.msrb.mxu2 %vm848_vm1, %v3977_v13  ;;  %6435 = vmatmul.msk.f32.gmra.mxu1 %vm848_vm1, %v3607_v5 }
 0xcc8   : > { %6496 = vmatpush.xpose.msk.msrb.mxu2 %vm848_vm1, %v3974_v62 }
 0xccc   : > { %6497 = vmatpush.xpose.msk.msrb.mxu2 %vm848_vm1, %v3971_v42  ;;  %6436 = vmatmul.msk.f32.gmra.mxu1 %vm848_vm1, %v3608_v51 }
 0xcd0   : > { %6498 = vmatpush.xpose.msk.msrb.mxu2 %vm848_vm1, %v3968_v19 }
 0xcd4   : > { %6499 = vmatpush.xpose.msk.msrb.mxu2 %vm848_vm1, %v3965_v32  ;;  %6437 = vmatmul.msk.f32.gmra.mxu1 %vm848_vm1, %v3609_v2 }
 0xcdc   : > { %6482 = vmatmul.msk.f32.vlgmr.msrb.gmra.mxu1 %vm663_vm0, %v8625_v21 }
 0xce4   : > { %6483 = vmatmul.msk.f32.gmra.mxu1 %vm663_vm0, %v8637_v31 }
 0xcec   : > { %6484 = vmatmul.msk.f32.gmra.mxu1 %vm663_vm0, %v8649_v7 }
 0xcf4   : > { %6485 = vmatmul.msk.f32.gmra.mxu1 %vm663_vm0, %v8661_v41 }
 0xcfc   : > { %6486 = vmatmul.msk.f32.gmra.mxu1 %vm663_vm0, %v8672_v52 }
 0xd04   : > { %6487 = vmatmul.msk.f32.gmra.mxu1 %vm663_vm0, %v8683_v24 }
 0xd0c   : > { %6488 = vmatmul.msk.f32.gmra.mxu1 %vm663_vm0, %v8694_v43 }
 0xd11   : > { %v3681_v18 = vpop.f32.mrf.mxu1 }
 0xd12   : > { %v3708_v17 = vsel %vm947_vm3, %v3681_v18, -inf }
 0xd13   : > { %3709 = vmax.xlane.f32.xlu0 %v3708_v17 }
 0xd14   : > { %6489 = vmatmul.msk.f32.gmra.mxu1 %vm663_vm0, %v8731_v29 }
 0xd19   : > { %v3684_v36 = vpop.f32.mrf.mxu1 }
 0xd1a   : > { %v3711_v61 = vsel %vm947_vm3, %v3684_v36, -inf }
 0xd1b   : > { %3712 = vmax.xlane.f32.xlu1 %v3711_v61 }
 0xd1c   : > { %6490 = vmatmul.msk.f32.gmra.mxu1 %vm663_vm0, %v8742_v38 }
 0xd21   : > { %v3687_v39 = vpop.f32.mrf.mxu1 }
 0xd22   : > { %v3714_v16 = vsel %vm947_vm3, %v3687_v39, -inf }
 0xd23   : > { %3715 = vmax.xlane.f32.xlu2 %v3714_v16 }
 0xd29   : > { %v3690_v47 = vpop.f32.mrf.mxu1 }
 0xd2a   : > { %v3717_v30 = vsel %vm947_vm3, %v3690_v47, -inf }
 0xd2b   : > { %3718 = vmax.xlane.f32.xlu0 %v3717_v30 }
 0xd31   : > { %v8883_v49 = vpop.f32.mrf.mxu1 }
 0xd32   : > { %v3720_v60 = vsel %vm947_vm3, %v8883_v49, -inf }
 0xd33   : > { %3721 = vmax.xlane.f32.xlu1 %v3720_v60 }
 0xd39   : > { %v8887_v34 = vpop.f32.mrf.mxu1 }
 0xd3a   : > { %v3723_v37 = vsel %vm947_vm3, %v8887_v34, -inf }
 0xd3b   : > { %3724 = vmax.xlane.f32.xlu2 %v3723_v37 }
 0xd41   : > { %v8891_v8 = vpop.f32.mrf.mxu1 }
 0xd42   : > { %v3726_v28 = vsel %vm947_vm3, %v8891_v8, -inf }
 0xd43   : > { %3727 = vmax.xlane.f32.xlu0 %v3726_v28 }
 0xd49   : > { %v8895_v35 = vpop.f32.mrf.mxu1 }
 0xd4a   : > { %v3729_v55 = vsel %vm947_vm3, %v8895_v35, -inf }
 0xd4b   : > { %3730 = vmax.xlane.f32.xlu1 %v3729_v55  ;;  %v3910_v55 = vpop.f32.mrf.mxu3 }
 0xd51   : > { %v8899_v4 = vpop.f32.mrf.mxu1 }
 0xd52   : > { %v3732_v57 = vsel %vm972_vm4, %v8899_v4, -inf }
 0xd53   : > { %3733 = vmax.xlane.f32.xlu2 %v3732_v57 }
 0xd59   : > { %v4018_v6 = vpop.f32.mrf.mxu1 }
 0xd5a   : > { %v4019_v17 = vadd.f32 %v6786_v15, %v4018_v6 }
 0xd61   : > { %v4021_v48 = vpop.f32.mrf.mxu1 }
 0xd62   : > { %v4022_v2 = vadd.f32 %v6786_v15, %v4021_v48 }
 0xd69   : > { %v4024_v26 = vpop.f32.mrf.mxu1 }
 0xd6a   : > { %v4025_v54 = vadd.f32 %v6786_v15, %v4024_v26 }
 0xd71   : > { %v4027_v40 = vpop.f32.mrf.mxu1 }
 0xd72   : > { %v4028_v42 = vadd.f32 %v6786_v15, %v4027_v40  ;;  %v3913_v40 = vpop.f32.mrf.mxu3 }
 0xd79   : > { %v4030_v46 = vpop.f32.mrf.mxu1 }
 0xd7a   : > { %v4031_v51 = vadd.f32 %v6786_v15, %v4030_v46 }
 0xd81   : > { %v4033_v10 = vpop.f32.mrf.mxu1 }
 0xd82   : > { %v4034_v13 = vadd.f32 %v6786_v15, %v4033_v10 }
 0xd86   : > { %v3710_v53 = vpop.xlane.xlu0 %3709 }
 0xd87   : > { %v3735_v9 = vsub.f32 %v3681_v18, %v3710_v53  ;;  %v3916_v53 = vpop.f32.mrf.mxu3 }
 0xd89   : > { %v3744_v59 = vmul.f32 1.442695, %v3735_v9  ;;  %v4036_v0 = vpop.f32.mrf.mxu1 }
 0xd8a   : > { %v4037_v25 = vadd.f32 %v6786_v15, %v4036_v0 }
 0xd8b   : > { %6983 = vpow2.f32 %v3744_v59 }
 0xd8e   : > { %v3713_v23 = vpop.xlane.xlu1 %3712 }
 0xd8f   : > { %v3736_v11 = vsub.f32 %v3684_v36, %v3713_v23  ;;  %v3919_v59 = vpop.f32.mrf.mxu3 }
 0xd91   : > { %v8903_v44 = vpop.eup %6983  ;;  %v3746_v58 = vmul.f32 1.442695, %v3736_v11  ;;  %v4039_v63 = vpop.f32.mrf.mxu1 }
 0xd92   : > { %6439 = vmatmul.msk.f32.vlgmr.msra.gmra.mxu2 %vm947_vm3, %v8903_v44  ;;  %v4040_v20 = vadd.f32 %v6786_v15, %v4039_v63 }
 0xd93   : > { %6985 = vpow2.f32 %v3746_v58 }
 0xd96   : > { %v3716_v12 = vpop.xlane.xlu2 %3715 }
 0xd97   : > { %v3737_v14 = vsub.f32 %v3687_v39, %v3716_v12  ;;  %v3922_v58 = vpop.f32.mrf.mxu3 }
 0xd99   : > { %v8910_v56 = vpop.eup %6985  ;;  %v3748_v50 = vmul.f32 1.442695, %v3737_v14  ;;  %v4042_v22 = vpop.f32.mrf.mxu1 }
 0xd9a   : > { %v4043_v1 = vadd.f32 %v6786_v15, %v4042_v22  ;;  %6440 = vmatmul.msk.f32.gmra.mxu2 %vm947_vm3, %v8910_v56  ;;  %v6541_v22 = vld [vmem:[%s9790_s29 + $0xd8] sm:$0xff] }
 0xd9b   : > { %6987 = vpow2.f32 %v3748_v50  ;;  %4491 = vmatpush.msra.mxu2 %v6541_v22 }
 0xd9c   : > { %6509 = vmatpush.msk.msra.mxu3 %vm1057_vm2, %v4043_v1 }
 0xd9e   : > { %v3719_v3 = vpop.xlane.xlu0 %3718  ;;  %4271 = vmatpush.msra.mxu3 %v4040_v20 }
 0xd9f   : > { %v3738_v5 = vsub.f32 %v3690_v47, %v3719_v3  ;;  %v3925_v14 = vpop.f32.mrf.mxu3  ;;  %v6539_v3 = vld [vmem:[%s9790_s29 + $0xc8] sm:$0xff] }
 0xda0   : > { %4272 = vmatpush.msra.mxu3 %v4037_v25  ;;  %v6540_v25 = vld [vmem:[%s9790_s29 + $0xd0] sm:$0xff] }
 0xda1   : > { %v8915_v27 = vpop.eup %6987  ;;  %v3750_v62 = vmul.f32 1.442695, %v3738_v5  ;;  %4492 = vmatpush.msra.mxu2 %v6540_v25 }
 0xda2   : > { %6441 = vmatmul.msk.f32.gmra.mxu2 %vm947_vm3, %v8915_v27  ;;  %4273 = vmatpush.msra.mxu3 %v4034_v13  ;;  %v6538_v13 = vld [vmem:[%s9790_s29 + $0xc0] sm:$0xff] }
 0xda3   : > { %6989 = vpow2.f32 %v3750_v62  ;;  %4493 = vmatpush.msra.mxu2 %v6539_v3 }
 0xda4   : > { %4274 = vmatpush.msra.mxu3 %v4031_v51 }
 0xda5   : > { %4494 = vmatpush.msra.mxu2 %v6538_v13 }
 0xda6   : > { %v3722_v33 = vpop.xlane.xlu1 %3721  ;;  %4275 = vmatpush.msra.mxu3 %v4028_v42 }
 0xda7   : > { %v3739_v19 = vsub.f32 %v8883_v49, %v3722_v33  ;;  %v3928_v20 = vpop.f32.mrf.mxu3 }
 0xda8   : > { %4276 = vmatpush.msra.mxu3 %v4025_v54 }
 0xda9   : > { %v8920_v32 = vpop.eup %6989  ;;  %v3752_v18 = vmul.f32 1.442695, %v3739_v19 }
 0xdaa   : > { %6442 = vmatmul.msk.f32.gmra.mxu2 %vm947_vm3, %v8920_v32  ;;  %4277 = vmatpush.msra.mxu3 %v4022_v2 }
 0xdab   : > { %6991 = vpow2.f32 %v3752_v18 }
 0xdac   : > { %4278 = vmatpush.msra.mxu3 %v4019_v17 }
 0xdae   : > { %v3725_v36 = vpop.xlane.xlu2 %3724 }
 0xdaf   : > { %v3740_v61 = vsub.f32 %v8887_v34, %v3725_v36  ;;  %v3931_v51 = vpop.f32.mrf.mxu3 }
 0xdb1   : > { %v8925_v39 = vpop.eup %6991  ;;  %v3754_v16 = vmul.f32 1.442695, %v3740_v61 }
 0xdb2   : > { %6443 = vmatmul.msk.f32.gmra.mxu2 %vm947_vm3, %v8925_v39 }
 0xdb3   : > { %6993 = vpow2.f32 %v3754_v16 }
 0xdb6   : > { %v3728_v47 = vpop.xlane.xlu0 %3727 }
 0xdb7   : > { %v3741_v30 = vsub.f32 %v8891_v8, %v3728_v47  ;;  %v3934_v19 = vpop.f32.mrf.mxu3 }
 0xdb9   : > { %v8930_v49 = vpop.eup %6993  ;;  %v3756_v60 = vmul.f32 1.442695, %v3741_v30 }
 0xdba   : > { %6444 = vmatmul.msk.f32.gmra.mxu2 %vm947_vm3, %v8930_v49 }
 0xdbb   : > { %6995 = vpow2.f32 %v3756_v60 }
 0xdbe   : > { %v3731_v37 = vpop.xlane.xlu1 %3730 }
 0xdbf   : > { %v3742_v34 = vsub.f32 %v8895_v35, %v3731_v37  ;;  %v6785_v35 = vld [vmem:[%s9792_s0 + $0x5] ss:$0 sm:$0xff] }
 0xdc0   : > { %v3911_v10 = vadd.f32 %v6785_v35, %v3910_v55  ;;  %v3914_v9 = vadd.f32 %v6785_v35, %v3913_v40  ;;  %v3917_v23 = vadd.f32 %v6785_v35, %v3916_v53  ;;  %v3920_v63 = vadd.f32 %v6785_v35, %v3919_v59 }
 0xdc1   : > { %v8935_v28 = vpop.eup %6995  ;;  %v3758_v57 = vmul.f32 1.442695, %v3742_v34  ;;  %v3923_v15 = vadd.f32 %v6785_v35, %v3922_v58  ;;  %v3926_v1 = vadd.f32 %v6785_v35, %v3925_v14  ;;  %v3929_v62 = vadd.f32 %v6785_v35, %v3928_v20 }
 0xdc2   : > { %6445 = vmatmul.msk.f32.gmra.mxu2 %vm947_vm3, %v8935_v28  ;;  %v4046_v0 = vmul.f32 0.35355338, %v3914_v9  ;;  %v4047_v11 = vmul.f32 0.35355338, %v3917_v23  ;;  %v4048_v12 = vmul.f32 0.35355338, %v3920_v63  ;;  %v3932_v54 = vadd.f32 %v6785_v35, %v3931_v51 }
 0xdc3   : > { %6997 = vpow2.f32 %v3758_v57  ;;  %v4049_v50 = vmul.f32 0.35355338, %v3923_v15  ;;  %v4050_v5 = vmul.f32 0.35355338, %v3926_v1  ;;  %v4051_v42 = vmul.f32 0.35355338, %v3929_v62 }
 0xdc4   : > { %v4052_v33 = vmul.f32 0.35355338, %v3932_v54  ;;  %v3935_v2 = vadd.f32 %v6785_v35, %v3934_v19  ;;  %v6555_v54 = vld [vmem:[%s9787_s2 + $0xd8] sm:$0xff] }
 0xdc5   : > { %4545 = vmatpush.msrb.mxu3 %v6555_v54 }
 0xdc6   : > { %v3734_v6 = vpop.xlane.xlu2 %3733  ;;  %v4053_v17 = vmul.f32 0.35355338, %v3935_v2 }
 0xdc7   : > { %v3743_v8 = vsub.f32 %v8899_v4, %v3734_v6  ;;  %v4045_v4 = vmul.f32 0.35355338, %v3911_v10 }
 0xdc9   : > { %v8940_v48 = vpop.eup %6997  ;;  %v3760_v26 = vmul.f32 1.442695, %v3743_v8 }
 0xdca   : > { %6446 = vmatmul.msk.f32.gmra.mxu2 %vm947_vm3, %v8940_v48 }
 0xdcb   : > { %6999 = vpow2.f32 %v3760_v26 }
 0xdd1   : > { %v8947_v46 = vpop.eup %6999 }
 0xdd2   : > { %6447 = vmatmul.msk.f32.gmra.mxu2 %vm947_vm3, %v8947_v46 }
 0xdda   : > { %6500 = vmatmul.msk.f32.vlgmr.msrb.gmra.mxu2 %vm848_vm1, %v4045_v4 }
 0xde2   : > { %6501 = vmatmul.msk.f32.gmra.mxu2 %vm848_vm1, %v4046_v0 }
 0xdea   : > { %6502 = vmatmul.msk.f32.gmra.mxu2 %vm848_vm1, %v4047_v11 }
 0xdf2   : > { %6503 = vmatmul.msk.f32.gmra.mxu2 %vm848_vm1, %v4048_v12 }
 0xdfa   : > { %6504 = vmatmul.msk.f32.gmra.mxu2 %vm848_vm1, %v4049_v50 }
 0xe02   : > { %6505 = vmatmul.msk.f32.gmra.mxu2 %vm848_vm1, %v4050_v5 }
 0xe0a   : > { %6506 = vmatmul.msk.f32.gmra.mxu2 %vm848_vm1, %v4051_v42 }
 0xe12   : > { %6507 = vmatmul.msk.f32.gmra.mxu2 %vm848_vm1, %v4052_v33 }
 0xe15   : > { %v8971_v18 = vpop.f32.mrf.mxu2 }
 0xe1a   : > { %6508 = vmatmul.msk.f32.gmra.mxu2 %vm848_vm1, %v4053_v17 }
 0xe1d   : > { %v8974_v36 = vpop.f32.mrf.mxu2 }
 0xe22   : > { %6543 = vmatmul.msk.f32.vlgmr.msra.gmra.mxu2 %vm663_vm0, %v8625_v21 }
 0xe25   : > { %v8978_v61 = vpop.f32.mrf.mxu2 }
 0xe2a   : > { %6544 = vmatmul.msk.f32.gmra.mxu2 %vm663_vm0, %v8637_v31 }
 0xe2d   : > { %v8982_v16 = vpop.f32.mrf.mxu2 }
 0xe32   : > { %6545 = vmatmul.msk.f32.gmra.mxu2 %vm663_vm0, %v8649_v7 }
 0xe35   : > { %v8986_v47 = vpop.f32.mrf.mxu2 }
 0xe3a   : > { %6546 = vmatmul.msk.f32.gmra.mxu2 %vm663_vm0, %v8661_v41 }
 0xe3d   : > { %v8990_v30 = vpop.f32.mrf.mxu2 }
 0xe42   : > { %6547 = vmatmul.msk.f32.gmra.mxu2 %vm663_vm0, %v8672_v52 }
 0xe45   : > { %v8994_v60 = vpop.f32.mrf.mxu2 }
 0xe4a   : > { %6548 = vmatmul.msk.f32.gmra.mxu2 %vm663_vm0, %v8683_v24 }
 0xe4d   : > { %v8998_v37 = vpop.f32.mrf.mxu2 }
 0xe52   : > { %6549 = vmatmul.msk.f32.gmra.mxu2 %vm663_vm0, %v8694_v43 }
 0xe55   : > { %v9002_v34 = vpop.f32.mrf.mxu2 }
 0xe5a   : > { %6550 = vmatmul.msk.f32.gmra.mxu2 %vm663_vm0, %v8731_v29 }
 0xe5d   : > { %v4125_v55 = vpop.f32.mrf.mxu2 }
 0xe5e   : > { %v4152_v57 = vsel %vm947_vm3, %v4125_v55, -inf }
 0xe5f   : > { %4153 = vmax.xlane.f32.xlu0 %v4152_v57 }
 0xe62   : > { %6551 = vmatmul.msk.f32.gmra.mxu2 %vm663_vm0, %v8742_v38 }
 0xe65   : > { %v4128_v6 = vpop.f32.mrf.mxu2 }
 0xe66   : > { %v4155_v8 = vsel %vm947_vm3, %v4128_v6, -inf }
 0xe67   : > { %4156 = vmax.xlane.f32.xlu1 %v4155_v8 }
 0xe6d   : > { %v4131_v26 = vpop.f32.mrf.mxu2 }
 0xe6e   : > { %v4158_v40 = vsel %vm947_vm3, %v4131_v26, -inf }
 0xe6f   : > { %4159 = vmax.xlane.f32.xlu2 %v4158_v40 }
 0xe75   : > { %v4134_v35 = vpop.f32.mrf.mxu2 }
 0xe76   : > { %v4161_v10 = vsel %vm947_vm3, %v4134_v35, -inf }
 0xe77   : > { %4162 = vmax.xlane.f32.xlu0 %v4161_v10  ;;  %v6554_v10 = vld [vmem:[%s9787_s2 + $0xd0] sm:$0xff] }
 0xe78   : > { %4546 = vmatpush.msrb.mxu3 %v6554_v10 }
 0xe7d   : > { %v4137_v53 = vpop.f32.mrf.mxu2 }
 0xe7e   : > { %v4164_v4 = vsel %vm947_vm3, %v4137_v53, -inf }
 0xe7f   : > { %4165 = vmax.xlane.f32.xlu1 %v4164_v4 }
 0xe85   : > { %v4140_v9 = vpop.f32.mrf.mxu2 }
 0xe86   : > { %v4167_v59 = vsel %vm947_vm3, %v4140_v9, -inf }
 0xe87   : > { %4168 = vmax.xlane.f32.xlu2 %v4167_v59 }
 0xe8d   : > { %v9014_v0 = vpop.f32.mrf.mxu2 }
 0xe8e   : > { %v4170_v23 = vsel %vm947_vm3, %v9014_v0, -inf }
 0xe8f   : > { %4171 = vmax.xlane.f32.xlu0 %v4170_v23 }
 0xe95   : > { %v9018_v11 = vpop.f32.mrf.mxu2 }
 0xe96   : > { %v4173_v58 = vsel %vm947_vm3, %v9018_v11, -inf }
 0xe97   : > { %4174 = vmax.xlane.f32.xlu1 %v4173_v58 }
 0xe9d   : > { %v9022_v63 = vpop.f32.mrf.mxu2 }
 0xe9e   : > { %v4176_v12 = vsel %vm972_vm4, %v9022_v63, -inf }
 0xe9f   : > { %4177 = vmax.xlane.f32.xlu2 %v4176_v12  ;;  %v6553_v12 = vld [vmem:[%s9787_s2 + $0xc8] sm:$0xff] }
 0xea0   : > { %4547 = vmatpush.msrb.mxu3 %v6553_v12 }
 0xed2   : > { %v4154_v14 = vpop.xlane.xlu0 %4153 }
 0xed3   : > { %v4179_v15 = vsub.f32 %v4125_v55, %v4154_v14  ;;  %v3762_v55 = vsel %vm947_vm3, %v8903_v44, 0.0 }
 0xed5   : > { %v4188_v50 = vmul.f32 1.442695, %v4179_v15 }
 0xed7   : > { %7001 = vpow2.f32 %v4188_v50 }
 0xeda   : > { %v4157_v22 = vpop.xlane.xlu1 %4156 }
 0xedb   : > { %v4180_v1 = vsub.f32 %v4128_v6, %v4157_v22 }
 0xedd   : > { %v7002_v20 = vpop.eup %7001  ;;  %v4190_v25 = vmul.f32 1.442695, %v4180_v1  ;;  %v3768_v1 = vsel %vm947_vm3, %v8915_v27, 0.0 }
 0xede   : > { %6510 = vmatmul.msk.f32.vlgmr.msra.gmra.mxu3 %vm947_vm3, %v7002_v20  ;;  %v4206_v3 = vsel %vm947_vm3, %v7002_v20, 0.0 }
 0xedf   : > { %7003 = vpow2.f32 %v4190_v25  ;;  %4207 = vadd.xlane.f32.xlu0 %v4206_v3 }
 0xee2   : > { %v4160_v5 = vpop.xlane.xlu2 %4159 }
 0xee3   : > { %v4181_v13 = vsub.f32 %v4131_v26, %v4160_v5 }
 0xee5   : > { %v7004_v62 = vpop.eup %7003  ;;  %v4192_v51 = vmul.f32 1.442695, %v4181_v13  ;;  %v3771_v13 = vsel %vm947_vm3, %v8920_v32, 0.0  ;;  %v3780_v32 = vsel %vm947_vm3, %v8935_v28, 0.0  ;;  %v6448_v28 = vld [vmem:[%s9763_s8 + $0x20] sm:$0xff] }
 0xee6   : > { %6511 = vmatmul.msk.f32.gmra.mxu3 %vm947_vm3, %v7004_v62  ;;  %v4209_v42 = vsel %vm947_vm3, %v7004_v62, 0.0  ;;  %4440 = vmatpush.msra.mxu1 %v6448_v28 }
 0xee7   : > { %7005 = vpow2.f32 %v4192_v51  ;;  %4210 = vadd.xlane.f32.xlu1 %v4209_v42 }
 0xeea   : > { %v4163_v33 = vpop.xlane.xlu0 %4162 }
 0xeeb   : > { %v4182_v19 = vsub.f32 %v4134_v35, %v4163_v33 }
 0xeed   : > { %v7006_v2 = vpop.eup %7005  ;;  %v4194_v17 = vmul.f32 1.442695, %v4182_v19 }
 0xeee   : > { %6512 = vmatmul.msk.f32.gmra.mxu3 %vm947_vm3, %v7006_v2  ;;  %v4212_v57 = vsel %vm947_vm3, %v7006_v2, 0.0  ;;  %v3783_v2 = vsel %vm947_vm3, %v8940_v48, 0.0 }
 0xeef   : > { %7007 = vpow2.f32 %v4194_v17  ;;  %3763 = vadd.xlane.f32.xlu1 %v3762_v55  ;;  %4213 = vadd.xlane.f32.xlu2 %v4212_v57 }
 0xef2   : > { %v4166_v6 = vpop.xlane.xlu1 %4165 }
 0xef3   : > { %v4183_v8 = vsub.f32 %v4137_v53, %v4166_v6  ;;  %v3765_v53 = vsel %vm947_vm3, %v8910_v56, 0.0 }
 0xef5   : > { %v7008_v26 = vpop.eup %7007  ;;  %v4196_v40 = vmul.f32 1.442695, %v4183_v8 }
 0xef6   : > { %6513 = vmatmul.msk.f32.gmra.mxu3 %vm947_vm3, %v7008_v26  ;;  %v4215_v35 = vsel %vm947_vm3, %v7008_v26, 0.0 }
 0xef7   : > { %7009 = vpow2.f32 %v4196_v40  ;;  %4216 = vadd.xlane.f32.xlu0 %v4215_v35 }
 0xefa   : > { %v4169_v44 = vpop.xlane.xlu2 %4168 }
 0xefb   : > { %v4184_v4 = vsub.f32 %v4140_v9, %v4169_v44  ;;  %v6552_v9 = vld [vmem:[%s9787_s2 + $0xc0] sm:$0xff] }
 0xefc   : > { %4548 = vmatpush.msrb.mxu3 %v6552_v9 }
 0xefd   : > { %v7010_v59 = vpop.eup %7009  ;;  %v4198_v23 = vmul.f32 1.442695, %v4184_v4 }
 0xefe   : > { %6514 = vmatmul.msk.f32.gmra.mxu3 %vm947_vm3, %v7010_v59  ;;  %v4218_v58 = vsel %vm947_vm3, %v7010_v59, 0.0 }
 0xeff   : > { %7011 = vpow2.f32 %v4198_v23  ;;  %3766 = vadd.xlane.f32.xlu0 %v3765_v53  ;;  %4219 = vadd.xlane.f32.xlu2 %v4218_v58 }
 0xf02   : > { %v4172_v14 = vpop.xlane.xlu0 %4171 }
 0xf03   : > { %v4185_v15 = vsub.f32 %v9014_v0, %v4172_v14 }
 0xf05   : > { %v7012_v50 = vpop.eup %7011  ;;  %v4200_v56 = vmul.f32 1.442695, %v4185_v15 }
 0xf06   : > { %6515 = vmatmul.msk.f32.gmra.mxu3 %vm947_vm3, %v7012_v50  ;;  %v4221_v22 = vsel %vm947_vm3, %v7012_v50, 0.0 }
 0xf07   : > { %7013 = vpow2.f32 %v4200_v56  ;;  %4222 = vadd.xlane.f32.xlu1 %v4221_v22  ;;  %3769 = vadd.xlane.f32.xlu2 %v3768_v1 }
 0xf0a   : > { %v4175_v20 = vpop.xlane.xlu1 %4174 }
 0xf0b   : > { %v4186_v25 = vsub.f32 %v9018_v11, %v4175_v20  ;;  %v3774_v11 = vsel %vm947_vm3, %v8925_v39, 0.0  ;;  %v3786_v39 = vsel %vm972_vm4, %v8947_v46, 0.0 }
 0xf0d   : > { %v7014_v3 = vpop.eup %7013  ;;  %v4202_v5 = vmul.f32 1.442695, %v4186_v25 }
 0xf0e   : > { %6516 = vmatmul.msk.f32.gmra.mxu3 %vm947_vm3, %v7014_v3  ;;  %v4224_v0 = vsel %vm947_vm3, %v7014_v3, 0.0 }
 0xf0f   : > { %7015 = vpow2.f32 %v4202_v5  ;;  %4225 = vadd.xlane.f32.xlu0 %v4224_v0  ;;  %3772 = vadd.xlane.f32.xlu1 %v3771_v13 }
 0xf12   : > { %v4178_v62 = vpop.xlane.xlu2 %4177 }
 0xf13   : > { %v4187_v27 = vsub.f32 %v9022_v63, %v4178_v62  ;;  %v3777_v63 = vsel %vm947_vm3, %v8930_v49, 0.0  ;;  %v6519_v49 = vld [vmem:[%s9763_s8 + $0x28] sm:$0xff]  ;;  %v6568_v62 = vld [vmem:[%s9761_s6 + $0xd0] sm:$0xff] }
 0xf14   : > { %4369 = vmatpush.msrb.mxu0 %v6519_v49 }
 0xf15   : > { %v7016_v51 = vpop.eup %7015  ;;  %v4204_v42 = vmul.f32 1.442695, %v4187_v27 }
 0xf16   : > { %6517 = vmatmul.msk.f32.gmra.mxu3 %vm947_vm3, %v7016_v51  ;;  %v4227_v54 = vsel %vm947_vm3, %v7016_v51, 0.0 }
 0xf17   : > { %7017 = vpow2.f32 %v4204_v42  ;;  %3775 = vadd.xlane.f32.xlu0 %v3774_v11  ;;  %4228 = vadd.xlane.f32.xlu2 %v4227_v54 }
 0xf1d   : > { %v7018_v33 = vpop.eup %7017 }
 0xf1e   : > { %6518 = vmatmul.msk.f32.gmra.mxu3 %vm947_vm3, %v7018_v33  ;;  %v4230_v19 = vsel %vm972_vm4, %v7018_v33, 0.0  ;;  %v6567_v33 = vld [vmem:[%s9761_s6 + $0xc8] sm:$0xff] }
 0xf1f   : > { %3781 = vadd.xlane.f32.xlu0 %v3780_v32  ;;  %3778 = vadd.xlane.f32.xlu2 %v3777_v63  ;;  %v6566_v32 = vld [vmem:[%s9761_s6 + $0xc0] sm:$0xff] }
 0xf20   : > { %4231 = vadd.xlane.f32.xlu1 %v4230_v19 }
 0xf26   : > { %6557 = vmatmul.msk.f32.vlgmr.msrb.gmra.mxu3 %vm663_vm0, %v8625_v21 }
 0xf27   : > { %3787 = vadd.xlane.f32.xlu2 %v3786_v39 }
 0xf28   : > { %3784 = vadd.xlane.f32.xlu1 %v3783_v2 }
 0xf2e   : > { %6558 = vmatmul.msk.f32.gmra.mxu3 %vm663_vm0, %v8637_v31 }
 0xf36   : > { %6559 = vmatmul.msk.f32.gmra.mxu3 %vm663_vm0, %v8649_v7 }
 0xf3e   : > { %6560 = vmatmul.msk.f32.gmra.mxu3 %vm663_vm0, %v8661_v41 }
 0xf46   : > { %6561 = vmatmul.msk.f32.gmra.mxu3 %vm663_vm0, %v8672_v52 }
 0xf4e   : > { %6562 = vmatmul.msk.f32.gmra.mxu3 %vm663_vm0, %v8683_v24 }
 0xf52   : > { %v4208_v48 = vpop.xlane.xlu0 %4207 }
 0xf53   : > { %7019 = vrcp.f32 %v4208_v48 }
 0xf56   : > { %6563 = vmatmul.msk.f32.gmra.mxu3 %vm663_vm0, %v8694_v43 }
 0xf59   : > { %v7020_v17 = vpop.eup %7019 }
 0xf5a   : > { %v4211_v46 = vpop.xlane.xlu1 %4210 }
 0xf5b   : > { %7021 = vrcp.f32 %v4211_v46 }
 0xf5e   : > { %6564 = vmatmul.msk.f32.gmra.mxu3 %vm663_vm0, %v8731_v29 }
 0xf61   : > { %v4280_v55 = vpop.f32.mrf.mxu3  ;;  %v7022_v8 = vpop.eup %7021 }
 0xf62   : > { %v4316_v57 = vmul.f32 %v7020_v17, %v4280_v55  ;;  %v3764_v6 = vpop.xlane.xlu1 %3763  ;;  %v4214_v26 = vpop.xlane.xlu2 %4213 }
 0xf63   : > { %7023 = vrcp.f32 %v3764_v6 }
 0xf64   : > { %6520 = vmatmul.msk.f32.vlgmr.msrb.gmra.mxu0 %vm848_vm1, %v4316_v57  ;;  %7025 = vrcp.f32 %v4214_v26 }
 0xf66   : > { %6565 = vmatmul.msk.f32.gmra.mxu3 %vm663_vm0, %v8742_v38 }
 0xf69   : > { %v7024_v40 = vpop.eup %7023  ;;  %v4283_v35 = vpop.f32.mrf.mxu3 }
 0xf6a   : > { %v3872_v10 = vmul.f32 %v7024_v40, %v8971_v18  ;;  %v4317_v44 = vmul.f32 %v7022_v8, %v4283_v35  ;;  %v4217_v4 = vpop.xlane.xlu0 %4216  ;;  %v7026_v59 = vpop.eup %7025 }
 0xf6b   : > { %7027 = vrcp.f32 %v4217_v4 }
 0xf6c   : > { %6521 = vmatmul.msk.f32.gmra.mxu0 %vm848_vm1, %v4317_v44  ;;  %6529 = vmatmul.msk.f32.vlgmr.msra.gmra.mxu1 %vm848_vm1, %v3872_v10 }
 0xf71   : > { %v4286_v23 = vpop.f32.mrf.mxu3  ;;  %v7028_v9 = vpop.eup %7027 }
 0xf72   : > { %v4318_v53 = vmul.f32 %v7026_v59, %v4286_v23  ;;  %v3767_v58 = vpop.xlane.xlu0 %3766  ;;  %v4220_v12 = vpop.xlane.xlu2 %4219 }
 0xf73   : > { %7029 = vrcp.f32 %v3767_v58 }
 0xf74   : > { %6522 = vmatmul.msk.f32.gmra.mxu0 %vm848_vm1, %v4318_v53  ;;  %7031 = vrcp.f32 %v4220_v12 }
 0xf79   : > { %v7030_v14 = vpop.eup %7029  ;;  %v4289_v15 = vpop.f32.mrf.mxu3 }
 0xf7a   : > { %v4319_v18 = vmul.f32 %v7028_v9, %v4289_v15  ;;  %v4223_v50 = vpop.xlane.xlu1 %4222  ;;  %v3770_v56 = vpop.xlane.xlu2 %3769  ;;  %v3873_v22 = vmul.f32 %v7030_v14, %v8974_v36  ;;  %v6569_v36 = vld [vmem:[%s9761_s6 + $0xd8] sm:$0xff]  ;;  %v6620_v14 = vld [vmem:[%s9790_s29 + $0xf0] sm:$0xff] }
 0xf7b   : > { %7033 = vrcp.f32 %v3770_v56  ;;  %v7032_v1 = vpop.eup %7031  ;;  %4599 = vmatpush.msra.mxu0 %v6569_v36 }
 0xf7c   : > { %6523 = vmatmul.msk.f32.gmra.mxu0 %vm848_vm1, %v4319_v18  ;;  %6530 = vmatmul.msk.f32.gmra.mxu1 %vm848_vm1, %v3873_v22  ;;  %7035 = vrcp.f32 %v4223_v50  ;;  %v6619_v18 = vld [vmem:[%s9790_s29 + $0xe8] sm:$0xff]  ;;  %v6618_v50 = vld [vmem:[%s9790_s29 + $0xe0] sm:$0xff] }
 0xf7d   : > { %4600 = vmatpush.msra.mxu0 %v6568_v62  ;;  %v4496_v62 = vpop.f32.mrf.mxu2 }
 0xf7f   : > { %4601 = vmatpush.msra.mxu0 %v6567_v33 }
 0xf81   : > { %v4292_v20 = vpop.f32.mrf.mxu3  ;;  %v7034_v25 = vpop.eup %7033  ;;  %4602 = vmatpush.msra.mxu0 %v6566_v32  ;;  %v6787_v32 = vld [vmem:[%s9792_s0 + $0x6] ss:$0 sm:$0xff] }
 0xf82   : > { %v4320_v3 = vmul.f32 %v7032_v1, %v4292_v20  ;;  %v4226_v5 = vpop.xlane.xlu0 %4225  ;;  %v3773_v0 = vpop.xlane.xlu1 %3772  ;;  %v3874_v13 = vmul.f32 %v7034_v25, %v8978_v61  ;;  %v6788_v20 = vld [vmem:[%s9760_s5 + $0x6] ss:$0 sm:$0xff] }
 0xf83   : > { %7037 = vrcp.f32 %v3773_v0  ;;  %v7036_v27 = vpop.eup %7035 }
 0xf84   : > { %6524 = vmatmul.msk.f32.gmra.mxu0 %vm848_vm1, %v4320_v3  ;;  %6531 = vmatmul.msk.f32.gmra.mxu1 %vm848_vm1, %v3874_v13  ;;  %7039 = vrcp.f32 %v4226_v5 }
 0xf89   : > { %v4295_v51 = vpop.f32.mrf.mxu3  ;;  %v7038_v42 = vpop.eup %7037 }
 0xf8a   : > { %v4321_v61 = vmul.f32 %v7036_v27, %v4295_v51  ;;  %v3776_v11 = vpop.xlane.xlu0 %3775  ;;  %v4229_v54 = vpop.xlane.xlu2 %4228  ;;  %v3875_v63 = vmul.f32 %v7038_v42, %v8982_v16 }
 0xf8b   : > { %7041 = vrcp.f32 %v3776_v11  ;;  %v7040_v19 = vpop.eup %7039  ;;  %v4499_v11 = vpop.f32.mrf.mxu2 }
 0xf8c   : > { %6525 = vmatmul.msk.f32.gmra.mxu0 %vm848_vm1, %v4321_v61  ;;  %6532 = vmatmul.msk.f32.gmra.mxu1 %vm848_vm1, %v3875_v63  ;;  %7043 = vrcp.f32 %v4229_v54 }
 0xf91   : > { %v7042_v39 = vpop.eup %7041  ;;  %v4298_v2 = vpop.f32.mrf.mxu3 }
 0xf92   : > { %v4322_v49 = vmul.f32 %v7040_v19, %v4298_v2  ;;  %v3779_v28 = vpop.xlane.xlu2 %3778  ;;  %v3876_v48 = vmul.f32 %v7042_v39, %v8986_v47  ;;  %v3782_v46 = vpop.xlane.xlu0 %3781  ;;  %v4497_v39 = vadd.f32 %v6787_v32, %v4496_v62 }
 0xf93   : > { %7045 = vrcp.f32 %v3779_v28  ;;  %v4232_v16 = vpop.xlane.xlu1 %4231  ;;  %v7044_v17 = vpop.eup %7043 }
 0xf94   : > { %6526 = vmatmul.msk.f32.gmra.mxu0 %vm848_vm1, %v4322_v49  ;;  %6533 = vmatmul.msk.f32.gmra.mxu1 %vm848_vm1, %v3876_v48  ;;  %7047 = vrcp.f32 %v3782_v46  ;;  %v4502_v2 = vpop.f32.mrf.mxu2  ;;  %v4631_v28 = vmul.f32 0.35355338, %v4497_v39 }
 0xf95   : > { %7049 = vrcp.f32 %v4232_v16  ;;  %v4500_v16 = vadd.f32 %v6787_v32, %v4499_v11 }
 0xf99   : > { %v4301_v55 = vpop.f32.mrf.mxu3  ;;  %v7046_v6 = vpop.eup %7045 }
 0xf9a   : > { %v4323_v57 = vmul.f32 %v7044_v17, %v4301_v55  ;;  %v3877_v8 = vmul.f32 %v7046_v6, %v8990_v30  ;;  %v7048_v47 = vpop.eup %7047  ;;  %v3788_v4 = vpop.xlane.xlu2 %3787  ;;  %v4632_v17 = vmul.f32 0.35355338, %v4500_v16 }
 0xf9b   : > { %v3785_v26 = vpop.xlane.xlu1 %3784  ;;  %v7050_v40 = vpop.eup %7049  ;;  %v3878_v44 = vmul.f32 %v7048_v47, %v8994_v60 }
 0xf9c   : > { %6527 = vmatmul.msk.f32.gmra.mxu0 %vm848_vm1, %v4323_v57  ;;  %6534 = vmatmul.msk.f32.gmra.mxu1 %vm848_vm1, %v3877_v8  ;;  %7051 = vrcp.f32 %v3785_v26  ;;  %v4505_v46 = vpop.f32.mrf.mxu2  ;;  %v4503_v57 = vadd.f32 %v6787_v32, %v4502_v2 }
 0xf9d   : > { %7053 = vrcp.f32 %v3788_v4  ;;  %v4506_v26 = vadd.f32 %v6787_v32, %v4505_v46 }
 0xf9e   : > { %v4633_v6 = vmul.f32 0.35355338, %v4503_v57 }
 0xfa1   : > { %v4304_v35 = vpop.f32.mrf.mxu3 }
 0xfa2   : > { %v4324_v10 = vmul.f32 %v7050_v40, %v4304_v35  ;;  %v7052_v59 = vpop.eup %7051  ;;  %v4634_v40 = vmul.f32 0.35355338, %v4506_v26 }
 0xfa3   : > { %v3879_v30 = vmul.f32 %v7052_v59, %v8998_v37  ;;  %v7054_v53 = vpop.eup %7053  ;;  %v6635_v59 = vld [vmem:[%s9787_s2 + $0xf8] sm:$0xff] }
 0xfa4   : > { %6528 = vmatmul.msk.f32.gmra.mxu0 %vm848_vm1, %v4324_v10  ;;  %6535 = vmatmul.msk.f32.gmra.mxu1 %vm848_vm1, %v3878_v44  ;;  %v3880_v12 = vmul.f32 %v7054_v53, %v9002_v34  ;;  %v6621_v34 = vld [vmem:[%s9790_s29 + $0xf8] sm:$0xff]  ;;  %v4508_v8 = vpop.f32.mrf.mxu2  ;;  %v6634_v53 = vld [vmem:[%s9787_s2 + $0xf0] sm:$0xff] }
 0xfa5   : > { %5015 = vmatpush.msrb.mxu0 %v6621_v34  ;;  %v4509_v44 = vadd.f32 %v6787_v32, %v4508_v8 }
 0xfa7   : > { %5016 = vmatpush.msrb.mxu0 %v6620_v14  ;;  %v4635_v4 = vmul.f32 0.35355338, %v4509_v44 }
 0xfa9   : > { %v9136_v23 = vpop.f32.mrf.mxu3  ;;  %5017 = vmatpush.msrb.mxu0 %v6619_v18 }
 0xfaa   : > { %v4551_v49 = vadd.f32 %v6788_v20, %v9136_v23 }
 0xfab   : > { %5018 = vmatpush.msrb.mxu0 %v6618_v50 }
 0xfac   : > { %6571 = vmatmul.msk.f32.vlgmr.msra.gmra.mxu0 %vm663_vm0, %v8625_v21  ;;  %6536 = vmatmul.msk.f32.gmra.mxu1 %vm848_vm1, %v3879_v30  ;;  %v4511_v35 = vpop.f32.mrf.mxu2 }
 0xfad   : > { %v4512_v30 = vadd.f32 %v6787_v32, %v4511_v35 }
 0xfb1   : > { %v4553_v58 = vpop.f32.mrf.mxu3 }
 0xfb2   : > { %v4554_v63 = vadd.f32 %v6788_v20, %v4553_v58  ;;  %v6633_v58 = vld [vmem:[%s9787_s2 + $0xe8] sm:$0xff] }
 0xfb4   : > { %6572 = vmatmul.msk.f32.gmra.mxu0 %vm663_vm0, %v8637_v31  ;;  %6537 = vmatmul.msk.f32.gmra.mxu1 %vm848_vm1, %v3880_v12  ;;  %v4514_v12 = vpop.f32.mrf.mxu2 }
 0xfb5   : > { %v4515_v14 = vadd.f32 %v6787_v32, %v4514_v12 }
 0xfb7   : > { %v4637_v18 = vmul.f32 0.35355338, %v4515_v14 }
 0xfb9   : > { %v4556_v60 = vpop.f32.mrf.mxu3 }
 0xfba   : > { %v4557_v33 = vadd.f32 %v6788_v20, %v4556_v60  ;;  %v6632_v60 = vld [vmem:[%s9787_s2 + $0xe0] sm:$0xff] }
 0xfbc   : > { %6573 = vmatmul.msk.f32.gmra.mxu0 %vm663_vm0, %v8649_v7 }
 0xfc1   : > { %v4559_v9 = vpop.f32.mrf.mxu3 }
 0xfc2   : > { %v4560_v61 = vadd.f32 %v6788_v20, %v4559_v9  ;;  %v4636_v9 = vmul.f32 0.35355338, %v4512_v30 }
 0xfc4   : > { %6574 = vmatmul.msk.f32.gmra.mxu0 %vm663_vm0, %v8661_v41 }
 0xfc9   : > { %v4562_v37 = vpop.f32.mrf.mxu3 }
 0xfca   : > { %v4563_v42 = vadd.f32 %v6788_v20, %v4562_v37 }
 0xfcc   : > { %6575 = vmatmul.msk.f32.gmra.mxu0 %vm663_vm0, %v8672_v52 }
 0xfd1   : > { %v4565_v15 = vpop.f32.mrf.mxu3 }
 0xfd2   : > { %v4566_v27 = vadd.f32 %v6788_v20, %v4565_v15  ;;  %v4517_v15 = vpop.f32.mrf.mxu2 }
 0xfd4   : > { %6576 = vmatmul.msk.f32.gmra.mxu0 %vm663_vm0, %v8683_v24 }
 0xfd9   : > { %v4568_v56 = vpop.f32.mrf.mxu3 }
 0xfda   : > { %v4569_v36 = vadd.f32 %v6788_v20, %v4568_v56 }
 0xfdc   : > { %6577 = vmatmul.msk.f32.gmra.mxu0 %vm663_vm0, %v8694_v43 }
 0xfe1   : > { %v9168_v22 = vpop.f32.mrf.mxu0  ;;  %v4571_v1 = vpop.f32.mrf.mxu3 }
 0xfe2   : > { %v4572_v0 = vadd.f32 %v6788_v20, %v4571_v1  ;;  %v4518_v1 = vadd.f32 %v6787_v32, %v4517_v15 }
 0xfe4   : > { %6578 = vmatmul.msk.f32.gmra.mxu0 %vm663_vm0, %v8731_v29 }
 0xfe9   : > { %v9175_v25 = vpop.f32.mrf.mxu0  ;;  %v4574_v3 = vpop.f32.mrf.mxu3 }
 0xfea   : > { %v4575_v5 = vadd.f32 %v6788_v20, %v4574_v3  ;;  %v9243_v37 = vpop.f32.mrf.mxu1  ;;  %v4638_v20 = vmul.f32 0.35355338, %v4518_v1  ;;  %v4520_v3 = vpop.f32.mrf.mxu2 }
 0xfec   : > { %6579 = vmatmul.msk.f32.gmra.mxu0 %vm663_vm0, %v8742_v38  ;;  %6580 = vmatpush.xpose.msk.msrb.mxu1 %vm848_vm1, %v4575_v5 }
 0xff0   : > { %6581 = vmatpush.xpose.msk.msrb.mxu1 %vm848_vm1, %v4572_v0 }
 0xff1   : > { %v9181_v13 = vpop.f32.mrf.mxu0 }
 0xff4   : > { %6623 = vmatmul.msk.f32.vlgmr.msrb.gmra.mxu0 %vm663_vm0, %v8625_v21  ;;  %6582 = vmatpush.xpose.msk.msrb.mxu1 %vm848_vm1, %v4569_v36  ;;  %v4521_v36 = vadd.f32 %v6787_v32, %v4520_v3  ;;  %v6789_v32 = vld [vmem:[%s9762_s7 + $0x6] ss:$0 sm:$0xff] }
 0xff6   : > { %v4639_v62 = vmul.f32 0.35355338, %v4521_v36 }
 0xff8   : > { %6583 = vmatpush.xpose.msk.msrb.mxu1 %vm848_vm1, %v4566_v27 }
 0xff9   : > { %v9187_v51 = vpop.f32.mrf.mxu0  ;;  %v9246_v50 = vpop.f32.mrf.mxu1 }
 0xffc   : > { %6624 = vmatmul.msk.f32.gmra.mxu0 %vm663_vm0, %v8637_v31  ;;  %6584 = vmatpush.xpose.msk.msrb.mxu1 %vm848_vm1, %v4563_v42 }
0x1000   : > { %6585 = vmatpush.xpose.msk.msrb.mxu1 %vm848_vm1, %v4560_v61 }
0x1001   : > { %v9193_v54 = vpop.f32.mrf.mxu0  ;;  %v9250_v5 = vpop.f32.mrf.mxu1 }
0x1004   : > { %6625 = vmatmul.msk.f32.gmra.mxu0 %vm663_vm0, %v8649_v7  ;;  %6586 = vmatpush.xpose.msk.msrb.mxu1 %vm848_vm1, %v4557_v33 }
0x1008   : > { %6587 = vmatpush.xpose.msk.msrb.mxu1 %vm848_vm1, %v4554_v63 }
0x1009   : > { %v9202_v19 = vpop.f32.mrf.mxu0  ;;  %v9253_v42 = vpop.f32.mrf.mxu1 }
0x100c   : > { %6626 = vmatmul.msk.f32.gmra.mxu0 %vm663_vm0, %v8661_v41  ;;  %6588 = vmatpush.xpose.msk.msrb.mxu1 %vm848_vm1, %v4551_v49 }
0x100f   : > { %6589 = vmatmul.msk.f32.vlgmr.msrb.gmra.mxu1 %vm848_vm1, %v4631_v28 }
0x1010   : > { %5069 = vmatpush.msra.mxu1 %v6635_v59 }
0x1011   : > { %v9209_v48 = vpop.f32.mrf.mxu0  ;;  %v9257_v11 = vpop.f32.mrf.mxu1 }
0x1012   : > { %5070 = vmatpush.msra.mxu1 %v6634_v53 }
0x1014   : > { %6627 = vmatmul.msk.f32.gmra.mxu0 %vm663_vm0, %v8672_v52  ;;  %5071 = vmatpush.msra.mxu1 %v6633_v58 }
0x1016   : > { %5072 = vmatpush.msra.mxu1 %v6632_v60 }
0x1017   : > { %6590 = vmatmul.msk.f32.gmra.mxu1 %vm848_vm1, %v4632_v17 }
0x1019   : > { %v9214_v55 = vpop.f32.mrf.mxu0  ;;  %v9261_v63 = vpop.f32.mrf.mxu1 }
0x101c   : > { %6628 = vmatmul.msk.f32.gmra.mxu0 %vm663_vm0, %v8683_v24 }
0x101f   : > { %6591 = vmatmul.msk.f32.gmra.mxu1 %vm848_vm1, %v4633_v6 }
0x1021   : > { %v9219_v47 = vpop.f32.mrf.mxu0  ;;  %v9271_v46 = vpop.f32.mrf.mxu1 }
0x1024   : > { %6629 = vmatmul.msk.f32.gmra.mxu0 %vm663_vm0, %v8694_v43 }
0x1027   : > { %6592 = vmatmul.msk.f32.gmra.mxu1 %vm848_vm1, %v4634_v40 }
0x1029   : > { %v9224_v10 = vpop.f32.mrf.mxu0  ;;  %v9276_v40 = vpop.f32.mrf.mxu1 }
0x102a   : > { %v4605_v26 = vadd.f32 %v6789_v32, %v9224_v10 }
0x102c   : > { %6630 = vmatmul.msk.f32.gmra.mxu0 %vm663_vm0, %v8731_v29 }
0x102f   : > { %6593 = vmatmul.msk.f32.gmra.mxu1 %vm848_vm1, %v4635_v4 }
0x1031   : > { %v4607_v23 = vpop.f32.mrf.mxu0  ;;  %v9280_v35 = vpop.f32.mrf.mxu1 }
0x1032   : > { %v4608_v8 = vadd.f32 %v6789_v32, %v4607_v23 }
0x1034   : > { %6631 = vmatmul.msk.f32.gmra.mxu0 %vm663_vm0, %v8742_v38 }
0x1037   : > { %6594 = vmatmul.msk.f32.gmra.mxu1 %vm848_vm1, %v4636_v9 }
0x1039   : > { %v4610_v34 = vpop.f32.mrf.mxu0 }
0x103a   : > { %v4611_v6 = vadd.f32 %v6789_v32, %v4610_v34 }
0x103f   : > { %6595 = vmatmul.msk.f32.gmra.mxu1 %vm848_vm1, %v4637_v18 }
0x1041   : > { %v4613_v56 = vpop.f32.mrf.mxu0 }
0x1042   : > { %v4614_v57 = vadd.f32 %v6789_v32, %v4613_v56 }
0x1047   : > { %6596 = vmatmul.msk.f32.gmra.mxu1 %vm848_vm1, %v4638_v20 }
0x1049   : > { %v4616_v0 = vpop.f32.mrf.mxu0 }
0x104a   : > { %v4617_v17 = vadd.f32 %v6789_v32, %v4616_v0 }
0x104f   : > { %6597 = vmatmul.msk.f32.gmra.mxu1 %vm848_vm1, %v4639_v62 }
0x1051   : > { %v4619_v27 = vpop.f32.mrf.mxu0 }
0x1052   : > { %v4620_v16 = vadd.f32 %v6789_v32, %v4619_v27 }
0x1057   : > { %6637 = vmatmul.msk.f32.vlgmr.msra.gmra.mxu1 %vm663_vm0, %v8625_v21 }
0x1059   : > { %v4622_v61 = vpop.f32.mrf.mxu0 }
0x105a   : > { %v4623_v28 = vadd.f32 %v6789_v32, %v4622_v61  ;;  %v6608_v61 = vld [vmem:[%s9763_s8 + $0x30] sm:$0xff] }
0x105b   : > { %4955 = vmatpush.msra.mxu3 %v6608_v61 }
0x105f   : > { %6638 = vmatmul.msk.f32.gmra.mxu1 %vm663_vm0, %v8637_v31 }
0x1061   : > { %v4625_v33 = vpop.f32.mrf.mxu0 }
0x1062   : > { %v4626_v49 = vadd.f32 %v6789_v32, %v4625_v33 }
0x1067   : > { %6639 = vmatmul.msk.f32.gmra.mxu1 %vm663_vm0, %v8649_v7 }
0x1069   : > { %v4628_v39 = vpop.f32.mrf.mxu0 }
0x106a   : > { %v4629_v2 = vadd.f32 %v6789_v32, %v4628_v39 }
0x106c   : > { %6598 = vmatpush.msk.msrb.mxu2 %vm1057_vm2, %v4629_v2 }
0x106e   : > { %4857 = vmatpush.msrb.mxu2 %v4626_v49 }
0x106f   : > { %6640 = vmatmul.msk.f32.gmra.mxu1 %vm663_vm0, %v8661_v41 }
0x1070   : > { %4858 = vmatpush.msrb.mxu2 %v4623_v28 }
0x1072   : > { %4859 = vmatpush.msrb.mxu2 %v4620_v16 }
0x1074   : > { %4860 = vmatpush.msrb.mxu2 %v4617_v17 }
0x1076   : > { %4861 = vmatpush.msrb.mxu2 %v4614_v57 }
0x1077   : > { %6641 = vmatmul.msk.f32.gmra.mxu1 %vm663_vm0, %v8672_v52 }
0x1078   : > { %4862 = vmatpush.msrb.mxu2 %v4611_v6 }
0x107a   : > { %4863 = vmatpush.msrb.mxu2 %v4608_v8 }
0x107c   : > { %4864 = vmatpush.msrb.mxu2 %v4605_v26 }
0x107f   : > { %6642 = vmatmul.msk.f32.gmra.mxu1 %vm663_vm0, %v8683_v24 }
0x1087   : > { %6643 = vmatmul.msk.f32.gmra.mxu1 %vm663_vm0, %v8694_v43 }
0x108c   : > { %v4711_v44 = vpop.f32.mrf.mxu1 }
0x108d   : > { %v4738_v4 = vsel %vm947_vm3, %v4711_v44, -inf }
0x108e   : > { %4739 = vmax.xlane.f32.xlu0 %v4738_v4 }
0x108f   : > { %6644 = vmatmul.msk.f32.gmra.mxu1 %vm663_vm0, %v8731_v29 }
0x1094   : > { %v4714_v10 = vpop.f32.mrf.mxu1 }
0x1095   : > { %v4741_v59 = vsel %vm947_vm3, %v4714_v10, -inf }
0x1096   : > { %4742 = vmax.xlane.f32.xlu1 %v4741_v59 }
0x1097   : > { %6645 = vmatmul.msk.f32.gmra.mxu1 %vm663_vm0, %v8742_v38 }
0x109c   : > { %v4717_v23 = vpop.f32.mrf.mxu1 }
0x109d   : > { %v4744_v30 = vsel %vm947_vm3, %v4717_v23, -inf }
0x109e   : > { %4745 = vmax.xlane.f32.xlu2 %v4744_v30 }
0x10a4   : > { %v4720_v53 = vpop.f32.mrf.mxu1 }
0x10a5   : > { %v4747_v58 = vsel %vm947_vm3, %v4720_v53, -inf }
0x10a6   : > { %4748 = vmax.xlane.f32.xlu0 %v4747_v58 }
0x10ac   : > { %v9292_v12 = vpop.f32.mrf.mxu1 }
0x10ad   : > { %v4750_v60 = vsel %vm947_vm3, %v9292_v12, -inf }
0x10ae   : > { %4751 = vmax.xlane.f32.xlu1 %v4750_v60 }
0x10b4   : > { %v9296_v9 = vpop.f32.mrf.mxu1 }
0x10b5   : > { %v4753_v34 = vsel %vm947_vm3, %v9296_v9, -inf }
0x10b6   : > { %4754 = vmax.xlane.f32.xlu2 %v4753_v34 }
0x10bc   : > { %v9300_v14 = vpop.f32.mrf.mxu1 }
0x10bd   : > { %v4756_v15 = vsel %vm947_vm3, %v9300_v14, -inf }
0x10be   : > { %4757 = vmax.xlane.f32.xlu0 %v4756_v15 }
0x10c4   : > { %v9304_v18 = vpop.f32.mrf.mxu1 }
0x10c5   : > { %v4759_v56 = vsel %vm947_vm3, %v9304_v18, -inf }
0x10c6   : > { %4760 = vmax.xlane.f32.xlu1 %v4759_v56 }
0x10cc   : > { %v9308_v1 = vpop.f32.mrf.mxu1 }
0x10cd   : > { %v4762_v20 = vsel %vm972_vm4, %v9308_v1, -inf }
0x10ce   : > { %4763 = vmax.xlane.f32.xlu2 %v4762_v20 }
0x10d4   : > { %v9312_v3 = vpop.f32.mrf.mxu1 }
0x10dc   : > { %v9314_v0 = vpop.f32.mrf.mxu1 }
0x10e4   : > { %v5080_v36 = vpop.f32.mrf.mxu1 }
0x10ec   : > { %v5083_v62 = vpop.f32.mrf.mxu1 }
0x10f4   : > { %v5086_v27 = vpop.f32.mrf.mxu1 }
0x10fc   : > { %v5089_v33 = vpop.f32.mrf.mxu1 }
0x1101   : > { %v4740_v32 = vpop.xlane.xlu0 %4739 }
0x1102   : > { %v4765_v39 = vsub.f32 %v4711_v44, %v4740_v32  ;;  %v6791_v44 = vld [vmem:[%s9760_s5 + $0x7] ss:$0 sm:$0xff] }
0x1104   : > { %v4774_v2 = vmul.f32 1.442695, %v4765_v39  ;;  %v5092_v49 = vpop.f32.mrf.mxu1  ;;  %v5090_v39 = vadd.f32 %v6791_v44, %v5089_v33 }
0x1105   : > { %v5093_v61 = vadd.f32 %v6791_v44, %v5092_v49 }
0x1106   : > { %7055 = vpow2.f32 %v4774_v2 }
0x1109   : > { %v4743_v28 = vpop.xlane.xlu1 %4742 }
0x110a   : > { %v4766_v16 = vsub.f32 %v4714_v10, %v4743_v28 }
0x110c   : > { %v7056_v17 = vpop.eup %7055  ;;  %v4776_v57 = vmul.f32 1.442695, %v4766_v16  ;;  %v5095_v6 = vpop.f32.mrf.mxu1 }
0x110d   : > { %6599 = vmatmul.msk.f32.vlgmr.msrb.gmra.mxu2 %vm947_vm3, %v7056_v17  ;;  %v4792_v8 = vsel %vm947_vm3, %v7056_v17, 0.0  ;;  %v5096_v34 = vadd.f32 %v6791_v44, %v5095_v6  ;;  %v5087_v17 = vadd.f32 %v6791_v44, %v5086_v27 }
0x110e   : > { %7057 = vpow2.f32 %v4776_v57  ;;  %4793 = vadd.xlane.f32.xlu0 %v4792_v8  ;;  %v5084_v57 = vadd.f32 %v6791_v44, %v5083_v62  ;;  %v5078_v62 = vadd.f32 %v6791_v44, %v9314_v0 }
0x1111   : > { %v4746_v26 = vpop.xlane.xlu2 %4745 }
0x1112   : > { %v4767_v4 = vsub.f32 %v4717_v23, %v4746_v26  ;;  %v5081_v26 = vadd.f32 %v6791_v44, %v5080_v36  ;;  %v6647_v36 = vld [vmem:[%s9761_s6 + $0xe8] sm:$0xff] }
0x1114   : > { %v7058_v59 = vpop.eup %7057  ;;  %v4778_v30 = vmul.f32 1.442695, %v4767_v4  ;;  %v5098_v58 = vpop.f32.mrf.mxu1  ;;  %v6649_v4 = vld [vmem:[%s9761_s6 + $0xf8] sm:$0xff] }
0x1115   : > { %v5099_v60 = vadd.f32 %v6791_v44, %v5098_v58  ;;  %6600 = vmatmul.msk.f32.gmra.mxu2 %vm947_vm3, %v7058_v59  ;;  %v4795_v10 = vsel %vm947_vm3, %v7058_v59, 0.0 }
0x1116   : > { %7059 = vpow2.f32 %v4778_v30  ;;  %4796 = vadd.xlane.f32.xlu1 %v4795_v10  ;;  %5123 = vmatpush.msra.mxu2 %v6649_v4  ;;  %v6646_v30 = vld [vmem:[%s9761_s6 + $0xe0] sm:$0xff] }
0x1117   : > { %6660 = vmatpush.xpose.msk.msrb.mxu3 %vm848_vm1, %v5099_v60 }
0x1119   : > { %v4749_v15 = vpop.xlane.xlu0 %4748 }
0x111a   : > { %v4768_v56 = vsub.f32 %v4720_v53, %v4749_v15 }
0x111b   : > { %6661 = vmatpush.xpose.msk.msrb.mxu3 %vm848_vm1, %v5096_v34  ;;  %v5075_v34 = vadd.f32 %v6791_v44, %v9312_v3 }
0x111c   : > { %v7060_v23 = vpop.eup %7059  ;;  %v4780_v20 = vmul.f32 1.442695, %v4768_v56 }
0x111d   : > { %6601 = vmatmul.msk.f32.gmra.mxu2 %vm947_vm3, %v7060_v23  ;;  %v4798_v32 = vsel %vm947_vm3, %v7060_v23, 0.0 }
0x111e   : > { %7061 = vpow2.f32 %v4780_v20  ;;  %4799 = vadd.xlane.f32.xlu2 %v4798_v32 }
0x111f   : > { %6662 = vmatpush.xpose.msk.msrb.mxu3 %vm848_vm1, %v5093_v61 }
0x1121   : > { %v4752_v2 = vpop.xlane.xlu1 %4751 }
0x1122   : > { %v4769_v28 = vsub.f32 %v9292_v12, %v4752_v2 }
0x1123   : > { %6663 = vmatpush.xpose.msk.msrb.mxu3 %vm848_vm1, %v5090_v39 }
0x1124   : > { %v7062_v53 = vpop.eup %7061  ;;  %v4782_v16 = vmul.f32 1.442695, %v4769_v28 }
0x1125   : > { %6602 = vmatmul.msk.f32.gmra.mxu2 %vm947_vm3, %v7062_v53  ;;  %v4801_v49 = vsel %vm947_vm3, %v7062_v53, 0.0 }
0x1126   : > { %7063 = vpow2.f32 %v4782_v16  ;;  %4802 = vadd.xlane.f32.xlu0 %v4801_v49 }
0x1127   : > { %6664 = vmatpush.xpose.msk.msrb.mxu3 %vm848_vm1, %v5087_v17 }
0x1129   : > { %v4755_v6 = vpop.xlane.xlu2 %4754 }
0x112a   : > { %v4770_v33 = vsub.f32 %v9296_v9, %v4755_v6  ;;  %v6648_v9 = vld [vmem:[%s9761_s6 + $0xf0] sm:$0xff] }
0x112b   : > { %6665 = vmatpush.xpose.msk.msrb.mxu3 %vm848_vm1, %v5084_v57  ;;  %5124 = vmatpush.msra.mxu2 %v6648_v9 }
0x112c   : > { %v7064_v12 = vpop.eup %7063  ;;  %v4784_v8 = vmul.f32 1.442695, %v4770_v33 }
0x112d   : > { %6603 = vmatmul.msk.f32.gmra.mxu2 %vm947_vm3, %v7064_v12  ;;  %v4804_v27 = vsel %vm947_vm3, %v7064_v12, 0.0 }
0x112e   : > { %7065 = vpow2.f32 %v4784_v8  ;;  %4805 = vadd.xlane.f32.xlu1 %v4804_v27  ;;  %5125 = vmatpush.msra.mxu2 %v6647_v36 }
0x112f   : > { %6666 = vmatpush.xpose.msk.msrb.mxu3 %vm848_vm1, %v5081_v26 }
0x1130   : > { %5126 = vmatpush.msra.mxu2 %v6646_v30 }
0x1131   : > { %v4758_v59 = vpop.xlane.xlu0 %4757 }
0x1132   : > { %v4771_v58 = vsub.f32 %v9300_v14, %v4758_v59 }
0x1133   : > { %6667 = vmatpush.xpose.msk.msrb.mxu3 %vm848_vm1, %v5078_v62 }
0x1134   : > { %v7066_v60 = vpop.eup %7065  ;;  %v4786_v10 = vmul.f32 1.442695, %v4771_v58 }
0x1135   : > { %6604 = vmatmul.msk.f32.gmra.mxu2 %vm947_vm3, %v7066_v60  ;;  %v4807_v15 = vsel %vm947_vm3, %v7066_v60, 0.0 }
0x1136   : > { %7067 = vpow2.f32 %v4786_v10  ;;  %4808 = vadd.xlane.f32.xlu2 %v4807_v15 }
0x1137   : > { %6668 = vmatpush.xpose.msk.msrb.mxu3 %vm848_vm1, %v5075_v34 }
0x1139   : > { %v4761_v0 = vpop.xlane.xlu1 %4760 }
0x113a   : > { %v4772_v56 = vsub.f32 %v9304_v18, %v4761_v0 }
0x113c   : > { %v7068_v14 = vpop.eup %7067  ;;  %v4788_v23 = vmul.f32 1.442695, %v4772_v56 }
0x113d   : > { %6605 = vmatmul.msk.f32.gmra.mxu2 %vm947_vm3, %v7068_v14  ;;  %v4810_v20 = vsel %vm947_vm3, %v7068_v14, 0.0 }
0x113e   : > { %7069 = vpow2.f32 %v4788_v23  ;;  %4811 = vadd.xlane.f32.xlu0 %v4810_v20 }
0x1141   : > { %v4764_v3 = vpop.xlane.xlu2 %4763 }
0x1142   : > { %v4773_v44 = vsub.f32 %v9308_v1, %v4764_v3  ;;  %v5020_v3 = vpop.f32.mrf.mxu0 }
0x1144   : > { %v7070_v61 = vpop.eup %7069  ;;  %v4790_v32 = vmul.f32 1.442695, %v4773_v44 }
0x1145   : > { %6606 = vmatmul.msk.f32.gmra.mxu2 %vm947_vm3, %v7070_v61  ;;  %v4813_v39 = vsel %vm947_vm3, %v7070_v61, 0.0 }
0x1146   : > { %7071 = vpow2.f32 %v4790_v32  ;;  %4814 = vadd.xlane.f32.xlu1 %v4813_v39 }
0x114c   : > { %v7072_v18 = vpop.eup %7071 }
0x114d   : > { %6607 = vmatmul.msk.f32.gmra.mxu2 %vm947_vm3, %v7072_v18  ;;  %v4816_v2 = vsel %vm972_vm4, %v7072_v18, 0.0  ;;  %v5023_v18 = vpop.f32.mrf.mxu0 }
0x114e   : > { %4817 = vadd.xlane.f32.xlu2 %v4816_v2 }
0x1155   : > { %6651 = vmatmul.msk.f32.vlgmr.msra.gmra.mxu2 %vm663_vm0, %v8625_v21 }
0x115d   : > { %6652 = vmatmul.msk.f32.gmra.mxu2 %vm663_vm0, %v8637_v31 }
0x1165   : > { %6653 = vmatmul.msk.f32.gmra.mxu2 %vm663_vm0, %v8649_v7 }
0x116d   : > { %6654 = vmatmul.msk.f32.gmra.mxu2 %vm663_vm0, %v8661_v41 }
0x1175   : > { %6655 = vmatmul.msk.f32.gmra.mxu2 %vm663_vm0, %v8672_v52 }
0x117d   : > { %6656 = vmatmul.msk.f32.gmra.mxu2 %vm663_vm0, %v8683_v24 }
0x1181   : > { %v4794_v1 = vpop.xlane.xlu0 %4793 }
0x1182   : > { %7073 = vrcp.f32 %v4794_v1 }
0x1185   : > { %6657 = vmatmul.msk.f32.gmra.mxu2 %vm663_vm0, %v8694_v43 }
0x1188   : > { %v7074_v53 = vpop.eup %7073 }
0x1189   : > { %v4797_v28 = vpop.xlane.xlu1 %4796 }
0x118a   : > { %7075 = vrcp.f32 %v4797_v28  ;;  %v6790_v28 = vld [vmem:[%s9792_s0 + $0x7] ss:$0 sm:$0xff] }
0x118d   : > { %6658 = vmatmul.msk.f32.gmra.mxu2 %vm663_vm0, %v8731_v29 }
0x1190   : > { %v4866_v16 = vpop.f32.mrf.mxu2  ;;  %v7076_v57 = vpop.eup %7075 }
0x1191   : > { %v4902_v17 = vmul.f32 %v7074_v53, %v4866_v16  ;;  %v4800_v49 = vpop.xlane.xlu2 %4799  ;;  %v5021_v16 = vadd.f32 %v6790_v28, %v5020_v3 }
0x1192   : > { %7077 = vrcp.f32 %v4800_v49 }
0x1193   : > { %6609 = vmatmul.msk.f32.vlgmr.msra.gmra.mxu3 %vm848_vm1, %v4902_v17  ;;  %v5026_v17 = vpop.f32.mrf.mxu0 }
0x1195   : > { %6659 = vmatmul.msk.f32.gmra.mxu2 %vm663_vm0, %v8742_v38 }
0x1198   : > { %v4869_v6 = vpop.f32.mrf.mxu2  ;;  %v7078_v8 = vpop.eup %7077 }
0x1199   : > { %v4903_v33 = vmul.f32 %v7076_v57, %v4869_v6  ;;  %v4803_v12 = vpop.xlane.xlu0 %4802  ;;  %v5155_v57 = vmul.f32 0.35355338, %v5021_v16  ;;  %v5024_v6 = vadd.f32 %v6790_v28, %v5023_v18 }
0x119a   : > { %7079 = vrcp.f32 %v4803_v12 }
0x119b   : > { %6610 = vmatmul.msk.f32.gmra.mxu3 %vm848_vm1, %v4903_v33  ;;  %v5029_v33 = vpop.f32.mrf.mxu0 }
0x11a0   : > { %v4872_v26 = vpop.f32.mrf.mxu2  ;;  %v7080_v9 = vpop.eup %7079 }
0x11a1   : > { %v4904_v27 = vmul.f32 %v7078_v8, %v4872_v26  ;;  %v4806_v4 = vpop.xlane.xlu1 %4805  ;;  %v5156_v8 = vmul.f32 0.35355338, %v5024_v6  ;;  %v5027_v26 = vadd.f32 %v6790_v28, %v5026_v17 }
0x11a2   : > { %7081 = vrcp.f32 %v4806_v4 }
0x11a3   : > { %6611 = vmatmul.msk.f32.gmra.mxu3 %vm848_vm1, %v4904_v27  ;;  %v5157_v4 = vmul.f32 0.35355338, %v5027_v26 }
0x11a8   : > { %v4875_v36 = vpop.f32.mrf.mxu2  ;;  %v7082_v30 = vpop.eup %7081 }
0x11a9   : > { %v4905_v62 = vmul.f32 %v7080_v9, %v4875_v36  ;;  %v4809_v59 = vpop.xlane.xlu2 %4808  ;;  %v5032_v9 = vpop.f32.mrf.mxu0  ;;  %v5030_v36 = vadd.f32 %v6790_v28, %v5029_v33 }
0x11aa   : > { %7083 = vrcp.f32 %v4809_v59 }
0x11ab   : > { %6612 = vmatmul.msk.f32.gmra.mxu3 %vm848_vm1, %v4905_v62  ;;  %v5158_v59 = vmul.f32 0.35355338, %v5030_v36 }
0x11b0   : > { %v4878_v58 = vpop.f32.mrf.mxu2  ;;  %v7084_v34 = vpop.eup %7083 }
0x11b1   : > { %v4906_v60 = vmul.f32 %v7082_v30, %v4878_v58  ;;  %v4812_v10 = vpop.xlane.xlu0 %4811  ;;  %v5035_v30 = vpop.f32.mrf.mxu0  ;;  %v5033_v58 = vadd.f32 %v6790_v28, %v5032_v9 }
0x11b2   : > { %7085 = vrcp.f32 %v4812_v10 }
0x11b3   : > { %6613 = vmatmul.msk.f32.gmra.mxu3 %vm848_vm1, %v4906_v60  ;;  %v5159_v10 = vmul.f32 0.35355338, %v5033_v58 }
0x11b8   : > { %v4881_v15 = vpop.f32.mrf.mxu2  ;;  %v7086_v14 = vpop.eup %7085 }
0x11b9   : > { %v4907_v0 = vmul.f32 %v7084_v34, %v4881_v15  ;;  %v4815_v56 = vpop.xlane.xlu1 %4814  ;;  %v5036_v34 = vadd.f32 %v6790_v28, %v5035_v30  ;;  %v5038_v15 = vpop.f32.mrf.mxu0 }
0x11ba   : > { %7087 = vrcp.f32 %v4815_v56 }
0x11bb   : > { %6614 = vmatmul.msk.f32.gmra.mxu3 %vm848_vm1, %v4907_v0  ;;  %v5160_v56 = vmul.f32 0.35355338, %v5036_v34 }
0x11c0   : > { %v4884_v23 = vpop.f32.mrf.mxu2  ;;  %v7088_v61 = vpop.eup %7087 }
0x11c1   : > { %v4908_v20 = vmul.f32 %v7086_v14, %v4884_v23  ;;  %v4818_v44 = vpop.xlane.xlu2 %4817  ;;  %v5039_v14 = vadd.f32 %v6790_v28, %v5038_v15  ;;  %v5041_v23 = vpop.f32.mrf.mxu0 }
0x11c2   : > { %7089 = vrcp.f32 %v4818_v44  ;;  %v5042_v44 = vadd.f32 %v6790_v28, %v5041_v23 }
0x11c3   : > { %6615 = vmatmul.msk.f32.gmra.mxu3 %vm848_vm1, %v4908_v20  ;;  %v5161_v3 = vmul.f32 0.35355338, %v5039_v14 }
0x11c8   : > { %v4887_v32 = vpop.f32.mrf.mxu2  ;;  %v7090_v2 = vpop.eup %7089 }
0x11c9   : > { %v4909_v39 = vmul.f32 %v7088_v61, %v4887_v32  ;;  %v5162_v32 = vmul.f32 0.35355338, %v5042_v44 }
0x11cb   : > { %6616 = vmatmul.msk.f32.gmra.mxu3 %vm848_vm1, %v4909_v39  ;;  %v5044_v39 = vpop.f32.mrf.mxu0 }
0x11cc   : > { %v5045_v18 = vadd.f32 %v6790_v28, %v5044_v39 }
0x11ce   : > { %v5163_v16 = vmul.f32 0.35355338, %v5045_v18 }
0x11d0   : > { %v4890_v1 = vpop.f32.mrf.mxu2 }
0x11d1   : > { %v4910_v53 = vmul.f32 %v7090_v2, %v4890_v1  ;;  %v6792_v1 = vld [vmem:[%s9762_s7 + $0x7] ss:$0 sm:$0xff] }
0x11d3   : > { %6617 = vmatmul.msk.f32.gmra.mxu3 %vm848_vm1, %v4910_v53 }
0x11d8   : > { %v5128_v49 = vpop.f32.mrf.mxu2 }
0x11db   : > { %6669 = vmatmul.msk.f32.vlgmr.msrb.gmra.mxu3 %vm848_vm1, %v5155_v57 }
0x11e0   : > { %v5131_v12 = vpop.f32.mrf.mxu2 }
0x11e1   : > { %v5132_v36 = vadd.f32 %v6792_v1, %v5131_v12 }
0x11e3   : > { %6670 = vmatmul.msk.f32.gmra.mxu3 %vm848_vm1, %v5156_v8 }
0x11e8   : > { %v5134_v27 = vpop.f32.mrf.mxu2 }
0x11eb   : > { %6671 = vmatmul.msk.f32.gmra.mxu3 %vm848_vm1, %v5157_v4  ;;  %v5135_v4 = vadd.f32 %v6792_v1, %v5134_v27 }
0x11f0   : > { %v5137_v62 = vpop.f32.mrf.mxu2 }
0x11f1   : > { %v5138_v26 = vadd.f32 %v6792_v1, %v5137_v62 }
0x11f3   : > { %6672 = vmatmul.msk.f32.gmra.mxu3 %vm848_vm1, %v5158_v59  ;;  %v5129_v59 = vadd.f32 %v6792_v1, %v5128_v49 }
0x11f8   : > { %v5140_v60 = vpop.f32.mrf.mxu2 }
0x11f9   : > { %v5141_v28 = vadd.f32 %v6792_v1, %v5140_v60 }
0x11fb   : > { %6673 = vmatmul.msk.f32.gmra.mxu3 %vm848_vm1, %v5159_v10 }
0x1200   : > { %v5143_v0 = vpop.f32.mrf.mxu2 }
0x1201   : > { %v5144_v8 = vadd.f32 %v6792_v1, %v5143_v0 }
0x1203   : > { %6674 = vmatmul.msk.f32.gmra.mxu3 %vm848_vm1, %v5160_v56 }
0x1208   : > { %v5146_v20 = vpop.f32.mrf.mxu2 }
0x1209   : > { %v5147_v6 = vadd.f32 %v6792_v1, %v5146_v20 }
0x120b   : > { %6675 = vmatmul.msk.f32.gmra.mxu3 %vm848_vm1, %v5161_v3 }
0x1210   : > { %v5149_v61 = vpop.f32.mrf.mxu2 }
0x1211   : > { %v5150_v57 = vadd.f32 %v6792_v1, %v5149_v61 }
0x1213   : > { %6676 = vmatmul.msk.f32.gmra.mxu3 %vm848_vm1, %v5162_v32 }
0x1216   : > { %v9406_v2 = vpop.f32.mrf.mxu3 }
0x1218   : > { %v5152_v53 = vpop.f32.mrf.mxu2 }
0x1219   : > { %v5153_v17 = vadd.f32 %v6792_v1, %v5152_v53 }
0x121b   : > { %6677 = vmatmul.msk.f32.gmra.mxu3 %vm848_vm1, %v5163_v16  ;;  %6678 = vmatpush.msk.msra.mxu0 %vm1057_vm2, %v5153_v17 }
0x121d   : > { %5381 = vmatpush.msra.mxu0 %v5150_v57 }
0x121e   : > { %v9413_v33 = vpop.f32.mrf.mxu3 }
0x121f   : > { %5382 = vmatpush.msra.mxu0 %v5147_v6 }
0x1221   : > { %5383 = vmatpush.msra.mxu0 %v5144_v8 }
0x1223   : > { %5384 = vmatpush.msra.mxu0 %v5141_v28 }
0x1225   : > { %5385 = vmatpush.msra.mxu0 %v5138_v26 }
0x1226   : > { %v9415_v9 = vpop.f32.mrf.mxu3 }
0x1227   : > { %5386 = vmatpush.msra.mxu0 %v5135_v4 }
0x1229   : > { %5387 = vmatpush.msra.mxu0 %v5132_v36 }
0x122b   : > { %5388 = vmatpush.msra.mxu0 %v5129_v59 }
0x122e   : > { %v9417_v30 = vpop.f32.mrf.mxu3 }
0x1236   : > { %v9419_v58 = vpop.f32.mrf.mxu3 }
0x123e   : > { %v9421_v10 = vpop.f32.mrf.mxu3 }
0x1246   : > { %v9423_v34 = vpop.f32.mrf.mxu3 }
0x124e   : > { %v9425_v60 = vpop.f32.mrf.mxu3 }
0x1256   : > { %v9427_v62 = vpop.f32.mrf.mxu3 }
0x125e   : > { %v5235_v27 = vpop.f32.mrf.mxu3 }
0x125f   : > { %v5262_v15 = vsel %vm947_vm3, %v5235_v27, -inf }
0x1260   : > { %5263 = vmax.xlane.f32.xlu0 %v5262_v15 }
0x1266   : > { %v5238_v12 = vpop.f32.mrf.mxu3 }
0x1267   : > { %v5265_v49 = vsel %vm947_vm3, %v5238_v12, -inf }
0x1268   : > { %5266 = vmax.xlane.f32.xlu2 %v5265_v49 }
0x126e   : > { %v5241_v0 = vpop.f32.mrf.mxu3 }
0x126f   : > { %v5268_v56 = vsel %vm947_vm3, %v5241_v0, -inf }
0x1270   : > { %5269 = vmax.xlane.f32.xlu0 %v5268_v56 }
0x1276   : > { %v9432_v14 = vpop.f32.mrf.mxu3 }
0x127e   : > { %v5247_v23 = vpop.f32.mrf.mxu3 }
0x127f   : > { %v5274_v20 = vsel %vm947_vm3, %v5247_v23, -inf }
0x1280   : > { %5275 = vmax.xlane.f32.xlu2 %v5274_v20 }
0x1286   : > { %v5250_v3 = vpop.f32.mrf.mxu3 }
0x1287   : > { %v5277_v44 = vsel %vm947_vm3, %v5250_v3, -inf }
0x1288   : > { %5278 = vmax.xlane.f32.xlu0 %v5277_v44 }
0x128e   : > { %v9436_v61 = vpop.f32.mrf.mxu3 }
0x128f   : > { %v5280_v56 = vsel %vm947_vm3, %v9436_v61, -inf }
0x1296   : > { %v5256_v32 = vpop.f32.mrf.mxu3 }
0x1297   : > { %v5283_v39 = vsel %vm947_vm3, %v5256_v32, -inf }
0x1298   : > { %5284 = vmax.xlane.f32.xlu2 %v5283_v39 }
0x129e   : > { %v9439_v18 = vpop.f32.mrf.mxu3 }
0x129f   : > { %v5286_v1 = vsel %vm972_vm4, %v9439_v18, -inf }
0x12a0   : > { %5287 = vmax.xlane.f32.xlu0 %v5286_v1  ;;  %v6688_v1 = vld [vmem:[%s9763_s8 + $0x38] sm:$0xff] }
0x12a1   : > { %5479 = vmatpush.msrb.mxu1 %v6688_v1 }
0x12d3   : > { %v5264_v53 = vpop.xlane.xlu0 %5263 }
0x12d4   : > { %v5289_v16 = vsub.f32 %v5235_v27, %v5264_v53  ;;  %v5271_v27 = vsel %vm947_vm3, %v9432_v14, -inf }
0x12d6   : > { %v5298_v17 = vmul.f32 1.442695, %v5289_v16 }
0x12d8   : > { %7091 = vpow2.f32 %v5298_v17 }
0x12db   : > { %v5267_v57 = vpop.xlane.xlu2 %5266 }
0x12dc   : > { %v5290_v6 = vsub.f32 %v5238_v12, %v5267_v57 }
0x12de   : > { %v7092_v8 = vpop.eup %7091  ;;  %v5300_v28 = vmul.f32 1.442695, %v5290_v6 }
0x12df   : > { %6679 = vmatmul.msk.f32.vlgmr.msra.gmra.mxu0 %vm947_vm3, %v7092_v8  ;;  %v5316_v26 = vsel %vm947_vm3, %v7092_v8, 0.0 }
0x12e0   : > { %7093 = vpow2.f32 %v5300_v28  ;;  %5317 = vadd.xlane.f32.xlu1 %v5316_v26 }
0x12e3   : > { %v5270_v4 = vpop.xlane.xlu0 %5269 }
0x12e4   : > { %v5291_v36 = vsub.f32 %v5241_v0, %v5270_v4 }
0x12e6   : > { %v7094_v59 = vpop.eup %7093  ;;  %v5302_v15 = vmul.f32 1.442695, %v5291_v36 }
0x12e7   : > { %6680 = vmatmul.msk.f32.gmra.mxu0 %vm947_vm3, %v7094_v59  ;;  %v5319_v49 = vsel %vm947_vm3, %v7094_v59, 0.0 }
0x12e8   : > { %7095 = vpow2.f32 %v5302_v15  ;;  %5272 = vmax.xlane.f32.xlu1 %v5271_v27  ;;  %5320 = vadd.xlane.f32.xlu2 %v5319_v49 }
0x12ee   : > { %v7096_v12 = vpop.eup %7095 }
0x12ef   : > { %6681 = vmatmul.msk.f32.gmra.mxu0 %vm947_vm3, %v7096_v12  ;;  %v5322_v0 = vsel %vm947_vm3, %v7096_v12, 0.0 }
0x12f0   : > { %5281 = vmax.xlane.f32.xlu1 %v5280_v56  ;;  %5323 = vadd.xlane.f32.xlu0 %v5322_v0 }
0x12f3   : > { %v5276_v20 = vpop.xlane.xlu2 %5275 }
0x12f4   : > { %v5293_v44 = vsub.f32 %v5247_v23, %v5276_v20 }
0x12f6   : > { %v5306_v39 = vmul.f32 1.442695, %v5293_v44 }
0x12f8   : > { %7097 = vpow2.f32 %v5306_v39 }
0x12fb   : > { %v5279_v53 = vpop.xlane.xlu0 %5278 }
0x12fc   : > { %v5294_v16 = vsub.f32 %v5250_v3, %v5279_v53 }
0x12fe   : > { %v7098_v17 = vpop.eup %7097  ;;  %v5308_v57 = vmul.f32 1.442695, %v5294_v16 }
0x12ff   : > { %v5328_v6 = vsel %vm947_vm3, %v7098_v17, 0.0 }
0x1300   : > { %7099 = vpow2.f32 %v5308_v57  ;;  %5329 = vadd.xlane.f32.xlu2 %v5328_v6 }
0x1306   : > { %v7100_v8 = vpop.eup %7099 }
0x1307   : > { %v5331_v28 = vsel %vm947_vm3, %v7100_v8, 0.0 }
0x1308   : > { %5332 = vadd.xlane.f32.xlu0 %v5331_v28 }
0x130b   : > { %v5285_v23 = vpop.xlane.xlu2 %5284 }
0x130c   : > { %v5296_v26 = vsub.f32 %v5256_v32, %v5285_v23 }
0x130e   : > { %v5312_v4 = vmul.f32 1.442695, %v5296_v26 }
0x1310   : > { %7101 = vpow2.f32 %v5312_v4 }
0x1313   : > { %v5288_v3 = vpop.xlane.xlu0 %5287 }
0x1316   : > { %v7102_v36 = vpop.eup %7101 }
0x1317   : > { %v5337_v59 = vsel %vm947_vm3, %v7102_v36, 0.0 }
0x1318   : > { %5338 = vadd.xlane.f32.xlu0 %v5337_v59  ;;  %v5297_v59 = vsub.f32 %v9439_v18, %v5288_v3 }
0x1353   : > { %v5318_v15 = vpop.xlane.xlu1 %5317 }
0x1354   : > { %7103 = vrcp.f32 %v5318_v15  ;;  %v5314_v15 = vmul.f32 1.442695, %v5297_v59 }
0x135a   : > { %v7104_v12 = vpop.eup %7103 }
0x135b   : > { %v5273_v27 = vpop.xlane.xlu1 %5272  ;;  %v5321_v49 = vpop.xlane.xlu2 %5320 }
0x135c   : > { %v5292_v56 = vsub.f32 %v9432_v14, %v5273_v27  ;;  %v5390_v0 = vpop.f32.mrf.mxu0  ;;  %7105 = vrcp.f32 %v5321_v49 }
0x135d   : > { %v5426_v20 = vmul.f32 %v7104_v12, %v5390_v0 }
0x135e   : > { %v5304_v44 = vmul.f32 1.442695, %v5292_v56 }
0x135f   : > { %6689 = vmatmul.msk.f32.vlgmr.msrb.gmra.mxu1 %vm848_vm1, %v5426_v20 }
0x1360   : > { %7107 = vpow2.f32 %v5304_v44  ;;  %v4449_v44 = vadd.f32 %v9250_v5, %v9181_v13 }
0x1362   : > { %v7106_v1 = vpop.eup %7105 }
0x1363   : > { %v5282_v32 = vpop.xlane.xlu1 %5281  ;;  %v5324_v39 = vpop.xlane.xlu0 %5323 }
0x1364   : > { %v5295_v53 = vsub.f32 %v9436_v61, %v5282_v32  ;;  %v5393_v16 = vpop.f32.mrf.mxu0  ;;  %7109 = vrcp.f32 %v5324_v39 }
0x1365   : > { %v5427_v57 = vmul.f32 %v7106_v1, %v5393_v16 }
0x1366   : > { %v7108_v6 = vpop.eup %7107  ;;  %v5310_v28 = vmul.f32 1.442695, %v5295_v53 }
0x1367   : > { %6682 = vmatmul.msk.f32.gmra.mxu0 %vm947_vm3, %v7108_v6  ;;  %6690 = vmatmul.msk.f32.gmra.mxu1 %vm848_vm1, %v5427_v57 }
0x1368   : > { %7111 = vpow2.f32 %v5310_v28 }
0x1369   : > { %7113 = vpow2.f32 %v5314_v15 }
0x136a   : > { %v7110_v14 = vpop.eup %7109 }
0x136c   : > { %v5396_v23 = vpop.f32.mrf.mxu0 }
0x136d   : > { %v5428_v26 = vmul.f32 %v7110_v14, %v5396_v23 }
0x136e   : > { %v7112_v4 = vpop.eup %7111 }
0x136f   : > { %6683 = vmatmul.msk.f32.gmra.mxu0 %vm947_vm3, %v7098_v17  ;;  %6691 = vmatmul.msk.f32.gmra.mxu1 %vm848_vm1, %v5428_v26  ;;  %v5334_v61 = vsel %vm947_vm3, %v7112_v4, 0.0  ;;  %v7114_v27 = vpop.eup %7113  ;;  %v4443_v17 = vadd.f32 %v9243_v37, %v9168_v22 }
0x1370   : > { %5335 = vadd.xlane.f32.xlu2 %v5334_v61  ;;  %v5340_v26 = vsel %vm972_vm4, %v7114_v27, 0.0  ;;  %v6704_v61 = vld [vmem:[%s9767_s12 + $0x38] sm:$0xff] }
0x1371   : > { %v4984_v49 = vadd.f32 %v9406_v2, %v4443_v17  ;;  %5815 = vmatpush.msrb.mxu2 %v6704_v61 }
0x1373   : > { %v5330_v28 = vpop.xlane.xlu2 %5329 }
0x1377   : > { %6684 = vmatmul.msk.f32.gmra.mxu0 %vm947_vm3, %v7100_v8  ;;  %v9478_v8 = vld [vmem:[%s9764_s9 + $0x1] ss:$0 sm:$0xff] }
0x137b   : > { %v5333_v59 = vpop.xlane.xlu0 %5332 }
0x137f   : > { %6685 = vmatmul.msk.f32.gmra.mxu0 %vm947_vm3, %v7112_v4 }
0x1387   : > { %6686 = vmatmul.msk.f32.gmra.mxu0 %vm947_vm3, %v7102_v36  ;;  %v4446_v36 = vadd.f32 %v9246_v50, %v9175_v25  ;;  %v5325_v25 = vsel %vm947_vm3, %v7108_v6, 0.0 }
0x1389   : > { %v4985_v0 = vadd.f32 %v9413_v33, %v4446_v36 }
0x138b   : > { %v5339_v36 = vpop.xlane.xlu0 %5338 }
0x138f   : > { %6687 = vmatmul.msk.f32.gmra.mxu0 %vm947_vm3, %v7114_v27 }
0x13dc   : > { %v5481_v12 = vpop.f32.mrf.mxu1 }
0x13dd   : > { %v5508_v56 = vadd.f32 %v5481_v12, %v4984_v49 }
0x13df   : > { %v5517_v18 = vadd.f32 %v5508_v56, %v8625_v21  ;;  %v4986_v21 = vadd.f32 %v9415_v9, %v4449_v44  ;;  %v6702_v44 = vld [vmem:[%s9767_s12 + $0x28] sm:$0xff] }
0x13e1   : > { %v5531_v3 = vadd.f32 %v9478_v8, %v5517_v18 }
0x13e3   : > { %v5544_v22 = vsel %vm663_vm0, %v5531_v3, 0.0  ;;  %v5336_v12 = vpop.xlane.xlu2 %5335 }
0x13e4   : > { %5545 = vadd.xlane.f32.xlu1 %v5544_v22  ;;  %v5484_v37 = vpop.f32.mrf.mxu1  ;;  %v5399_v16 = vpop.f32.mrf.mxu0 }
0x13e5   : > { %v5509_v2 = vadd.f32 %v5484_v37, %v4985_v0 }
0x13e7   : > { %v5518_v20 = vadd.f32 %v5509_v2, %v8637_v31 }
0x13e9   : > { %v9490_v32 = vadd.f32 %v9478_v8, %v5518_v20  ;;  %v6703_v20 = vld [vmem:[%s9767_s12 + $0x30] sm:$0xff] }
0x13ea   : > { %5816 = vmatpush.msrb.mxu2 %v6703_v20 }
0x13eb   : > { %v5547_v50 = vsel %vm663_vm0, %v9490_v32, 0.0 }
0x13ec   : > { %5326 = vadd.xlane.f32.xlu1 %v5325_v25  ;;  %5548 = vadd.xlane.f32.xlu2 %v5547_v50  ;;  %v5487_v33 = vpop.f32.mrf.mxu1  ;;  %v5402_v23 = vpop.f32.mrf.mxu0 }
0x13ed   : > { %v5510_v39 = vadd.f32 %v5487_v33, %v4986_v21  ;;  %5817 = vmatpush.msrb.mxu2 %v6702_v44  ;;  %v6701_v21 = vld [vmem:[%s9767_s12 + $0x20] sm:$0xff] }
0x13ef   : > { %v5519_v1 = vadd.f32 %v5510_v39, %v8649_v7  ;;  %5818 = vmatpush.msrb.mxu2 %v6701_v21 }
0x13f1   : > { %v9498_v31 = vadd.f32 %v9478_v8, %v5519_v1 }
0x13f3   : > { %v5550_v13 = vsel %vm663_vm0, %v9498_v31, 0.0 }
0x13f4   : > { %5551 = vadd.xlane.f32.xlu0 %v5550_v13  ;;  %v5405_v49 = vpop.f32.mrf.mxu0 }
0x13fc   : > { %v5408_v18 = vpop.f32.mrf.mxu0 }
0x1404   : > { %v5411_v22 = vpop.f32.mrf.mxu0 }
0x1457   : > { %v5546_v5 = vpop.xlane.xlu1 %5545 }
0x1458   : > { %v5571_v9 = vmul.f32 %v5546_v5, %v8281_v45 }
0x145a   : > { %v9503_v53 = vsub.f32 %v5531_v3, %v5571_v9 }
0x145c   : > { %v5589_v57 = vmul.f32 %v9503_v53, %v9503_v53 }
0x145e   : > { %v5598_v6 = vsel %vm663_vm0, %v5589_v57, 0.0 }
0x145f   : > { %5599 = vadd.xlane.f32.xlu1 %v5598_v6  ;;  %v5327_v7 = vpop.xlane.xlu1 %5326 }
0x1460   : > { %7115 = vrcp.f32 %v5327_v7  ;;  %v4452_v7 = vadd.f32 %v9253_v42, %v9187_v51  ;;  %v9539_v51 = vld [vmem:[%s9766_s11 + $0x1] ss:$0 sm:$0xff] }
0x1461   : > { %7117 = vrcp.f32 %v5330_v28 }
0x1462   : > { %7119 = vrcp.f32 %v5333_v59 }
0x1463   : > { %7121 = vrcp.f32 %v5336_v12 }
0x1464   : > { %7123 = vrcp.f32 %v5339_v36 }
0x1466   : > { %v7116_v14 = vpop.eup %7115 }
0x1467   : > { %5341 = vadd.xlane.f32.xlu1 %v5340_v26  ;;  %v5429_v4 = vmul.f32 %v7116_v14, %v5399_v16  ;;  %v7118_v15 = vpop.eup %7117  ;;  %v5414_v16 = vpop.f32.mrf.mxu0  ;;  %v4987_v14 = vadd.f32 %v9417_v30, %v4452_v7 }
0x1468   : > { %v5430_v17 = vmul.f32 %v7118_v15, %v5402_v23  ;;  %v7120_v56 = vpop.eup %7119  ;;  %v4455_v15 = vadd.f32 %v9257_v11, %v9193_v54 }
0x1469   : > { %6692 = vmatmul.msk.f32.gmra.mxu1 %vm848_vm1, %v5429_v4  ;;  %v5431_v27 = vmul.f32 %v7120_v56, %v5405_v49  ;;  %v7122_v3 = vpop.eup %7121  ;;  %v9534_v4 = vld [vmem:[%s9765_s10 + $0x1] ss:$0 sm:$0xff] }
0x146a   : > { %v5432_v0 = vmul.f32 %v7122_v3, %v5408_v18  ;;  %v7124_v37 = vpop.eup %7123  ;;  %v4988_v12 = vadd.f32 %v9419_v58, %v4455_v15  ;;  %v5549_v18 = vpop.xlane.xlu2 %5548  ;;  %v4458_v58 = vadd.f32 %v9261_v63, %v9202_v19  ;;  %v4461_v19 = vadd.f32 %v9271_v46, %v9209_v48 }
0x146b   : > { %v5433_v2 = vmul.f32 %v7124_v37, %v5411_v22  ;;  %v5572_v54 = vmul.f32 %v5549_v18, %v8281_v45  ;;  %v4464_v48 = vadd.f32 %v9276_v40, %v9214_v55 }
0x146d   : > { %v9564_v22 = vsub.f32 %v9490_v32, %v5572_v54 }
0x1471   : > { %6693 = vmatmul.msk.f32.gmra.mxu1 %vm848_vm1, %v5430_v17 }
0x1479   : > { %6694 = vmatmul.msk.f32.gmra.mxu1 %vm848_vm1, %v5431_v27 }
0x1481   : > { %6695 = vmatmul.msk.f32.gmra.mxu1 %vm848_vm1, %v5432_v0  ;;  %v4989_v0 = vadd.f32 %v9421_v10, %v4458_v58  ;;  %v4990_v10 = vadd.f32 %v9423_v34, %v4461_v19  ;;  %v4991_v34 = vadd.f32 %v9425_v60, %v4464_v48  ;;  %v6717_v60 = vld [vmem:[%s9769_s14 + $0x30] sm:$0xff] }
0x1489   : > { %6696 = vmatmul.msk.f32.gmra.mxu1 %vm848_vm1, %v5433_v2 }
0x14d2   : > { %v5600_v25 = vpop.xlane.xlu1 %5599 }
0x14d3   : > { %v5625_v50 = vmul.f32 %v5600_v25, %v8281_v45  ;;  %v5552_v25 = vpop.xlane.xlu0 %5551 }
0x14d5   : > { %v5634_v33 = vadd.f32 1e-05, %v5625_v50 }
0x14d7   : > { %7125 = vrsqrt.f32 %v5634_v33  ;;  %vm5649_vm3 = vweird.f32 %v5634_v33 }
0x14da   : > { %v5342_v39 = vpop.xlane.xlu1 %5341 }
0x14db   : > { %7127 = vrcp.f32 %v5342_v39 }
0x14dd   : > { %v7126_v1 = vpop.eup %7125 }
0x14de   : > { %v5644_v13 = vmul.f32 %v7126_v1, %v5634_v33  ;;  %vm5650_vm2 = vweird.f32 %v7126_v1 }
0x14df   : > { %vm5651_vm4 = vmor %vm5649_vm3, %vm5650_vm2 }
0x14e0   : > { %v5645_v5 = vmul.f32 %v7126_v1, %v5644_v13 }
0x14e1   : > { %v7128_v9 = vpop.eup %7127 }
0x14e2   : > { %v5646_v57 = vmul.f32 0.5, %v5645_v5  ;;  %v5434_v6 = vmul.f32 %v7128_v9, %v5414_v16 }
0x14e4   : > { %v5647_v28 = vsub.f32 1.5, %v5646_v57  ;;  %6697 = vmatmul.msk.f32.gmra.mxu1 %vm848_vm1, %v5434_v6  ;;  %v4467_v6 = vadd.f32 %v9280_v35, %v9219_v47 }
0x14e6   : > { %v5648_v23 = vmul.f32 %v7126_v1, %v5647_v28  ;;  %v5490_v26 = vpop.f32.mrf.mxu1  ;;  %v4992_v7 = vadd.f32 %v9427_v62, %v4467_v6 }
0x14e7   : > { %v5511_v61 = vadd.f32 %v5490_v26, %v4987_v14 }
0x14e8   : > { %v5652_v59 = vsel %vm5651_vm4, %v7126_v1, %v5648_v23 }
0x14e9   : > { %v5733_v42 = vmul.f32 %v5652_v59, %v9503_v53  ;;  %v5520_v30 = vadd.f32 %v5511_v61, %v8661_v41  ;;  %v6718_v41 = vld [vmem:[%s9769_s14 + $0x38] sm:$0xff] }
0x14ea   : > { %5905 = vmatpush.msra.mxu3 %v6718_v41 }
0x14eb   : > { %v5745_v17 = vmul.f32 %v9534_v4, %v5733_v42  ;;  %v5534_v49 = vadd.f32 %v9478_v8, %v5520_v30 }
0x14ec   : > { %5906 = vmatpush.msra.mxu3 %v6717_v60 }
0x14ed   : > { %v9549_v56 = vadd.f32 %v9539_v51, %v5745_v17  ;;  %v5553_v27 = vsel %vm663_vm0, %v5534_v49, 0.0 }
0x14ee   : > { %5554 = vadd.xlane.f32.xlu1 %v5553_v27  ;;  %v5493_v36 = vpop.f32.mrf.mxu1 }
0x14ef   : > { %v5512_v53 = vadd.f32 %v5493_v36, %v4988_v12  ;;  %6706 = vmatmul.msk.f32.vlgmr.msrb.gmra.mxu2 %vm663_vm0, %v9549_v56 }
0x14f1   : > { %v5521_v11 = vadd.f32 %v5512_v53, %v8672_v52  ;;  %v5590_v52 = vmul.f32 %v9564_v22, %v9564_v22 }
0x14f3   : > { %v5535_v3 = vadd.f32 %v9478_v8, %v5521_v11  ;;  %v5601_v32 = vsel %vm663_vm0, %v5590_v52, 0.0 }
0x14f5   : > { %v5556_v37 = vsel %vm663_vm0, %v5535_v3, 0.0 }
0x14f6   : > { %5557 = vadd.xlane.f32.xlu2 %v5556_v37  ;;  %v5496_v2 = vpop.f32.mrf.mxu1 }
0x14f7   : > { %v5513_v20 = vadd.f32 %v5496_v2, %v4989_v0 }
0x14f9   : > { %v5522_v44 = vadd.f32 %v5513_v20, %v8683_v24  ;;  %v5573_v24 = vmul.f32 %v5552_v25, %v8281_v45 }
0x14fb   : > { %v5536_v63 = vadd.f32 %v9478_v8, %v5522_v44  ;;  %v9583_v1 = vsub.f32 %v9498_v31, %v5573_v24  ;;  %v6715_v31 = vld [vmem:[%s9769_s14 + $0x20] sm:$0xff] }
0x14fd   : > { %v5559_v21 = vsel %vm663_vm0, %v5536_v63, 0.0 }
0x14fe   : > { %5602 = vadd.xlane.f32.xlu2 %v5601_v32  ;;  %5560 = vadd.xlane.f32.xlu0 %v5559_v21  ;;  %v5499_v50 = vpop.f32.mrf.mxu1 }
0x14ff   : > { %v5514_v33 = vadd.f32 %v5499_v50, %v4990_v10 }
0x1501   : > { %v5523_v39 = vadd.f32 %v5514_v33, %v8694_v43  ;;  %v5591_v43 = vmul.f32 %v9583_v1, %v9583_v1 }
0x1503   : > { %v5537_v46 = vadd.f32 %v9478_v8, %v5523_v39  ;;  %v5604_v40 = vsel %vm663_vm0, %v5591_v43, 0.0 }
0x1505   : > { %v5562_v13 = vsel %vm663_vm0, %v5537_v46, 0.0 }
0x1506   : > { %5563 = vadd.xlane.f32.xlu1 %v5562_v13  ;;  %v5502_v5 = vpop.f32.mrf.mxu1 }
0x1507   : > { %v5515_v9 = vadd.f32 %v5502_v5, %v4991_v34 }
0x1509   : > { %v5524_v16 = vadd.f32 %v5515_v9, %v8731_v29  ;;  %v6716_v29 = vld [vmem:[%s9769_s14 + $0x28] sm:$0xff] }
0x150a   : > { %5907 = vmatpush.msra.mxu3 %v6716_v29 }
0x150b   : > { %v9590_v57 = vadd.f32 %v9478_v8, %v5524_v16 }
0x150c   : > { %5908 = vmatpush.msra.mxu3 %v6715_v31 }
0x150d   : > { %v5565_v55 = vsel %vm663_vm0, %v9590_v57, 0.0 }
0x150e   : > { %5566 = vadd.xlane.f32.xlu0 %v5565_v55  ;;  %5605 = vadd.xlane.f32.xlu1 %v5604_v40 }
0x1561   : > { %v5555_v28 = vpop.xlane.xlu1 %5554  ;;  %v5505_v14 = vpop.f32.mrf.mxu1 }
0x1562   : > { %v5574_v23 = vmul.f32 %v5555_v28, %v8281_v45  ;;  %v5516_v26 = vadd.f32 %v5505_v14, %v4992_v7 }
0x1564   : > { %v9608_v61 = vsub.f32 %v5534_v49, %v5574_v23  ;;  %v5525_v59 = vadd.f32 %v5516_v26, %v8742_v38 }
0x1566   : > { %v5592_v42 = vmul.f32 %v9608_v61, %v9608_v61  ;;  %v9614_v30 = vadd.f32 %v9478_v8, %v5525_v59  ;;  %v9627_v8 = vld [vmem:[%s9768_s13 + $0x1] ss:$0 sm:$0xff] }
0x1568   : > { %v5607_v15 = vsel %vm663_vm0, %v5592_v42, 0.0  ;;  %v5568_v47 = vsel %vm2806_vm6, %v9614_v30, 0.0 }
0x1569   : > { %v5558_v35 = vpop.xlane.xlu2 %5557  ;;  %5608 = vadd.xlane.f32.xlu0 %v5607_v15  ;;  %5569 = vadd.xlane.f32.xlu2 %v5568_v47 }
0x156a   : > { %v5575_v62 = vmul.f32 %v5558_v35, %v8281_v45 }
0x156c   : > { %v9620_v17 = vsub.f32 %v5535_v3, %v5575_v62 }
0x156e   : > { %v5593_v38 = vmul.f32 %v9620_v17, %v9620_v17 }
0x1570   : > { %v5610_v49 = vsel %vm663_vm0, %v5593_v38, 0.0 }
0x1571   : > { %v5603_v12 = vpop.xlane.xlu2 %5602  ;;  %5611 = vadd.xlane.f32.xlu1 %v5610_v49  ;;  %v5561_v27 = vpop.xlane.xlu0 %5560 }
0x1572   : > { %v5626_v18 = vmul.f32 %v5603_v12, %v8281_v45  ;;  %v5576_v36 = vmul.f32 %v5561_v27, %v8281_v45  ;;  %v5820_v41 = vpop.f32.mrf.mxu2 }
0x1573   : > { %v5821_v53 = vadd.f32 %v9627_v8, %v5820_v41 }
0x1574   : > { %v5635_v54 = vadd.f32 1e-05, %v5626_v18  ;;  %v9633_v11 = vsub.f32 %v5536_v63, %v5576_v36 }
0x1575   : > { %v5847_v58 = vmax.f32 %v5821_v53, 0.0 }
0x1576   : > { %7129 = vrsqrt.f32 %v5635_v54  ;;  %v5594_v3 = vmul.f32 %v9633_v11, %v9633_v11  ;;  %vm5659_vm11 = vweird.f32 %v5635_v54 }
0x1577   : > { %6720 = vmatmul.msk.f32.vlgmr.msra.gmra.mxu3 %vm663_vm0, %v5847_v58 }
0x1578   : > { %v5613_v0 = vsel %vm663_vm0, %v5594_v3, 0.0 }
0x1579   : > { %v5564_v37 = vpop.xlane.xlu1 %5563  ;;  %5614 = vadd.xlane.f32.xlu2 %v5613_v0 }
0x157a   : > { %v5577_v2 = vmul.f32 %v5564_v37, %v8281_v45 }
0x157c   : > { %v7130_v20 = vpop.eup %7129  ;;  %v9640_v44 = vsub.f32 %v5537_v46, %v5577_v2 }
0x157d   : > { %v5654_v52 = vmul.f32 %v7130_v20, %v5635_v54  ;;  %vm5660_vm1 = vweird.f32 %v7130_v20 }
0x157e   : > { %v5595_v19 = vmul.f32 %v9640_v44, %v9640_v44  ;;  %vm5661_vm12 = vmor %vm5659_vm11, %vm5660_vm1 }
0x157f   : > { %v5655_v63 = vmul.f32 %v7130_v20, %v5654_v52 }
0x1580   : > { %v5616_v10 = vsel %vm663_vm0, %v5595_v19, 0.0 }
0x1581   : > { %v5656_v32 = vmul.f32 0.5, %v5655_v63  ;;  %5617 = vadd.xlane.f32.xlu0 %v5616_v10  ;;  %v5606_v21 = vpop.xlane.xlu1 %5605  ;;  %v5567_v25 = vpop.xlane.xlu0 %5566 }
0x1582   : > { %v5627_v50 = vmul.f32 %v5606_v21, %v8281_v45  ;;  %v5578_v33 = vmul.f32 %v5567_v25, %v8281_v45 }
0x1583   : > { %v5657_v24 = vsub.f32 1.5, %v5656_v32 }
0x1584   : > { %v5636_v39 = vadd.f32 1e-05, %v5627_v50  ;;  %v9648_v48 = vsub.f32 %v9590_v57, %v5578_v33  ;;  %v6797_v50 = vld [vmem:[%s9770_s15 + $0x1] ss:$0 sm:$0xff] }
0x1585   : > { %v5658_v46 = vmul.f32 %v7130_v20, %v5657_v24 }
0x1586   : > { %7131 = vrsqrt.f32 %v5636_v39  ;;  %v5596_v34 = vmul.f32 %v9648_v48, %v9648_v48  ;;  %vm5669_vm14 = vweird.f32 %v5636_v39 }
0x1587   : > { %v5662_v13 = vsel %vm5661_vm12, %v7130_v20, %v5658_v46 }
0x1588   : > { %v5734_v5 = vmul.f32 %v5662_v13, %v9564_v22  ;;  %v5619_v9 = vsel %vm663_vm0, %v5596_v34, 0.0 }
0x1589   : > { %5620 = vadd.xlane.f32.xlu1 %v5619_v9 }
0x158a   : > { %v5746_v16 = vmul.f32 %v9534_v4, %v5734_v5 }
0x158c   : > { %v7132_v43 = vpop.eup %7131  ;;  %v5758_v55 = vadd.f32 %v9539_v51, %v5746_v16 }
0x158d   : > { %v5664_v57 = vmul.f32 %v7132_v43, %v5636_v39  ;;  %vm5670_vm13 = vweird.f32 %v7132_v43 }
0x158e   : > { %6707 = vmatmul.msk.f32.gmra.mxu2 %vm663_vm0, %v5758_v55  ;;  %vm5671_vm15 = vmor %vm5669_vm14, %vm5670_vm13 }
0x158f   : > { %v5665_v40 = vmul.f32 %v7132_v43, %v5664_v57 }
0x1591   : > { %v5666_v60 = vmul.f32 0.5, %v5665_v40 }
0x1593   : > { %v5667_v29 = vsub.f32 1.5, %v5666_v60 }
0x1595   : > { %v5668_v31 = vmul.f32 %v7132_v43, %v5667_v29 }
0x1597   : > { %v5672_v6 = vsel %vm5671_vm15, %v7132_v43, %v5668_v31 }
0x1598   : > { %v5735_v22 = vmul.f32 %v5672_v6, %v9583_v1 }
0x159a   : > { %v5747_v7 = vmul.f32 %v9534_v4, %v5735_v22 }
0x159c   : > { %v5759_v28 = vadd.f32 %v9539_v51, %v5747_v7 }
0x159e   : > { %6708 = vmatmul.msk.f32.gmra.mxu2 %vm663_vm0, %v5759_v28 }
0x15dc   : > { %v5609_v14 = vpop.xlane.xlu0 %5608  ;;  %v5570_v23 = vpop.xlane.xlu2 %5569 }
0x15dd   : > { %v5628_v26 = vmul.f32 %v5609_v14, %v8281_v45  ;;  %v5579_v59 = vmul.f32 %v5570_v23, %v8281_v45 }
0x15df   : > { %v5637_v42 = vadd.f32 1e-05, %v5628_v26  ;;  %v9664_v15 = vsub.f32 %v9614_v30, %v5579_v59 }
0x15e1   : > { %7133 = vrsqrt.f32 %v5637_v42  ;;  %v5597_v1 = vmul.f32 %v9664_v15, %v9664_v15  ;;  %vm5679_vm7 = vweird.f32 %v5637_v42 }
0x15e3   : > { %v5622_v47 = vsel %vm2806_vm6, %v5597_v1, 0.0 }
0x15e4   : > { %v5612_v35 = vpop.xlane.xlu1 %5611  ;;  %5623 = vadd.xlane.f32.xlu2 %v5622_v47 }
0x15e5   : > { %v5629_v62 = vmul.f32 %v5612_v35, %v8281_v45 }
0x15e7   : > { %v7134_v38 = vpop.eup %7133  ;;  %v5638_v49 = vadd.f32 1e-05, %v5629_v62 }
0x15e8   : > { %v5674_v12 = vmul.f32 %v7134_v38, %v5637_v42  ;;  %vm5680_vm5 = vweird.f32 %v7134_v38 }
0x15e9   : > { %7135 = vrsqrt.f32 %v5638_v49  ;;  %vm5681_vm6 = vmor %vm5679_vm7, %vm5680_vm5  ;;  %vm5689_vm9 = vweird.f32 %v5638_v49 }
0x15ea   : > { %v5675_v27 = vmul.f32 %v7134_v38, %v5674_v12 }
0x15ec   : > { %v5676_v18 = vmul.f32 0.5, %v5675_v27  ;;  %v5615_v36 = vpop.xlane.xlu2 %5614 }
0x15ed   : > { %v5630_v30 = vmul.f32 %v5615_v36, %v8281_v45 }
0x15ee   : > { %v5677_v41 = vsub.f32 1.5, %v5676_v18 }
0x15ef   : > { %v7136_v53 = vpop.eup %7135  ;;  %v5639_v54 = vadd.f32 1e-05, %v5630_v30 }
0x15f0   : > { %v5678_v58 = vmul.f32 %v7134_v38, %v5677_v41  ;;  %v5684_v3 = vmul.f32 %v7136_v53, %v5638_v49  ;;  %vm5690_vm8 = vweird.f32 %v7136_v53 }
0x15f1   : > { %7137 = vrsqrt.f32 %v5639_v54  ;;  %vm5691_vm10 = vmor %vm5689_vm9, %vm5690_vm8  ;;  %vm5699_vm3 = vweird.f32 %v5639_v54 }
0x15f2   : > { %v5682_v0 = vsel %vm5681_vm6, %v7134_v38, %v5678_v58  ;;  %v5685_v37 = vmul.f32 %v7136_v53, %v5684_v3 }
0x15f3   : > { %v5736_v2 = vmul.f32 %v5682_v0, %v9608_v61 }
0x15f4   : > { %v5686_v20 = vmul.f32 0.5, %v5685_v37  ;;  %v5618_v52 = vpop.xlane.xlu0 %5617 }
0x15f5   : > { %v5631_v19 = vmul.f32 %v5618_v52, %v8281_v45  ;;  %v5748_v63 = vmul.f32 %v9534_v4, %v5736_v2 }
0x15f6   : > { %v5687_v10 = vsub.f32 1.5, %v5686_v20 }
0x15f7   : > { %v7138_v32 = vpop.eup %7137  ;;  %v5640_v21 = vadd.f32 1e-05, %v5631_v19  ;;  %v5760_v25 = vadd.f32 %v9539_v51, %v5748_v63 }
0x15f8   : > { %v5688_v33 = vmul.f32 %v7136_v53, %v5687_v10  ;;  %v5694_v24 = vmul.f32 %v7138_v32, %v5639_v54  ;;  %vm5700_vm2 = vweird.f32 %v7138_v32 }
0x15f9   : > { %7139 = vrsqrt.f32 %v5640_v21  ;;  %6709 = vmatmul.msk.f32.gmra.mxu2 %vm663_vm0, %v5760_v25  ;;  %vm5701_vm4 = vmor %vm5699_vm3, %vm5700_vm2  ;;  %vm5709_vm11 = vweird.f32 %v5640_v21 }
0x15fa   : > { %v5692_v61 = vsel %vm5691_vm10, %v7136_v53, %v5688_v33  ;;  %v5695_v39 = vmul.f32 %v7138_v32, %v5694_v24  ;;  %v5910_v46 = vpop.f32.mrf.mxu3 }
0x15fb   : > { %v5737_v34 = vmul.f32 %v5692_v61, %v9620_v17  ;;  %v5911_v13 = vadd.f32 %v6797_v50, %v5910_v46 }
0x15fc   : > { %v5696_v5 = vmul.f32 0.5, %v5695_v39  ;;  %v5621_v9 = vpop.xlane.xlu1 %5620 }
0x15fd   : > { %v9681_v16 = vadd.f32 %v5911_v13, %v9549_v56  ;;  %v5632_v43 = vmul.f32 %v5621_v9, %v8281_v45  ;;  %v5749_v55 = vmul.f32 %v9534_v4, %v5737_v34 }
0x15fe   : > { %v5697_v57 = vsub.f32 1.5, %v5696_v5 }
0x15ff   : > { %v7140_v40 = vpop.eup %7139  ;;  %v5641_v60 = vadd.f32 1e-05, %v5632_v43  ;;  %v5934_v29 = vsel %vm663_vm0, %v9681_v16, 0.0  ;;  %v5761_v31 = vadd.f32 %v9539_v51, %v5749_v55 }
0x1600   : > { %v5698_v17 = vmul.f32 %v7138_v32, %v5697_v57  ;;  %v5704_v6 = vmul.f32 %v7140_v40, %v5640_v21  ;;  %5935 = vadd.xlane.f32.xlu0 %v5934_v29  ;;  %vm5710_vm1 = vweird.f32 %v7140_v40 }
0x1601   : > { %7141 = vrsqrt.f32 %v5641_v60  ;;  %6710 = vmatmul.msk.f32.gmra.mxu2 %vm663_vm0, %v5761_v31  ;;  %vm5711_vm12 = vmor %vm5709_vm11, %vm5710_vm1  ;;  %vm5719_vm14 = vweird.f32 %v5641_v60 }
0x1602   : > { %v5702_v56 = vsel %vm5701_vm4, %v7138_v32, %v5698_v17  ;;  %v5705_v22 = vmul.f32 %v7140_v40, %v5704_v6 }
0x1603   : > { %v5738_v7 = vmul.f32 %v5702_v56, %v9633_v11 }
0x1604   : > { %v5706_v28 = vmul.f32 0.5, %v5705_v22 }
0x1605   : > { %v5750_v14 = vmul.f32 %v9534_v4, %v5738_v7  ;;  %v5966_v7 = vld [vmem:[%s9773_s18 + $0x10] sm:$0xff] }
0x1606   : > { %v5707_v23 = vsub.f32 1.5, %v5706_v28  ;;  %v5965_v28 = vld [vmem:[%s9773_s18 + $0x8] sm:$0xff] }
0x1607   : > { %v7142_v26 = vpop.eup %7141  ;;  %v5762_v59 = vadd.f32 %v9539_v51, %v5750_v14  ;;  %v5964_v14 = vld [vmem:[%s9773_s18] sm:$0xff] }
0x1608   : > { %v5708_v42 = vmul.f32 %v7140_v40, %v5707_v23  ;;  %v5714_v1 = vmul.f32 %v7142_v26, %v5641_v60  ;;  %vm5720_vm13 = vweird.f32 %v7142_v26 }
0x1609   : > { %6711 = vmatmul.msk.f32.gmra.mxu2 %vm663_vm0, %v5762_v59  ;;  %vm5721_vm15 = vmor %vm5719_vm14, %vm5720_vm13 }
0x160a   : > { %v5712_v47 = vsel %vm5711_vm12, %v7140_v40, %v5708_v42  ;;  %v5715_v35 = vmul.f32 %v7142_v26, %v5714_v1 }
0x160b   : > { %v5739_v62 = vmul.f32 %v5712_v47, %v9640_v44 }
0x160c   : > { %v5716_v38 = vmul.f32 0.5, %v5715_v35 }
0x160d   : > { %v5751_v11 = vmul.f32 %v9534_v4, %v5739_v62 }
0x160e   : > { %v5717_v49 = vsub.f32 1.5, %v5716_v38 }
0x160f   : > { %v5763_v12 = vadd.f32 %v9539_v51, %v5751_v11 }
0x1610   : > { %v5718_v27 = vmul.f32 %v7142_v26, %v5717_v49 }
0x1611   : > { %v5823_v18 = vpop.f32.mrf.mxu2  ;;  %6712 = vmatmul.msk.f32.gmra.mxu2 %vm663_vm0, %v5763_v12 }
0x1612   : > { %v5722_v36 = vsel %vm5721_vm15, %v7142_v26, %v5718_v27  ;;  %v5824_v30 = vadd.f32 %v9627_v8, %v5823_v18 }
0x1613   : > { %v5740_v41 = vmul.f32 %v5722_v36, %v9648_v48 }
0x1614   : > { %v5848_v53 = vmax.f32 %v5824_v30, 0.0 }
0x1615   : > { %v5752_v44 = vmul.f32 %v9534_v4, %v5740_v41 }
0x1616   : > { %6721 = vmatmul.msk.f32.gmra.mxu3 %vm663_vm0, %v5848_v53 }
0x1617   : > { %v5764_v54 = vadd.f32 %v9539_v51, %v5752_v44 }
0x1619   : > { %6713 = vmatmul.msk.f32.gmra.mxu2 %vm663_vm0, %v5764_v54 }
0x1621   : > { %v5826_v58 = vpop.f32.mrf.mxu2 }
0x1622   : > { %v5827_v3 = vadd.f32 %v9627_v8, %v5826_v58 }
0x1624   : > { %v5849_v0 = vmax.f32 %v5827_v3, 0.0 }
0x1626   : > { %6722 = vmatmul.msk.f32.gmra.mxu3 %vm663_vm0, %v5849_v0  ;;  %v6800_v0 = vld [vmem:[%s9774_s19] ss:$0 sm:$0xff] }
0x1657   : > { %v5624_v37 = vpop.xlane.xlu2 %5623 }
0x1658   : > { %v5633_v2 = vmul.f32 %v5624_v37, %v8281_v45 }
0x165a   : > { %v5642_v20 = vadd.f32 1e-05, %v5633_v2 }
0x165c   : > { %7143 = vrsqrt.f32 %v5642_v20  ;;  %vm5729_vm7 = vweird.f32 %v5642_v20 }
0x1662   : > { %v7144_v48 = vpop.eup %7143 }
0x1663   : > { %v5724_v52 = vmul.f32 %v7144_v48, %v5642_v20  ;;  %vm5730_vm5 = vweird.f32 %v7144_v48 }
0x1664   : > { %vm5731_vm6 = vmor %vm5729_vm7, %vm5730_vm5 }
0x1665   : > { %v5725_v19 = vmul.f32 %v7144_v48, %v5724_v52 }
0x1667   : > { %v5726_v63 = vmul.f32 0.5, %v5725_v19 }
0x1669   : > { %v5727_v10 = vsub.f32 1.5, %v5726_v63 }
0x166b   : > { %v5728_v32 = vmul.f32 %v7144_v48, %v5727_v10 }
0x166d   : > { %v5732_v21 = vsel %vm5731_vm6, %v7144_v48, %v5728_v32 }
0x166e   : > { %v5741_v25 = vmul.f32 %v5732_v21, %v9664_v15 }
0x1670   : > { %v5753_v50 = vmul.f32 %v9534_v4, %v5741_v25 }
0x1672   : > { %v5765_v33 = vadd.f32 %v9539_v51, %v5753_v50 }
0x1673   : > { %v5936_v24 = vpop.xlane.xlu0 %5935 }
0x1674   : > { %v5937_v61 = vmul.f32 %v5936_v24, %v8281_v45  ;;  %6714 = vmatmul.msk.f32.gmra.mxu2 %vm663_vm0, %v5765_v33 }
0x1676   : > { %v5938_v39 = vsub.f32 %v9681_v16, %v5937_v61  ;;  %v5967_v16 = vld [vmem:[%s9773_s18 + $0x18] sm:$0xff] }
0x1677   : > { %5987 = vmatpush.msrb.mxu0 %v5967_v16 }
0x1678   : > { %v5939_v46 = vmul.f32 %v5938_v39, %v5938_v39 }
0x1679   : > { %5988 = vmatpush.msrb.mxu0 %v5966_v7 }
0x167a   : > { %v5940_v34 = vsel %vm663_vm0, %v5939_v46, 0.0 }
0x167b   : > { %5941 = vadd.xlane.f32.xlu1 %v5940_v34  ;;  %5989 = vmatpush.msrb.mxu0 %v5965_v28 }
0x167c   : > { %v5829_v13 = vpop.f32.mrf.mxu2 }
0x167d   : > { %v5830_v5 = vadd.f32 %v9627_v8, %v5829_v13  ;;  %5990 = vmatpush.msrb.mxu0 %v5964_v14 }
0x167f   : > { %v5850_v9 = vmax.f32 %v5830_v5, 0.0 }
0x1681   : > { %6723 = vmatmul.msk.f32.gmra.mxu3 %vm663_vm0, %v5850_v9 }
0x1684   : > { %v5832_v4 = vpop.f32.mrf.mxu2 }
0x1685   : > { %v5833_v51 = vadd.f32 %v9627_v8, %v5832_v4 }
0x1687   : > { %v5851_v15 = vmax.f32 %v5833_v51, 0.0 }
0x1689   : > { %6724 = vmatmul.msk.f32.gmra.mxu3 %vm663_vm0, %v5851_v15 }
0x168c   : > { %v5835_v43 = vpop.f32.mrf.mxu2 }
0x168d   : > { %v5836_v55 = vadd.f32 %v9627_v8, %v5835_v43 }
0x168f   : > { %v5852_v57 = vmax.f32 %v5836_v55, 0.0 }
0x1691   : > { %6725 = vmatmul.msk.f32.gmra.mxu3 %vm663_vm0, %v5852_v57 }
0x1694   : > { %v5838_v40 = vpop.f32.mrf.mxu2 }
0x1695   : > { %v5839_v60 = vadd.f32 %v9627_v8, %v5838_v40 }
0x1697   : > { %v5853_v29 = vmax.f32 %v5839_v60, 0.0 }
0x1699   : > { %v5913_v31 = vpop.f32.mrf.mxu3  ;;  %6726 = vmatmul.msk.f32.gmra.mxu3 %vm663_vm0, %v5853_v29 }
0x169c   : > { %v5841_v17 = vpop.f32.mrf.mxu2 }
0x169d   : > { %v5842_v6 = vadd.f32 %v9627_v8, %v5841_v17 }
0x169f   : > { %v5854_v56 = vmax.f32 %v5842_v6, 0.0 }
0x16a1   : > { %6727 = vmatmul.msk.f32.gmra.mxu3 %vm663_vm0, %v5854_v56 }
0x16a9   : > { %v5915_v22 = vpop.f32.mrf.mxu3 }
0x16ee   : > { %v5942_v23 = vpop.xlane.xlu1 %5941 }
0x16ef   : > { %v5943_v26 = vmul.f32 %v5942_v23, %v8281_v45  ;;  %v6798_v45 = vld [vmem:[%s9771_s16 + $0x1] ss:$0 sm:$0xff] }
0x16f1   : > { %v5944_v59 = vadd.f32 1e-05, %v5943_v26 }
0x16f3   : > { %7145 = vrsqrt.f32 %v5944_v59  ;;  %vm5951_vm9 = vweird.f32 %v5944_v59 }
0x16f7   : > { %v5844_v42 = vpop.f32.mrf.mxu2 }
0x16f8   : > { %v5845_v1 = vadd.f32 %v9627_v8, %v5844_v42  ;;  %v6799_v8 = vld [vmem:[%s9772_s17 + $0x1] ss:$0 sm:$0xff] }
0x16f9   : > { %v7146_v47 = vpop.eup %7145 }
0x16fa   : > { %v5946_v35 = vmul.f32 %v7146_v47, %v5944_v59  ;;  %v5855_v62 = vmax.f32 %v5845_v1, 0.0  ;;  %vm5952_vm8 = vweird.f32 %v7146_v47 }
0x16fb   : > { %vm5953_vm10 = vmor %vm5951_vm9, %vm5952_vm8 }
0x16fc   : > { %v5947_v38 = vmul.f32 %v7146_v47, %v5946_v35  ;;  %6728 = vmatmul.msk.f32.gmra.mxu3 %vm663_vm0, %v5855_v62 }
0x16fe   : > { %v5948_v11 = vmul.f32 0.5, %v5947_v38 }
0x1700   : > { %v5949_v49 = vsub.f32 1.5, %v5948_v11 }
0x1702   : > { %v5950_v12 = vmul.f32 %v7146_v47, %v5949_v49 }
0x1704   : > { %v5954_v27 = vsel %vm5953_vm10, %v7146_v47, %v5950_v12  ;;  %v5917_v18 = vpop.f32.mrf.mxu3 }
0x1705   : > { %v5955_v36 = vmul.f32 %v5954_v27, %v5938_v39 }
0x1707   : > { %v5959_v30 = vmul.f32 %v6798_v45, %v5955_v36 }
0x1709   : > { %v5963_v41 = vadd.f32 %v6799_v8, %v5959_v30 }
0x170b   : > { %6731 = vmatmul.msk.f32.vlgmr.msrb.gmra.mxu0 %vm663_vm0, %v5963_v41 }
0x170c   : > { %v5919_v53 = vpop.f32.mrf.mxu3 }
0x1714   : > { %v5921_v44 = vpop.f32.mrf.mxu3 }
0x171c   : > { %v5923_v54 = vpop.f32.mrf.mxu3 }
0x1724   : > { %v5925_v58 = vpop.f32.mrf.mxu3 }
0x177f   : > { %v5927_v3 = vpop.f32.mrf.mxu3 }
0x1788   : > { %v5992_v37 = vpop.f32.mrf.mxu0 }
0x1789   : > { %v5993_v2 = vadd.f32 %v6800_v0, %v5992_v37 }
0x178b   : > { %5995 = vst [vmem:[%s627_s24] sm:$0xf] %v5993_v2 }
0x178c PF: > { %s9793_s25 = sld [smem:[#allocation2_spill]] }
0x1792   : > { %s30_s1 = sadd.s32 1, %s9793_s25  }
0x1793   : > { %p27_p4 = scmp.ge.s32.totalorder %s30_s1, 4  }
0x1795   :  { %29 = sbr.rel (!%p27_p4) target bundleno = 6 (0x6), region = 188 }

</bundles_post_ra>
